<compile_context>
chip_gen: v6e
topology: v6e:2x2x1
jax: 0.10.0
libtpu: 0.0.40
codegen_flags: <defaults>
</compile_context>

<pallas_src>
import functools

import jax
import jax.numpy as jnp
from jax.experimental import pallas as pl
from jax.experimental.pallas import tpu as pltpu

BN_EPS = 1e-5
VMEM_LIMIT = 48 * 1024 * 1024  # raised scoped-VMEM budget (fits v5e/v6e/v7x)


def _pick_tile(n, target):
    """Largest divisor of n that is <= target (row-tile picker)."""
    t = min(n, target)
    while n % t:
        t -= 1
    return t


# ----------------------------- Pallas kernels -------------------------------

def _matmul_stats_kernel(a_ref, w_ref, y_ref, s_ref, q_ref):
    # a: (tm, K) bf16 tile, w: (K, tc) bf16 -> y: (tm, tc) f32 on the MXU.
    y = jnp.dot(a_ref[...], w_ref[...], preferred_element_type=jnp.float32)
    y_ref[...] = y
    # per-(row-tile, channel-tile) partial BatchNorm statistics
    s_ref[...] = jnp.sum(y, axis=0, keepdims=True)[None]          # (1, 1, tc)
    q_ref[...] = jnp.sum(y * y, axis=0, keepdims=True)[None]      # (1, 1, tc)


def _bn_act_kernel(y_ref, s_ref, q_ref, g_ref, b_ref, o_ref, *, inv_n, relu):
    # Finalize global (all-rows) BN stats from the per-tile partials, then normalize.
    mean = jnp.sum(s_ref[...], axis=0) * inv_n                     # (1, tc)
    var = jnp.sum(q_ref[...], axis=0) * inv_n - mean * mean        # biased variance
    scale = g_ref[...] * jax.lax.rsqrt(var + BN_EPS)
    shift = b_ref[...] - mean * scale
    z = y_ref[...] * scale + shift
    if relu:
        z = jnp.maximum(z, 0.0)
    o_ref[...] = z.astype(o_ref.dtype)


def _maxpool_kernel(x_ref, o_ref, *, k, c):
    # x: (tr, k, Wo, k*C) — fused k x k window max, lane-dense (channels stay on lanes).
    m = x_ref[:, 0, :, :]
    for i in range(1, k):
        m = jnp.maximum(m, x_ref[:, i, :, :])                      # (tr, Wo, k*C)
    r = m[:, :, 0:c]
    for j in range(1, k):
        r = jnp.maximum(r, m[:, :, j * c:(j + 1) * c])             # (tr, Wo, C)
    o_ref[...] = r


def _att_mid_kernel(yg_ref, sg_ref, qg_ref, gg_ref, bg_ref,
                    yx_ref, sx_ref, qx_ref, gx_ref, bx_ref,
                    wp_ref, q_ref, qs_ref, qq_ref, *, inv_n):
    def scale_shift(s_part, q_part, gamma, beta):
        mean = jnp.sum(s_part[...], axis=0) * inv_n                # (1, C)
        var = jnp.sum(q_part[...], axis=0) * inv_n - mean * mean
        sc = gamma[...] * jax.lax.rsqrt(var + BN_EPS)
        return sc, beta[...] - mean * sc

    scg, shg = scale_shift(sg_ref, qg_ref, gg_ref, bg_ref)
    scx, shx = scale_shift(sx_ref, qx_ref, gx_ref, bx_ref)
    # relu(BN(W_gate*g) + BN(W_x*s))
    p = jnp.maximum(yg_ref[...] * scg + shg + yx_ref[...] * scx + shx, 0.0)
    # psi 1x1 conv to a single channel == lane reduction against the wp row vector
    q = jnp.sum(p * wp_ref[...], axis=-1, keepdims=True)           # (tm, 1)
    q_ref[...] = q
    qs_ref[...] = jnp.sum(q, axis=0, keepdims=True)[None]          # (1, 1, 1)
    qq_ref[...] = jnp.sum(q * q, axis=0, keepdims=True)[None]


def _att_out_kernel(q_ref, qs_ref, qq_ref, gp_ref, bp_ref, s_ref, o_ref, *, inv_n):
    mean = jnp.sum(qs_ref[...], axis=0) * inv_n                    # (1, 1)
    var = jnp.sum(qq_ref[...], axis=0) * inv_n - mean * mean
    sc = gp_ref[...] * jax.lax.rsqrt(var + BN_EPS)
    sh = bp_ref[...] - mean * sc
    psi = jax.nn.sigmoid(q_ref[...] * sc + sh)                     # (tm, 1)
    o_ref[...] = s_ref[...].astype(jnp.float32) * psi              # skip * attention coeff


def _head_kernel(x_ref, w_ref, b_ref, o_ref):
    # x: (N, S, C) — global average pool over spatial S, then Linear(C -> 1)
    x = x_ref[...].astype(jnp.float32)
    pooled = jnp.mean(x, axis=1)                                   # (N, C)
    o_ref[...] = jnp.sum(pooled * w_ref[...], axis=-1, keepdims=True) + b_ref[...]


# ------------------------------- wrappers ------------------------------------

def _matmul_with_stats(a_bf16, w_bf16, *, tm, tc):
    R, K = a_bf16.shape
    Cout = w_bf16.shape[1]
    nrt, nct = R // tm, Cout // tc
    return pl.pallas_call(
        _matmul_stats_kernel,
        out_shape=(jax.ShapeDtypeStruct((R, Cout), jnp.float32),
                   jax.ShapeDtypeStruct((nrt, 1, Cout), jnp.float32),
                   jax.ShapeDtypeStruct((nrt, 1, Cout), jnp.float32)),
        grid=(nct, nrt),
        in_specs=[pl.BlockSpec((tm, K), lambda j, i: (i, 0)),
                  pl.BlockSpec((K, tc), lambda j, i: (0, j))],
        out_specs=(pl.BlockSpec((tm, tc), lambda j, i: (i, j)),
                   pl.BlockSpec((1, 1, tc), lambda j, i: (i, 0, j)),
                   pl.BlockSpec((1, 1, tc), lambda j, i: (i, 0, j))),
        compiler_params=pltpu.CompilerParams(
            dimension_semantics=("parallel", "parallel"),
            vmem_limit_bytes=VMEM_LIMIT),
        cost_estimate=pl.CostEstimate(
            flops=2 * R * K * Cout, transcendentals=0,
            bytes_accessed=R * K * 2 + K * Cout * 2 + R * Cout * 4),
    )(a_bf16, w_bf16)


def _bn_act(y, ssum, ssq, gamma, beta, *, tm, tc, relu, out_dtype):
    R, Cout = y.shape
    T = ssum.shape[0]
    nrt, nct = R // tm, Cout // tc
    return pl.pallas_call(
        functools.partial(_bn_act_kernel, inv_n=1.0 / float(R), relu=relu),
        out_shape=jax.ShapeDtypeStruct((R, Cout), out_dtype),
        grid=(nct, nrt),
        in_specs=[pl.BlockSpec((tm, tc), lambda j, i: (i, j)),
                  pl.BlockSpec((T, 1, tc), lambda j, i: (0, 0, j)),
                  pl.BlockSpec((T, 1, tc), lambda j, i: (0, 0, j)),
                  pl.BlockSpec((1, tc), lambda j, i: (0, j)),
                  pl.BlockSpec((1, tc), lambda j, i: (0, j))],
        out_specs=pl.BlockSpec((tm, tc), lambda j, i: (i, j)),
        compiler_params=pltpu.CompilerParams(
            dimension_semantics=("parallel", "parallel"),
            vmem_limit_bytes=VMEM_LIMIT),
    )(y, ssum, ssq, gamma, beta)


def conv3x3_bn_relu(x_nhwc, w_hwio, gamma, beta):
    """Conv2d(3x3, stride 1, pad 1) + BatchNorm2d (train mode, global stats) + ReLU.

    Conv bias is omitted: under train-mode BN the per-channel mean subtraction cancels
    any bias exactly, so the add (and its parameter DMA) is dead work."""
    N, H, W, Cin = x_nhwc.shape
    if w_hwio.shape[2] != Cin:               # layer-1 channel padding (3 -> 8), exact with 0-weights
        w_hwio = jnp.pad(w_hwio, ((0, 0), (0, 0), (0, Cin - w_hwio.shape[2]), (0, 0)))
    Cout = w_hwio.shape[-1]

    # glue: im2col patch extraction in bf16 (layout only).
    # TODO(synk): fuse the 3x3 tap extraction into the matmul kernel (shifted loads from a
    # padded-input ref) to remove the 9x im2col HBM materialization entirely.
    xp = jnp.pad(x_nhwc, ((0, 0), (1, 1), (1, 1), (0, 0)))
    cols = [xp[:, dy:dy + H, dx:dx + W, :] for dy in range(3) for dx in range(3)]
    a = jnp.concatenate(cols, axis=-1).reshape(N * H * W, 9 * Cin).astype(jnp.bfloat16)
    wmat = w_hwio.reshape(9 * Cin, Cout).astype(jnp.bfloat16)

    R = N * H * W
    tm = _pick_tile(R, 512)                  # row tile (512-row target per perf guidance)
    tc = min(Cout, 128)                      # output-channel tile
    y, ssum, ssq = _matmul_with_stats(a, wmat, tm=tm, tc=tc)
    out = _bn_act(y, ssum, ssq, gamma.reshape(1, Cout), beta.reshape(1, Cout),
                  tm=tm, tc=tc, relu=True, out_dtype=jnp.bfloat16)
    return out.reshape(N, H, W, Cout)


def maxpool(x_nhwc, k):
    """k x k max-pool, stride k. Pure-reshape glue (no transpose copy), lane-dense kernel."""
    N, H, W, C = x_nhwc.shape
    Ho, Wo = H // k, W // k
    xr = x_nhwc.reshape(N * Ho, k, Wo, k * C)          # pure reshape, no data movement
    R = N * Ho
    tr = _pick_tile(R, 256)
    out = pl.pallas_call(
        functools.partial(_maxpool_kernel, k=k, c=C),
        out_shape=jax.ShapeDtypeStruct((R, Wo, C), x_nhwc.dtype),
        grid=(R // tr,),
        in_specs=[pl.BlockSpec((tr, k, Wo, k * C), lambda i: (i, 0, 0, 0))],
        out_specs=pl.BlockSpec((tr, Wo, C), lambda i: (i, 0, 0)),
        compiler_params=pltpu.CompilerParams(
            dimension_semantics=("parallel",), vmem_limit_bytes=VMEM_LIMIT),
    )(xr)
    return out.reshape(N, Ho, Wo, C)


def attention_block(gate, skip, p_g, p_x, p_psi):
    N, h, w, Fg = gate.shape
    Fl = skip.shape[-1]
    R = N * h * w
    g2 = gate.reshape(R, Fg)
    s2 = skip.reshape(R, Fl)
    nco = p_g['w'].shape[1]
    tm = _pick_tile(R, 512)
    nrt = R // tm
    inv_n = 1.0 / float(R)

    # 1x1 convs on the MXU (bf16) + per-tile partial BN stats (biases cancelled by BN).
    yg, sg, qg = _matmul_with_stats(g2.astype(jnp.bfloat16),
                                    p_g['w'].astype(jnp.bfloat16), tm=tm, tc=min(nco, 128))
    yx, sx, qx = _matmul_with_stats(s2.astype(jnp.bfloat16),
                                    p_x['w'].astype(jnp.bfloat16), tm=tm, tc=min(nco, 128))
    T = sg.shape[0]
    wp_row = jnp.transpose(p_psi['w'])                 # (1, nco)

    qpre, qs, qq = pl.pallas_call(
        functools.partial(_att_mid_kernel, inv_n=inv_n),
        out_shape=(jax.ShapeDtypeStruct((R, 1), jnp.float32),
                   jax.ShapeDtypeStruct((nrt, 1, 1), jnp.float32),
                   jax.ShapeDtypeStruct((nrt, 1, 1), jnp.float32)),
        grid=(nrt,),
        in_specs=[pl.BlockSpec((tm, nco), lambda i: (i, 0)),
                  pl.BlockSpec((T, 1, nco), lambda i: (0, 0, 0)),
                  pl.BlockSpec((T, 1, nco), lambda i: (0, 0, 0)),
                  pl.BlockSpec((1, nco), lambda i: (0, 0)),
                  pl.BlockSpec((1, nco), lambda i: (0, 0)),
                  pl.BlockSpec((tm, nco), lambda i: (i, 0)),
                  pl.BlockSpec((T, 1, nco), lambda i: (0, 0, 0)),
                  pl.BlockSpec((T, 1, nco), lambda i: (0, 0, 0)),
                  pl.BlockSpec((1, nco), lambda i: (0, 0)),
                  pl.BlockSpec((1, nco), lambda i: (0, 0)),
                  pl.BlockSpec((1, nco), lambda i: (0, 0))],
        out_specs=(pl.BlockSpec((tm, 1), lambda i: (i, 0)),
                   pl.BlockSpec((1, 1, 1), lambda i: (i, 0, 0)),
                   pl.BlockSpec((1, 1, 1), lambda i: (i, 0, 0))),
        compiler_params=pltpu.CompilerParams(
            dimension_semantics=("parallel",), vmem_limit_bytes=VMEM_LIMIT),
    )(yg, sg, qg, p_g['gamma'], p_g['beta'],
      yx, sx, qx, p_x['gamma'], p_x['beta'], wp_row)

    att = pl.pallas_call(
        functools.partial(_att_out_kernel, inv_n=inv_n),
        out_shape=jax.ShapeDtypeStruct((R, Fl), jnp.float32),
        grid=(nrt,),
        in_specs=[pl.BlockSpec((tm, 1), lambda i: (i, 0)),
                  pl.BlockSpec((nrt, 1, 1), lambda i: (0, 0, 0)),
                  pl.BlockSpec((nrt, 1, 1), lambda i: (0, 0, 0)),
                  pl.BlockSpec((1, 1), lambda i: (0, 0)),
                  pl.BlockSpec((1, 1), lambda i: (0, 0)),
                  pl.BlockSpec((tm, Fl), lambda i: (i, 0))],
        out_specs=pl.BlockSpec((tm, Fl), lambda i: (i, 0)),
        compiler_params=pltpu.CompilerParams(
            dimension_semantics=("parallel",), vmem_limit_bytes=VMEM_LIMIT),
    )(qpre, qs, qq, p_psi['gamma'], p_psi['beta'], s2)
    return att.reshape(N, h, w, Fl)


def fc_head(feat_nhwc, fc_w_row, fc_b):
    N, h, w, C = feat_nhwc.shape
    g3 = feat_nhwc.reshape(N, h * w, C)                # tiny: (N, S, C) fits VMEM by construction
    return pl.pallas_call(
        _head_kernel,
        out_shape=jax.ShapeDtypeStruct((N, 1), jnp.float32),
    )(g3, fc_w_row, fc_b)


def attention_discriminator_forward(x_nchw, params):
    # layout: accept NCHW like PyTorch, transpose to NHWC for the kernels.
    x = jnp.transpose(x_nchw, (0, 2, 3, 1)).astype(jnp.float32)
    # pad image channels (3 -> 8) so layer-1's contraction dim is sublane-aligned;
    # the matching weight rows are zero-padded in the conv wrapper (numerically exact).
    pad_c = (-x.shape[-1]) % 8
    if pad_c:
        x = jnp.pad(x, ((0, 0), (0, 0), (0, 0), (0, pad_c)))
    x = x.astype(jnp.bfloat16)                         # bf16 activations for MXU + HBM savings

    p = params
    e1 = conv3x3_bn_relu(x,  p['c1a']['w'], p['c1a']['gamma'], p['c1a']['beta'])
    e1 = conv3x3_bn_relu(e1, p['c1b']['w'], p['c1b']['gamma'], p['c1b']['beta'])

    e2 = maxpool(e1, 2)
    e2 = conv3x3_bn_relu(e2, p['c2a']['w'], p['c2a']['gamma'], p['c2a']['beta'])
    e2 = conv3x3_bn_relu(e2, p['c2b']['w'], p['c2b']['gamma'], p['c2b']['beta'])

    e3 = maxpool(e2, 2)
    e3 = conv3x3_bn_relu(e3, p['c3a']['w'], p['c3a']['gamma'], p['c3a']['beta'])
    e3 = conv3x3_bn_relu(e3, p['c3b']['w'], p['c3b']['gamma'], p['c3b']['beta'])

    e4 = maxpool(e3, 2)                                # (N, H/8, W/8, 256) — attention gate

    # TODO(synk): reference forward feeds e2 (H/2 spatial, 128ch) as the attention skip while
    # the gate e4 is at H/8 — those shapes do not broadcast in PyTorch; we use a single fused
    # 4x4 max-pool of e2 (== two 2x2 pools) to align spatial dims before the attention block.
    skip = maxpool(e2, 4)                              # (N, H/8, W/8, 128)
    att = attention_block(e4, skip, p['att_g'], p['att_x'], p['att_psi'])

    # TODO(synk): `e5` is undefined in the reference forward; fc expects 256 features, so we
    # global-average-pool the 256-channel gate e4 for the fc input and also return the
    # (otherwise orphaned) attention output.
    out = fc_head(e4, p['fc_w'], p['fc_b'])            # (N, 1)
    return out, att


# --------------------------- parameter construction --------------------------

def init_params(key, img_ch=3):
    # note: the conv / 1x1-conv biases below are kept for structural parity with the PyTorch
    # module but are unused — train-mode BatchNorm's mean subtraction cancels them exactly.
    def conv_bn(k, cin, cout):
        k1, k2, k3, k4 = jax.random.split(k, 4)
        scale = (9.0 * cin) ** -0.5
        return dict(
            w=scale * jax.random.normal(k1, (3, 3, cin, cout), jnp.float32),
            b=0.05 * jax.random.normal(k2, (cout,), jnp.float32),
            gamma=1.0 + 0.05 * jax.random.normal(k3, (cout,), jnp.float32),
            beta=0.05 * jax.random.normal(k4, (cout,), jnp.float32),
        )

    def conv1x1_bn(k, cin, cout):
        k1, k2, k3, k4 = jax.random.split(k, 4)
        scale = float(cin) ** -0.5
        return dict(
            w=scale * jax.random.normal(k1, (cin, cout), jnp.float32),
            b=0.05 * jax.random.normal(k2, (1, cout), jnp.float32),
            gamma=1.0 + 0.05 * jax.random.normal(k3, (1, cout), jnp.float32),
            beta=0.05 * jax.random.normal(k4, (1, cout), jnp.float32),
        )

    ks = jax.random.split(key, 11)
    return {
        'c1a': conv_bn(ks[0], img_ch, 64),
        'c1b': conv_bn(ks[1], 64, 64),
        'c2a': conv_bn(ks[2], 64, 128),
        'c2b': conv_bn(ks[3], 128, 128),
        'c3a': conv_bn(ks[4], 128, 256),
        'c3b': conv_bn(ks[5], 256, 256),
        'att_g': conv1x1_bn(ks[6], 256, 128),          # W_gate: F_g=256 -> 128
        'att_x': conv1x1_bn(ks[7], 128, 128),          # W_x:    F_l=128 -> 128
        'att_psi': conv1x1_bn(ks[8], 128, 1),          # psi:    128 -> 1
        'fc_w': (256.0 ** -0.5) * jax.random.normal(ks[9], (1, 256), jnp.float32),
        'fc_b': 0.05 * jax.random.normal(ks[10], (1, 1), jnp.float32),
    }


if __name__ == "__main__":
    key = jax.random.PRNGKey(0)
    pkey, xkey = jax.random.split(key)
    params = init_params(pkey, img_ch=3)
    x = jax.random.normal(xkey, (2, 3, 16, 16), jnp.float32)   # NCHW, like PyTorch

    fwd = jax.jit(lambda inp: attention_discriminator_forward(inp, params))
    out, att = fwd(x)
    jax.block_until_ready((out, att))

    assert out.shape == (2, 1) and out.dtype == jnp.float32
    assert att.shape == (2, 2, 2, 128) and att.dtype == jnp.float32
    print("KERNEL_OK")
</pallas_src>

<mosaic_0001>
module attributes {stable_mosaic.version = 11 : i64} {
  func.func @_matmul_stats_kernel(%arg0: i32, %arg1: i32, %arg2: memref<512x72xbf16, #tpu.memory_space<vmem>>, %arg3: memref<72x64xbf16, #tpu.memory_space<vmem>>, %arg4: memref<512x64xf32, #tpu.memory_space<vmem>>, %arg5: memref<1x1x64xf32, #tpu.memory_space<vmem>>, %arg6: memref<1x1x64xf32, #tpu.memory_space<vmem>>) attributes {dimension_semantics = [#tpu.dimension_semantics<parallel>, #tpu.dimension_semantics<parallel>], iteration_bounds = array<i64: 1, 1>, scalar_prefetch = 0 : i64, scratch_operands = 0 : i64, tpu.core_type = #tpu.core_type<tc>, window_params = [{transform_indices = @transform_0, window_bounds = array<i64: 512, 72>}, {transform_indices = @transform_1, window_bounds = array<i64: 72, 64>}, {transform_indices = @transform_2, window_bounds = array<i64: 512, 64>}, {transform_indices = @transform_3, window_bounds = array<i64: 1, 1, 64>}, {transform_indices = @transform_4, window_bounds = array<i64: 1, 1, 64>}]} {
    %c0 = arith.constant 0 : index
    %c0_0 = arith.constant 0 : index
    %0 = vector.load %arg2[%c0, %c0_0] : memref<512x72xbf16, #tpu.memory_space<vmem>>, vector<512x72xbf16>
    %c0_1 = arith.constant 0 : index
    %c0_2 = arith.constant 0 : index
    %1 = vector.load %arg3[%c0_1, %c0_2] : memref<72x64xbf16, #tpu.memory_space<vmem>>, vector<72x64xbf16>
    %cst = arith.constant dense<0.000000e+00> : vector<512x64xf32>
    %2 = tpu.matmul %0, %1, %cst {dimension_numbers = #tpu.dot_dimension_numbers<[1], [0], [0], [1], [0, 0, 1, 1], [], []>} : vector<512x72xbf16>, vector<72x64xbf16>, vector<512x64xf32> -> vector<512x64xf32>
    %c0_3 = arith.constant 0 : index
    %c0_4 = arith.constant 0 : index
    %3 = vector.load %arg4[%c0_3, %c0_4] : memref<512x64xf32, #tpu.memory_space<vmem>>, vector<512x64xf32>
    tpu.vector_store %arg4[%c0_3, %c0_4], %2 {strides = array<i32>} : memref<512x64xf32, #tpu.memory_space<vmem>>, vector<512x64xf32>,
    %cst_5 = arith.constant dense<0.000000e+00> : vector<64xf32>
    %4 = vector.multi_reduction <add>, %2, %cst_5 [0] : vector<512x64xf32> to vector<64xf32>
    %5 = vector.shape_cast %4 : vector<64xf32> to vector<1x64xf32>
    %6 = vector.shape_cast %5 : vector<1x64xf32> to vector<1x1x64xf32>
    %c0_6 = arith.constant 0 : index
    %c0_7 = arith.constant 0 : index
    %c0_8 = arith.constant 0 : index
    %7 = vector.load %arg5[%c0_6, %c0_7, %c0_8] : memref<1x1x64xf32, #tpu.memory_space<vmem>>, vector<1x1x64xf32>
    tpu.vector_store %arg5[%c0_6, %c0_7, %c0_8], %6 {strides = array<i32>} : memref<1x1x64xf32, #tpu.memory_space<vmem>>, vector<1x1x64xf32>,
    %8 = arith.mulf %2, %2 : vector<512x64xf32>
    %cst_9 = arith.constant dense<0.000000e+00> : vector<64xf32>
    %9 = vector.multi_reduction <add>, %8, %cst_9 [0] : vector<512x64xf32> to vector<64xf32>
    %10 = vector.shape_cast %9 : vector<64xf32> to vector<1x64xf32>
    %11 = vector.shape_cast %10 : vector<1x64xf32> to vector<1x1x64xf32>
    %c0_10 = arith.constant 0 : index
    %c0_11 = arith.constant 0 : index
    %c0_12 = arith.constant 0 : index
    %12 = vector.load %arg6[%c0_10, %c0_11, %c0_12] : memref<1x1x64xf32, #tpu.memory_space<vmem>>, vector<1x1x64xf32>
    tpu.vector_store %arg6[%c0_10, %c0_11, %c0_12], %11 {strides = array<i32>} : memref<1x1x64xf32, #tpu.memory_space<vmem>>, vector<1x1x64xf32>,
    return
  }
  func.func @transform_0(%arg0: i32, %arg1: i32) -> (i32, i32) {
    %c0_i32 = arith.constant 0 : i32
    %c0_i32_0 = arith.constant 0 : i32
    return %arg1, %c0_i32 : i32, i32
  }
  func.func @transform_1(%arg0: i32, %arg1: i32) -> (i32, i32) {
    %c0_i32 = arith.constant 0 : i32
    %c0_i32_0 = arith.constant 0 : i32
    return %c0_i32, %arg0 : i32, i32
  }
  func.func @transform_2(%arg0: i32, %arg1: i32) -> (i32, i32) {
    %c0_i32 = arith.constant 0 : i32
    return %arg1, %arg0 : i32, i32
  }
  func.func @transform_3(%arg0: i32, %arg1: i32) -> (i32, i32, i32) {
    %c0_i32 = arith.constant 0 : i32
    %c0_i32_0 = arith.constant 0 : i32
    return %arg1, %c0_i32, %arg0 : i32, i32, i32
  }
  func.func @transform_4(%arg0: i32, %arg1: i32) -> (i32, i32, i32) {
    %c0_i32 = arith.constant 0 : i32
    %c0_i32_0 = arith.constant 0 : i32
    return %arg1, %c0_i32, %arg0 : i32, i32, i32
  }
}

module attributes {stable_mosaic.version = 11 : i64} {
  func.func @_bn_act_kernel(%arg0: i32, %arg1: i32, %arg2: memref<512x64xf32, #tpu.memory_space<vmem>>, %arg3: memref<1x1x64xf32, #tpu.memory_space<vmem>>, %arg4: memref<1x1x64xf32, #tpu.memory_space<vmem>>, %arg5: memref<1x64xf32, #tpu.memory_space<vmem>>, %arg6: memref<1x64xf32, #tpu.memory_space<vmem>>, %arg7: memref<512x64xbf16, #tpu.memory_space<vmem>>) attributes {dimension_semantics = [#tpu.dimension_semantics<parallel>, #tpu.dimension_semantics<parallel>], iteration_bounds = array<i64: 1, 1>, scalar_prefetch = 0 : i64, scratch_operands = 0 : i64, tpu.core_type = #tpu.core_type<tc>, window_params = [{transform_indices = @transform_0, window_bounds = array<i64: 512, 64>}, {transform_indices = @transform_1, window_bounds = array<i64: 1, 1, 64>}, {transform_indices = @transform_2, window_bounds = array<i64: 1, 1, 64>}, {transform_indices = @transform_3, window_bounds = array<i64: 1, 64>}, {transform_indices = @transform_4, window_bounds = array<i64: 1, 64>}, {transform_indices = @transform_5, window_bounds = array<i64: 512, 64>}]} {
    %c0 = arith.constant 0 : index
    %c0_0 = arith.constant 0 : index
    %c0_1 = arith.constant 0 : index
    %0 = vector.load %arg3[%c0, %c0_0, %c0_1] : memref<1x1x64xf32, #tpu.memory_space<vmem>>, vector<1x1x64xf32>
    %cst = arith.constant dense<0.000000e+00> : vector<1x64xf32>
    %1 = vector.multi_reduction <add>, %0, %cst [0] : vector<1x1x64xf32> to vector<1x64xf32>
    %cst_2 = arith.constant 0.001953125 : f32
    %2 = vector.broadcast %cst_2 : f32 to vector<1x64xf32>
    %3 = arith.mulf %1, %2 : vector<1x64xf32>
    %c0_3 = arith.constant 0 : index
    %c0_4 = arith.constant 0 : index
    %c0_5 = arith.constant 0 : index
    %4 = vector.load %arg4[%c0_3, %c0_4, %c0_5] : memref<1x1x64xf32, #tpu.memory_space<vmem>>, vector<1x1x64xf32>
    %cst_6 = arith.constant dense<0.000000e+00> : vector<1x64xf32>
    %5 = vector.multi_reduction <add>, %4, %cst_6 [0] : vector<1x1x64xf32> to vector<1x64xf32>
    %cst_7 = arith.constant 0.001953125 : f32
    %6 = vector.broadcast %cst_7 : f32 to vector<1x64xf32>
    %7 = arith.mulf %5, %6 : vector<1x64xf32>
    %8 = arith.mulf %3, %3 : vector<1x64xf32>
    %9 = arith.subf %7, %8 : vector<1x64xf32>
    %c0_8 = arith.constant 0 : index
    %c0_9 = arith.constant 0 : index
    %10 = vector.load %arg5[%c0_8, %c0_9] : memref<1x64xf32, #tpu.memory_space<vmem>>, vector<1x64xf32>
    %cst_10 = arith.constant 9.99999974E-6 : f32
    %11 = vector.broadcast %cst_10 : f32 to vector<1x64xf32>
    %12 = arith.addf %9, %11 : vector<1x64xf32>
    %13 = math.rsqrt %12 : vector<1x64xf32>
    %14 = arith.mulf %10, %13 : vector<1x64xf32>
    %c0_11 = arith.constant 0 : index
    %c0_12 = arith.constant 0 : index
    %15 = vector.load %arg6[%c0_11, %c0_12] : memref<1x64xf32, #tpu.memory_space<vmem>>, vector<1x64xf32>
    %16 = arith.mulf %3, %14 : vector<1x64xf32>
    %17 = arith.subf %15, %16 : vector<1x64xf32>
    %c0_13 = arith.constant 0 : index
    %c0_14 = arith.constant 0 : index
    %18 = vector.load %arg2[%c0_13, %c0_14] : memref<512x64xf32, #tpu.memory_space<vmem>>, vector<512x64xf32>
    %19 = vector.broadcast %14 : vector<1x64xf32> to vector<512x64xf32>
    %20 = arith.mulf %18, %19 : vector<512x64xf32>
    %21 = vector.broadcast %17 : vector<1x64xf32> to vector<512x64xf32>
    %22 = arith.addf %20, %21 : vector<512x64xf32>
    %cst_15 = arith.constant 0.000000e+00 : f32
    %23 = vector.broadcast %cst_15 : f32 to vector<512x64xf32>
    %24 = arith.maximumf %22, %23 : vector<512x64xf32>
    %25 = arith.truncf %24 : vector<512x64xf32> to vector<512x64xbf16>
    %c0_16 = arith.constant 0 : index
    %c0_17 = arith.constant 0 : index
    %26 = vector.load %arg7[%c0_16, %c0_17] : memref<512x64xbf16, #tpu.memory_space<vmem>>, vector<512x64xbf16>
    tpu.vector_store %arg7[%c0_16, %c0_17], %25 {strides = array<i32>} : memref<512x64xbf16, #tpu.memory_space<vmem>>, vector<512x64xbf16>,
    return
  }
  func.func @transform_0(%arg0: i32, %arg1: i32) -> (i32, i32) {
    %c0_i32 = arith.constant 0 : i32
    return %arg1, %arg0 : i32, i32
  }
  func.func @transform_1(%arg0: i32, %arg1: i32) -> (i32, i32, i32) {
    %c0_i32 = arith.constant 0 : i32
    %c0_i32_0 = arith.constant 0 : i32
    %c0_i32_1 = arith.constant 0 : i32
    return %c0_i32, %c0_i32_0, %arg0 : i32, i32, i32
  }
  func.func @transform_2(%arg0: i32, %arg1: i32) -> (i32, i32, i32) {
    %c0_i32 = arith.constant 0 : i32
    %c0_i32_0 = arith.constant 0 : i32
    %c0_i32_1 = arith.constant 0 : i32
    return %c0_i32, %c0_i32_0, %arg0 : i32, i32, i32
  }
  func.func @transform_3(%arg0: i32, %arg1: i32) -> (i32, i32) {
    %c0_i32 = arith.constant 0 : i32
    %c0_i32_0 = arith.constant 0 : i32
    return %c0_i32, %arg0 : i32, i32
  }
  func.func @transform_4(%arg0: i32, %arg1: i32) -> (i32, i32) {
    %c0_i32 = arith.constant 0 : i32
    %c0_i32_0 = arith.constant 0 : i32
    return %c0_i32, %arg0 : i32, i32
  }
  func.func @transform_5(%arg0: i32, %arg1: i32) -> (i32, i32) {
    %c0_i32 = arith.constant 0 : i32
    return %arg1, %arg0 : i32, i32
  }
}

module attributes {stable_mosaic.version = 11 : i64} {
  func.func @_matmul_stats_kernel(%arg0: i32, %arg1: i32, %arg2: memref<512x576xbf16, #tpu.memory_space<vmem>>, %arg3: memref<576x64xbf16, #tpu.memory_space<vmem>>, %arg4: memref<512x64xf32, #tpu.memory_space<vmem>>, %arg5: memref<1x1x64xf32, #tpu.memory_space<vmem>>, %arg6: memref<1x1x64xf32, #tpu.memory_space<vmem>>) attributes {dimension_semantics = [#tpu.dimension_semantics<parallel>, #tpu.dimension_semantics<parallel>], iteration_bounds = array<i64: 1, 1>, scalar_prefetch = 0 : i64, scratch_operands = 0 : i64, tpu.core_type = #tpu.core_type<tc>, window_params = [{transform_indices = @transform_0, window_bounds = array<i64: 512, 576>}, {transform_indices = @transform_1, window_bounds = array<i64: 576, 64>}, {transform_indices = @transform_2, window_bounds = array<i64: 512, 64>}, {transform_indices = @transform_3, window_bounds = array<i64: 1, 1, 64>}, {transform_indices = @transform_4, window_bounds = array<i64: 1, 1, 64>}]} {
    %c0 = arith.constant 0 : index
    %c0_0 = arith.constant 0 : index
    %0 = vector.load %arg2[%c0, %c0_0] : memref<512x576xbf16, #tpu.memory_space<vmem>>, vector<512x576xbf16>
    %c0_1 = arith.constant 0 : index
    %c0_2 = arith.constant 0 : index
    %1 = vector.load %arg3[%c0_1, %c0_2] : memref<576x64xbf16, #tpu.memory_space<vmem>>, vector<576x64xbf16>
    %cst = arith.constant dense<0.000000e+00> : vector<512x64xf32>
    %2 = tpu.matmul %0, %1, %cst {dimension_numbers = #tpu.dot_dimension_numbers<[1], [0], [0], [1], [0, 0, 1, 1], [], []>} : vector<512x576xbf16>, vector<576x64xbf16>, vector<512x64xf32> -> vector<512x64xf32>
    %c0_3 = arith.constant 0 : index
    %c0_4 = arith.constant 0 : index
    %3 = vector.load %arg4[%c0_3, %c0_4] : memref<512x64xf32, #tpu.memory_space<vmem>>, vector<512x64xf32>
    tpu.vector_store %arg4[%c0_3, %c0_4], %2 {strides = array<i32>} : memref<512x64xf32, #tpu.memory_space<vmem>>, vector<512x64xf32>,
    %cst_5 = arith.constant dense<0.000000e+00> : vector<64xf32>
    %4 = vector.multi_reduction <add>, %2, %cst_5 [0] : vector<512x64xf32> to vector<64xf32>
    %5 = vector.shape_cast %4 : vector<64xf32> to vector<1x64xf32>
    %6 = vector.shape_cast %5 : vector<1x64xf32> to vector<1x1x64xf32>
    %c0_6 = arith.constant 0 : index
    %c0_7 = arith.constant 0 : index
    %c0_8 = arith.constant 0 : index
    %7 = vector.load %arg5[%c0_6, %c0_7, %c0_8] : memref<1x1x64xf32, #tpu.memory_space<vmem>>, vector<1x1x64xf32>
    tpu.vector_store %arg5[%c0_6, %c0_7, %c0_8], %6 {strides = array<i32>} : memref<1x1x64xf32, #tpu.memory_space<vmem>>, vector<1x1x64xf32>,
    %8 = arith.mulf %2, %2 : vector<512x64xf32>
    %cst_9 = arith.constant dense<0.000000e+00> : vector<64xf32>
    %9 = vector.multi_reduction <add>, %8, %cst_9 [0] : vector<512x64xf32> to vector<64xf32>
    %10 = vector.shape_cast %9 : vector<64xf32> to vector<1x64xf32>
    %11 = vector.shape_cast %10 : vector<1x64xf32> to vector<1x1x64xf32>
    %c0_10 = arith.constant 0 : index
    %c0_11 = arith.constant 0 : index
    %c0_12 = arith.constant 0 : index
    %12 = vector.load %arg6[%c0_10, %c0_11, %c0_12] : memref<1x1x64xf32, #tpu.memory_space<vmem>>, vector<1x1x64xf32>
    tpu.vector_store %arg6[%c0_10, %c0_11, %c0_12], %11 {strides = array<i32>} : memref<1x1x64xf32, #tpu.memory_space<vmem>>, vector<1x1x64xf32>,
    return
  }
  func.func @transform_0(%arg0: i32, %arg1: i32) -> (i32, i32) {
    %c0_i32 = arith.constant 0 : i32
    %c0_i32_0 = arith.constant 0 : i32
    return %arg1, %c0_i32 : i32, i32
  }
  func.func @transform_1(%arg0: i32, %arg1: i32) -> (i32, i32) {
    %c0_i32 = arith.constant 0 : i32
    %c0_i32_0 = arith.constant 0 : i32
    return %c0_i32, %arg0 : i32, i32
  }
  func.func @transform_2(%arg0: i32, %arg1: i32) -> (i32, i32) {
    %c0_i32 = arith.constant 0 : i32
    return %arg1, %arg0 : i32, i32
  }
  func.func @transform_3(%arg0: i32, %arg1: i32) -> (i32, i32, i32) {
    %c0_i32 = arith.constant 0 : i32
    %c0_i32_0 = arith.constant 0 : i32
    return %arg1, %c0_i32, %arg0 : i32, i32, i32
  }
  func.func @transform_4(%arg0: i32, %arg1: i32) -> (i32, i32, i32) {
    %c0_i32 = arith.constant 0 : i32
    %c0_i32_0 = arith.constant 0 : i32
    return %arg1, %c0_i32, %arg0 : i32, i32, i32
  }
}

module attributes {stable_mosaic.version = 11 : i64} {
  func.func @_maxpool_kernel(%arg0: i32, %arg1: memref<16x2x8x128xbf16, #tpu.memory_space<vmem>>, %arg2: memref<16x8x64xbf16, #tpu.memory_space<vmem>>) attributes {dimension_semantics = [#tpu.dimension_semantics<parallel>], iteration_bounds = array<i64: 1>, scalar_prefetch = 0 : i64, scratch_operands = 0 : i64, tpu.core_type = #tpu.core_type<tc>, window_params = [{transform_indices = @transform_0, window_bounds = array<i64: 16, 2, 8, 128>}, {transform_indices = @transform_1, window_bounds = array<i64: 16, 8, 64>}]} {
    %c0 = arith.constant 0 : index
    %c0_0 = arith.constant 0 : index
    %c0_1 = arith.constant 0 : index
    %c0_2 = arith.constant 0 : index
    %0 = vector.load %arg1[%c0, %c0_0, %c0_1, %c0_2] : memref<16x2x8x128xbf16, #tpu.memory_space<vmem>>, vector<16x1x8x128xbf16>
    %1 = vector.shape_cast %0 : vector<16x1x8x128xbf16> to vector<16x8x128xbf16>
    %c0_3 = arith.constant 0 : index
    %c1 = arith.constant 1 : index
    %c0_4 = arith.constant 0 : index
    %c0_5 = arith.constant 0 : index
    %2 = vector.load %arg1[%c0_3, %c1, %c0_4, %c0_5] : memref<16x2x8x128xbf16, #tpu.memory_space<vmem>>, vector<16x1x8x128xbf16>
    %3 = vector.shape_cast %2 : vector<16x1x8x128xbf16> to vector<16x8x128xbf16>
    %4 = arith.maximumf %1, %3 : vector<16x8x128xbf16>
    %5 = vector.extract_strided_slice %4 {offsets = [0, 0, 0], sizes = [16, 8, 64], strides = [1, 1, 1]} : vector<16x8x128xbf16> to vector<16x8x64xbf16>
    %6 = vector.extract_strided_slice %4 {offsets = [0, 0, 64], sizes = [16, 8, 64], strides = [1, 1, 1]} : vector<16x8x128xbf16> to vector<16x8x64xbf16>
    %7 = arith.maximumf %5, %6 : vector<16x8x64xbf16>
    %c0_6 = arith.constant 0 : index
    %c0_7 = arith.constant 0 : index
    %c0_8 = arith.constant 0 : index
    %8 = vector.load %arg2[%c0_6, %c0_7, %c0_8] : memref<16x8x64xbf16, #tpu.memory_space<vmem>>, vector<16x8x64xbf16>
    tpu.vector_store %arg2[%c0_6, %c0_7, %c0_8], %7 {strides = array<i32>} : memref<16x8x64xbf16, #tpu.memory_space<vmem>>, vector<16x8x64xbf16>,
    return
  }
  func.func @transform_0(%arg0: i32) -> (i32, i32, i32, i32) {
    %c0_i32 = arith.constant 0 : i32
    %c0_i32_0 = arith.constant 0 : i32
    %c0_i32_1 = arith.constant 0 : i32
    %c0_i32_2 = arith.constant 0 : i32
    return %arg0, %c0_i32, %c0_i32_0, %c0_i32_1 : i32, i32, i32, i32
  }
  func.func @transform_1(%arg0: i32) -> (i32, i32, i32) {
    %c0_i32 = arith.constant 0 : i32
    %c0_i32_0 = arith.constant 0 : i32
    %c0_i32_1 = arith.constant 0 : i32
    return %arg0, %c0_i32, %c0_i32_0 : i32, i32, i32
  }
}

module attributes {stable_mosaic.version = 11 : i64} {
  func.func @_bn_act_kernel(%arg0: i32, %arg1: i32, %arg2: memref<128x128xf32, #tpu.memory_space<vmem>>, %arg3: memref<1x1x128xf32, #tpu.memory_space<vmem>>, %arg4: memref<1x1x128xf32, #tpu.memory_space<vmem>>, %arg5: memref<1x128xf32, #tpu.memory_space<vmem>>, %arg6: memref<1x128xf32, #tpu.memory_space<vmem>>, %arg7: memref<128x128xbf16, #tpu.memory_space<vmem>>) attributes {dimension_semantics = [#tpu.dimension_semantics<parallel>, #tpu.dimension_semantics<parallel>], iteration_bounds = array<i64: 1, 1>, scalar_prefetch = 0 : i64, scratch_operands = 0 : i64, tpu.core_type = #tpu.core_type<tc>, window_params = [{transform_indices = @transform_0, window_bounds = array<i64: 128, 128>}, {transform_indices = @transform_1, window_bounds = array<i64: 1, 1, 128>}, {transform_indices = @transform_2, window_bounds = array<i64: 1, 1, 128>}, {transform_indices = @transform_3, window_bounds = array<i64: 1, 128>}, {transform_indices = @transform_4, window_bounds = array<i64: 1, 128>}, {transform_indices = @transform_5, window_bounds = array<i64: 128, 128>}]} {
    %c0 = arith.constant 0 : index
    %c0_0 = arith.constant 0 : index
    %c0_1 = arith.constant 0 : index
    %0 = vector.load %arg3[%c0, %c0_0, %c0_1] : memref<1x1x128xf32, #tpu.memory_space<vmem>>, vector<1x1x128xf32>
    %cst = arith.constant dense<0.000000e+00> : vector<1x128xf32>
    %1 = vector.multi_reduction <add>, %0, %cst [0] : vector<1x1x128xf32> to vector<1x128xf32>
    %cst_2 = arith.constant 7.812500e-03 : f32
    %2 = vector.broadcast %cst_2 : f32 to vector<1x128xf32>
    %3 = arith.mulf %1, %2 : vector<1x128xf32>
    %c0_3 = arith.constant 0 : index
    %c0_4 = arith.constant 0 : index
    %c0_5 = arith.constant 0 : index
    %4 = vector.load %arg4[%c0_3, %c0_4, %c0_5] : memref<1x1x128xf32, #tpu.memory_space<vmem>>, vector<1x1x128xf32>
    %cst_6 = arith.constant dense<0.000000e+00> : vector<1x128xf32>
    %5 = vector.multi_reduction <add>, %4, %cst_6 [0] : vector<1x1x128xf32> to vector<1x128xf32>
    %cst_7 = arith.constant 7.812500e-03 : f32
    %6 = vector.broadcast %cst_7 : f32 to vector<1x128xf32>
    %7 = arith.mulf %5, %6 : vector<1x128xf32>
    %8 = arith.mulf %3, %3 : vector<1x128xf32>
    %9 = arith.subf %7, %8 : vector<1x128xf32>
    %c0_8 = arith.constant 0 : index
    %c0_9 = arith.constant 0 : index
    %10 = vector.load %arg5[%c0_8, %c0_9] : memref<1x128xf32, #tpu.memory_space<vmem>>, vector<1x128xf32>
    %cst_10 = arith.constant 9.99999974E-6 : f32
    %11 = vector.broadcast %cst_10 : f32 to vector<1x128xf32>
    %12 = arith.addf %9, %11 : vector<1x128xf32>
    %13 = math.rsqrt %12 : vector<1x128xf32>
    %14 = arith.mulf %10, %13 : vector<1x128xf32>
    %c0_11 = arith.constant 0 : index
    %c0_12 = arith.constant 0 : index
    %15 = vector.load %arg6[%c0_11, %c0_12] : memref<1x128xf32, #tpu.memory_space<vmem>>, vector<1x128xf32>
    %16 = arith.mulf %3, %14 : vector<1x128xf32>
    %17 = arith.subf %15, %16 : vector<1x128xf32>
    %c0_13 = arith.constant 0 : index
    %c0_14 = arith.constant 0 : index
    %18 = vector.load %arg2[%c0_13, %c0_14] : memref<128x128xf32, #tpu.memory_space<vmem>>, vector<128x128xf32>
    %19 = vector.broadcast %14 : vector<1x128xf32> to vector<128x128xf32>
    %20 = arith.mulf %18, %19 : vector<128x128xf32>
    %21 = vector.broadcast %17 : vector<1x128xf32> to vector<128x128xf32>
    %22 = arith.addf %20, %21 : vector<128x128xf32>
    %cst_15 = arith.constant 0.000000e+00 : f32
    %23 = vector.broadcast %cst_15 : f32 to vector<128x128xf32>
    %24 = arith.maximumf %22, %23 : vector<128x128xf32>
    %25 = arith.truncf %24 : vector<128x128xf32> to vector<128x128xbf16>
    %c0_16 = arith.constant 0 : index
    %c0_17 = arith.constant 0 : index
    %26 = vector.load %arg7[%c0_16, %c0_17] : memref<128x128xbf16, #tpu.memory_space<vmem>>, vector<128x128xbf16>
    tpu.vector_store %arg7[%c0_16, %c0_17], %25 {strides = array<i32>} : memref<128x128xbf16, #tpu.memory_space<vmem>>, vector<128x128xbf16>,
    return
  }
  func.func @transform_0(%arg0: i32, %arg1: i32) -> (i32, i32) {
    %c0_i32 = arith.constant 0 : i32
    return %arg1, %arg0 : i32, i32
  }
  func.func @transform_1(%arg0: i32, %arg1: i32) -> (i32, i32, i32) {
    %c0_i32 = arith.constant 0 : i32
    %c0_i32_0 = arith.constant 0 : i32
    %c0_i32_1 = arith.constant 0 : i32
    return %c0_i32, %c0_i32_0, %arg0 : i32, i32, i32
  }
  func.func @transform_2(%arg0: i32, %arg1: i32) -> (i32, i32, i32) {
    %c0_i32 = arith.constant 0 : i32
    %c0_i32_0 = arith.constant 0 : i32
    %c0_i32_1 = arith.constant 0 : i32
    return %c0_i32, %c0_i32_0, %arg0 : i32, i32, i32
  }
  func.func @transform_3(%arg0: i32, %arg1: i32) -> (i32, i32) {
    %c0_i32 = arith.constant 0 : i32
    %c0_i32_0 = arith.constant 0 : i32
    return %c0_i32, %arg0 : i32, i32
  }
  func.func @transform_4(%arg0: i32, %arg1: i32) -> (i32, i32) {
    %c0_i32 = arith.constant 0 : i32
    %c0_i32_0 = arith.constant 0 : i32
    return %c0_i32, %arg0 : i32, i32
  }
  func.func @transform_5(%arg0: i32, %arg1: i32) -> (i32, i32) {
    %c0_i32 = arith.constant 0 : i32
    return %arg1, %arg0 : i32, i32
  }
}

module attributes {stable_mosaic.version = 11 : i64} {
  func.func @_matmul_stats_kernel(%arg0: i32, %arg1: i32, %arg2: memref<128x576xbf16, #tpu.memory_space<vmem>>, %arg3: memref<576x128xbf16, #tpu.memory_space<vmem>>, %arg4: memref<128x128xf32, #tpu.memory_space<vmem>>, %arg5: memref<1x1x128xf32, #tpu.memory_space<vmem>>, %arg6: memref<1x1x128xf32, #tpu.memory_space<vmem>>) attributes {dimension_semantics = [#tpu.dimension_semantics<parallel>, #tpu.dimension_semantics<parallel>], iteration_bounds = array<i64: 1, 1>, scalar_prefetch = 0 : i64, scratch_operands = 0 : i64, tpu.core_type = #tpu.core_type<tc>, window_params = [{transform_indices = @transform_0, window_bounds = array<i64: 128, 576>}, {transform_indices = @transform_1, window_bounds = array<i64: 576, 128>}, {transform_indices = @transform_2, window_bounds = array<i64: 128, 128>}, {transform_indices = @transform_3, window_bounds = array<i64: 1, 1, 128>}, {transform_indices = @transform_4, window_bounds = array<i64: 1, 1, 128>}]} {
    %c0 = arith.constant 0 : index
    %c0_0 = arith.constant 0 : index
    %0 = vector.load %arg2[%c0, %c0_0] : memref<128x576xbf16, #tpu.memory_space<vmem>>, vector<128x576xbf16>
    %c0_1 = arith.constant 0 : index
    %c0_2 = arith.constant 0 : index
    %1 = vector.load %arg3[%c0_1, %c0_2] : memref<576x128xbf16, #tpu.memory_space<vmem>>, vector<576x128xbf16>
    %cst = arith.constant dense<0.000000e+00> : vector<128x128xf32>
    %2 = tpu.matmul %0, %1, %cst {dimension_numbers = #tpu.dot_dimension_numbers<[1], [0], [0], [1], [0, 0, 1, 1], [], []>} : vector<128x576xbf16>, vector<576x128xbf16>, vector<128x128xf32> -> vector<128x128xf32>
    %c0_3 = arith.constant 0 : index
    %c0_4 = arith.constant 0 : index
    %3 = vector.load %arg4[%c0_3, %c0_4] : memref<128x128xf32, #tpu.memory_space<vmem>>, vector<128x128xf32>
    tpu.vector_store %arg4[%c0_3, %c0_4], %2 {strides = array<i32>} : memref<128x128xf32, #tpu.memory_space<vmem>>, vector<128x128xf32>,
    %cst_5 = arith.constant dense<0.000000e+00> : vector<128xf32>
    %4 = vector.multi_reduction <add>, %2, %cst_5 [0] : vector<128x128xf32> to vector<128xf32>
    %5 = vector.shape_cast %4 : vector<128xf32> to vector<1x128xf32>
    %6 = vector.shape_cast %5 : vector<1x128xf32> to vector<1x1x128xf32>
    %c0_6 = arith.constant 0 : index
    %c0_7 = arith.constant 0 : index
    %c0_8 = arith.constant 0 : index
    %7 = vector.load %arg5[%c0_6, %c0_7, %c0_8] : memref<1x1x128xf32, #tpu.memory_space<vmem>>, vector<1x1x128xf32>
    tpu.vector_store %arg5[%c0_6, %c0_7, %c0_8], %6 {strides = array<i32>} : memref<1x1x128xf32, #tpu.memory_space<vmem>>, vector<1x1x128xf32>,
    %8 = arith.mulf %2, %2 : vector<128x128xf32>
    %cst_9 = arith.constant dense<0.000000e+00> : vector<128xf32>
    %9 = vector.multi_reduction <add>, %8, %cst_9 [0] : vector<128x128xf32> to vector<128xf32>
    %10 = vector.shape_cast %9 : vector<128xf32> to vector<1x128xf32>
    %11 = vector.shape_cast %10 : vector<1x128xf32> to vector<1x1x128xf32>
    %c0_10 = arith.constant 0 : index
    %c0_11 = arith.constant 0 : index
    %c0_12 = arith.constant 0 : index
    %12 = vector.load %arg6[%c0_10, %c0_11, %c0_12] : memref<1x1x128xf32, #tpu.memory_space<vmem>>, vector<1x1x128xf32>
    tpu.vector_store %arg6[%c0_10, %c0_11, %c0_12], %11 {strides = array<i32>} : memref<1x1x128xf32, #tpu.memory_space<vmem>>, vector<1x1x128xf32>,
    return
  }
  func.func @transform_0(%arg0: i32, %arg1: i32) -> (i32, i32) {
    %c0_i32 = arith.constant 0 : i32
    %c0_i32_0 = arith.constant 0 : i32
    return %arg1, %c0_i32 : i32, i32
  }
  func.func @transform_1(%arg0: i32, %arg1: i32) -> (i32, i32) {
    %c0_i32 = arith.constant 0 : i32
    %c0_i32_0 = arith.constant 0 : i32
    return %c0_i32, %arg0 : i32, i32
  }
  func.func @transform_2(%arg0: i32, %arg1: i32) -> (i32, i32) {
    %c0_i32 = arith.constant 0 : i32
    return %arg1, %arg0 : i32, i32
  }
  func.func @transform_3(%arg0: i32, %arg1: i32) -> (i32, i32, i32) {
    %c0_i32 = arith.constant 0 : i32
    %c0_i32_0 = arith.constant 0 : i32
    return %arg1, %c0_i32, %arg0 : i32, i32, i32
  }
  func.func @transform_4(%arg0: i32, %arg1: i32) -> (i32, i32, i32) {
    %c0_i32 = arith.constant 0 : i32
    %c0_i32_0 = arith.constant 0 : i32
    return %arg1, %c0_i32, %arg0 : i32, i32, i32
  }
}

module attributes {stable_mosaic.version = 11 : i64} {
  func.func @_maxpool_kernel(%arg0: i32, %arg1: memref<4x4x2x512xbf16, #tpu.memory_space<vmem>>, %arg2: memref<4x2x128xbf16, #tpu.memory_space<vmem>>) attributes {dimension_semantics = [#tpu.dimension_semantics<parallel>], iteration_bounds = array<i64: 1>, scalar_prefetch = 0 : i64, scratch_operands = 0 : i64, tpu.core_type = #tpu.core_type<tc>, window_params = [{transform_indices = @transform_0, window_bounds = array<i64: 4, 4, 2, 512>}, {transform_indices = @transform_1, window_bounds = array<i64: 4, 2, 128>}]} {
    %c0 = arith.constant 0 : index
    %c0_0 = arith.constant 0 : index
    %c0_1 = arith.constant 0 : index
    %c0_2 = arith.constant 0 : index
    %0 = vector.load %arg1[%c0, %c0_0, %c0_1, %c0_2] : memref<4x4x2x512xbf16, #tpu.memory_space<vmem>>, vector<4x1x2x512xbf16>
    %1 = vector.shape_cast %0 : vector<4x1x2x512xbf16> to vector<4x2x512xbf16>
    %c0_3 = arith.constant 0 : index
    %c1 = arith.constant 1 : index
    %c0_4 = arith.constant 0 : index
    %c0_5 = arith.constant 0 : index
    %2 = vector.load %arg1[%c0_3, %c1, %c0_4, %c0_5] : memref<4x4x2x512xbf16, #tpu.memory_space<vmem>>, vector<4x1x2x512xbf16>
    %3 = vector.shape_cast %2 : vector<4x1x2x512xbf16> to vector<4x2x512xbf16>
    %4 = arith.maximumf %1, %3 : vector<4x2x512xbf16>
    %c0_6 = arith.constant 0 : index
    %c2 = arith.constant 2 : index
    %c0_7 = arith.constant 0 : index
    %c0_8 = arith.constant 0 : index
    %5 = vector.load %arg1[%c0_6, %c2, %c0_7, %c0_8] : memref<4x4x2x512xbf16, #tpu.memory_space<vmem>>, vector<4x1x2x512xbf16>
    %6 = vector.shape_cast %5 : vector<4x1x2x512xbf16> to vector<4x2x512xbf16>
    %7 = arith.maximumf %4, %6 : vector<4x2x512xbf16>
    %c0_9 = arith.constant 0 : index
    %c3 = arith.constant 3 : index
    %c0_10 = arith.constant 0 : index
    %c0_11 = arith.constant 0 : index
    %8 = vector.load %arg1[%c0_9, %c3, %c0_10, %c0_11] : memref<4x4x2x512xbf16, #tpu.memory_space<vmem>>, vector<4x1x2x512xbf16>
    %9 = vector.shape_cast %8 : vector<4x1x2x512xbf16> to vector<4x2x512xbf16>
    %10 = arith.maximumf %7, %9 : vector<4x2x512xbf16>
    %11 = vector.extract_strided_slice %10 {offsets = [0, 0, 0], sizes = [4, 2, 128], strides = [1, 1, 1]} : vector<4x2x512xbf16> to vector<4x2x128xbf16>
    %12 = vector.extract_strided_slice %10 {offsets = [0, 0, 128], sizes = [4, 2, 128], strides = [1, 1, 1]} : vector<4x2x512xbf16> to vector<4x2x128xbf16>
    %13 = arith.maximumf %11, %12 : vector<4x2x128xbf16>
    %14 = vector.extract_strided_slice %10 {offsets = [0, 0, 256], sizes = [4, 2, 128], strides = [1, 1, 1]} : vector<4x2x512xbf16> to vector<4x2x128xbf16>
    %15 = arith.maximumf %13, %14 : vector<4x2x128xbf16>
    %16 = vector.extract_strided_slice %10 {offsets = [0, 0, 384], sizes = [4, 2, 128], strides = [1, 1, 1]} : vector<4x2x512xbf16> to vector<4x2x128xbf16>
    %17 = arith.maximumf %15, %16 : vector<4x2x128xbf16>
    %c0_12 = arith.constant 0 : index
    %c0_13 = arith.constant 0 : index
    %c0_14 = arith.constant 0 : index
    %18 = vector.load %arg2[%c0_12, %c0_13, %c0_14] : memref<4x2x128xbf16, #tpu.memory_space<vmem>>, vector<4x2x128xbf16>
    tpu.vector_store %arg2[%c0_12, %c0_13, %c0_14], %17 {strides = array<i32>} : memref<4x2x128xbf16, #tpu.memory_space<vmem>>, vector<4x2x128xbf16>,
    return
  }
  func.func @transform_0(%arg0: i32) -> (i32, i32, i32, i32) {
    %c0_i32 = arith.constant 0 : i32
    %c0_i32_0 = arith.constant 0 : i32
    %c0_i32_1 = arith.constant 0 : i32
    %c0_i32_2 = arith.constant 0 : i32
    return %arg0, %c0_i32, %c0_i32_0, %c0_i32_1 : i32, i32, i32, i32
  }
  func.func @transform_1(%arg0: i32) -> (i32, i32, i32) {
    %c0_i32 = arith.constant 0 : i32
    %c0_i32_0 = arith.constant 0 : i32
    %c0_i32_1 = arith.constant 0 : i32
    return %arg0, %c0_i32, %c0_i32_0 : i32, i32, i32
  }
}

module attributes {stable_mosaic.version = 11 : i64} {
  func.func @_maxpool_kernel(%arg0: i32, %arg1: memref<8x2x4x256xbf16, #tpu.memory_space<vmem>>, %arg2: memref<8x4x128xbf16, #tpu.memory_space<vmem>>) attributes {dimension_semantics = [#tpu.dimension_semantics<parallel>], iteration_bounds = array<i64: 1>, scalar_prefetch = 0 : i64, scratch_operands = 0 : i64, tpu.core_type = #tpu.core_type<tc>, window_params = [{transform_indices = @transform_0, window_bounds = array<i64: 8, 2, 4, 256>}, {transform_indices = @transform_1, window_bounds = array<i64: 8, 4, 128>}]} {
    %c0 = arith.constant 0 : index
    %c0_0 = arith.constant 0 : index
    %c0_1 = arith.constant 0 : index
    %c0_2 = arith.constant 0 : index
    %0 = vector.load %arg1[%c0, %c0_0, %c0_1, %c0_2] : memref<8x2x4x256xbf16, #tpu.memory_space<vmem>>, vector<8x1x4x256xbf16>
    %1 = vector.shape_cast %0 : vector<8x1x4x256xbf16> to vector<8x4x256xbf16>
    %c0_3 = arith.constant 0 : index
    %c1 = arith.constant 1 : index
    %c0_4 = arith.constant 0 : index
    %c0_5 = arith.constant 0 : index
    %2 = vector.load %arg1[%c0_3, %c1, %c0_4, %c0_5] : memref<8x2x4x256xbf16, #tpu.memory_space<vmem>>, vector<8x1x4x256xbf16>
    %3 = vector.shape_cast %2 : vector<8x1x4x256xbf16> to vector<8x4x256xbf16>
    %4 = arith.maximumf %1, %3 : vector<8x4x256xbf16>
    %5 = vector.extract_strided_slice %4 {offsets = [0, 0, 0], sizes = [8, 4, 128], strides = [1, 1, 1]} : vector<8x4x256xbf16> to vector<8x4x128xbf16>
    %6 = vector.extract_strided_slice %4 {offsets = [0, 0, 128], sizes = [8, 4, 128], strides = [1, 1, 1]} : vector<8x4x256xbf16> to vector<8x4x128xbf16>
    %7 = arith.maximumf %5, %6 : vector<8x4x128xbf16>
    %c0_6 = arith.constant 0 : index
    %c0_7 = arith.constant 0 : index
    %c0_8 = arith.constant 0 : index
    %8 = vector.load %arg2[%c0_6, %c0_7, %c0_8] : memref<8x4x128xbf16, #tpu.memory_space<vmem>>, vector<8x4x128xbf16>
    tpu.vector_store %arg2[%c0_6, %c0_7, %c0_8], %7 {strides = array<i32>} : memref<8x4x128xbf16, #tpu.memory_space<vmem>>, vector<8x4x128xbf16>,
    return
  }
  func.func @transform_0(%arg0: i32) -> (i32, i32, i32, i32) {
    %c0_i32 = arith.constant 0 : i32
    %c0_i32_0 = arith.constant 0 : i32
    %c0_i32_1 = arith.constant 0 : i32
    %c0_i32_2 = arith.constant 0 : i32
    return %arg0, %c0_i32, %c0_i32_0, %c0_i32_1 : i32, i32, i32, i32
  }
  func.func @transform_1(%arg0: i32) -> (i32, i32, i32) {
    %c0_i32 = arith.constant 0 : i32
    %c0_i32_0 = arith.constant 0 : i32
    %c0_i32_1 = arith.constant 0 : i32
    return %arg0, %c0_i32, %c0_i32_0 : i32, i32, i32
  }
}

module attributes {stable_mosaic.version = 11 : i64} {
  func.func @_matmul_stats_kernel(%arg0: i32, %arg1: i32, %arg2: memref<128x1152xbf16, #tpu.memory_space<vmem>>, %arg3: memref<1152x128xbf16, #tpu.memory_space<vmem>>, %arg4: memref<128x128xf32, #tpu.memory_space<vmem>>, %arg5: memref<1x1x128xf32, #tpu.memory_space<vmem>>, %arg6: memref<1x1x128xf32, #tpu.memory_space<vmem>>) attributes {dimension_semantics = [#tpu.dimension_semantics<parallel>, #tpu.dimension_semantics<parallel>], iteration_bounds = array<i64: 1, 1>, scalar_prefetch = 0 : i64, scratch_operands = 0 : i64, tpu.core_type = #tpu.core_type<tc>, window_params = [{transform_indices = @transform_0, window_bounds = array<i64: 128, 1152>}, {transform_indices = @transform_1, window_bounds = array<i64: 1152, 128>}, {transform_indices = @transform_2, window_bounds = array<i64: 128, 128>}, {transform_indices = @transform_3, window_bounds = array<i64: 1, 1, 128>}, {transform_indices = @transform_4, window_bounds = array<i64: 1, 1, 128>}]} {
    %c0 = arith.constant 0 : index
    %c0_0 = arith.constant 0 : index
    %0 = vector.load %arg2[%c0, %c0_0] : memref<128x1152xbf16, #tpu.memory_space<vmem>>, vector<128x1152xbf16>
    %c0_1 = arith.constant 0 : index
    %c0_2 = arith.constant 0 : index
    %1 = vector.load %arg3[%c0_1, %c0_2] : memref<1152x128xbf16, #tpu.memory_space<vmem>>, vector<1152x128xbf16>
    %cst = arith.constant dense<0.000000e+00> : vector<128x128xf32>
    %2 = tpu.matmul %0, %1, %cst {dimension_numbers = #tpu.dot_dimension_numbers<[1], [0], [0], [1], [0, 0, 1, 1], [], []>} : vector<128x1152xbf16>, vector<1152x128xbf16>, vector<128x128xf32> -> vector<128x128xf32>
    %c0_3 = arith.constant 0 : index
    %c0_4 = arith.constant 0 : index
    %3 = vector.load %arg4[%c0_3, %c0_4] : memref<128x128xf32, #tpu.memory_space<vmem>>, vector<128x128xf32>
    tpu.vector_store %arg4[%c0_3, %c0_4], %2 {strides = array<i32>} : memref<128x128xf32, #tpu.memory_space<vmem>>, vector<128x128xf32>,
    %cst_5 = arith.constant dense<0.000000e+00> : vector<128xf32>
    %4 = vector.multi_reduction <add>, %2, %cst_5 [0] : vector<128x128xf32> to vector<128xf32>
    %5 = vector.shape_cast %4 : vector<128xf32> to vector<1x128xf32>
    %6 = vector.shape_cast %5 : vector<1x128xf32> to vector<1x1x128xf32>
    %c0_6 = arith.constant 0 : index
    %c0_7 = arith.constant 0 : index
    %c0_8 = arith.constant 0 : index
    %7 = vector.load %arg5[%c0_6, %c0_7, %c0_8] : memref<1x1x128xf32, #tpu.memory_space<vmem>>, vector<1x1x128xf32>
    tpu.vector_store %arg5[%c0_6, %c0_7, %c0_8], %6 {strides = array<i32>} : memref<1x1x128xf32, #tpu.memory_space<vmem>>, vector<1x1x128xf32>,
    %8 = arith.mulf %2, %2 : vector<128x128xf32>
    %cst_9 = arith.constant dense<0.000000e+00> : vector<128xf32>
    %9 = vector.multi_reduction <add>, %8, %cst_9 [0] : vector<128x128xf32> to vector<128xf32>
    %10 = vector.shape_cast %9 : vector<128xf32> to vector<1x128xf32>
    %11 = vector.shape_cast %10 : vector<1x128xf32> to vector<1x1x128xf32>
    %c0_10 = arith.constant 0 : index
    %c0_11 = arith.constant 0 : index
    %c0_12 = arith.constant 0 : index
    %12 = vector.load %arg6[%c0_10, %c0_11, %c0_12] : memref<1x1x128xf32, #tpu.memory_space<vmem>>, vector<1x1x128xf32>
    tpu.vector_store %arg6[%c0_10, %c0_11, %c0_12], %11 {strides = array<i32>} : memref<1x1x128xf32, #tpu.memory_space<vmem>>, vector<1x1x128xf32>,
    return
  }
  func.func @transform_0(%arg0: i32, %arg1: i32) -> (i32, i32) {
    %c0_i32 = arith.constant 0 : i32
    %c0_i32_0 = arith.constant 0 : i32
    return %arg1, %c0_i32 : i32, i32
  }
  func.func @transform_1(%arg0: i32, %arg1: i32) -> (i32, i32) {
    %c0_i32 = arith.constant 0 : i32
    %c0_i32_0 = arith.constant 0 : i32
    return %c0_i32, %arg0 : i32, i32
  }
  func.func @transform_2(%arg0: i32, %arg1: i32) -> (i32, i32) {
    %c0_i32 = arith.constant 0 : i32
    return %arg1, %arg0 : i32, i32
  }
  func.func @transform_3(%arg0: i32, %arg1: i32) -> (i32, i32, i32) {
    %c0_i32 = arith.constant 0 : i32
    %c0_i32_0 = arith.constant 0 : i32
    return %arg1, %c0_i32, %arg0 : i32, i32, i32
  }
  func.func @transform_4(%arg0: i32, %arg1: i32) -> (i32, i32, i32) {
    %c0_i32 = arith.constant 0 : i32
    %c0_i32_0 = arith.constant 0 : i32
    return %arg1, %c0_i32, %arg0 : i32, i32, i32
  }
}

module attributes {stable_mosaic.version = 11 : i64} {
  func.func @_matmul_stats_kernel(%arg0: i32, %arg1: i32, %arg2: memref<8x128xbf16, #tpu.memory_space<vmem>>, %arg3: memref<128x128xbf16, #tpu.memory_space<vmem>>, %arg4: memref<8x128xf32, #tpu.memory_space<vmem>>, %arg5: memref<1x1x128xf32, #tpu.memory_space<vmem>>, %arg6: memref<1x1x128xf32, #tpu.memory_space<vmem>>) attributes {dimension_semantics = [#tpu.dimension_semantics<parallel>, #tpu.dimension_semantics<parallel>], iteration_bounds = array<i64: 1, 1>, scalar_prefetch = 0 : i64, scratch_operands = 0 : i64, tpu.core_type = #tpu.core_type<tc>, window_params = [{transform_indices = @transform_0, window_bounds = array<i64: 8, 128>}, {transform_indices = @transform_1, window_bounds = array<i64: 128, 128>}, {transform_indices = @transform_2, window_bounds = array<i64: 8, 128>}, {transform_indices = @transform_3, window_bounds = array<i64: 1, 1, 128>}, {transform_indices = @transform_4, window_bounds = array<i64: 1, 1, 128>}]} {
    %c0 = arith.constant 0 : index
    %c0_0 = arith.constant 0 : index
    %0 = vector.load %arg2[%c0, %c0_0] : memref<8x128xbf16, #tpu.memory_space<vmem>>, vector<8x128xbf16>
    %c0_1 = arith.constant 0 : index
    %c0_2 = arith.constant 0 : index
    %1 = vector.load %arg3[%c0_1, %c0_2] : memref<128x128xbf16, #tpu.memory_space<vmem>>, vector<128x128xbf16>
    %cst = arith.constant dense<0.000000e+00> : vector<8x128xf32>
    %2 = tpu.matmul %0, %1, %cst {dimension_numbers = #tpu.dot_dimension_numbers<[1], [0], [0], [1], [0, 0, 1, 1], [], []>} : vector<8x128xbf16>, vector<128x128xbf16>, vector<8x128xf32> -> vector<8x128xf32>
    %c0_3 = arith.constant 0 : index
    %c0_4 = arith.constant 0 : index
    %3 = vector.load %arg4[%c0_3, %c0_4] : memref<8x128xf32, #tpu.memory_space<vmem>>, vector<8x128xf32>
    tpu.vector_store %arg4[%c0_3, %c0_4], %2 {strides = array<i32>} : memref<8x128xf32, #tpu.memory_space<vmem>>, vector<8x128xf32>,
    %cst_5 = arith.constant dense<0.000000e+00> : vector<128xf32>
    %4 = vector.multi_reduction <add>, %2, %cst_5 [0] : vector<8x128xf32> to vector<128xf32>
    %5 = vector.shape_cast %4 : vector<128xf32> to vector<1x128xf32>
    %6 = vector.shape_cast %5 : vector<1x128xf32> to vector<1x1x128xf32>
    %c0_6 = arith.constant 0 : index
    %c0_7 = arith.constant 0 : index
    %c0_8 = arith.constant 0 : index
    %7 = vector.load %arg5[%c0_6, %c0_7, %c0_8] : memref<1x1x128xf32, #tpu.memory_space<vmem>>, vector<1x1x128xf32>
    tpu.vector_store %arg5[%c0_6, %c0_7, %c0_8], %6 {strides = array<i32>} : memref<1x1x128xf32, #tpu.memory_space<vmem>>, vector<1x1x128xf32>,
    %8 = arith.mulf %2, %2 : vector<8x128xf32>
    %cst_9 = arith.constant dense<0.000000e+00> : vector<128xf32>
    %9 = vector.multi_reduction <add>, %8, %cst_9 [0] : vector<8x128xf32> to vector<128xf32>
    %10 = vector.shape_cast %9 : vector<128xf32> to vector<1x128xf32>
    %11 = vector.shape_cast %10 : vector<1x128xf32> to vector<1x1x128xf32>
    %c0_10 = arith.constant 0 : index
    %c0_11 = arith.constant 0 : index
    %c0_12 = arith.constant 0 : index
    %12 = vector.load %arg6[%c0_10, %c0_11, %c0_12] : memref<1x1x128xf32, #tpu.memory_space<vmem>>, vector<1x1x128xf32>
    tpu.vector_store %arg6[%c0_10, %c0_11, %c0_12], %11 {strides = array<i32>} : memref<1x1x128xf32, #tpu.memory_space<vmem>>, vector<1x1x128xf32>,
    return
  }
  func.func @transform_0(%arg0: i32, %arg1: i32) -> (i32, i32) {
    %c0_i32 = arith.constant 0 : i32
    %c0_i32_0 = arith.constant 0 : i32
    return %arg1, %c0_i32 : i32, i32
  }
  func.func @transform_1(%arg0: i32, %arg1: i32) -> (i32, i32) {
    %c0_i32 = arith.constant 0 : i32
    %c0_i32_0 = arith.constant 0 : i32
    return %c0_i32, %arg0 : i32, i32
  }
  func.func @transform_2(%arg0: i32, %arg1: i32) -> (i32, i32) {
    %c0_i32 = arith.constant 0 : i32
    return %arg1, %arg0 : i32, i32
  }
  func.func @transform_3(%arg0: i32, %arg1: i32) -> (i32, i32, i32) {
    %c0_i32 = arith.constant 0 : i32
    %c0_i32_0 = arith.constant 0 : i32
    return %arg1, %c0_i32, %arg0 : i32, i32, i32
  }
  func.func @transform_4(%arg0: i32, %arg1: i32) -> (i32, i32, i32) {
    %c0_i32 = arith.constant 0 : i32
    %c0_i32_0 = arith.constant 0 : i32
    return %arg1, %c0_i32, %arg0 : i32, i32, i32
  }
}

module attributes {stable_mosaic.version = 11 : i64} {
  func.func @_matmul_stats_kernel(%arg0: i32, %arg1: i32, %arg2: memref<32x1152xbf16, #tpu.memory_space<vmem>>, %arg3: memref<1152x128xbf16, #tpu.memory_space<vmem>>, %arg4: memref<32x128xf32, #tpu.memory_space<vmem>>, %arg5: memref<1x1x128xf32, #tpu.memory_space<vmem>>, %arg6: memref<1x1x128xf32, #tpu.memory_space<vmem>>) attributes {dimension_semantics = [#tpu.dimension_semantics<parallel>, #tpu.dimension_semantics<parallel>], iteration_bounds = array<i64: 2, 1>, scalar_prefetch = 0 : i64, scratch_operands = 0 : i64, tpu.core_type = #tpu.core_type<tc>, window_params = [{transform_indices = @transform_0, window_bounds = array<i64: 32, 1152>}, {transform_indices = @transform_1, window_bounds = array<i64: 1152, 128>}, {transform_indices = @transform_2, window_bounds = array<i64: 32, 128>}, {transform_indices = @transform_3, window_bounds = array<i64: 1, 1, 128>}, {transform_indices = @transform_4, window_bounds = array<i64: 1, 1, 128>}]} {
    %c0 = arith.constant 0 : index
    %c0_0 = arith.constant 0 : index
    %0 = vector.load %arg2[%c0, %c0_0] : memref<32x1152xbf16, #tpu.memory_space<vmem>>, vector<32x1152xbf16>
    %c0_1 = arith.constant 0 : index
    %c0_2 = arith.constant 0 : index
    %1 = vector.load %arg3[%c0_1, %c0_2] : memref<1152x128xbf16, #tpu.memory_space<vmem>>, vector<1152x128xbf16>
    %cst = arith.constant dense<0.000000e+00> : vector<32x128xf32>
    %2 = tpu.matmul %0, %1, %cst {dimension_numbers = #tpu.dot_dimension_numbers<[1], [0], [0], [1], [0, 0, 1, 1], [], []>} : vector<32x1152xbf16>, vector<1152x128xbf16>, vector<32x128xf32> -> vector<32x128xf32>
    %c0_3 = arith.constant 0 : index
    %c0_4 = arith.constant 0 : index
    %3 = vector.load %arg4[%c0_3, %c0_4] : memref<32x128xf32, #tpu.memory_space<vmem>>, vector<32x128xf32>
    tpu.vector_store %arg4[%c0_3, %c0_4], %2 {strides = array<i32>} : memref<32x128xf32, #tpu.memory_space<vmem>>, vector<32x128xf32>,
    %cst_5 = arith.constant dense<0.000000e+00> : vector<128xf32>
    %4 = vector.multi_reduction <add>, %2, %cst_5 [0] : vector<32x128xf32> to vector<128xf32>
    %5 = vector.shape_cast %4 : vector<128xf32> to vector<1x128xf32>
    %6 = vector.shape_cast %5 : vector<1x128xf32> to vector<1x1x128xf32>
    %c0_6 = arith.constant 0 : index
    %c0_7 = arith.constant 0 : index
    %c0_8 = arith.constant 0 : index
    %7 = vector.load %arg5[%c0_6, %c0_7, %c0_8] : memref<1x1x128xf32, #tpu.memory_space<vmem>>, vector<1x1x128xf32>
    tpu.vector_store %arg5[%c0_6, %c0_7, %c0_8], %6 {strides = array<i32>} : memref<1x1x128xf32, #tpu.memory_space<vmem>>, vector<1x1x128xf32>,
    %8 = arith.mulf %2, %2 : vector<32x128xf32>
    %cst_9 = arith.constant dense<0.000000e+00> : vector<128xf32>
    %9 = vector.multi_reduction <add>, %8, %cst_9 [0] : vector<32x128xf32> to vector<128xf32>
    %10 = vector.shape_cast %9 : vector<128xf32> to vector<1x128xf32>
    %11 = vector.shape_cast %10 : vector<1x128xf32> to vector<1x1x128xf32>
    %c0_10 = arith.constant 0 : index
    %c0_11 = arith.constant 0 : index
    %c0_12 = arith.constant 0 : index
    %12 = vector.load %arg6[%c0_10, %c0_11, %c0_12] : memref<1x1x128xf32, #tpu.memory_space<vmem>>, vector<1x1x128xf32>
    tpu.vector_store %arg6[%c0_10, %c0_11, %c0_12], %11 {strides = array<i32>} : memref<1x1x128xf32, #tpu.memory_space<vmem>>, vector<1x1x128xf32>,
    return
  }
  func.func @transform_0(%arg0: i32, %arg1: i32) -> (i32, i32) {
    %c0_i32 = arith.constant 0 : i32
    %c0_i32_0 = arith.constant 0 : i32
    return %arg1, %c0_i32 : i32, i32
  }
  func.func @transform_1(%arg0: i32, %arg1: i32) -> (i32, i32) {
    %c0_i32 = arith.constant 0 : i32
    %c0_i32_0 = arith.constant 0 : i32
    return %c0_i32, %arg0 : i32, i32
  }
  func.func @transform_2(%arg0: i32, %arg1: i32) -> (i32, i32) {
    %c0_i32 = arith.constant 0 : i32
    return %arg1, %arg0 : i32, i32
  }
  func.func @transform_3(%arg0: i32, %arg1: i32) -> (i32, i32, i32) {
    %c0_i32 = arith.constant 0 : i32
    %c0_i32_0 = arith.constant 0 : i32
    return %arg1, %c0_i32, %arg0 : i32, i32, i32
  }
  func.func @transform_4(%arg0: i32, %arg1: i32) -> (i32, i32, i32) {
    %c0_i32 = arith.constant 0 : i32
    %c0_i32_0 = arith.constant 0 : i32
    return %arg1, %c0_i32, %arg0 : i32, i32, i32
  }
}

module attributes {stable_mosaic.version = 11 : i64} {
  func.func @_bn_act_kernel(%arg0: i32, %arg1: i32, %arg2: memref<32x128xf32, #tpu.memory_space<vmem>>, %arg3: memref<1x1x128xf32, #tpu.memory_space<vmem>>, %arg4: memref<1x1x128xf32, #tpu.memory_space<vmem>>, %arg5: memref<1x128xf32, #tpu.memory_space<vmem>>, %arg6: memref<1x128xf32, #tpu.memory_space<vmem>>, %arg7: memref<32x128xbf16, #tpu.memory_space<vmem>>) attributes {dimension_semantics = [#tpu.dimension_semantics<parallel>, #tpu.dimension_semantics<parallel>], iteration_bounds = array<i64: 2, 1>, scalar_prefetch = 0 : i64, scratch_operands = 0 : i64, tpu.core_type = #tpu.core_type<tc>, window_params = [{transform_indices = @transform_0, window_bounds = array<i64: 32, 128>}, {transform_indices = @transform_1, window_bounds = array<i64: 1, 1, 128>}, {transform_indices = @transform_2, window_bounds = array<i64: 1, 1, 128>}, {transform_indices = @transform_3, window_bounds = array<i64: 1, 128>}, {transform_indices = @transform_4, window_bounds = array<i64: 1, 128>}, {transform_indices = @transform_5, window_bounds = array<i64: 32, 128>}]} {
    %c0 = arith.constant 0 : index
    %c0_0 = arith.constant 0 : index
    %c0_1 = arith.constant 0 : index
    %0 = vector.load %arg3[%c0, %c0_0, %c0_1] : memref<1x1x128xf32, #tpu.memory_space<vmem>>, vector<1x1x128xf32>
    %cst = arith.constant dense<0.000000e+00> : vector<1x128xf32>
    %1 = vector.multi_reduction <add>, %0, %cst [0] : vector<1x1x128xf32> to vector<1x128xf32>
    %cst_2 = arith.constant 3.125000e-02 : f32
    %2 = vector.broadcast %cst_2 : f32 to vector<1x128xf32>
    %3 = arith.mulf %1, %2 : vector<1x128xf32>
    %c0_3 = arith.constant 0 : index
    %c0_4 = arith.constant 0 : index
    %c0_5 = arith.constant 0 : index
    %4 = vector.load %arg4[%c0_3, %c0_4, %c0_5] : memref<1x1x128xf32, #tpu.memory_space<vmem>>, vector<1x1x128xf32>
    %cst_6 = arith.constant dense<0.000000e+00> : vector<1x128xf32>
    %5 = vector.multi_reduction <add>, %4, %cst_6 [0] : vector<1x1x128xf32> to vector<1x128xf32>
    %cst_7 = arith.constant 3.125000e-02 : f32
    %6 = vector.broadcast %cst_7 : f32 to vector<1x128xf32>
    %7 = arith.mulf %5, %6 : vector<1x128xf32>
    %8 = arith.mulf %3, %3 : vector<1x128xf32>
    %9 = arith.subf %7, %8 : vector<1x128xf32>
    %c0_8 = arith.constant 0 : index
    %c0_9 = arith.constant 0 : index
    %10 = vector.load %arg5[%c0_8, %c0_9] : memref<1x128xf32, #tpu.memory_space<vmem>>, vector<1x128xf32>
    %cst_10 = arith.constant 9.99999974E-6 : f32
    %11 = vector.broadcast %cst_10 : f32 to vector<1x128xf32>
    %12 = arith.addf %9, %11 : vector<1x128xf32>
    %13 = math.rsqrt %12 : vector<1x128xf32>
    %14 = arith.mulf %10, %13 : vector<1x128xf32>
    %c0_11 = arith.constant 0 : index
    %c0_12 = arith.constant 0 : index
    %15 = vector.load %arg6[%c0_11, %c0_12] : memref<1x128xf32, #tpu.memory_space<vmem>>, vector<1x128xf32>
    %16 = arith.mulf %3, %14 : vector<1x128xf32>
    %17 = arith.subf %15, %16 : vector<1x128xf32>
    %c0_13 = arith.constant 0 : index
    %c0_14 = arith.constant 0 : index
    %18 = vector.load %arg2[%c0_13, %c0_14] : memref<32x128xf32, #tpu.memory_space<vmem>>, vector<32x128xf32>
    %19 = vector.broadcast %14 : vector<1x128xf32> to vector<32x128xf32>
    %20 = arith.mulf %18, %19 : vector<32x128xf32>
    %21 = vector.broadcast %17 : vector<1x128xf32> to vector<32x128xf32>
    %22 = arith.addf %20, %21 : vector<32x128xf32>
    %cst_15 = arith.constant 0.000000e+00 : f32
    %23 = vector.broadcast %cst_15 : f32 to vector<32x128xf32>
    %24 = arith.maximumf %22, %23 : vector<32x128xf32>
    %25 = arith.truncf %24 : vector<32x128xf32> to vector<32x128xbf16>
    %c0_16 = arith.constant 0 : index
    %c0_17 = arith.constant 0 : index
    %26 = vector.load %arg7[%c0_16, %c0_17] : memref<32x128xbf16, #tpu.memory_space<vmem>>, vector<32x128xbf16>
    tpu.vector_store %arg7[%c0_16, %c0_17], %25 {strides = array<i32>} : memref<32x128xbf16, #tpu.memory_space<vmem>>, vector<32x128xbf16>,
    return
  }
  func.func @transform_0(%arg0: i32, %arg1: i32) -> (i32, i32) {
    %c0_i32 = arith.constant 0 : i32
    return %arg1, %arg0 : i32, i32
  }
  func.func @transform_1(%arg0: i32, %arg1: i32) -> (i32, i32, i32) {
    %c0_i32 = arith.constant 0 : i32
    %c0_i32_0 = arith.constant 0 : i32
    %c0_i32_1 = arith.constant 0 : i32
    return %c0_i32, %c0_i32_0, %arg0 : i32, i32, i32
  }
  func.func @transform_2(%arg0: i32, %arg1: i32) -> (i32, i32, i32) {
    %c0_i32 = arith.constant 0 : i32
    %c0_i32_0 = arith.constant 0 : i32
    %c0_i32_1 = arith.constant 0 : i32
    return %c0_i32, %c0_i32_0, %arg0 : i32, i32, i32
  }
  func.func @transform_3(%arg0: i32, %arg1: i32) -> (i32, i32) {
    %c0_i32 = arith.constant 0 : i32
    %c0_i32_0 = arith.constant 0 : i32
    return %c0_i32, %arg0 : i32, i32
  }
  func.func @transform_4(%arg0: i32, %arg1: i32) -> (i32, i32) {
    %c0_i32 = arith.constant 0 : i32
    %c0_i32_0 = arith.constant 0 : i32
    return %c0_i32, %arg0 : i32, i32
  }
  func.func @transform_5(%arg0: i32, %arg1: i32) -> (i32, i32) {
    %c0_i32 = arith.constant 0 : i32
    return %arg1, %arg0 : i32, i32
  }
}

module attributes {stable_mosaic.version = 11 : i64} {
  func.func @_maxpool_kernel(%arg0: i32, %arg1: memref<4x2x2x512xbf16, #tpu.memory_space<vmem>>, %arg2: memref<4x2x256xbf16, #tpu.memory_space<vmem>>) attributes {dimension_semantics = [#tpu.dimension_semantics<parallel>], iteration_bounds = array<i64: 1>, scalar_prefetch = 0 : i64, scratch_operands = 0 : i64, tpu.core_type = #tpu.core_type<tc>, window_params = [{transform_indices = @transform_0, window_bounds = array<i64: 4, 2, 2, 512>}, {transform_indices = @transform_1, window_bounds = array<i64: 4, 2, 256>}]} {
    %c0 = arith.constant 0 : index
    %c0_0 = arith.constant 0 : index
    %c0_1 = arith.constant 0 : index
    %c0_2 = arith.constant 0 : index
    %0 = vector.load %arg1[%c0, %c0_0, %c0_1, %c0_2] : memref<4x2x2x512xbf16, #tpu.memory_space<vmem>>, vector<4x1x2x512xbf16>
    %1 = vector.shape_cast %0 : vector<4x1x2x512xbf16> to vector<4x2x512xbf16>
    %c0_3 = arith.constant 0 : index
    %c1 = arith.constant 1 : index
    %c0_4 = arith.constant 0 : index
    %c0_5 = arith.constant 0 : index
    %2 = vector.load %arg1[%c0_3, %c1, %c0_4, %c0_5] : memref<4x2x2x512xbf16, #tpu.memory_space<vmem>>, vector<4x1x2x512xbf16>
    %3 = vector.shape_cast %2 : vector<4x1x2x512xbf16> to vector<4x2x512xbf16>
    %4 = arith.maximumf %1, %3 : vector<4x2x512xbf16>
    %5 = vector.extract_strided_slice %4 {offsets = [0, 0, 0], sizes = [4, 2, 256], strides = [1, 1, 1]} : vector<4x2x512xbf16> to vector<4x2x256xbf16>
    %6 = vector.extract_strided_slice %4 {offsets = [0, 0, 256], sizes = [4, 2, 256], strides = [1, 1, 1]} : vector<4x2x512xbf16> to vector<4x2x256xbf16>
    %7 = arith.maximumf %5, %6 : vector<4x2x256xbf16>
    %c0_6 = arith.constant 0 : index
    %c0_7 = arith.constant 0 : index
    %c0_8 = arith.constant 0 : index
    %8 = vector.load %arg2[%c0_6, %c0_7, %c0_8] : memref<4x2x256xbf16, #tpu.memory_space<vmem>>, vector<4x2x256xbf16>
    tpu.vector_store %arg2[%c0_6, %c0_7, %c0_8], %7 {strides = array<i32>} : memref<4x2x256xbf16, #tpu.memory_space<vmem>>, vector<4x2x256xbf16>,
    return
  }
  func.func @transform_0(%arg0: i32) -> (i32, i32, i32, i32) {
    %c0_i32 = arith.constant 0 : i32
    %c0_i32_0 = arith.constant 0 : i32
    %c0_i32_1 = arith.constant 0 : i32
    %c0_i32_2 = arith.constant 0 : i32
    return %arg0, %c0_i32, %c0_i32_0, %c0_i32_1 : i32, i32, i32, i32
  }
  func.func @transform_1(%arg0: i32) -> (i32, i32, i32) {
    %c0_i32 = arith.constant 0 : i32
    %c0_i32_0 = arith.constant 0 : i32
    %c0_i32_1 = arith.constant 0 : i32
    return %arg0, %c0_i32, %c0_i32_0 : i32, i32, i32
  }
}

module attributes {stable_mosaic.version = 11 : i64} {
  func.func @_matmul_stats_kernel(%arg0: i32, %arg1: i32, %arg2: memref<32x2304xbf16, #tpu.memory_space<vmem>>, %arg3: memref<2304x128xbf16, #tpu.memory_space<vmem>>, %arg4: memref<32x128xf32, #tpu.memory_space<vmem>>, %arg5: memref<1x1x128xf32, #tpu.memory_space<vmem>>, %arg6: memref<1x1x128xf32, #tpu.memory_space<vmem>>) attributes {dimension_semantics = [#tpu.dimension_semantics<parallel>, #tpu.dimension_semantics<parallel>], iteration_bounds = array<i64: 2, 1>, scalar_prefetch = 0 : i64, scratch_operands = 0 : i64, tpu.core_type = #tpu.core_type<tc>, window_params = [{transform_indices = @transform_0, window_bounds = array<i64: 32, 2304>}, {transform_indices = @transform_1, window_bounds = array<i64: 2304, 128>}, {transform_indices = @transform_2, window_bounds = array<i64: 32, 128>}, {transform_indices = @transform_3, window_bounds = array<i64: 1, 1, 128>}, {transform_indices = @transform_4, window_bounds = array<i64: 1, 1, 128>}]} {
    %c0 = arith.constant 0 : index
    %c0_0 = arith.constant 0 : index
    %0 = vector.load %arg2[%c0, %c0_0] : memref<32x2304xbf16, #tpu.memory_space<vmem>>, vector<32x2304xbf16>
    %c0_1 = arith.constant 0 : index
    %c0_2 = arith.constant 0 : index
    %1 = vector.load %arg3[%c0_1, %c0_2] : memref<2304x128xbf16, #tpu.memory_space<vmem>>, vector<2304x128xbf16>
    %cst = arith.constant dense<0.000000e+00> : vector<32x128xf32>
    %2 = tpu.matmul %0, %1, %cst {dimension_numbers = #tpu.dot_dimension_numbers<[1], [0], [0], [1], [0, 0, 1, 1], [], []>} : vector<32x2304xbf16>, vector<2304x128xbf16>, vector<32x128xf32> -> vector<32x128xf32>
    %c0_3 = arith.constant 0 : index
    %c0_4 = arith.constant 0 : index
    %3 = vector.load %arg4[%c0_3, %c0_4] : memref<32x128xf32, #tpu.memory_space<vmem>>, vector<32x128xf32>
    tpu.vector_store %arg4[%c0_3, %c0_4], %2 {strides = array<i32>} : memref<32x128xf32, #tpu.memory_space<vmem>>, vector<32x128xf32>,
    %cst_5 = arith.constant dense<0.000000e+00> : vector<128xf32>
    %4 = vector.multi_reduction <add>, %2, %cst_5 [0] : vector<32x128xf32> to vector<128xf32>
    %5 = vector.shape_cast %4 : vector<128xf32> to vector<1x128xf32>
    %6 = vector.shape_cast %5 : vector<1x128xf32> to vector<1x1x128xf32>
    %c0_6 = arith.constant 0 : index
    %c0_7 = arith.constant 0 : index
    %c0_8 = arith.constant 0 : index
    %7 = vector.load %arg5[%c0_6, %c0_7, %c0_8] : memref<1x1x128xf32, #tpu.memory_space<vmem>>, vector<1x1x128xf32>
    tpu.vector_store %arg5[%c0_6, %c0_7, %c0_8], %6 {strides = array<i32>} : memref<1x1x128xf32, #tpu.memory_space<vmem>>, vector<1x1x128xf32>,
    %8 = arith.mulf %2, %2 : vector<32x128xf32>
    %cst_9 = arith.constant dense<0.000000e+00> : vector<128xf32>
    %9 = vector.multi_reduction <add>, %8, %cst_9 [0] : vector<32x128xf32> to vector<128xf32>
    %10 = vector.shape_cast %9 : vector<128xf32> to vector<1x128xf32>
    %11 = vector.shape_cast %10 : vector<1x128xf32> to vector<1x1x128xf32>
    %c0_10 = arith.constant 0 : index
    %c0_11 = arith.constant 0 : index
    %c0_12 = arith.constant 0 : index
    %12 = vector.load %arg6[%c0_10, %c0_11, %c0_12] : memref<1x1x128xf32, #tpu.memory_space<vmem>>, vector<1x1x128xf32>
    tpu.vector_store %arg6[%c0_10, %c0_11, %c0_12], %11 {strides = array<i32>} : memref<1x1x128xf32, #tpu.memory_space<vmem>>, vector<1x1x128xf32>,
    return
  }
  func.func @transform_0(%arg0: i32, %arg1: i32) -> (i32, i32) {
    %c0_i32 = arith.constant 0 : i32
    %c0_i32_0 = arith.constant 0 : i32
    return %arg1, %c0_i32 : i32, i32
  }
  func.func @transform_1(%arg0: i32, %arg1: i32) -> (i32, i32) {
    %c0_i32 = arith.constant 0 : i32
    %c0_i32_0 = arith.constant 0 : i32
    return %c0_i32, %arg0 : i32, i32
  }
  func.func @transform_2(%arg0: i32, %arg1: i32) -> (i32, i32) {
    %c0_i32 = arith.constant 0 : i32
    return %arg1, %arg0 : i32, i32
  }
  func.func @transform_3(%arg0: i32, %arg1: i32) -> (i32, i32, i32) {
    %c0_i32 = arith.constant 0 : i32
    %c0_i32_0 = arith.constant 0 : i32
    return %arg1, %c0_i32, %arg0 : i32, i32, i32
  }
  func.func @transform_4(%arg0: i32, %arg1: i32) -> (i32, i32, i32) {
    %c0_i32 = arith.constant 0 : i32
    %c0_i32_0 = arith.constant 0 : i32
    return %arg1, %c0_i32, %arg0 : i32, i32, i32
  }
}

module attributes {stable_mosaic.version = 11 : i64} {
  func.func @_head_kernel(%arg0: memref<2x4x256xbf16, #tpu.memory_space<vmem>>, %arg1: memref<1x256xf32, #tpu.memory_space<vmem>>, %arg2: memref<1x1xf32, #tpu.memory_space<vmem>>, %arg3: memref<2x1xf32, #tpu.memory_space<vmem>>) attributes {dimension_semantics = [], scalar_prefetch = 0 : i64, scratch_operands = 0 : i64, tpu.core_type = #tpu.core_type<tc>} {
    %c0 = arith.constant 0 : index
    %c0_0 = arith.constant 0 : index
    %c0_1 = arith.constant 0 : index
    %0 = vector.load %arg0[%c0, %c0_0, %c0_1] : memref<2x4x256xbf16, #tpu.memory_space<vmem>>, vector<2x4x256xbf16>
    %1 = arith.extf %0 : vector<2x4x256xbf16> to vector<2x4x256xf32>
    %cst = arith.constant dense<0.000000e+00> : vector<2x256xf32>
    %2 = vector.multi_reduction <add>, %1, %cst [1] : vector<2x4x256xf32> to vector<2x256xf32>
    %cst_2 = arith.constant 4.000000e+00 : f32
    %3 = vector.broadcast %cst_2 : f32 to vector<2x256xf32>
    %4 = arith.divf %2, %3 : vector<2x256xf32>
    %c0_3 = arith.constant 0 : index
    %c0_4 = arith.constant 0 : index
    %5 = vector.load %arg1[%c0_3, %c0_4] : memref<1x256xf32, #tpu.memory_space<vmem>>, vector<1x256xf32>
    %6 = vector.broadcast %5 : vector<1x256xf32> to vector<2x256xf32>
    %7 = arith.mulf %4, %6 : vector<2x256xf32>
    %cst_5 = arith.constant dense<0.000000e+00> : vector<2xf32>
    %8 = vector.multi_reduction <add>, %7, %cst_5 [1] : vector<2x256xf32> to vector<2xf32>
    %9 = vector.shape_cast %8 : vector<2xf32> to vector<2x1xf32>
    %c0_6 = arith.constant 0 : index
    %c0_7 = arith.constant 0 : index
    %10 = vector.load %arg2[%c0_6, %c0_7] : memref<1x1xf32, #tpu.memory_space<vmem>>, vector<1x1xf32>
    %11 = vector.broadcast %10 : vector<1x1xf32> to vector<2x1xf32>
    %12 = arith.addf %9, %11 : vector<2x1xf32>
    %c0_8 = arith.constant 0 : index
    %c0_9 = arith.constant 0 : index
    %13 = vector.load %arg3[%c0_8, %c0_9] : memref<2x1xf32, #tpu.memory_space<vmem>>, vector<2x1xf32>
    tpu.vector_store %arg3[%c0_8, %c0_9], %12 {strides = array<i32>} : memref<2x1xf32, #tpu.memory_space<vmem>>, vector<2x1xf32>,
    return
  }
}

module attributes {stable_mosaic.version = 11 : i64} {
  func.func @_matmul_stats_kernel(%arg0: i32, %arg1: i32, %arg2: memref<8x256xbf16, #tpu.memory_space<vmem>>, %arg3: memref<256x128xbf16, #tpu.memory_space<vmem>>, %arg4: memref<8x128xf32, #tpu.memory_space<vmem>>, %arg5: memref<1x1x128xf32, #tpu.memory_space<vmem>>, %arg6: memref<1x1x128xf32, #tpu.memory_space<vmem>>) attributes {dimension_semantics = [#tpu.dimension_semantics<parallel>, #tpu.dimension_semantics<parallel>], iteration_bounds = array<i64: 1, 1>, scalar_prefetch = 0 : i64, scratch_operands = 0 : i64, tpu.core_type = #tpu.core_type<tc>, window_params = [{transform_indices = @transform_0, window_bounds = array<i64: 8, 256>}, {transform_indices = @transform_1, window_bounds = array<i64: 256, 128>}, {transform_indices = @transform_2, window_bounds = array<i64: 8, 128>}, {transform_indices = @transform_3, window_bounds = array<i64: 1, 1, 128>}, {transform_indices = @transform_4, window_bounds = array<i64: 1, 1, 128>}]} {
    %c0 = arith.constant 0 : index
    %c0_0 = arith.constant 0 : index
    %0 = vector.load %arg2[%c0, %c0_0] : memref<8x256xbf16, #tpu.memory_space<vmem>>, vector<8x256xbf16>
    %c0_1 = arith.constant 0 : index
    %c0_2 = arith.constant 0 : index
    %1 = vector.load %arg3[%c0_1, %c0_2] : memref<256x128xbf16, #tpu.memory_space<vmem>>, vector<256x128xbf16>
    %cst = arith.constant dense<0.000000e+00> : vector<8x128xf32>
    %2 = tpu.matmul %0, %1, %cst {dimension_numbers = #tpu.dot_dimension_numbers<[1], [0], [0], [1], [0, 0, 1, 1], [], []>} : vector<8x256xbf16>, vector<256x128xbf16>, vector<8x128xf32> -> vector<8x128xf32>
    %c0_3 = arith.constant 0 : index
    %c0_4 = arith.constant 0 : index
    %3 = vector.load %arg4[%c0_3, %c0_4] : memref<8x128xf32, #tpu.memory_space<vmem>>, vector<8x128xf32>
    tpu.vector_store %arg4[%c0_3, %c0_4], %2 {strides = array<i32>} : memref<8x128xf32, #tpu.memory_space<vmem>>, vector<8x128xf32>,
    %cst_5 = arith.constant dense<0.000000e+00> : vector<128xf32>
    %4 = vector.multi_reduction <add>, %2, %cst_5 [0] : vector<8x128xf32> to vector<128xf32>
    %5 = vector.shape_cast %4 : vector<128xf32> to vector<1x128xf32>
    %6 = vector.shape_cast %5 : vector<1x128xf32> to vector<1x1x128xf32>
    %c0_6 = arith.constant 0 : index
    %c0_7 = arith.constant 0 : index
    %c0_8 = arith.constant 0 : index
    %7 = vector.load %arg5[%c0_6, %c0_7, %c0_8] : memref<1x1x128xf32, #tpu.memory_space<vmem>>, vector<1x1x128xf32>
    tpu.vector_store %arg5[%c0_6, %c0_7, %c0_8], %6 {strides = array<i32>} : memref<1x1x128xf32, #tpu.memory_space<vmem>>, vector<1x1x128xf32>,
    %8 = arith.mulf %2, %2 : vector<8x128xf32>
    %cst_9 = arith.constant dense<0.000000e+00> : vector<128xf32>
    %9 = vector.multi_reduction <add>, %8, %cst_9 [0] : vector<8x128xf32> to vector<128xf32>
    %10 = vector.shape_cast %9 : vector<128xf32> to vector<1x128xf32>
    %11 = vector.shape_cast %10 : vector<1x128xf32> to vector<1x1x128xf32>
    %c0_10 = arith.constant 0 : index
    %c0_11 = arith.constant 0 : index
    %c0_12 = arith.constant 0 : index
    %12 = vector.load %arg6[%c0_10, %c0_11, %c0_12] : memref<1x1x128xf32, #tpu.memory_space<vmem>>, vector<1x1x128xf32>
    tpu.vector_store %arg6[%c0_10, %c0_11, %c0_12], %11 {strides = array<i32>} : memref<1x1x128xf32, #tpu.memory_space<vmem>>, vector<1x1x128xf32>,
    return
  }
  func.func @transform_0(%arg0: i32, %arg1: i32) -> (i32, i32) {
    %c0_i32 = arith.constant 0 : i32
    %c0_i32_0 = arith.constant 0 : i32
    return %arg1, %c0_i32 : i32, i32
  }
  func.func @transform_1(%arg0: i32, %arg1: i32) -> (i32, i32) {
    %c0_i32 = arith.constant 0 : i32
    %c0_i32_0 = arith.constant 0 : i32
    return %c0_i32, %arg0 : i32, i32
  }
  func.func @transform_2(%arg0: i32, %arg1: i32) -> (i32, i32) {
    %c0_i32 = arith.constant 0 : i32
    return %arg1, %arg0 : i32, i32
  }
  func.func @transform_3(%arg0: i32, %arg1: i32) -> (i32, i32, i32) {
    %c0_i32 = arith.constant 0 : i32
    %c0_i32_0 = arith.constant 0 : i32
    return %arg1, %c0_i32, %arg0 : i32, i32, i32
  }
  func.func @transform_4(%arg0: i32, %arg1: i32) -> (i32, i32, i32) {
    %c0_i32 = arith.constant 0 : i32
    %c0_i32_0 = arith.constant 0 : i32
    return %arg1, %c0_i32, %arg0 : i32, i32, i32
  }
}

module attributes {stable_mosaic.version = 11 : i64} {
  func.func @_att_mid_kernel(%arg0: i32, %arg1: memref<8x128xf32, #tpu.memory_space<vmem>>, %arg2: memref<1x1x128xf32, #tpu.memory_space<vmem>>, %arg3: memref<1x1x128xf32, #tpu.memory_space<vmem>>, %arg4: memref<1x128xf32, #tpu.memory_space<vmem>>, %arg5: memref<1x128xf32, #tpu.memory_space<vmem>>, %arg6: memref<8x128xf32, #tpu.memory_space<vmem>>, %arg7: memref<1x1x128xf32, #tpu.memory_space<vmem>>, %arg8: memref<1x1x128xf32, #tpu.memory_space<vmem>>, %arg9: memref<1x128xf32, #tpu.memory_space<vmem>>, %arg10: memref<1x128xf32, #tpu.memory_space<vmem>>, %arg11: memref<1x128xf32, #tpu.memory_space<vmem>>, %arg12: memref<8x1xf32, #tpu.memory_space<vmem>>, %arg13: memref<1x1x1xf32, #tpu.memory_space<vmem>>, %arg14: memref<1x1x1xf32, #tpu.memory_space<vmem>>) attributes {dimension_semantics = [#tpu.dimension_semantics<parallel>], iteration_bounds = array<i64: 1>, scalar_prefetch = 0 : i64, scratch_operands = 0 : i64, tpu.core_type = #tpu.core_type<tc>, window_params = [{transform_indices = @transform_0, window_bounds = array<i64: 8, 128>}, {pipeline_mode = #tpu.pipeline_mode<synchronous>, transform_indices = @transform_1, window_bounds = array<i64: 1, 1, 128>}, {pipeline_mode = #tpu.pipeline_mode<synchronous>, transform_indices = @transform_2, window_bounds = array<i64: 1, 1, 128>}, {pipeline_mode = #tpu.pipeline_mode<synchronous>, transform_indices = @transform_3, window_bounds = array<i64: 1, 128>}, {pipeline_mode = #tpu.pipeline_mode<synchronous>, transform_indices = @transform_4, window_bounds = array<i64: 1, 128>}, {transform_indices = @transform_5, window_bounds = array<i64: 8, 128>}, {pipeline_mode = #tpu.pipeline_mode<synchronous>, transform_indices = @transform_6, window_bounds = array<i64: 1, 1, 128>}, {pipeline_mode = #tpu.pipeline_mode<synchronous>, transform_indices = @transform_7, window_bounds = array<i64: 1, 1, 128>}, {pipeline_mode = #tpu.pipeline_mode<synchronous>, transform_indices = @transform_8, window_bounds = array<i64: 1, 128>}, {pipeline_mode = #tpu.pipeline_mode<synchronous>, transform_indices = @transform_9, window_bounds = array<i64: 1, 128>}, {pipeline_mode = #tpu.pipeline_mode<synchronous>, transform_indices = @transform_10, window_bounds = array<i64: 1, 128>}, {transform_indices = @transform_11, window_bounds = array<i64: 8, 1>}, {transform_indices = @transform_12, window_bounds = array<i64: 1, 1, 1>}, {transform_indices = @transform_13, window_bounds = array<i64: 1, 1, 1>}]} {
    %c0 = arith.constant 0 : index
    %c0_0 = arith.constant 0 : index
    %c0_1 = arith.constant 0 : index
    %0 = vector.load %arg2[%c0, %c0_0, %c0_1] : memref<1x1x128xf32, #tpu.memory_space<vmem>>, vector<1x1x128xf32>
    %cst = arith.constant dense<0.000000e+00> : vector<1x128xf32>
    %1 = vector.multi_reduction <add>, %0, %cst [0] : vector<1x1x128xf32> to vector<1x128xf32>
    %cst_2 = arith.constant 1.250000e-01 : f32
    %2 = vector.broadcast %cst_2 : f32 to vector<1x128xf32>
    %3 = arith.mulf %1, %2 : vector<1x128xf32>
    %c0_3 = arith.constant 0 : index
    %c0_4 = arith.constant 0 : index
    %c0_5 = arith.constant 0 : index
    %4 = vector.load %arg3[%c0_3, %c0_4, %c0_5] : memref<1x1x128xf32, #tpu.memory_space<vmem>>, vector<1x1x128xf32>
    %cst_6 = arith.constant dense<0.000000e+00> : vector<1x128xf32>
    %5 = vector.multi_reduction <add>, %4, %cst_6 [0] : vector<1x1x128xf32> to vector<1x128xf32>
    %cst_7 = arith.constant 1.250000e-01 : f32
    %6 = vector.broadcast %cst_7 : f32 to vector<1x128xf32>
    %7 = arith.mulf %5, %6 : vector<1x128xf32>
    %8 = arith.mulf %3, %3 : vector<1x128xf32>
    %9 = arith.subf %7, %8 : vector<1x128xf32>
    %c0_8 = arith.constant 0 : index
    %c0_9 = arith.constant 0 : index
    %10 = vector.load %arg4[%c0_8, %c0_9] : memref<1x128xf32, #tpu.memory_space<vmem>>, vector<1x128xf32>
    %cst_10 = arith.constant 9.99999974E-6 : f32
    %11 = vector.broadcast %cst_10 : f32 to vector<1x128xf32>
    %12 = arith.addf %9, %11 : vector<1x128xf32>
    %13 = math.rsqrt %12 : vector<1x128xf32>
    %14 = arith.mulf %10, %13 : vector<1x128xf32>
    %c0_11 = arith.constant 0 : index
    %c0_12 = arith.constant 0 : index
    %15 = vector.load %arg5[%c0_11, %c0_12] : memref<1x128xf32, #tpu.memory_space<vmem>>, vector<1x128xf32>
    %16 = arith.mulf %3, %14 : vector<1x128xf32>
    %17 = arith.subf %15, %16 : vector<1x128xf32>
    %c0_13 = arith.constant 0 : index
    %c0_14 = arith.constant 0 : index
    %c0_15 = arith.constant 0 : index
    %18 = vector.load %arg7[%c0_13, %c0_14, %c0_15] : memref<1x1x128xf32, #tpu.memory_space<vmem>>, vector<1x1x128xf32>
    %cst_16 = arith.constant dense<0.000000e+00> : vector<1x128xf32>
    %19 = vector.multi_reduction <add>, %18, %cst_16 [0] : vector<1x1x128xf32> to vector<1x128xf32>
    %cst_17 = arith.constant 1.250000e-01 : f32
    %20 = vector.broadcast %cst_17 : f32 to vector<1x128xf32>
    %21 = arith.mulf %19, %20 : vector<1x128xf32>
    %c0_18 = arith.constant 0 : index
    %c0_19 = arith.constant 0 : index
    %c0_20 = arith.constant 0 : index
    %22 = vector.load %arg8[%c0_18, %c0_19, %c0_20] : memref<1x1x128xf32, #tpu.memory_space<vmem>>, vector<1x1x128xf32>
    %cst_21 = arith.constant dense<0.000000e+00> : vector<1x128xf32>
    %23 = vector.multi_reduction <add>, %22, %cst_21 [0] : vector<1x1x128xf32> to vector<1x128xf32>
    %cst_22 = arith.constant 1.250000e-01 : f32
    %24 = vector.broadcast %cst_22 : f32 to vector<1x128xf32>
    %25 = arith.mulf %23, %24 : vector<1x128xf32>
    %26 = arith.mulf %21, %21 : vector<1x128xf32>
    %27 = arith.subf %25, %26 : vector<1x128xf32>
    %c0_23 = arith.constant 0 : index
    %c0_24 = arith.constant 0 : index
    %28 = vector.load %arg9[%c0_23, %c0_24] : memref<1x128xf32, #tpu.memory_space<vmem>>, vector<1x128xf32>
    %cst_25 = arith.constant 9.99999974E-6 : f32
    %29 = vector.broadcast %cst_25 : f32 to vector<1x128xf32>
    %30 = arith.addf %27, %29 : vector<1x128xf32>
    %31 = math.rsqrt %30 : vector<1x128xf32>
    %32 = arith.mulf %28, %31 : vector<1x128xf32>
    %c0_26 = arith.constant 0 : index
    %c0_27 = arith.constant 0 : index
    %33 = vector.load %arg10[%c0_26, %c0_27] : memref<1x128xf32, #tpu.memory_space<vmem>>, vector<1x128xf32>
    %34 = arith.mulf %21, %32 : vector<1x128xf32>
    %35 = arith.subf %33, %34 : vector<1x128xf32>
    %c0_28 = arith.constant 0 : index
    %c0_29 = arith.constant 0 : index
    %36 = vector.load %arg1[%c0_28, %c0_29] : memref<8x128xf32, #tpu.memory_space<vmem>>, vector<8x128xf32>
    %37 = vector.broadcast %14 : vector<1x128xf32> to vector<8x128xf32>
    %38 = arith.mulf %36, %37 : vector<8x128xf32>
    %39 = vector.broadcast %17 : vector<1x128xf32> to vector<8x128xf32>
    %40 = arith.addf %38, %39 : vector<8x128xf32>
    %c0_30 = arith.constant 0 : index
    %c0_31 = arith.constant 0 : index
    %41 = vector.load %arg6[%c0_30, %c0_31] : memref<8x128xf32, #tpu.memory_space<vmem>>, vector<8x128xf32>
    %42 = vector.broadcast %32 : vector<1x128xf32> to vector<8x128xf32>
    %43 = arith.mulf %41, %42 : vector<8x128xf32>
    %44 = arith.addf %40, %43 : vector<8x128xf32>
    %45 = vector.broadcast %35 : vector<1x128xf32> to vector<8x128xf32>
    %46 = arith.addf %44, %45 : vector<8x128xf32>
    %cst_32 = arith.constant 0.000000e+00 : f32
    %47 = vector.broadcast %cst_32 : f32 to vector<8x128xf32>
    %48 = arith.maximumf %46, %47 : vector<8x128xf32>
    %c0_33 = arith.constant 0 : index
    %c0_34 = arith.constant 0 : index
    %49 = vector.load %arg11[%c0_33, %c0_34] : memref<1x128xf32, #tpu.memory_space<vmem>>, vector<1x128xf32>
    %50 = vector.broadcast %49 : vector<1x128xf32> to vector<8x128xf32>
    %51 = arith.mulf %48, %50 : vector<8x128xf32>
    %cst_35 = arith.constant dense<0.000000e+00> : vector<8xf32>
    %52 = vector.multi_reduction <add>, %51, %cst_35 [1] : vector<8x128xf32> to vector<8xf32>
    %53 = vector.shape_cast %52 : vector<8xf32> to vector<8x1xf32>
    %c0_36 = arith.constant 0 : index
    %c0_37 = arith.constant 0 : index
    %54 = vector.load %arg12[%c0_36, %c0_37] : memref<8x1xf32, #tpu.memory_space<vmem>>, vector<8x1xf32>
    tpu.vector_store %arg12[%c0_36, %c0_37], %53 {strides = array<i32>} : memref<8x1xf32, #tpu.memory_space<vmem>>, vector<8x1xf32>,
    %cst_38 = arith.constant dense<0.000000e+00> : vector<1xf32>
    %55 = vector.multi_reduction <add>, %53, %cst_38 [0] : vector<8x1xf32> to vector<1xf32>
    %56 = vector.shape_cast %55 : vector<1xf32> to vector<1x1xf32>
    %57 = vector.shape_cast %56 : vector<1x1xf32> to vector<1x1x1xf32>
    %c0_39 = arith.constant 0 : index
    %c0_40 = arith.constant 0 : index
    %c0_41 = arith.constant 0 : index
    %58 = vector.load %arg13[%c0_39, %c0_40, %c0_41] : memref<1x1x1xf32, #tpu.memory_space<vmem>>, vector<1x1x1xf32>
    tpu.vector_store %arg13[%c0_39, %c0_40, %c0_41], %57 {strides = array<i32>} : memref<1x1x1xf32, #tpu.memory_space<vmem>>, vector<1x1x1xf32>,
    %59 = arith.mulf %53, %53 : vector<8x1xf32>
    %cst_42 = arith.constant dense<0.000000e+00> : vector<1xf32>
    %60 = vector.multi_reduction <add>, %59, %cst_42 [0] : vector<8x1xf32> to vector<1xf32>
    %61 = vector.shape_cast %60 : vector<1xf32> to vector<1x1xf32>
    %62 = vector.shape_cast %61 : vector<1x1xf32> to vector<1x1x1xf32>
    %c0_43 = arith.constant 0 : index
    %c0_44 = arith.constant 0 : index
    %c0_45 = arith.constant 0 : index
    %63 = vector.load %arg14[%c0_43, %c0_44, %c0_45] : memref<1x1x1xf32, #tpu.memory_space<vmem>>, vector<1x1x1xf32>
    tpu.vector_store %arg14[%c0_43, %c0_44, %c0_45], %62 {strides = array<i32>} : memref<1x1x1xf32, #tpu.memory_space<vmem>>, vector<1x1x1xf32>,
    return
  }
  func.func @transform_0(%arg0: i32) -> (i32, i32) {
    %c0_i32 = arith.constant 0 : i32
    %c0_i32_0 = arith.constant 0 : i32
    return %arg0, %c0_i32 : i32, i32
  }
  func.func @transform_1(%arg0: i32) -> (i32, i32, i32) {
    %c0_i32 = arith.constant 0 : i32
    %c0_i32_0 = arith.constant 0 : i32
    %c0_i32_1 = arith.constant 0 : i32
    %c0_i32_2 = arith.constant 0 : i32
    return %c0_i32, %c0_i32_0, %c0_i32_1 : i32, i32, i32
  }
  func.func @transform_2(%arg0: i32) -> (i32, i32, i32) {
    %c0_i32 = arith.constant 0 : i32
    %c0_i32_0 = arith.constant 0 : i32
    %c0_i32_1 = arith.constant 0 : i32
    %c0_i32_2 = arith.constant 0 : i32
    return %c0_i32, %c0_i32_0, %c0_i32_1 : i32, i32, i32
  }
  func.func @transform_3(%arg0: i32) -> (i32, i32) {
    %c0_i32 = arith.constant 0 : i32
    %c0_i32_0 = arith.constant 0 : i32
    %c0_i32_1 = arith.constant 0 : i32
    return %c0_i32, %c0_i32_0 : i32, i32
  }
  func.func @transform_4(%arg0: i32) -> (i32, i32) {
    %c0_i32 = arith.constant 0 : i32
    %c0_i32_0 = arith.constant 0 : i32
    %c0_i32_1 = arith.constant 0 : i32
    return %c0_i32, %c0_i32_0 : i32, i32
  }
  func.func @transform_5(%arg0: i32) -> (i32, i32) {
    %c0_i32 = arith.constant 0 : i32
    %c0_i32_0 = arith.constant 0 : i32
    return %arg0, %c0_i32 : i32, i32
  }
  func.func @transform_6(%arg0: i32) -> (i32, i32, i32) {
    %c0_i32 = arith.constant 0 : i32
    %c0_i32_0 = arith.constant 0 : i32
    %c0_i32_1 = arith.constant 0 : i32
    %c0_i32_2 = arith.constant 0 : i32
    return %c0_i32, %c0_i32_0, %c0_i32_1 : i32, i32, i32
  }
  func.func @transform_7(%arg0: i32) -> (i32, i32, i32) {
    %c0_i32 = arith.constant 0 : i32
    %c0_i32_0 = arith.constant 0 : i32
    %c0_i32_1 = arith.constant 0 : i32
    %c0_i32_2 = arith.constant 0 : i32
    return %c0_i32, %c0_i32_0, %c0_i32_1 : i32, i32, i32
  }
  func.func @transform_8(%arg0: i32) -> (i32, i32) {
    %c0_i32 = arith.constant 0 : i32
    %c0_i32_0 = arith.constant 0 : i32
    %c0_i32_1 = arith.constant 0 : i32
    return %c0_i32, %c0_i32_0 : i32, i32
  }
  func.func @transform_9(%arg0: i32) -> (i32, i32) {
    %c0_i32 = arith.constant 0 : i32
    %c0_i32_0 = arith.constant 0 : i32
    %c0_i32_1 = arith.constant 0 : i32
    return %c0_i32, %c0_i32_0 : i32, i32
  }
  func.func @transform_10(%arg0: i32) -> (i32, i32) {
    %c0_i32 = arith.constant 0 : i32
    %c0_i32_0 = arith.constant 0 : i32
    %c0_i32_1 = arith.constant 0 : i32
    return %c0_i32, %c0_i32_0 : i32, i32
  }
  func.func @transform_11(%arg0: i32) -> (i32, i32) {
    %c0_i32 = arith.constant 0 : i32
    %c0_i32_0 = arith.constant 0 : i32
    return %arg0, %c0_i32 : i32, i32
  }
  func.func @transform_12(%arg0: i32) -> (i32, i32, i32) {
    %c0_i32 = arith.constant 0 : i32
    %c0_i32_0 = arith.constant 0 : i32
    %c0_i32_1 = arith.constant 0 : i32
    return %arg0, %c0_i32, %c0_i32_0 : i32, i32, i32
  }
  func.func @transform_13(%arg0: i32) -> (i32, i32, i32) {
    %c0_i32 = arith.constant 0 : i32
    %c0_i32_0 = arith.constant 0 : i32
    %c0_i32_1 = arith.constant 0 : i32
    return %arg0, %c0_i32, %c0_i32_0 : i32, i32, i32
  }
}

module attributes {stable_mosaic.version = 11 : i64} {
  func.func @_att_out_kernel(%arg0: i32, %arg1: memref<8x1xf32, #tpu.memory_space<vmem>>, %arg2: memref<1x1x1xf32, #tpu.memory_space<vmem>>, %arg3: memref<1x1x1xf32, #tpu.memory_space<vmem>>, %arg4: memref<1x1xf32, #tpu.memory_space<vmem>>, %arg5: memref<1x1xf32, #tpu.memory_space<vmem>>, %arg6: memref<8x128xbf16, #tpu.memory_space<vmem>>, %arg7: memref<8x128xf32, #tpu.memory_space<vmem>>) attributes {dimension_semantics = [#tpu.dimension_semantics<parallel>], iteration_bounds = array<i64: 1>, scalar_prefetch = 0 : i64, scratch_operands = 0 : i64, tpu.core_type = #tpu.core_type<tc>, window_params = [{transform_indices = @transform_0, window_bounds = array<i64: 8, 1>}, {pipeline_mode = #tpu.pipeline_mode<synchronous>, transform_indices = @transform_1, window_bounds = array<i64: 1, 1, 1>}, {pipeline_mode = #tpu.pipeline_mode<synchronous>, transform_indices = @transform_2, window_bounds = array<i64: 1, 1, 1>}, {pipeline_mode = #tpu.pipeline_mode<synchronous>, transform_indices = @transform_3, window_bounds = array<i64: 1, 1>}, {pipeline_mode = #tpu.pipeline_mode<synchronous>, transform_indices = @transform_4, window_bounds = array<i64: 1, 1>}, {transform_indices = @transform_5, window_bounds = array<i64: 8, 128>}, {transform_indices = @transform_6, window_bounds = array<i64: 8, 128>}]} {
    %c0 = arith.constant 0 : index
    %c0_0 = arith.constant 0 : index
    %c0_1 = arith.constant 0 : index
    %0 = vector.load %arg2[%c0, %c0_0, %c0_1] : memref<1x1x1xf32, #tpu.memory_space<vmem>>, vector<1x1x1xf32>
    %cst = arith.constant dense<0.000000e+00> : vector<1x1xf32>
    %1 = vector.multi_reduction <add>, %0, %cst [0] : vector<1x1x1xf32> to vector<1x1xf32>
    %cst_2 = arith.constant 1.250000e-01 : f32
    %2 = vector.broadcast %cst_2 : f32 to vector<1x1xf32>
    %3 = arith.mulf %1, %2 : vector<1x1xf32>
    %c0_3 = arith.constant 0 : index
    %c0_4 = arith.constant 0 : index
    %c0_5 = arith.constant 0 : index
    %4 = vector.load %arg3[%c0_3, %c0_4, %c0_5] : memref<1x1x1xf32, #tpu.memory_space<vmem>>, vector<1x1x1xf32>
    %cst_6 = arith.constant dense<0.000000e+00> : vector<1x1xf32>
    %5 = vector.multi_reduction <add>, %4, %cst_6 [0] : vector<1x1x1xf32> to vector<1x1xf32>
    %cst_7 = arith.constant 1.250000e-01 : f32
    %6 = vector.broadcast %cst_7 : f32 to vector<1x1xf32>
    %7 = arith.mulf %5, %6 : vector<1x1xf32>
    %8 = arith.mulf %3, %3 : vector<1x1xf32>
    %9 = arith.subf %7, %8 : vector<1x1xf32>
    %c0_8 = arith.constant 0 : index
    %c0_9 = arith.constant 0 : index
    %10 = vector.load %arg4[%c0_8, %c0_9] : memref<1x1xf32, #tpu.memory_space<vmem>>, vector<1x1xf32>
    %cst_10 = arith.constant 9.99999974E-6 : f32
    %11 = vector.broadcast %cst_10 : f32 to vector<1x1xf32>
    %12 = arith.addf %9, %11 : vector<1x1xf32>
    %13 = math.rsqrt %12 : vector<1x1xf32>
    %14 = arith.mulf %10, %13 : vector<1x1xf32>
    %c0_11 = arith.constant 0 : index
    %c0_12 = arith.constant 0 : index
    %15 = vector.load %arg5[%c0_11, %c0_12] : memref<1x1xf32, #tpu.memory_space<vmem>>, vector<1x1xf32>
    %16 = arith.mulf %3, %14 : vector<1x1xf32>
    %17 = arith.subf %15, %16 : vector<1x1xf32>
    %c0_13 = arith.constant 0 : index
    %c0_14 = arith.constant 0 : index
    %18 = vector.load %arg1[%c0_13, %c0_14] : memref<8x1xf32, #tpu.memory_space<vmem>>, vector<8x1xf32>
    %19 = vector.broadcast %14 : vector<1x1xf32> to vector<8x1xf32>
    %20 = arith.mulf %18, %19 : vector<8x1xf32>
    %21 = vector.broadcast %17 : vector<1x1xf32> to vector<8x1xf32>
    %22 = arith.addf %20, %21 : vector<8x1xf32>
    %23 = arith.negf %22 : vector<8x1xf32>
    %24 = math.exp %23 : vector<8x1xf32>
    %cst_15 = arith.constant 1.000000e+00 : f32
    %25 = vector.broadcast %cst_15 : f32 to vector<8x1xf32>
    %26 = arith.addf %25, %24 : vector<8x1xf32>
    %27 = arith.divf %25, %26 : vector<8x1xf32>
    %c0_16 = arith.constant 0 : index
    %c0_17 = arith.constant 0 : index
    %28 = vector.load %arg6[%c0_16, %c0_17] : memref<8x128xbf16, #tpu.memory_space<vmem>>, vector<8x128xbf16>
    %29 = arith.extf %28 : vector<8x128xbf16> to vector<8x128xf32>
    %30 = vector.broadcast %27 : vector<8x1xf32> to vector<8x128xf32>
    %31 = arith.mulf %29, %30 : vector<8x128xf32>
    %c0_18 = arith.constant 0 : index
    %c0_19 = arith.constant 0 : index
    %32 = vector.load %arg7[%c0_18, %c0_19] : memref<8x128xf32, #tpu.memory_space<vmem>>, vector<8x128xf32>
    tpu.vector_store %arg7[%c0_18, %c0_19], %31 {strides = array<i32>} : memref<8x128xf32, #tpu.memory_space<vmem>>, vector<8x128xf32>,
    return
  }
  func.func @transform_0(%arg0: i32) -> (i32, i32) {
    %c0_i32 = arith.constant 0 : i32
    %c0_i32_0 = arith.constant 0 : i32
    return %arg0, %c0_i32 : i32, i32
  }
  func.func @transform_1(%arg0: i32) -> (i32, i32, i32) {
    %c0_i32 = arith.constant 0 : i32
    %c0_i32_0 = arith.constant 0 : i32
    %c0_i32_1 = arith.constant 0 : i32
    %c0_i32_2 = arith.constant 0 : i32
    return %c0_i32, %c0_i32_0, %c0_i32_1 : i32, i32, i32
  }
  func.func @transform_2(%arg0: i32) -> (i32, i32, i32) {
    %c0_i32 = arith.constant 0 : i32
    %c0_i32_0 = arith.constant 0 : i32
    %c0_i32_1 = arith.constant 0 : i32
    %c0_i32_2 = arith.constant 0 : i32
    return %c0_i32, %c0_i32_0, %c0_i32_1 : i32, i32, i32
  }
  func.func @transform_3(%arg0: i32) -> (i32, i32) {
    %c0_i32 = arith.constant 0 : i32
    %c0_i32_0 = arith.constant 0 : i32
    %c0_i32_1 = arith.constant 0 : i32
    return %c0_i32, %c0_i32_0 : i32, i32
  }
  func.func @transform_4(%arg0: i32) -> (i32, i32) {
    %c0_i32 = arith.constant 0 : i32
    %c0_i32_0 = arith.constant 0 : i32
    %c0_i32_1 = arith.constant 0 : i32
    return %c0_i32, %c0_i32_0 : i32, i32
  }
  func.func @transform_5(%arg0: i32) -> (i32, i32) {
    %c0_i32 = arith.constant 0 : i32
    %c0_i32_0 = arith.constant 0 : i32
    return %arg0, %c0_i32 : i32, i32
  }
  func.func @transform_6(%arg0: i32) -> (i32, i32) {
    %c0_i32 = arith.constant 0 : i32
    %c0_i32_0 = arith.constant 0 : i32
    return %arg0, %c0_i32 : i32, i32
  }
}

</mosaic_0001>

<bundles_post_ra>
// kernel: _lambda_.22
= control target key start
LH: loop header
LB: loop body
LE: loop exit
PB: predicated region body
PF: predicated region fallthrough
CT: control target
= control target key end

     0   :  { %v100_v7 = vlaneseq  ;;  %vm559_vm0 = vcmask 519168   ;;  %s1380_s1 = inlined_call_operand.vmem [shape: f32[1,1,64], index: 1, kind: input, shape index: {}]   ;;  %s1381_s2 = inlined_call_operand.vmem [shape: f32[1,1,64], index: 2, kind: input, shape index: {}]   ;;  %s1382_s3 = inlined_call_operand.vmem [shape: f32[1,64], index: 3, kind: input, shape index: {}]   ;;  %s1383_s0 = inlined_call_operand.vmem [shape: f32[512,64], index: 0, kind: input, shape index: {}]   ;;  %s1384_s4 = inlined_call_operand.vmem [shape: f32[1,64], index: 4, kind: input, shape index: {}]   ;;  %s1385_s5 = inlined_call_operand.vmem [shape: bf16[512,64], index: 5, kind: output, shape index: {}]  }
   0x1   :  { %v20_v0 = vld [vmem:[%s1380_s1] sm:$0x1]  ;;  %v36_v15 = vld [vmem:[%s1383_s0 + $0x8] sm:$0xff]  ;;  %v37_v16 = vld [vmem:[%s1383_s0 + $0x10] sm:$0xff] }
   0x2   :  { %v23_v1 = vld [vmem:[%s1381_s2] sm:$0x1]  ;;  %v22_v2 = vmul.f32 0.001953125, %v20_v0  ;;  %v101_v8 = vshrl.u32 %v100_v7, 7  ;;  %v38_v17 = vld [vmem:[%s1383_s0 + $0x18] sm:$0xff]  ;;  %v40_v21 = vld [vmem:[%s1383_s0 + $0x28] sm:$0xff] }
   0x3   :  { %v25_v3 = vmul.f32 0.001953125, %v23_v1  ;;  %v28_v9 = vld [vmem:[%s1382_s3] sm:$0x1]  ;;  %v41_v22 = vld [vmem:[%s1383_s0 + $0x30] sm:$0xff]  ;;  %v42_v23 = vld [vmem:[%s1383_s0 + $0x38] sm:$0xff] }
   0x4   :  { %v26_v4 = vmul.f32 %v22_v2, %v22_v2  ;;  %v102_v10 = vsub.s32 0, %v101_v8  ;;  %v32_v13 = vld [vmem:[%s1384_s4] sm:$0x1]  ;;  %v44_v25 = vld [vmem:[%s1383_s0 + $0x48] sm:$0xff]  ;;  %v45_v26 = vld [vmem:[%s1383_s0 + $0x50] sm:$0xff] }
   0x5   :  { %v35_v14 = vld [vmem:[%s1383_s0] sm:$0xff]  ;;  %v46_v31 = vld [vmem:[%s1383_s0 + $0x58] sm:$0xff]  ;;  %v48_v33 = vld [vmem:[%s1383_s0 + $0x68] sm:$0xff] }
   0x6   :  { %v27_v5 = vsub.f32 %v25_v3, %v26_v4  ;;  %v39_v18 = vld [vmem:[%s1383_s0 + $0x20] sm:$0xff]  ;;  %v50_v3 = vld [vmem:[%s1383_s0 + $0x78] sm:$0xff] }
   0x7   :  { %v43_v24 = vld [vmem:[%s1383_s0 + $0x40] sm:$0xff] }
   0x8   :  { %v29_v6 = vadd.f32 1e-05, %v27_v5  ;;  %v47_v32 = vld [vmem:[%s1383_s0 + $0x60] sm:$0xff] }
   0xa   :  { %756 = vrsqrt.f32 %v29_v6 }
  0x17   :  { %v757_v11 = vpop.eup %756 }
  0x18   :  { %v31_v12 = vmul.f32 %v757_v11, %v28_v9 }
  0x1a   :  { %v33_v19 = vmul.f32 %v31_v12, %v22_v2  ;;  %v815_v20 = vrot.slane %v31_v12, %v102_v10  ;;  %v49_v2 = vld [vmem:[%s1383_s0 + $0x70] sm:$0xff] }
  0x1c   :  { %v34_v27 = vsub.f32 %v32_v13, %v33_v19  ;;  %v105_v28 = vmul.f32 %v815_v20, %v35_v14  ;;  %v106_v29 = vmul.f32 %v815_v20, %v36_v15  ;;  %v107_v30 = vmul.f32 %v815_v20, %v37_v16 }
  0x1d   :  { %v108_v34 = vmul.f32 %v815_v20, %v38_v17  ;;  %v109_v35 = vmul.f32 %v815_v20, %v39_v18  ;;  %v110_v36 = vmul.f32 %v815_v20, %v40_v21  ;;  %v111_v37 = vmul.f32 %v815_v20, %v41_v22  ;;  %v51_v21 = vld [vmem:[%s1383_s0 + $0x80] sm:$0xff] }
  0x1e   :  { %v851_v38 = vrot.slane %v34_v27, %v102_v10  ;;  %v112_v39 = vmul.f32 %v815_v20, %v42_v23  ;;  %v113_v40 = vmul.f32 %v815_v20, %v43_v24  ;;  %v114_v41 = vmul.f32 %v815_v20, %v44_v25  ;;  %v53_v27 = vld [vmem:[%s1383_s0 + $0x90] sm:$0xff] }
  0x1f   :  { %v115_v42 = vmul.f32 %v815_v20, %v45_v26  ;;  %v116_v43 = vmul.f32 %v815_v20, %v46_v31  ;;  %v117_v44 = vmul.f32 %v815_v20, %v47_v32  ;;  %v118_v45 = vmul.f32 %v815_v20, %v48_v33  ;;  %v52_v26 = vld [vmem:[%s1383_s0 + $0x88] sm:$0xff]  ;;  %v55_v33 = vld [vmem:[%s1383_s0 + $0xa0] sm:$0xff] }
  0x20   :  { %v175_v46 = vadd.f32 %v851_v38, %v105_v28  ;;  %v176_v47 = vadd.f32 %v851_v38, %v106_v29  ;;  %v177_v48 = vadd.f32 %v851_v38, %v107_v30  ;;  %v178_v49 = vadd.f32 %v851_v38, %v108_v34  ;;  %v54_v28 = vld [vmem:[%s1383_s0 + $0x98] sm:$0xff]  ;;  %v56_v34 = vld [vmem:[%s1383_s0 + $0xa8] sm:$0xff] }
  0x21   :  { %v179_v50 = vadd.f32 %v851_v38, %v109_v35  ;;  %v180_v51 = vadd.f32 %v851_v38, %v110_v36  ;;  %v181_v52 = vadd.f32 %v851_v38, %v111_v37  ;;  %v182_v53 = vadd.f32 %v851_v38, %v112_v39 }
  0x22   :  { %v239_v54 = vmax.f32 %v175_v46, 0.0  ;;  %v240_v55 = vmax.f32 %v176_v47, 0.0  ;;  %v241_v56 = vmax.f32 %v177_v48, 0.0  ;;  %v242_v57 = vmax.f32 %v178_v49, 0.0 }
  0x23   :  { %v243_v58 = vmax.f32 %v179_v50, 0.0  ;;  %v244_v59 = vmax.f32 %v180_v51, 0.0  ;;  %v245_v60 = vmax.f32 %v181_v52, 0.0  ;;  %v246_v61 = vmax.f32 %v182_v53, 0.0 }
  0x24   :  { %v692_v62 = vpack.c.bf16 %v239_v54, %v239_v54  ;;  %v693_v63 = vpack.c.bf16 %v240_v55, %v240_v55  ;;  %v694_v0 = vpack.c.bf16 %v241_v56, %v241_v56  ;;  %v695_v1 = vpack.c.bf16 %v242_v57, %v242_v57 }
  0x25   :  { %v696_v4 = vpack.c.bf16 %v243_v58, %v243_v58  ;;  %v697_v5 = vpack.c.bf16 %v244_v59, %v244_v59  ;;  %v698_v6 = vpack.c.bf16 %v245_v60, %v245_v60  ;;  %v699_v7 = vpack.c.bf16 %v246_v61, %v246_v61 }
  0x26   :  { %560 = vst.msk [vmem:[%s1385_s5] sm:$0xf] %vm559_vm0, %v692_v62  ;;  %561 = vst.msk [vmem:[%s1385_s5 + $0x4] sm:$0xf] %vm559_vm0, %v693_v63  ;;  %v183_v8 = vadd.f32 %v851_v38, %v113_v40  ;;  %v184_v9 = vadd.f32 %v851_v38, %v114_v41  ;;  %v185_v10 = vadd.f32 %v851_v38, %v115_v42  ;;  %v59_v62 = vld [vmem:[%s1383_s0 + $0xc0] sm:$0xff] }
  0x27   :  { %562 = vst.msk [vmem:[%s1385_s5 + $0x8] sm:$0xf] %vm559_vm0, %v694_v0  ;;  %563 = vst.msk [vmem:[%s1385_s5 + $0xc] sm:$0xf] %vm559_vm0, %v695_v1  ;;  %v186_v11 = vadd.f32 %v851_v38, %v116_v43  ;;  %v187_v12 = vadd.f32 %v851_v38, %v117_v44  ;;  %v188_v13 = vadd.f32 %v851_v38, %v118_v45  ;;  %v57_v44 = vld [vmem:[%s1383_s0 + $0xb0] sm:$0xff]  ;;  %v58_v45 = vld [vmem:[%s1383_s0 + $0xb8] sm:$0xff] }
  0x28   :  { %564 = vst.msk [vmem:[%s1385_s5 + $0x10] sm:$0xf] %vm559_vm0, %v696_v4  ;;  %565 = vst.msk [vmem:[%s1385_s5 + $0x14] sm:$0xf] %vm559_vm0, %v697_v5  ;;  %v119_v14 = vmul.f32 %v815_v20, %v49_v2  ;;  %v120_v15 = vmul.f32 %v815_v20, %v50_v3  ;;  %v247_v16 = vmax.f32 %v183_v8, 0.0  ;;  %v248_v17 = vmax.f32 %v184_v9, 0.0 }
  0x29   :  { %566 = vst.msk [vmem:[%s1385_s5 + $0x18] sm:$0xf] %vm559_vm0, %v698_v6  ;;  %567 = vst.msk [vmem:[%s1385_s5 + $0x1c] sm:$0xf] %vm559_vm0, %v699_v7  ;;  %v249_v18 = vmax.f32 %v185_v10, 0.0  ;;  %v250_v19 = vmax.f32 %v186_v11, 0.0  ;;  %v121_v40 = vmul.f32 %v815_v20, %v51_v21  ;;  %v122_v41 = vmul.f32 %v815_v20, %v52_v26 }
  0x2a   :  { %v251_v22 = vmax.f32 %v187_v12, 0.0  ;;  %v252_v23 = vmax.f32 %v188_v13, 0.0  ;;  %v189_v24 = vadd.f32 %v851_v38, %v119_v14  ;;  %v190_v25 = vadd.f32 %v851_v38, %v120_v15  ;;  %v60_v3 = vld [vmem:[%s1383_s0 + $0xc8] sm:$0xff]  ;;  %v61_v4 = vld [vmem:[%s1383_s0 + $0xd0] sm:$0xff]  ;;  %v62_v5 = vld [vmem:[%s1383_s0 + $0xd8] sm:$0xff] }
  0x2b   :  { %v700_v29 = vpack.c.bf16 %v247_v16, %v247_v16  ;;  %v701_v30 = vpack.c.bf16 %v248_v17, %v248_v17  ;;  %v702_v31 = vpack.c.bf16 %v249_v18, %v249_v18  ;;  %v703_v32 = vpack.c.bf16 %v250_v19, %v250_v19  ;;  %v63_v10 = vld [vmem:[%s1383_s0 + $0xe0] sm:$0xff]  ;;  %v64_v11 = vld [vmem:[%s1383_s0 + $0xe8] sm:$0xff]  ;;  %v65_v21 = vld [vmem:[%s1383_s0 + $0xf0] sm:$0xff] }
  0x2c   :  { %v704_v35 = vpack.c.bf16 %v251_v22, %v251_v22  ;;  %v705_v36 = vpack.c.bf16 %v252_v23, %v252_v23  ;;  %v253_v37 = vmax.f32 %v189_v24, 0.0  ;;  %v254_v39 = vmax.f32 %v190_v25, 0.0  ;;  %v66_v22 = vld [vmem:[%s1383_s0 + $0xf8] sm:$0xff] }
  0x2d   :  { %568 = vst.msk [vmem:[%s1385_s5 + $0x20] sm:$0xf] %vm559_vm0, %v700_v29  ;;  %569 = vst.msk [vmem:[%s1385_s5 + $0x24] sm:$0xf] %vm559_vm0, %v701_v30  ;;  %v123_v42 = vmul.f32 %v815_v20, %v53_v27  ;;  %v124_v43 = vmul.f32 %v815_v20, %v54_v28  ;;  %v125_v48 = vmul.f32 %v815_v20, %v55_v33 }
  0x2e   :  { %570 = vst.msk [vmem:[%s1385_s5 + $0x28] sm:$0xf] %vm559_vm0, %v702_v31  ;;  %571 = vst.msk [vmem:[%s1385_s5 + $0x2c] sm:$0xf] %vm559_vm0, %v703_v32  ;;  %v706_v46 = vpack.c.bf16 %v253_v37, %v253_v37  ;;  %v707_v47 = vpack.c.bf16 %v254_v39, %v254_v39  ;;  %v126_v49 = vmul.f32 %v815_v20, %v56_v34 }
  0x2f   :  { %572 = vst.msk [vmem:[%s1385_s5 + $0x30] sm:$0xf] %vm559_vm0, %v704_v35  ;;  %573 = vst.msk [vmem:[%s1385_s5 + $0x34] sm:$0xf] %vm559_vm0, %v705_v36  ;;  %v191_v50 = vadd.f32 %v851_v38, %v121_v40  ;;  %v192_v51 = vadd.f32 %v851_v38, %v122_v41  ;;  %v193_v52 = vadd.f32 %v851_v38, %v123_v42  ;;  %v67_v40 = vld [vmem:[%s1383_s0 + $0x100] sm:$0xff] }
  0x30   :  { %v194_v53 = vadd.f32 %v851_v38, %v124_v43  ;;  %574 = vst.msk [vmem:[%s1385_s5 + $0x38] sm:$0xf] %vm559_vm0, %v706_v46  ;;  %575 = vst.msk [vmem:[%s1385_s5 + $0x3c] sm:$0xf] %vm559_vm0, %v707_v47  ;;  %v195_v54 = vadd.f32 %v851_v38, %v125_v48  ;;  %v196_v55 = vadd.f32 %v851_v38, %v126_v49  ;;  %v69_v46 = vld [vmem:[%s1383_s0 + $0x110] sm:$0xff]  ;;  %v70_v47 = vld [vmem:[%s1383_s0 + $0x118] sm:$0xff] }
  0x31   :  { %v127_v56 = vmul.f32 %v815_v20, %v57_v44  ;;  %v128_v57 = vmul.f32 %v815_v20, %v58_v45  ;;  %v255_v58 = vmax.f32 %v191_v50, 0.0  ;;  %v256_v59 = vmax.f32 %v192_v51, 0.0  ;;  %v68_v45 = vld [vmem:[%s1383_s0 + $0x108] sm:$0xff] }
  0x32   :  { %v257_v60 = vmax.f32 %v193_v52, 0.0  ;;  %v258_v61 = vmax.f32 %v194_v53, 0.0  ;;  %v259_v63 = vmax.f32 %v195_v54, 0.0  ;;  %v260_v0 = vmax.f32 %v196_v55, 0.0  ;;  %v71_v52 = vld [vmem:[%s1383_s0 + $0x120] sm:$0xff]  ;;  %v72_v53 = vld [vmem:[%s1383_s0 + $0x128] sm:$0xff] }
  0x33   :  { %v197_v1 = vadd.f32 %v851_v38, %v127_v56  ;;  %v198_v2 = vadd.f32 %v851_v38, %v128_v57  ;;  %v708_v6 = vpack.c.bf16 %v255_v58, %v255_v58  ;;  %v709_v7 = vpack.c.bf16 %v256_v59, %v256_v59 }
  0x34   :  { %v710_v8 = vpack.c.bf16 %v257_v60, %v257_v60  ;;  %v711_v9 = vpack.c.bf16 %v258_v61, %v258_v61  ;;  %v712_v12 = vpack.c.bf16 %v259_v63, %v259_v63  ;;  %v713_v13 = vpack.c.bf16 %v260_v0, %v260_v0  ;;  %v74_v63 = vld [vmem:[%s1383_s0 + $0x138] sm:$0xff] }
  0x35   :  { %v261_v14 = vmax.f32 %v197_v1, 0.0  ;;  %v262_v15 = vmax.f32 %v198_v2, 0.0  ;;  %576 = vst.msk [vmem:[%s1385_s5 + $0x40] sm:$0xf] %vm559_vm0, %v708_v6  ;;  %577 = vst.msk [vmem:[%s1385_s5 + $0x44] sm:$0xf] %vm559_vm0, %v709_v7  ;;  %v129_v16 = vmul.f32 %v815_v20, %v59_v62  ;;  %v130_v17 = vmul.f32 %v815_v20, %v60_v3 }
  0x36   :  { %578 = vst.msk [vmem:[%s1385_s5 + $0x48] sm:$0xf] %vm559_vm0, %v710_v8  ;;  %579 = vst.msk [vmem:[%s1385_s5 + $0x4c] sm:$0xf] %vm559_vm0, %v711_v9  ;;  %v131_v18 = vmul.f32 %v815_v20, %v61_v4  ;;  %v132_v19 = vmul.f32 %v815_v20, %v62_v5  ;;  %v133_v25 = vmul.f32 %v815_v20, %v63_v10  ;;  %v73_v62 = vld [vmem:[%s1383_s0 + $0x130] sm:$0xff] }
  0x37   :  { %580 = vst.msk [vmem:[%s1385_s5 + $0x50] sm:$0xf] %vm559_vm0, %v712_v12  ;;  %581 = vst.msk [vmem:[%s1385_s5 + $0x54] sm:$0xf] %vm559_vm0, %v713_v13  ;;  %v714_v23 = vpack.c.bf16 %v261_v14, %v261_v14  ;;  %v715_v24 = vpack.c.bf16 %v262_v15, %v262_v15  ;;  %v134_v26 = vmul.f32 %v815_v20, %v64_v11 }
  0x38   :  { %v199_v27 = vadd.f32 %v851_v38, %v129_v16  ;;  %v200_v28 = vadd.f32 %v851_v38, %v130_v17  ;;  %v201_v29 = vadd.f32 %v851_v38, %v131_v18  ;;  %v202_v30 = vadd.f32 %v851_v38, %v132_v19  ;;  %v75_v16 = vld [vmem:[%s1383_s0 + $0x140] sm:$0xff] }
  0x39   :  { %582 = vst.msk [vmem:[%s1385_s5 + $0x58] sm:$0xf] %vm559_vm0, %v714_v23  ;;  %583 = vst.msk [vmem:[%s1385_s5 + $0x5c] sm:$0xf] %vm559_vm0, %v715_v24  ;;  %v203_v31 = vadd.f32 %v851_v38, %v133_v25  ;;  %v204_v32 = vadd.f32 %v851_v38, %v134_v26  ;;  %v135_v33 = vmul.f32 %v815_v20, %v65_v21  ;;  %v77_v23 = vld [vmem:[%s1383_s0 + $0x150] sm:$0xff]  ;;  %v78_v24 = vld [vmem:[%s1383_s0 + $0x158] sm:$0xff] }
  0x3a   :  { %v136_v34 = vmul.f32 %v815_v20, %v66_v22  ;;  %v263_v35 = vmax.f32 %v199_v27, 0.0  ;;  %v264_v36 = vmax.f32 %v200_v28, 0.0  ;;  %v265_v37 = vmax.f32 %v201_v29, 0.0  ;;  %v76_v22 = vld [vmem:[%s1383_s0 + $0x148] sm:$0xff]  ;;  %v79_v29 = vld [vmem:[%s1383_s0 + $0x160] sm:$0xff] }
  0x3b   :  { %v266_v39 = vmax.f32 %v202_v30, 0.0  ;;  %v267_v41 = vmax.f32 %v203_v31, 0.0  ;;  %v268_v42 = vmax.f32 %v204_v32, 0.0  ;;  %v205_v43 = vadd.f32 %v851_v38, %v135_v33  ;;  %v80_v30 = vld [vmem:[%s1383_s0 + $0x168] sm:$0xff] }
  0x3c   :  { %v206_v44 = vadd.f32 %v851_v38, %v136_v34  ;;  %v716_v48 = vpack.c.bf16 %v263_v35, %v263_v35  ;;  %v717_v49 = vpack.c.bf16 %v264_v36, %v264_v36  ;;  %v718_v50 = vpack.c.bf16 %v265_v37, %v265_v37 }
  0x3d   :  { %v719_v51 = vpack.c.bf16 %v266_v39, %v266_v39  ;;  %v720_v54 = vpack.c.bf16 %v267_v41, %v267_v41  ;;  %v721_v55 = vpack.c.bf16 %v268_v42, %v268_v42  ;;  %v269_v56 = vmax.f32 %v205_v43, 0.0  ;;  %v82_v41 = vld [vmem:[%s1383_s0 + $0x178] sm:$0xff] }
  0x3e   :  { %v270_v57 = vmax.f32 %v206_v44, 0.0  ;;  %584 = vst.msk [vmem:[%s1385_s5 + $0x60] sm:$0xf] %vm559_vm0, %v716_v48  ;;  %585 = vst.msk [vmem:[%s1385_s5 + $0x64] sm:$0xf] %vm559_vm0, %v717_v49  ;;  %v137_v58 = vmul.f32 %v815_v20, %v67_v40  ;;  %v138_v59 = vmul.f32 %v815_v20, %v68_v45  ;;  %v139_v60 = vmul.f32 %v815_v20, %v69_v46  ;;  %v81_v40 = vld [vmem:[%s1383_s0 + $0x170] sm:$0xff] }
  0x3f   :  { %586 = vst.msk [vmem:[%s1385_s5 + $0x68] sm:$0xf] %vm559_vm0, %v718_v50  ;;  %587 = vst.msk [vmem:[%s1385_s5 + $0x6c] sm:$0xf] %vm559_vm0, %v719_v51  ;;  %v140_v61 = vmul.f32 %v815_v20, %v70_v47  ;;  %v722_v0 = vpack.c.bf16 %v269_v56, %v269_v56  ;;  %v141_v2 = vmul.f32 %v815_v20, %v71_v52 }
  0x40   :  { %588 = vst.msk [vmem:[%s1385_s5 + $0x70] sm:$0xf] %vm559_vm0, %v720_v54  ;;  %589 = vst.msk [vmem:[%s1385_s5 + $0x74] sm:$0xf] %vm559_vm0, %v721_v55  ;;  %v723_v1 = vpack.c.bf16 %v270_v57, %v270_v57  ;;  %v142_v3 = vmul.f32 %v815_v20, %v72_v53  ;;  %v207_v4 = vadd.f32 %v851_v38, %v137_v58  ;;  %v83_v58 = vld [vmem:[%s1383_s0 + $0x180] sm:$0xff] }
  0x41   :  { %v208_v5 = vadd.f32 %v851_v38, %v138_v59  ;;  %v209_v6 = vadd.f32 %v851_v38, %v139_v60  ;;  %v210_v7 = vadd.f32 %v851_v38, %v140_v61  ;;  %590 = vst.msk [vmem:[%s1385_s5 + $0x78] sm:$0xf] %vm559_vm0, %v722_v0  ;;  %v211_v8 = vadd.f32 %v851_v38, %v141_v2  ;;  %v85_v0 = vld [vmem:[%s1383_s0 + $0x190] sm:$0xff] }
  0x42   :  { %591 = vst.msk [vmem:[%s1385_s5 + $0x7c] sm:$0xf] %vm559_vm0, %v723_v1  ;;  %v212_v9 = vadd.f32 %v851_v38, %v142_v3  ;;  %v143_v10 = vmul.f32 %v815_v20, %v73_v62  ;;  %v144_v11 = vmul.f32 %v815_v20, %v74_v63  ;;  %v271_v12 = vmax.f32 %v207_v4, 0.0  ;;  %v84_v63 = vld [vmem:[%s1383_s0 + $0x188] sm:$0xff]  ;;  %v86_v1 = vld [vmem:[%s1383_s0 + $0x198] sm:$0xff] }
  0x43   :  { %v272_v13 = vmax.f32 %v208_v5, 0.0  ;;  %v273_v14 = vmax.f32 %v209_v6, 0.0  ;;  %v274_v15 = vmax.f32 %v210_v7, 0.0  ;;  %v275_v17 = vmax.f32 %v211_v8, 0.0  ;;  %v87_v6 = vld [vmem:[%s1383_s0 + $0x1a0] sm:$0xff]  ;;  %v88_v7 = vld [vmem:[%s1383_s0 + $0x1a8] sm:$0xff] }
  0x44   :  { %v276_v18 = vmax.f32 %v212_v9, 0.0  ;;  %v213_v19 = vadd.f32 %v851_v38, %v143_v10  ;;  %v214_v21 = vadd.f32 %v851_v38, %v144_v11  ;;  %v724_v25 = vpack.c.bf16 %v271_v12, %v271_v12 }
  0x45   :  { %v725_v26 = vpack.c.bf16 %v272_v13, %v272_v13  ;;  %v726_v27 = vpack.c.bf16 %v273_v14, %v273_v14  ;;  %v727_v28 = vpack.c.bf16 %v274_v15, %v274_v15  ;;  %v728_v31 = vpack.c.bf16 %v275_v17, %v275_v17  ;;  %v90_v17 = vld [vmem:[%s1383_s0 + $0x1b8] sm:$0xff] }
  0x46   :  { %v729_v32 = vpack.c.bf16 %v276_v18, %v276_v18  ;;  %v277_v33 = vmax.f32 %v213_v19, 0.0  ;;  %v278_v34 = vmax.f32 %v214_v21, 0.0  ;;  %592 = vst.msk [vmem:[%s1385_s5 + $0x80] sm:$0xf] %vm559_vm0, %v724_v25  ;;  %v145_v35 = vmul.f32 %v815_v20, %v75_v16  ;;  %v89_v16 = vld [vmem:[%s1383_s0 + $0x1b0] sm:$0xff] }
  0x47   :  { %593 = vst.msk [vmem:[%s1385_s5 + $0x84] sm:$0xf] %vm559_vm0, %v725_v26  ;;  %594 = vst.msk [vmem:[%s1385_s5 + $0x88] sm:$0xf] %vm559_vm0, %v726_v27  ;;  %v146_v36 = vmul.f32 %v815_v20, %v76_v22  ;;  %v147_v37 = vmul.f32 %v815_v20, %v77_v23  ;;  %v148_v39 = vmul.f32 %v815_v20, %v78_v24 }
  0x48   :  { %595 = vst.msk [vmem:[%s1385_s5 + $0x8c] sm:$0xf] %vm559_vm0, %v727_v28  ;;  %596 = vst.msk [vmem:[%s1385_s5 + $0x90] sm:$0xf] %vm559_vm0, %v728_v31  ;;  %v730_v42 = vpack.c.bf16 %v277_v33, %v277_v33  ;;  %v731_v43 = vpack.c.bf16 %v278_v34, %v278_v34  ;;  %v149_v44 = vmul.f32 %v815_v20, %v79_v29 }
  0x49   :  { %597 = vst.msk [vmem:[%s1385_s5 + $0x94] sm:$0xf] %vm559_vm0, %v729_v32  ;;  %v150_v45 = vmul.f32 %v815_v20, %v80_v30  ;;  %v215_v46 = vadd.f32 %v851_v38, %v145_v35  ;;  %v216_v47 = vadd.f32 %v851_v38, %v146_v36  ;;  %v217_v48 = vadd.f32 %v851_v38, %v147_v37  ;;  %v91_v35 = vld [vmem:[%s1383_s0 + $0x1c0] sm:$0xff] }
  0x4a   :  { %v218_v49 = vadd.f32 %v851_v38, %v148_v39  ;;  %598 = vst.msk [vmem:[%s1385_s5 + $0x98] sm:$0xf] %vm559_vm0, %v730_v42  ;;  %599 = vst.msk [vmem:[%s1385_s5 + $0x9c] sm:$0xf] %vm559_vm0, %v731_v43  ;;  %v219_v50 = vadd.f32 %v851_v38, %v149_v44  ;;  %v151_v52 = vmul.f32 %v815_v20, %v81_v40  ;;  %v93_v42 = vld [vmem:[%s1383_s0 + $0x1d0] sm:$0xff]  ;;  %v94_v43 = vld [vmem:[%s1383_s0 + $0x1d8] sm:$0xff] }
  0x4b   :  { %v220_v51 = vadd.f32 %v851_v38, %v150_v45  ;;  %v152_v53 = vmul.f32 %v815_v20, %v82_v41  ;;  %v279_v54 = vmax.f32 %v215_v46, 0.0  ;;  %v280_v55 = vmax.f32 %v216_v47, 0.0  ;;  %v92_v41 = vld [vmem:[%s1383_s0 + $0x1c8] sm:$0xff] }
  0x4c   :  { %v281_v56 = vmax.f32 %v217_v48, 0.0  ;;  %v282_v57 = vmax.f32 %v218_v49, 0.0  ;;  %v283_v59 = vmax.f32 %v219_v50, 0.0  ;;  %v221_v61 = vadd.f32 %v851_v38, %v151_v52  ;;  %v95_v48 = vld [vmem:[%s1383_s0 + $0x1e0] sm:$0xff]  ;;  %v96_v49 = vld [vmem:[%s1383_s0 + $0x1e8] sm:$0xff] }
  0x4d   :  { %v284_v60 = vmax.f32 %v220_v51, 0.0  ;;  %v222_v62 = vadd.f32 %v851_v38, %v152_v53  ;;  %v732_v2 = vpack.c.bf16 %v279_v54, %v279_v54  ;;  %v733_v3 = vpack.c.bf16 %v280_v55, %v280_v55 }
  0x4e   :  { %v734_v4 = vpack.c.bf16 %v281_v56, %v281_v56  ;;  %v735_v5 = vpack.c.bf16 %v282_v57, %v282_v57  ;;  %v736_v8 = vpack.c.bf16 %v283_v59, %v283_v59  ;;  %v285_v10 = vmax.f32 %v221_v61, 0.0  ;;  %v98_v59 = vld [vmem:[%s1383_s0 + $0x1f8] sm:$0xff] }
  0x4f   :  { %v737_v9 = vpack.c.bf16 %v284_v60, %v284_v60  ;;  %v286_v11 = vmax.f32 %v222_v62, 0.0  ;;  %600 = vst.msk [vmem:[%s1385_s5 + $0xa0] sm:$0xf] %vm559_vm0, %v732_v2  ;;  %601 = vst.msk [vmem:[%s1385_s5 + $0xa4] sm:$0xf] %vm559_vm0, %v733_v3  ;;  %v153_v12 = vmul.f32 %v815_v20, %v83_v58  ;;  %v154_v13 = vmul.f32 %v815_v20, %v84_v63  ;;  %v97_v58 = vld [vmem:[%s1383_s0 + $0x1f0] sm:$0xff] }
  0x50   :  { %602 = vst.msk [vmem:[%s1385_s5 + $0xa8] sm:$0xf] %vm559_vm0, %v734_v4  ;;  %603 = vst.msk [vmem:[%s1385_s5 + $0xac] sm:$0xf] %vm559_vm0, %v735_v5  ;;  %v155_v14 = vmul.f32 %v815_v20, %v85_v0  ;;  %v156_v15 = vmul.f32 %v815_v20, %v86_v1  ;;  %v738_v18 = vpack.c.bf16 %v285_v10, %v285_v10 }
  0x51   :  { %604 = vst.msk [vmem:[%s1385_s5 + $0xb0] sm:$0xf] %vm559_vm0, %v736_v8  ;;  %605 = vst.msk [vmem:[%s1385_s5 + $0xb4] sm:$0xf] %vm559_vm0, %v737_v9  ;;  %v739_v19 = vpack.c.bf16 %v286_v11, %v286_v11  ;;  %v157_v21 = vmul.f32 %v815_v20, %v87_v6  ;;  %v158_v22 = vmul.f32 %v815_v20, %v88_v7 }
  0x52   :  { %v223_v23 = vadd.f32 %v851_v38, %v153_v12  ;;  %v224_v24 = vadd.f32 %v851_v38, %v154_v13  ;;  %v225_v25 = vadd.f32 %v851_v38, %v155_v14  ;;  %v226_v26 = vadd.f32 %v851_v38, %v156_v15  ;;  %606 = vst.msk [vmem:[%s1385_s5 + $0xb8] sm:$0xf] %vm559_vm0, %v738_v18 }
  0x53   :  { %607 = vst.msk [vmem:[%s1385_s5 + $0xbc] sm:$0xf] %vm559_vm0, %v739_v19  ;;  %v227_v27 = vadd.f32 %v851_v38, %v157_v21  ;;  %v228_v28 = vadd.f32 %v851_v38, %v158_v22  ;;  %v159_v29 = vmul.f32 %v815_v20, %v89_v16  ;;  %v160_v30 = vmul.f32 %v815_v20, %v90_v17 }
  0x54   :  { %v287_v31 = vmax.f32 %v223_v23, 0.0  ;;  %v288_v32 = vmax.f32 %v224_v24, 0.0  ;;  %v289_v33 = vmax.f32 %v225_v25, 0.0  ;;  %v290_v34 = vmax.f32 %v226_v26, 0.0 }
  0x55   :  { %v291_v36 = vmax.f32 %v227_v27, 0.0  ;;  %v292_v37 = vmax.f32 %v228_v28, 0.0  ;;  %v229_v39 = vadd.f32 %v851_v38, %v159_v29  ;;  %v230_v40 = vadd.f32 %v851_v38, %v160_v30 }
  0x56   :  { %v740_v44 = vpack.c.bf16 %v287_v31, %v287_v31  ;;  %v741_v45 = vpack.c.bf16 %v288_v32, %v288_v32  ;;  %v742_v46 = vpack.c.bf16 %v289_v33, %v289_v33  ;;  %v743_v47 = vpack.c.bf16 %v290_v34, %v290_v34 }
  0x57   :  { %v744_v50 = vpack.c.bf16 %v291_v36, %v291_v36  ;;  %v745_v51 = vpack.c.bf16 %v292_v37, %v292_v37  ;;  %v293_v52 = vmax.f32 %v229_v39, 0.0  ;;  %v294_v53 = vmax.f32 %v230_v40, 0.0 }
  0x58   :  { %608 = vst.msk [vmem:[%s1385_s5 + $0xc0] sm:$0xf] %vm559_vm0, %v740_v44  ;;  %609 = vst.msk [vmem:[%s1385_s5 + $0xc4] sm:$0xf] %vm559_vm0, %v741_v45  ;;  %v161_v54 = vmul.f32 %v815_v20, %v91_v35  ;;  %v162_v55 = vmul.f32 %v815_v20, %v92_v41  ;;  %v163_v56 = vmul.f32 %v815_v20, %v93_v42 }
  0x59   :  { %610 = vst.msk [vmem:[%s1385_s5 + $0xc8] sm:$0xf] %vm559_vm0, %v742_v46  ;;  %611 = vst.msk [vmem:[%s1385_s5 + $0xcc] sm:$0xf] %vm559_vm0, %v743_v47  ;;  %v164_v57 = vmul.f32 %v815_v20, %v94_v43  ;;  %v746_v60 = vpack.c.bf16 %v293_v52, %v293_v52  ;;  %v747_v61 = vpack.c.bf16 %v294_v53, %v294_v53 }
  0x5a   :  { %612 = vst.msk [vmem:[%s1385_s5 + $0xd0] sm:$0xf] %vm559_vm0, %v744_v50  ;;  %613 = vst.msk [vmem:[%s1385_s5 + $0xd4] sm:$0xf] %vm559_vm0, %v745_v51  ;;  %v165_v62 = vmul.f32 %v815_v20, %v95_v48  ;;  %v166_v63 = vmul.f32 %v815_v20, %v96_v49  ;;  %v231_v0 = vadd.f32 %v851_v38, %v161_v54 }
  0x5b   :  { %v232_v1 = vadd.f32 %v851_v38, %v162_v55  ;;  %v233_v2 = vadd.f32 %v851_v38, %v163_v56  ;;  %v234_v3 = vadd.f32 %v851_v38, %v164_v57  ;;  %614 = vst.msk [vmem:[%s1385_s5 + $0xd8] sm:$0xf] %vm559_vm0, %v746_v60  ;;  %615 = vst.msk [vmem:[%s1385_s5 + $0xdc] sm:$0xf] %vm559_vm0, %v747_v61 }
  0x5c   :  { %v235_v4 = vadd.f32 %v851_v38, %v165_v62  ;;  %v236_v5 = vadd.f32 %v851_v38, %v166_v63  ;;  %v167_v6 = vmul.f32 %v815_v20, %v97_v58  ;;  %v168_v7 = vmul.f32 %v815_v20, %v98_v59 }
  0x5d   :  { %v295_v8 = vmax.f32 %v231_v0, 0.0  ;;  %v296_v9 = vmax.f32 %v232_v1, 0.0  ;;  %v297_v10 = vmax.f32 %v233_v2, 0.0  ;;  %v298_v11 = vmax.f32 %v234_v3, 0.0 }
  0x5e   :  { %v299_v12 = vmax.f32 %v235_v4, 0.0  ;;  %v300_v13 = vmax.f32 %v236_v5, 0.0  ;;  %v237_v14 = vadd.f32 %v851_v38, %v167_v6  ;;  %v238_v15 = vadd.f32 %v851_v38, %v168_v7 }
  0x5f   :  { %v748_v16 = vpack.c.bf16 %v295_v8, %v295_v8  ;;  %v749_v17 = vpack.c.bf16 %v296_v9, %v296_v9  ;;  %v750_v18 = vpack.c.bf16 %v297_v10, %v297_v10  ;;  %v751_v19 = vpack.c.bf16 %v298_v11, %v298_v11 }
  0x60   :  { %v752_v21 = vpack.c.bf16 %v299_v12, %v299_v12  ;;  %v753_v22 = vpack.c.bf16 %v300_v13, %v300_v13  ;;  %v301_v23 = vmax.f32 %v237_v14, 0.0  ;;  %v302_v24 = vmax.f32 %v238_v15, 0.0 }
  0x61   :  { %616 = vst.msk [vmem:[%s1385_s5 + $0xe0] sm:$0xf] %vm559_vm0, %v748_v16  ;;  %617 = vst.msk [vmem:[%s1385_s5 + $0xe4] sm:$0xf] %vm559_vm0, %v749_v17 }
  0x62   :  { %618 = vst.msk [vmem:[%s1385_s5 + $0xe8] sm:$0xf] %vm559_vm0, %v750_v18  ;;  %619 = vst.msk [vmem:[%s1385_s5 + $0xec] sm:$0xf] %vm559_vm0, %v751_v19  ;;  %v754_v20 = vpack.c.bf16 %v301_v23, %v301_v23  ;;  %v755_v38 = vpack.c.bf16 %v302_v24, %v302_v24 }
  0x63   :  { %620 = vst.msk [vmem:[%s1385_s5 + $0xf0] sm:$0xf] %vm559_vm0, %v752_v21  ;;  %621 = vst.msk [vmem:[%s1385_s5 + $0xf4] sm:$0xf] %vm559_vm0, %v753_v22 }
  0x64   :  { %622 = vst.msk [vmem:[%s1385_s5 + $0xf8] sm:$0xf] %vm559_vm0, %v754_v20  ;;  %623 = vst.msk [vmem:[%s1385_s5 + $0xfc] sm:$0xf] %vm559_vm0, %v755_v38 }

// kernel: _lambda_.21
= control target key start
LH: loop header
LB: loop body
LE: loop exit
PB: predicated region body
PF: predicated region fallthrough
CT: control target
= control target key end

     0   :  { %vm372_vm0 = vcmask 1043456   ;;  %vm275_vm1 = vcmask 588800   ;;  %vm665_vm2 = vcmask 523264   ;;  %vm863_vm3 = vcmask 516096   ;;  %s2054_s1 = inlined_call_operand.vmem [shape: bf16[72,64], index: 1, kind: input, shape index: {}]   ;;  %s2055_s0 = inlined_call_operand.vmem [shape: bf16[512,72], index: 0, kind: input, shape index: {}]   ;;  %s2056_s2 = inlined_call_operand.vmem [shape: f32[512,64], index: 2, kind: output, shape index: {0}]   ;;  %s2057_s3 = inlined_call_operand.vmem [shape: f32[1,1,64], index: 3, kind: output, shape index: {1}]   ;;  %s2058_s4 = inlined_call_operand.vmem [shape: f32[1,1,64], index: 4, kind: output, shape index: {2}]  }
   0x1   :  { %v1267_v0 = vld [vmem:[%s2054_s1 + $0x20] ss:$0 sps:$4 sm:$0xff]   ;;  %v1268_v1 = vld [vmem:[%s2054_s1 + $0x18] sm:$0xff]   ;;  %v1269_v3 = vld [vmem:[%s2054_s1 + $0x10] sm:$0xff]  }
   0x2   :  { %1265 = vmatprep.subr.msk.bf16.mxu0 %vm372_vm0, %v1267_v0  ;;  %v374_v2 = vsel %vm372_vm0, %v1267_v0, 0  ;;  %1266 = vmatprep.subr.msk.bf16.mxu1 %vm372_vm0, %v1267_v0  ;;  %v1272_v4 = vld [vmem:[%s2055_s0] sm:$0xff]   ;;  %v1270_v5 = vld [vmem:[%s2054_s1 + $0x8] sm:$0xff]   ;;  %v1274_v8 = vld [vmem:[%s2055_s0 + $0x10] sm:$0xff]  }
   0x3   :  { %1182 = vmatpush3.bf16.msra.mxu0 %v374_v2  ;;  %1260 = vmatpush3.bf16.msra.mxu1 %v374_v2  ;;  %v1271_v6 = vld [vmem:[%s2054_s1] sm:$0xff]   ;;  %v1273_v7 = vld [vmem:[%s2055_s0 + $0x8] sm:$0xff]   ;;  %v1290_v11 = vld [vmem:[%s2055_s0 + $0x90] sm:$0xff]  }
   0x4   :  { %1183 = vmatprep.subr.bf16.mxu0 %v1268_v1  ;;  %1256 = vmatprep.subr.bf16.mxu1 %v1268_v1  ;;  %v1288_v9 = vld [vmem:[%s2055_s0 + $0x80] sm:$0xff]   ;;  %v1289_v10 = vld [vmem:[%s2055_s0 + $0x88] sm:$0xff]   ;;  %v1275_v12 = vld [vmem:[%s2055_s0 + $0x18] sm:$0xff]  }
   0x5   :  { %1191 = vmatprep.mubr.msk.bf16.mxu0 %vm275_vm1, %v1272_v4  ;;  %1223 = vmatprep.mubr.msk.bf16.mxu1 %vm275_vm1, %v1288_v9  ;;  %v1276_v13 = vld [vmem:[%s2055_s0 + $0x20] sm:$0xff]   ;;  %v1291_v14 = vld [vmem:[%s2055_s0 + $0x98] sm:$0xff]   ;;  %v1277_v16 = vld [vmem:[%s2055_s0 + $0x28] sm:$0xff]  }
   0x6   :  { %v1292_v15 = vld [vmem:[%s2055_s0 + $0xa0] sm:$0xff]   ;;  %v1278_v17 = vld [vmem:[%s2055_s0 + $0x30] sm:$0xff]   ;;  %v1293_v18 = vld [vmem:[%s2055_s0 + $0xa8] sm:$0xff]  }
   0x7   :  { %1184 = vmatpush3.bf16.msra.mxu0 %v1268_v1  ;;  %1261 = vmatpush3.bf16.msra.mxu1 %v1268_v1  ;;  %v1294_v19 = vld [vmem:[%s2055_s0 + $0xb0] sm:$0xff]   ;;  %v1279_v20 = vld [vmem:[%s2055_s0 + $0x38] sm:$0xff]   ;;  %v1280_v21 = vld [vmem:[%s2055_s0 + $0x40] sm:$0xff]  }
   0x8   :  { %1185 = vmatprep.subr.bf16.mxu0 %v1269_v3  ;;  %1257 = vmatprep.subr.bf16.mxu1 %v1269_v3  ;;  %v1295_v22 = vld [vmem:[%s2055_s0 + $0xb8] sm:$0xff]   ;;  %v1296_v23 = vld [vmem:[%s2055_s0 + $0xc0] sm:$0xff]   ;;  %v1281_v24 = vld [vmem:[%s2055_s0 + $0x48] sm:$0xff]  }
   0x9   :  { %v1282_v25 = vld [vmem:[%s2055_s0 + $0x50] sm:$0xff]   ;;  %v1297_v26 = vld [vmem:[%s2055_s0 + $0xc8] sm:$0xff]   ;;  %v1283_v28 = vld [vmem:[%s2055_s0 + $0x58] sm:$0xff]  }
   0xa   :  { %v1298_v27 = vld [vmem:[%s2055_s0 + $0xd0] sm:$0xff]   ;;  %v1284_v29 = vld [vmem:[%s2055_s0 + $0x60] sm:$0xff]   ;;  %v1299_v30 = vld [vmem:[%s2055_s0 + $0xd8] sm:$0xff]  }
   0xb   :  { %1186 = vmatpush3.bf16.msra.mxu0 %v1269_v3  ;;  %1262 = vmatpush3.bf16.msra.mxu1 %v1269_v3  ;;  %v1300_v31 = vld [vmem:[%s2055_s0 + $0xe0] sm:$0xff]   ;;  %v1285_v32 = vld [vmem:[%s2055_s0 + $0x68] sm:$0xff]   ;;  %v1286_v33 = vld [vmem:[%s2055_s0 + $0x70] sm:$0xff]  }
   0xc   :  { %1187 = vmatprep.subr.bf16.mxu0 %v1270_v5  ;;  %1258 = vmatprep.subr.bf16.mxu1 %v1270_v5  ;;  %v1301_v34 = vld [vmem:[%s2055_s0 + $0xe8] sm:$0xff]   ;;  %v1302_v35 = vld [vmem:[%s2055_s0 + $0xf0] sm:$0xff]   ;;  %v1287_v36 = vld [vmem:[%s2055_s0 + $0x78] sm:$0xff]  }
   0xd   :  { %v1303_v37 = vld [vmem:[%s2055_s0 + $0xf8] sm:$0xff]  }
   0xf   :  { %1188 = vmatpush3.bf16.msra.mxu0 %v1270_v5  ;;  %1263 = vmatpush3.bf16.msra.mxu1 %v1270_v5 }
  0x10   :  { %1189 = vmatprep.subr.bf16.mxu0 %v1271_v6  ;;  %1259 = vmatprep.subr.bf16.mxu1 %v1271_v6 }
  0x13   :  { %1190 = vmatpush3.bf16.msra.mxu0 %v1271_v6  ;;  %1264 = vmatpush3.bf16.msra.mxu1 %v1271_v6 }
  0x16   :  { %1192 = vmatmul.mubr.msk.bf16.vlgmr.msra.gmra.mxu0 %vm275_vm1, %v1273_v7  ;;  %1224 = vmatmul.mubr.msk.bf16.vlgmr.msra.gmra.mxu1 %vm275_vm1, %v1289_v10 }
  0x17   :  { %1195 = vmatprep.mubr.msk.bf16.mxu0 %vm275_vm1, %v1274_v8  ;;  %1227 = vmatprep.mubr.msk.bf16.mxu1 %vm275_vm1, %v1290_v11 }
  0x1e   :  { %1196 = vmatmul.mubr.msk.bf16.gmra.mxu0 %vm275_vm1, %v1275_v12  ;;  %1228 = vmatmul.mubr.msk.bf16.gmra.mxu1 %vm275_vm1, %v1291_v14 }
  0x1f   :  { %1199 = vmatprep.mubr.msk.bf16.mxu0 %vm275_vm1, %v1276_v13  ;;  %1231 = vmatprep.mubr.msk.bf16.mxu1 %vm275_vm1, %v1292_v15 }
  0x26   :  { %1200 = vmatmul.mubr.msk.bf16.gmra.mxu0 %vm275_vm1, %v1277_v16  ;;  %1232 = vmatmul.mubr.msk.bf16.gmra.mxu1 %vm275_vm1, %v1293_v18 }
  0x27   :  { %1203 = vmatprep.mubr.msk.bf16.mxu0 %vm275_vm1, %v1278_v17  ;;  %1235 = vmatprep.mubr.msk.bf16.mxu1 %vm275_vm1, %v1294_v19 }
  0x2e   :  { %1204 = vmatmul.mubr.msk.bf16.gmra.mxu0 %vm275_vm1, %v1279_v20  ;;  %1236 = vmatmul.mubr.msk.bf16.gmra.mxu1 %vm275_vm1, %v1295_v22 }
  0x2f   :  { %1207 = vmatprep.mubr.msk.bf16.mxu0 %vm275_vm1, %v1280_v21  ;;  %1239 = vmatprep.mubr.msk.bf16.mxu1 %vm275_vm1, %v1296_v23 }
  0x36   :  { %1208 = vmatmul.mubr.msk.bf16.gmra.mxu0 %vm275_vm1, %v1281_v24  ;;  %1240 = vmatmul.mubr.msk.bf16.gmra.mxu1 %vm275_vm1, %v1297_v26 }
  0x37   :  { %1211 = vmatprep.mubr.msk.bf16.mxu0 %vm275_vm1, %v1282_v25  ;;  %1243 = vmatprep.mubr.msk.bf16.mxu1 %vm275_vm1, %v1298_v27 }
  0x3e   :  { %1212 = vmatmul.mubr.msk.bf16.gmra.mxu0 %vm275_vm1, %v1283_v28  ;;  %1244 = vmatmul.mubr.msk.bf16.gmra.mxu1 %vm275_vm1, %v1299_v30 }
  0x3f   :  { %1215 = vmatprep.mubr.msk.bf16.mxu0 %vm275_vm1, %v1284_v29  ;;  %1247 = vmatprep.mubr.msk.bf16.mxu1 %vm275_vm1, %v1300_v31 }
  0x46   :  { %1216 = vmatmul.mubr.msk.bf16.gmra.mxu0 %vm275_vm1, %v1285_v32  ;;  %1248 = vmatmul.mubr.msk.bf16.gmra.mxu1 %vm275_vm1, %v1301_v34 }
  0x47   :  { %1219 = vmatprep.mubr.msk.bf16.mxu0 %vm275_vm1, %v1286_v33  ;;  %1251 = vmatprep.mubr.msk.bf16.mxu1 %vm275_vm1, %v1302_v35 }
  0x4e   :  { %1220 = vmatmul.mubr.msk.bf16.gmra.mxu0 %vm275_vm1, %v1287_v36  ;;  %1252 = vmatmul.mubr.msk.bf16.gmra.mxu1 %vm275_vm1, %v1303_v37 }
  0xd6   :  { %v1193_v38 = vpop.f32.mrf.mxu0  ;;  %v1476_v40 = vpop.f32.mrf.mxu1 }
  0xd7   :  { %668 = vst.msk [vmem:[%s2056_s2 + $0x10] sm:$0xff] %vm665_vm2, %v1193_v38  ;;  %700 = vst.msk [vmem:[%s2056_s2 + $0x110] sm:$0xff] %vm665_vm2, %v1476_v40  ;;  %v867_v46 = vmul.f32 %v1193_v38, %v1193_v38  ;;  %v733_v53 = vsel %vm665_vm2, %v1193_v38, 0.0 }
  0xd8   :  { %v410_v39 = vpop.f32.mrf.mxu0  ;;  %v1487_v42 = vpop.f32.mrf.mxu1 }
  0xd9   :  { %666 = vst.msk [vmem:[%s2056_s2] sm:$0xff] %vm665_vm2, %v410_v39  ;;  %v865_v43 = vmul.f32 %v410_v39, %v410_v39  ;;  %698 = vst.msk [vmem:[%s2056_s2 + $0x100] sm:$0xff] %vm665_vm2, %v1487_v42  ;;  %v730_v47 = vsel %vm665_vm2, %v410_v39, 0.0  ;;  %v932_v61 = vsel %vm665_vm2, %v867_v46, 0.0 }
  0xda   :  { %v1194_v41 = vpop.f32.mrf.mxu0  ;;  %v1498_v45 = vpop.f32.mrf.mxu1 }
  0xdb   :  { %669 = vst.msk [vmem:[%s2056_s2 + $0x18] sm:$0xff] %vm665_vm2, %v1194_v41  ;;  %701 = vst.msk [vmem:[%s2056_s2 + $0x118] sm:$0xff] %vm665_vm2, %v1498_v45  ;;  %v929_v54 = vsel %vm665_vm2, %v865_v43, 0.0  ;;  %v868_v55 = vmul.f32 %v1194_v41, %v1194_v41  ;;  %v735_v62 = vsel %vm665_vm2, %v1194_v41, 0.0 }
  0xdc   :  { %v413_v44 = vpop.f32.mrf.mxu0  ;;  %v1511_v52 = vpop.f32.mrf.mxu1 }
  0xdd   :  { %667 = vst.msk [vmem:[%s2056_s2 + $0x8] sm:$0xff] %vm665_vm2, %v413_v44  ;;  %v731_v48 = vsel %vm665_vm2, %v413_v44, 0.0  ;;  %v866_v49 = vmul.f32 %v413_v44, %v413_v44  ;;  %699 = vst.msk [vmem:[%s2056_s2 + $0x108] sm:$0xff] %vm665_vm2, %v1511_v52  ;;  %v934_v4 = vsel %vm665_vm2, %v868_v55, 0.0 }
  0xde   :  { %v732_v50 = vadd.f32 %v731_v48, %v730_v47  ;;  %v1197_v51 = vpop.f32.mrf.mxu0  ;;  %v1525_v60 = vpop.f32.mrf.mxu1 }
  0xdf   :  { %v930_v56 = vsel %vm665_vm2, %v866_v49, 0.0  ;;  %672 = vst.msk [vmem:[%s2056_s2 + $0x30] sm:$0xff] %vm665_vm2, %v1197_v51  ;;  %704 = vst.msk [vmem:[%s2056_s2 + $0x130] sm:$0xff] %vm665_vm2, %v1525_v60  ;;  %v871_v10 = vmul.f32 %v1197_v51, %v1197_v51  ;;  %v741_v18 = vsel %vm665_vm2, %v1197_v51, 0.0 }
  0xe0   :  { %v734_v57 = vadd.f32 %v733_v53, %v732_v50  ;;  %v931_v58 = vadd.f32 %v930_v56, %v929_v54  ;;  %v426_v59 = vpop.f32.mrf.mxu0  ;;  %v1538_v3 = vpop.f32.mrf.mxu1 }
  0xe1   :  { %670 = vst.msk [vmem:[%s2056_s2 + $0x20] sm:$0xff] %vm665_vm2, %v426_v59  ;;  %v869_v63 = vmul.f32 %v426_v59, %v426_v59  ;;  %v737_v5 = vsel %vm665_vm2, %v426_v59, 0.0  ;;  %702 = vst.msk [vmem:[%s2056_s2 + $0x120] sm:$0xff] %vm665_vm2, %v1538_v3  ;;  %v940_v25 = vsel %vm665_vm2, %v871_v10, 0.0 }
  0xe2   :  { %v933_v0 = vadd.f32 %v932_v61, %v931_v58  ;;  %v736_v1 = vadd.f32 %v735_v62, %v734_v57  ;;  %v1198_v2 = vpop.f32.mrf.mxu0  ;;  %v1551_v9 = vpop.f32.mrf.mxu1 }
  0xe3   :  { %673 = vst.msk [vmem:[%s2056_s2 + $0x38] sm:$0xff] %vm665_vm2, %v1198_v2  ;;  %v936_v11 = vsel %vm665_vm2, %v869_v63, 0.0  ;;  %705 = vst.msk [vmem:[%s2056_s2 + $0x138] sm:$0xff] %vm665_vm2, %v1551_v9  ;;  %v872_v19 = vmul.f32 %v1198_v2, %v1198_v2  ;;  %v743_v26 = vsel %vm665_vm2, %v1198_v2, 0.0 }
  0xe4   :  { %v738_v6 = vadd.f32 %v737_v5, %v736_v1  ;;  %v935_v7 = vadd.f32 %v934_v4, %v933_v0  ;;  %v429_v8 = vpop.f32.mrf.mxu0  ;;  %v1564_v17 = vpop.f32.mrf.mxu1 }
  0xe5   :  { %671 = vst.msk [vmem:[%s2056_s2 + $0x28] sm:$0xff] %vm665_vm2, %v429_v8  ;;  %v739_v12 = vsel %vm665_vm2, %v429_v8, 0.0  ;;  %v870_v13 = vmul.f32 %v429_v8, %v429_v8  ;;  %703 = vst.msk [vmem:[%s2056_s2 + $0x128] sm:$0xff] %vm665_vm2, %v1564_v17  ;;  %v942_v32 = vsel %vm665_vm2, %v872_v19, 0.0 }
  0xe6   :  { %v937_v14 = vadd.f32 %v936_v11, %v935_v7  ;;  %v740_v15 = vadd.f32 %v739_v12, %v738_v6  ;;  %v1201_v16 = vpop.f32.mrf.mxu0  ;;  %v1577_v24 = vpop.f32.mrf.mxu1 }
  0xe7   :  { %v938_v20 = vsel %vm665_vm2, %v870_v13, 0.0  ;;  %676 = vst.msk [vmem:[%s2056_s2 + $0x50] sm:$0xff] %vm665_vm2, %v1201_v16  ;;  %708 = vst.msk [vmem:[%s2056_s2 + $0x150] sm:$0xff] %vm665_vm2, %v1577_v24  ;;  %v875_v38 = vmul.f32 %v1201_v16, %v1201_v16  ;;  %v749_v49 = vsel %vm665_vm2, %v1201_v16, 0.0 }
  0xe8   :  { %v742_v21 = vadd.f32 %v741_v18, %v740_v15  ;;  %v939_v22 = vadd.f32 %v938_v20, %v937_v14  ;;  %v442_v23 = vpop.f32.mrf.mxu0  ;;  %v1590_v31 = vpop.f32.mrf.mxu1 }
  0xe9   :  { %674 = vst.msk [vmem:[%s2056_s2 + $0x40] sm:$0xff] %vm665_vm2, %v442_v23  ;;  %v873_v27 = vmul.f32 %v442_v23, %v442_v23  ;;  %v745_v33 = vsel %vm665_vm2, %v442_v23, 0.0  ;;  %706 = vst.msk [vmem:[%s2056_s2 + $0x140] sm:$0xff] %vm665_vm2, %v1590_v31  ;;  %v948_v57 = vsel %vm665_vm2, %v875_v38, 0.0 }
  0xea   :  { %v941_v28 = vadd.f32 %v940_v25, %v939_v22  ;;  %v744_v29 = vadd.f32 %v743_v26, %v742_v21  ;;  %v1202_v30 = vpop.f32.mrf.mxu0  ;;  %v1603_v37 = vpop.f32.mrf.mxu1 }
  0xeb   :  { %677 = vst.msk [vmem:[%s2056_s2 + $0x58] sm:$0xff] %vm665_vm2, %v1202_v30  ;;  %v944_v39 = vsel %vm665_vm2, %v873_v27, 0.0  ;;  %709 = vst.msk [vmem:[%s2056_s2 + $0x158] sm:$0xff] %vm665_vm2, %v1603_v37  ;;  %v876_v50 = vmul.f32 %v1202_v30, %v1202_v30  ;;  %v751_v58 = vsel %vm665_vm2, %v1202_v30, 0.0 }
  0xec   :  { %v746_v34 = vadd.f32 %v745_v33, %v744_v29  ;;  %v943_v35 = vadd.f32 %v942_v32, %v941_v28  ;;  %v445_v36 = vpop.f32.mrf.mxu0  ;;  %v1616_v48 = vpop.f32.mrf.mxu1 }
  0xed   :  { %675 = vst.msk [vmem:[%s2056_s2 + $0x48] sm:$0xff] %vm665_vm2, %v445_v36  ;;  %v747_v41 = vsel %vm665_vm2, %v445_v36, 0.0  ;;  %v874_v43 = vmul.f32 %v445_v36, %v445_v36  ;;  %707 = vst.msk [vmem:[%s2056_s2 + $0x148] sm:$0xff] %vm665_vm2, %v1616_v48  ;;  %v950_v1 = vsel %vm665_vm2, %v876_v50, 0.0 }
  0xee   :  { %v945_v44 = vadd.f32 %v944_v39, %v943_v35  ;;  %v748_v46 = vadd.f32 %v747_v41, %v746_v34  ;;  %v1205_v47 = vpop.f32.mrf.mxu0  ;;  %v1629_v56 = vpop.f32.mrf.mxu1 }
  0xef   :  { %v946_v51 = vsel %vm665_vm2, %v874_v43, 0.0  ;;  %680 = vst.msk [vmem:[%s2056_s2 + $0x70] sm:$0xff] %vm665_vm2, %v1205_v47  ;;  %712 = vst.msk [vmem:[%s2056_s2 + $0x170] sm:$0xff] %vm665_vm2, %v1629_v56  ;;  %v879_v8 = vmul.f32 %v1205_v47, %v1205_v47  ;;  %v757_v18 = vsel %vm665_vm2, %v1205_v47, 0.0 }
  0xf0   :  { %v750_v53 = vadd.f32 %v749_v49, %v748_v46  ;;  %v947_v54 = vadd.f32 %v946_v51, %v945_v44  ;;  %v458_v55 = vpop.f32.mrf.mxu0  ;;  %v1642_v0 = vpop.f32.mrf.mxu1 }
  0xf1   :  { %678 = vst.msk [vmem:[%s2056_s2 + $0x60] sm:$0xff] %vm665_vm2, %v458_v55  ;;  %v877_v59 = vmul.f32 %v458_v55, %v458_v55  ;;  %v753_v2 = vsel %vm665_vm2, %v458_v55, 0.0  ;;  %710 = vst.msk [vmem:[%s2056_s2 + $0x160] sm:$0xff] %vm665_vm2, %v1642_v0  ;;  %v956_v26 = vsel %vm665_vm2, %v879_v8, 0.0 }
  0xf2   :  { %v949_v61 = vadd.f32 %v948_v57, %v947_v54  ;;  %v752_v62 = vadd.f32 %v751_v58, %v750_v53  ;;  %v1206_v63 = vpop.f32.mrf.mxu0  ;;  %v1655_v7 = vpop.f32.mrf.mxu1 }
  0xf3   :  { %681 = vst.msk [vmem:[%s2056_s2 + $0x78] sm:$0xff] %vm665_vm2, %v1206_v63  ;;  %v952_v10 = vsel %vm665_vm2, %v877_v59, 0.0  ;;  %713 = vst.msk [vmem:[%s2056_s2 + $0x178] sm:$0xff] %vm665_vm2, %v1655_v7  ;;  %v880_v19 = vmul.f32 %v1206_v63, %v1206_v63  ;;  %v759_v27 = vsel %vm665_vm2, %v1206_v63, 0.0 }
  0xf4   :  { %v754_v4 = vadd.f32 %v753_v2, %v752_v62  ;;  %v951_v5 = vadd.f32 %v950_v1, %v949_v61  ;;  %v461_v6 = vpop.f32.mrf.mxu0  ;;  %v1668_v16 = vpop.f32.mrf.mxu1 }
  0xf5   :  { %679 = vst.msk [vmem:[%s2056_s2 + $0x68] sm:$0xff] %vm665_vm2, %v461_v6  ;;  %v755_v11 = vsel %vm665_vm2, %v461_v6, 0.0  ;;  %v878_v12 = vmul.f32 %v461_v6, %v461_v6  ;;  %711 = vst.msk [vmem:[%s2056_s2 + $0x168] sm:$0xff] %vm665_vm2, %v1668_v16  ;;  %v958_v34 = vsel %vm665_vm2, %v880_v19, 0.0 }
  0xf6   :  { %v953_v13 = vadd.f32 %v952_v10, %v951_v5  ;;  %v756_v14 = vadd.f32 %v755_v11, %v754_v4  ;;  %v1209_v15 = vpop.f32.mrf.mxu0  ;;  %v1681_v25 = vpop.f32.mrf.mxu1 }
  0xf7   :  { %v954_v20 = vsel %vm665_vm2, %v878_v12, 0.0  ;;  %684 = vst.msk [vmem:[%s2056_s2 + $0x90] sm:$0xff] %vm665_vm2, %v1209_v15  ;;  %716 = vst.msk [vmem:[%s2056_s2 + $0x190] sm:$0xff] %vm665_vm2, %v1681_v25  ;;  %v883_v43 = vmul.f32 %v1209_v15, %v1209_v15  ;;  %v765_v54 = vsel %vm665_vm2, %v1209_v15, 0.0 }
  0xf8   :  { %v758_v21 = vadd.f32 %v757_v18, %v756_v14  ;;  %v955_v22 = vadd.f32 %v954_v20, %v953_v13  ;;  %v474_v23 = vpop.f32.mrf.mxu0  ;;  %v1694_v33 = vpop.f32.mrf.mxu1 }
  0xf9   :  { %682 = vst.msk [vmem:[%s2056_s2 + $0x80] sm:$0xff] %vm665_vm2, %v474_v23  ;;  %v881_v28 = vmul.f32 %v474_v23, %v474_v23  ;;  %v761_v35 = vsel %vm665_vm2, %v474_v23, 0.0  ;;  %714 = vst.msk [vmem:[%s2056_s2 + $0x180] sm:$0xff] %vm665_vm2, %v1694_v33  ;;  %v964_v63 = vsel %vm665_vm2, %v883_v43, 0.0 }
  0xfa   :  { %v957_v29 = vadd.f32 %v956_v26, %v955_v22  ;;  %v760_v30 = vadd.f32 %v759_v27, %v758_v21  ;;  %v1210_v32 = vpop.f32.mrf.mxu0  ;;  %v1707_v41 = vpop.f32.mrf.mxu1 }
  0xfb   :  { %685 = vst.msk [vmem:[%s2056_s2 + $0x98] sm:$0xff] %vm665_vm2, %v1210_v32  ;;  %v960_v44 = vsel %vm665_vm2, %v881_v28, 0.0  ;;  %717 = vst.msk [vmem:[%s2056_s2 + $0x198] sm:$0xff] %vm665_vm2, %v1707_v41  ;;  %v884_v55 = vmul.f32 %v1210_v32, %v1210_v32  ;;  %v767_v1 = vsel %vm665_vm2, %v1210_v32, 0.0 }
  0xfc   :  { %v762_v36 = vadd.f32 %v761_v35, %v760_v30  ;;  %v959_v38 = vadd.f32 %v958_v34, %v957_v29  ;;  %v477_v39 = vpop.f32.mrf.mxu0  ;;  %v1720_v53 = vpop.f32.mrf.mxu1 }
  0xfd   :  { %683 = vst.msk [vmem:[%s2056_s2 + $0x88] sm:$0xff] %vm665_vm2, %v477_v39  ;;  %v763_v46 = vsel %vm665_vm2, %v477_v39, 0.0  ;;  %v882_v47 = vmul.f32 %v477_v39, %v477_v39  ;;  %715 = vst.msk [vmem:[%s2056_s2 + $0x188] sm:$0xff] %vm665_vm2, %v1720_v53  ;;  %v966_v10 = vsel %vm665_vm2, %v884_v55, 0.0 }
  0xfe   :  { %v961_v49 = vadd.f32 %v960_v44, %v959_v38  ;;  %v764_v50 = vadd.f32 %v763_v46, %v762_v36  ;;  %v1213_v51 = vpop.f32.mrf.mxu0  ;;  %v1733_v62 = vpop.f32.mrf.mxu1 }
  0xff   :  { %v962_v57 = vsel %vm665_vm2, %v882_v47, 0.0  ;;  %688 = vst.msk [vmem:[%s2056_s2 + $0xb0] sm:$0xff] %vm665_vm2, %v1213_v51  ;;  %720 = vst.msk [vmem:[%s2056_s2 + $0x1b0] sm:$0xff] %vm665_vm2, %v1733_v62  ;;  %v887_v18 = vmul.f32 %v1213_v51, %v1213_v51  ;;  %v773_v28 = vsel %vm665_vm2, %v1213_v51, 0.0 }
 0x100   :  { %v766_v58 = vadd.f32 %v765_v54, %v764_v50  ;;  %v963_v59 = vadd.f32 %v962_v57, %v961_v49  ;;  %v490_v61 = vpop.f32.mrf.mxu0  ;;  %v1746_v8 = vpop.f32.mrf.mxu1 }
 0x101   :  { %686 = vst.msk [vmem:[%s2056_s2 + $0xa0] sm:$0xff] %vm665_vm2, %v490_v61  ;;  %v885_v2 = vmul.f32 %v490_v61, %v490_v61  ;;  %v769_v11 = vsel %vm665_vm2, %v490_v61, 0.0  ;;  %718 = vst.msk [vmem:[%s2056_s2 + $0x1a0] sm:$0xff] %vm665_vm2, %v1746_v8  ;;  %v972_v38 = vsel %vm665_vm2, %v887_v18, 0.0 }
 0x102   :  { %v965_v4 = vadd.f32 %v964_v63, %v963_v59  ;;  %v768_v5 = vadd.f32 %v767_v1, %v766_v58  ;;  %v1214_v6 = vpop.f32.mrf.mxu0  ;;  %v1759_v15 = vpop.f32.mrf.mxu1 }
 0x103   :  { %689 = vst.msk [vmem:[%s2056_s2 + $0xb8] sm:$0xff] %vm665_vm2, %v1214_v6  ;;  %v968_v19 = vsel %vm665_vm2, %v885_v2, 0.0  ;;  %721 = vst.msk [vmem:[%s2056_s2 + $0x1b8] sm:$0xff] %vm665_vm2, %v1759_v15  ;;  %v888_v29 = vmul.f32 %v1214_v6, %v1214_v6  ;;  %v775_v39 = vsel %vm665_vm2, %v1214_v6, 0.0 }
 0x104   :  { %v770_v12 = vadd.f32 %v769_v11, %v768_v5  ;;  %v967_v13 = vadd.f32 %v966_v10, %v965_v4  ;;  %v493_v14 = vpop.f32.mrf.mxu0  ;;  %v1772_v27 = vpop.f32.mrf.mxu1 }
 0x105   :  { %687 = vst.msk [vmem:[%s2056_s2 + $0xa8] sm:$0xff] %vm665_vm2, %v493_v14  ;;  %v771_v20 = vsel %vm665_vm2, %v493_v14, 0.0  ;;  %v886_v21 = vmul.f32 %v493_v14, %v493_v14  ;;  %719 = vst.msk [vmem:[%s2056_s2 + $0x1a8] sm:$0xff] %vm665_vm2, %v1772_v27  ;;  %v974_v50 = vsel %vm665_vm2, %v888_v29, 0.0 }
 0x106   :  { %v969_v22 = vadd.f32 %v968_v19, %v967_v13  ;;  %v772_v23 = vadd.f32 %v771_v20, %v770_v12  ;;  %v1217_v26 = vpop.f32.mrf.mxu0  ;;  %v1785_v36 = vpop.f32.mrf.mxu1 }
 0x107   :  { %v970_v30 = vsel %vm665_vm2, %v886_v21, 0.0  ;;  %692 = vst.msk [vmem:[%s2056_s2 + $0xd0] sm:$0xff] %vm665_vm2, %v1217_v26  ;;  %724 = vst.msk [vmem:[%s2056_s2 + $0x1d0] sm:$0xff] %vm665_vm2, %v1785_v36  ;;  %v891_v59 = vmul.f32 %v1217_v26, %v1217_v26  ;;  %v781_v10 = vsel %vm665_vm2, %v1217_v26, 0.0 }
 0x108   :  { %v774_v32 = vadd.f32 %v773_v28, %v772_v23  ;;  %v971_v34 = vadd.f32 %v970_v30, %v969_v22  ;;  %v506_v35 = vpop.f32.mrf.mxu0  ;;  %v1798_v49 = vpop.f32.mrf.mxu1 }
 0x109   :  { %690 = vst.msk [vmem:[%s2056_s2 + $0xc0] sm:$0xff] %vm665_vm2, %v506_v35  ;;  %v889_v43 = vmul.f32 %v506_v35, %v506_v35  ;;  %v777_v51 = vsel %vm665_vm2, %v506_v35, 0.0  ;;  %722 = vst.msk [vmem:[%s2056_s2 + $0x1c0] sm:$0xff] %vm665_vm2, %v1798_v49  ;;  %v980_v20 = vsel %vm665_vm2, %v891_v59, 0.0 }
 0x10a   :  { %v973_v44 = vadd.f32 %v972_v38, %v971_v34  ;;  %v776_v46 = vadd.f32 %v775_v39, %v774_v32  ;;  %v1218_v47 = vpop.f32.mrf.mxu0  ;;  %v1811_v58 = vpop.f32.mrf.mxu1 }
 0x10b   :  { %693 = vst.msk [vmem:[%s2056_s2 + $0xd8] sm:$0xff] %vm665_vm2, %v1218_v47  ;;  %v976_v61 = vsel %vm665_vm2, %v889_v43, 0.0  ;;  %725 = vst.msk [vmem:[%s2056_s2 + $0x1d8] sm:$0xff] %vm665_vm2, %v1811_v58  ;;  %v892_v11 = vmul.f32 %v1218_v47, %v1218_v47  ;;  %v783_v21 = vsel %vm665_vm2, %v1218_v47, 0.0 }
 0x10c   :  { %v778_v54 = vadd.f32 %v777_v51, %v776_v46  ;;  %v975_v55 = vadd.f32 %v974_v50, %v973_v44  ;;  %v509_v57 = vpop.f32.mrf.mxu0  ;;  %v1824_v6 = vpop.f32.mrf.mxu1 }
 0x10d   :  { %691 = vst.msk [vmem:[%s2056_s2 + $0xc8] sm:$0xff] %vm665_vm2, %v509_v57  ;;  %v779_v63 = vsel %vm665_vm2, %v509_v57, 0.0  ;;  %v890_v1 = vmul.f32 %v509_v57, %v509_v57  ;;  %723 = vst.msk [vmem:[%s2056_s2 + $0x1c8] sm:$0xff] %vm665_vm2, %v1824_v6  ;;  %v982_v30 = vsel %vm665_vm2, %v892_v11, 0.0 }
 0x10e   :  { %v977_v2 = vadd.f32 %v976_v61, %v975_v55  ;;  %v780_v4 = vadd.f32 %v779_v63, %v778_v54  ;;  %v1221_v5 = vpop.f32.mrf.mxu0  ;;  %v1837_v19 = vpop.f32.mrf.mxu1 }
 0x10f   :  { %v978_v12 = vsel %vm665_vm2, %v890_v1, 0.0  ;;  %696 = vst.msk [vmem:[%s2056_s2 + $0xf0] sm:$0xff] %vm665_vm2, %v1221_v5  ;;  %728 = vst.msk [vmem:[%s2056_s2 + $0x1f0] sm:$0xff] %vm665_vm2, %v1837_v19  ;;  %v895_v43 = vmul.f32 %v1221_v5, %v1221_v5  ;;  %v789_v55 = vsel %vm665_vm2, %v1221_v5, 0.0 }
 0x110   :  { %v782_v13 = vadd.f32 %v781_v10, %v780_v4  ;;  %v979_v14 = vadd.f32 %v978_v12, %v977_v2  ;;  %v522_v18 = vpop.f32.mrf.mxu0  ;;  %v1850_v29 = vpop.f32.mrf.mxu1  ;;  %v897_v4 = vmul.f32 %v1487_v42, %v1487_v42  ;;  %v793_v12 = vsel %vm665_vm2, %v1487_v42, 0.0 }
 0x111   :  { %694 = vst.msk [vmem:[%s2056_s2 + $0xe0] sm:$0xff] %vm665_vm2, %v522_v18  ;;  %v893_v22 = vmul.f32 %v522_v18, %v522_v18  ;;  %v785_v32 = vsel %vm665_vm2, %v522_v18, 0.0  ;;  %726 = vst.msk [vmem:[%s2056_s2 + $0x1e0] sm:$0xff] %vm665_vm2, %v1850_v29  ;;  %v988_v1 = vsel %vm665_vm2, %v895_v43, 0.0  ;;  %v900_v42 = vmul.f32 %v1498_v45, %v1498_v45 }
 0x112   :  { %v981_v23 = vadd.f32 %v980_v20, %v979_v14  ;;  %v784_v26 = vadd.f32 %v783_v21, %v782_v13  ;;  %v1222_v28 = vpop.f32.mrf.mxu0  ;;  %v1863_v39 = vpop.f32.mrf.mxu1  ;;  %v898_v13 = vmul.f32 %v1511_v52, %v1511_v52  ;;  %v899_v20 = vmul.f32 %v1476_v40, %v1476_v40 }
 0x113   :  { %697 = vst.msk [vmem:[%s2056_s2 + $0xf8] sm:$0xff] %vm665_vm2, %v1222_v28  ;;  %v984_v44 = vsel %vm665_vm2, %v893_v22, 0.0  ;;  %729 = vst.msk [vmem:[%s2056_s2 + $0x1f8] sm:$0xff] %vm665_vm2, %v1863_v39  ;;  %v896_v57 = vmul.f32 %v1222_v28, %v1222_v28  ;;  %v791_v2 = vsel %vm665_vm2, %v1222_v28, 0.0  ;;  %v992_v21 = vsel %vm665_vm2, %v897_v4, 0.0 }
 0x114   :  { %v786_v34 = vadd.f32 %v785_v32, %v784_v26  ;;  %v983_v35 = vadd.f32 %v982_v30, %v981_v23  ;;  %v525_v38 = vpop.f32.mrf.mxu0  ;;  %v1876_v54 = vpop.f32.mrf.mxu1  ;;  %v795_v22 = vsel %vm665_vm2, %v1511_v52, 0.0  ;;  %v797_v28 = vsel %vm665_vm2, %v1476_v40, 0.0 }
 0x115   :  { %695 = vst.msk [vmem:[%s2056_s2 + $0xe8] sm:$0xff] %vm665_vm2, %v525_v38  ;;  %v787_v46 = vsel %vm665_vm2, %v525_v38, 0.0  ;;  %v894_v47 = vmul.f32 %v525_v38, %v525_v38  ;;  %727 = vst.msk [vmem:[%s2056_s2 + $0x1e8] sm:$0xff] %vm665_vm2, %v1876_v54  ;;  %v990_v11 = vsel %vm665_vm2, %v896_v57, 0.0  ;;  %v994_v30 = vsel %vm665_vm2, %v898_v13, 0.0 }
 0x116   :  { %v985_v50 = vadd.f32 %v984_v44, %v983_v35  ;;  %v788_v51 = vadd.f32 %v787_v46, %v786_v34  ;;  %v996_v35 = vsel %vm665_vm2, %v899_v20, 0.0  ;;  %v799_v38 = vsel %vm665_vm2, %v1498_v45, 0.0 }
 0x117   :  { %v986_v59 = vsel %vm665_vm2, %v894_v47, 0.0  ;;  %v901_v52 = vmul.f32 %v1538_v3, %v1538_v3  ;;  %v998_v46 = vsel %vm665_vm2, %v900_v42, 0.0  ;;  %v801_v40 = vsel %vm665_vm2, %v1538_v3, 0.0 }
 0x118   :  { %v790_v61 = vadd.f32 %v789_v55, %v788_v51  ;;  %v987_v63 = vadd.f32 %v986_v59, %v985_v50  ;;  %v902_v47 = vmul.f32 %v1564_v17, %v1564_v17  ;;  %v903_v55 = vmul.f32 %v1525_v60, %v1525_v60 }
 0x119   :  { %v1000_v45 = vsel %vm665_vm2, %v901_v52, 0.0  ;;  %v803_v57 = vsel %vm665_vm2, %v1564_v17, 0.0  ;;  %v904_v3 = vmul.f32 %v1551_v9, %v1551_v9  ;;  %v905_v17 = vmul.f32 %v1590_v31, %v1590_v31 }
 0x11a   :  { %v792_v10 = vadd.f32 %v791_v2, %v790_v61  ;;  %v989_v5 = vadd.f32 %v988_v1, %v987_v63  ;;  %v805_v63 = vsel %vm665_vm2, %v1525_v60, 0.0  ;;  %v1002_v1 = vsel %vm665_vm2, %v902_v47, 0.0 }
 0x11b   :  { %v1006_v13 = vsel %vm665_vm2, %v904_v3, 0.0  ;;  %v809_v60 = vsel %vm665_vm2, %v1590_v31, 0.0  ;;  %v908_v31 = vmul.f32 %v1603_v37, %v1603_v37  ;;  %v911_v47 = vmul.f32 %v1629_v56, %v1629_v56 }
 0x11c   :  { %v991_v14 = vadd.f32 %v990_v11, %v989_v5  ;;  %v794_v18 = vadd.f32 %v793_v12, %v792_v10  ;;  %v1004_v10 = vsel %vm665_vm2, %v903_v55, 0.0  ;;  %v807_v5 = vsel %vm665_vm2, %v1551_v9, 0.0 }
 0x11d   :  { %v1008_v9 = vsel %vm665_vm2, %v905_v17, 0.0  ;;  %v823_v3 = vsel %vm665_vm2, %v1655_v7, 0.0 }
 0x11e   :  { %v796_v23 = vadd.f32 %v795_v22, %v794_v18  ;;  %v993_v26 = vadd.f32 %v992_v21, %v991_v14  ;;  %v906_v14 = vmul.f32 %v1616_v48, %v1616_v48  ;;  %v907_v21 = vmul.f32 %v1577_v24, %v1577_v24 }
 0x11f   :  { %v811_v22 = vsel %vm665_vm2, %v1616_v48, 0.0  ;;  %v909_v48 = vmul.f32 %v1642_v0, %v1642_v0 }
 0x120   :  { %v798_v32 = vadd.f32 %v797_v28, %v796_v23  ;;  %v995_v34 = vadd.f32 %v994_v30, %v993_v26  ;;  %v813_v28 = vsel %vm665_vm2, %v1577_v24, 0.0  ;;  %v1010_v42 = vsel %vm665_vm2, %v906_v14, 0.0 }
 0x121   :  { %v817_v24 = vsel %vm665_vm2, %v1642_v0, 0.0  ;;  %v912_v0 = vmul.f32 %v1655_v7, %v1655_v7  ;;  %v829_v14 = vsel %vm665_vm2, %v1681_v25, 0.0 }
 0x122   :  { %v997_v43 = vadd.f32 %v996_v35, %v995_v34  ;;  %v800_v44 = vadd.f32 %v799_v38, %v798_v32  ;;  %v1012_v34 = vsel %vm665_vm2, %v907_v21, 0.0  ;;  %v815_v35 = vsel %vm665_vm2, %v1603_v37, 0.0 }
 0x123   :  { %v1016_v37 = vsel %vm665_vm2, %v909_v48, 0.0 }
 0x124   :  { %v802_v50 = vadd.f32 %v801_v40, %v800_v44  ;;  %v999_v51 = vadd.f32 %v998_v46, %v997_v43  ;;  %v1014_v43 = vsel %vm665_vm2, %v908_v31, 0.0  ;;  %v910_v44 = vmul.f32 %v1668_v16, %v1668_v16 }
 0x125   :  { %v918_v31 = vmul.f32 %v1772_v27, %v1772_v27 }
 0x126   :  { %v1001_v59 = vadd.f32 %v1000_v45, %v999_v51  ;;  %v804_v61 = vadd.f32 %v803_v57, %v802_v50  ;;  %v819_v50 = vsel %vm665_vm2, %v1668_v16, 0.0  ;;  %v821_v45 = vsel %vm665_vm2, %v1629_v56, 0.0 }
 0x127   :  { %v1018_v57 = vsel %vm665_vm2, %v910_v44, 0.0  ;;  %v913_v16 = vmul.f32 %v1694_v33, %v1694_v33  ;;  %v825_v56 = vsel %vm665_vm2, %v1694_v33, 0.0  ;;  %v916_v33 = vmul.f32 %v1707_v41, %v1707_v41 }
 0x128   :  { %v806_v2 = vadd.f32 %v805_v63, %v804_v61  ;;  %v1003_v4 = vadd.f32 %v1002_v1, %v1001_v59  ;;  %v1020_v63 = vsel %vm665_vm2, %v911_v47, 0.0 }
 0x129   :  { %v1024_v7 = vsel %vm665_vm2, %v913_v16, 0.0 }
 0x12a   :  { %v1005_v11 = vadd.f32 %v1004_v10, %v1003_v4  ;;  %v808_v12 = vadd.f32 %v807_v5, %v806_v2  ;;  %v1022_v4 = vsel %vm665_vm2, %v912_v0, 0.0  ;;  %v914_v10 = vmul.f32 %v1720_v53, %v1720_v53 }
 0x12b   :  { %v843_v0 = vsel %vm665_vm2, %v1824_v6, 0.0 }
 0x12c   :  { %v810_v18 = vadd.f32 %v809_v60, %v808_v12  ;;  %v1007_v20 = vadd.f32 %v1006_v13, %v1005_v11  ;;  %v915_v11 = vmul.f32 %v1681_v25, %v1681_v25  ;;  %v827_v12 = vsel %vm665_vm2, %v1720_v53, 0.0 }
 0x12d   :  { %v917_v53 = vmul.f32 %v1746_v8, %v1746_v8  ;;  %v833_v25 = vsel %vm665_vm2, %v1746_v8, 0.0  ;;  %v920_v8 = vmul.f32 %v1759_v15, %v1759_v15 }
 0x12e   :  { %v1009_v23 = vadd.f32 %v1008_v9, %v1007_v20  ;;  %v812_v26 = vadd.f32 %v811_v22, %v810_v18  ;;  %v1026_v18 = vsel %vm665_vm2, %v914_v10, 0.0  ;;  %v1028_v9 = vsel %vm665_vm2, %v915_v11, 0.0 }
 0x12f   :  { %v831_v22 = vsel %vm665_vm2, %v1707_v41, 0.0  ;;  %v1032_v41 = vsel %vm665_vm2, %v917_v53, 0.0 }
 0x130   :  { %v814_v30 = vadd.f32 %v813_v28, %v812_v26  ;;  %v1011_v32 = vadd.f32 %v1010_v42, %v1009_v23  ;;  %v1030_v28 = vsel %vm665_vm2, %v916_v33, 0.0 }
 0x132   :  { %v1013_v38 = vadd.f32 %v1012_v34, %v1011_v32  ;;  %v816_v52 = vadd.f32 %v815_v35, %v814_v30  ;;  %v919_v32 = vmul.f32 %v1733_v62, %v1733_v62  ;;  %v835_v34 = vsel %vm665_vm2, %v1772_v27, 0.0 }
 0x133   :  { %v921_v27 = vmul.f32 %v1798_v49, %v1798_v49 }
 0x134   :  { %v818_v46 = vadd.f32 %v817_v24, %v816_v52  ;;  %v1015_v40 = vadd.f32 %v1014_v43, %v1013_v38  ;;  %v837_v38 = vsel %vm665_vm2, %v1733_v62, 0.0  ;;  %v1034_v52 = vsel %vm665_vm2, %v918_v31, 0.0 }
 0x135   :  { %v1036_v44 = vsel %vm665_vm2, %v919_v32, 0.0  ;;  %v841_v62 = vsel %vm665_vm2, %v1798_v49, 0.0  ;;  %v924_v49 = vmul.f32 %v1811_v58, %v1811_v58 }
 0x136   :  { %v1017_v51 = vadd.f32 %v1016_v37, %v1015_v40  ;;  %v820_v55 = vadd.f32 %v819_v50, %v818_v46  ;;  %v839_v46 = vsel %vm665_vm2, %v1759_v15, 0.0  ;;  %v1038_v37 = vsel %vm665_vm2, %v920_v8, 0.0 }
 0x137   :  { %v922_v50 = vmul.f32 %v1824_v6, %v1824_v6  ;;  %v1040_v15 = vsel %vm665_vm2, %v921_v27, 0.0  ;;  %v925_v6 = vmul.f32 %v1850_v29, %v1850_v29  ;;  %v1046_v10 = vsel %vm665_vm2, %v924_v49, 0.0 }
 0x138   :  { %v822_v59 = vadd.f32 %v821_v45, %v820_v55  ;;  %v1019_v61 = vadd.f32 %v1018_v57, %v1017_v51  ;;  %v923_v45 = vmul.f32 %v1785_v36, %v1785_v36 }
 0x13a   :  { %v1021_v1 = vadd.f32 %v1020_v63, %v1019_v61  ;;  %v824_v2 = vadd.f32 %v823_v3, %v822_v59  ;;  %v845_v61 = vsel %vm665_vm2, %v1785_v36, 0.0  ;;  %v1042_v63 = vsel %vm665_vm2, %v922_v50, 0.0 }
 0x13b   :  { %v849_v36 = vsel %vm665_vm2, %v1850_v29, 0.0  ;;  %v928_v29 = vmul.f32 %v1863_v39, %v1863_v39 }
 0x13c   :  { %v826_v5 = vadd.f32 %v825_v56, %v824_v2  ;;  %v1023_v17 = vadd.f32 %v1022_v4, %v1021_v1  ;;  %v1044_v1 = vsel %vm665_vm2, %v923_v45, 0.0  ;;  %v847_v2 = vsel %vm665_vm2, %v1811_v58, 0.0 }
 0x13d   :  { %v1048_v58 = vsel %vm665_vm2, %v925_v6, 0.0 }
 0x13e   :  { %v1025_v13 = vadd.f32 %v1024_v7, %v1023_v17  ;;  %v828_v60 = vadd.f32 %v827_v12, %v826_v5  ;;  %v926_v5 = vmul.f32 %v1876_v54, %v1876_v54  ;;  %v927_v7 = vmul.f32 %v1837_v19, %v1837_v19 }
 0x13f   :  { %v851_v12 = vsel %vm665_vm2, %v1876_v54, 0.0  ;;  %v1054_v54 = vsel %vm665_vm2, %v928_v29, 0.0 }
 0x140   :  { %v830_v20 = vadd.f32 %v829_v14, %v828_v60  ;;  %v1027_v21 = vadd.f32 %v1026_v18, %v1025_v13  ;;  %v853_v14 = vsel %vm665_vm2, %v1837_v19, 0.0  ;;  %v1050_v33 = vsel %vm665_vm2, %v926_v5, 0.0 }
 0x142   :  { %v1029_v23 = vadd.f32 %v1028_v9, %v1027_v21  ;;  %v832_v26 = vadd.f32 %v831_v22, %v830_v20  ;;  %v1052_v21 = vsel %vm665_vm2, %v927_v7, 0.0  ;;  %v855_v9 = vsel %vm665_vm2, %v1863_v39, 0.0 }
 0x144   :  { %v834_v42 = vadd.f32 %v833_v25, %v832_v26  ;;  %v1031_v30 = vadd.f32 %v1030_v28, %v1029_v23 }
 0x146   :  { %v1033_v35 = vadd.f32 %v1032_v41, %v1031_v30  ;;  %v836_v48 = vadd.f32 %v835_v34, %v834_v42 }
 0x148   :  { %v838_v43 = vadd.f32 %v837_v38, %v836_v48  ;;  %v1035_v24 = vadd.f32 %v1034_v52, %v1033_v35 }
 0x14a   :  { %v1037_v40 = vadd.f32 %v1036_v44, %v1035_v24  ;;  %v840_v47 = vadd.f32 %v839_v46, %v838_v43 }
 0x14c   :  { %v842_v51 = vadd.f32 %v841_v62, %v840_v47  ;;  %v1039_v55 = vadd.f32 %v1038_v37, %v1037_v40 }
 0x14e   :  { %v1041_v57 = vadd.f32 %v1040_v15, %v1039_v55  ;;  %v844_v59 = vadd.f32 %v843_v0, %v842_v51 }
 0x150   :  { %v846_v3 = vadd.f32 %v845_v61, %v844_v59  ;;  %v1043_v16 = vadd.f32 %v1042_v63, %v1041_v57 }
 0x152   :  { %v1045_v4 = vadd.f32 %v1044_v1, %v1043_v16  ;;  %v848_v56 = vadd.f32 %v847_v2, %v846_v3 }
 0x154   :  { %v850_v17 = vadd.f32 %v849_v36, %v848_v56  ;;  %v1047_v11 = vadd.f32 %v1046_v10, %v1045_v4 }
 0x156   :  { %v1049_v13 = vadd.f32 %v1048_v58, %v1047_v11  ;;  %v852_v60 = vadd.f32 %v851_v12, %v850_v17 }
 0x158   :  { %v854_v18 = vadd.f32 %v853_v14, %v852_v60  ;;  %v1051_v20 = vadd.f32 %v1050_v33, %v1049_v13 }
 0x15a   :  { %v856_v22 = vadd.f32 %v855_v9, %v854_v18  ;;  %v1053_v53 = vadd.f32 %v1052_v21, %v1051_v20 }
 0x15c   :  { %v857_v23 = vrot.slane %v856_v22, 4  ;;  %v1055_v26 = vadd.f32 %v1054_v54, %v1053_v53 }
 0x15e   :  { %v858_v28 = vadd.f32 %v857_v23, %v856_v22  ;;  %v1056_v19 = vrot.slane %v1055_v26, 4 }
 0x160   :  { %v859_v25 = vrot.slane %v858_v28, 2  ;;  %v1057_v31 = vadd.f32 %v1056_v19, %v1055_v26 }
 0x162   :  { %v860_v42 = vadd.f32 %v859_v25, %v858_v28  ;;  %v1058_v30 = vrot.slane %v1057_v31, 2 }
 0x164   :  { %v861_v32 = vrot.slane %v860_v42, 1  ;;  %v1059_v41 = vadd.f32 %v1058_v30, %v1057_v31 }
 0x166   :  { %v862_v34 = vadd.f32 %v861_v32, %v860_v42  ;;  %v1060_v35 = vrot.slane %v1059_v41, 1 }
 0x168   :  { %864 = vst.msk [vmem:[%s2057_s3] sm:$0x1] %vm863_vm3, %v862_v34  ;;  %v1061_v39 = vadd.f32 %v1060_v35, %v1059_v41 }
 0x16a   :  { %1062 = vst.msk [vmem:[%s2058_s4] sm:$0x1] %vm863_vm3, %v1061_v39 }

// kernel: _lambda_.25
= control target key start
LH: loop header
LB: loop body
LE: loop exit
PB: predicated region body
PF: predicated region fallthrough
CT: control target
= control target key end

     0   :  { %s175_s22 = smov 64   ;;  %vm137_vm0 = vcmask 519168   ;;  %s386_s0 = inlined_call_operand.vmem [shape: bf16[16,2,8,128], index: 0, kind: input, shape index: {}]   ;;  %s387_s1 = inlined_call_operand.vmem [shape: bf16[16,8,64], index: 1, kind: output, shape index: {}]  }
   0x1   :  { %v10_v0 = vld [vmem:[%s386_s0 + $0x10] sm:$0xf]  ;;  %v160_v1 = vld [vmem:[%s386_s0 + $0x14] sm:$0xf]  ;;  %v8_v2 = vld [vmem:[%s386_s0] sm:$0xf] }
   0x2   :  { %v195_v3 = vmax.bf16 %v160_v1, %v10_v0  ;;  %v158_v4 = vld [vmem:[%s386_s0 + $0x4] sm:$0xf]  ;;  %v11_v5 = vld [vmem:[%s386_s0 + $0x18] sm:$0xf]  ;;  %v161_v6 = vld [vmem:[%s386_s0 + $0x1c] sm:$0xf] }
   0x3   :  { %v206_v7 = vmax.bf16 %v158_v4, %v8_v2  ;;  %v9_v8 = vld [vmem:[%s386_s0 + $0x8] sm:$0xf]  ;;  %v159_v9 = vld [vmem:[%s386_s0 + $0xc] sm:$0xf]  ;;  %v216_v10 = vmax.bf16 %v161_v6, %v11_v5  ;;  %v12_v14 = vld [vmem:[%s386_s0 + $0x20] sm:$0xf] }
   0x4   :  { %77 = vrot.lane.b32.xlu1 %v195_v3, %s175_s22  ;;  %v220_v11 = vmax.bf16 %v159_v9, %v9_v8  ;;  %v13_v12 = vld [vmem:[%s386_s0 + $0x28] sm:$0xf]  ;;  %v163_v13 = vld [vmem:[%s386_s0 + $0x2c] sm:$0xf]  ;;  %v162_v15 = vld [vmem:[%s386_s0 + $0x24] sm:$0xf] }
   0x5   :  { %73 = vrot.lane.b32.xlu0 %v206_v7, %s175_s22  ;;  %v236_v16 = vmax.bf16 %v163_v13, %v13_v12  ;;  %v240_v17 = vmax.bf16 %v162_v15, %v12_v14  ;;  %v15_v18 = vld [vmem:[%s386_s0 + $0x38] sm:$0xf]  ;;  %v165_v19 = vld [vmem:[%s386_s0 + $0x3c] sm:$0xf]  ;;  %v14_v20 = vld [vmem:[%s386_s0 + $0x30] sm:$0xf] }
   0x6   :  { %v164_v21 = vld [vmem:[%s386_s0 + $0x34] sm:$0xf]  ;;  %v48_v22 = vmax.bf16 %v165_v19, %v15_v18  ;;  %v17_v24 = vld [vmem:[%s386_s0 + $0x48] sm:$0xf]  ;;  %v167_v25 = vld [vmem:[%s386_s0 + $0x4c] sm:$0xf] }
   0x7   :  { %v47_v23 = vmax.bf16 %v164_v21, %v14_v20  ;;  %v16_v26 = vld [vmem:[%s386_s0 + $0x40] sm:$0xf]  ;;  %v166_v27 = vld [vmem:[%s386_s0 + $0x44] sm:$0xf]  ;;  %v50_v28 = vmax.bf16 %v167_v25, %v17_v24  ;;  %v19_v30 = vld [vmem:[%s386_s0 + $0x58] sm:$0xf] }
   0x8   :  { %79 = vrot.lane.b32.xlu1 %v216_v10, %s175_s22  ;;  %v49_v29 = vmax.bf16 %v166_v27, %v16_v26  ;;  %v169_v31 = vld [vmem:[%s386_s0 + $0x5c] sm:$0xf]  ;;  %v18_v32 = vld [vmem:[%s386_s0 + $0x50] sm:$0xf]  ;;  %v168_v33 = vld [vmem:[%s386_s0 + $0x54] sm:$0xf] }
   0x9   :  { %75 = vrot.lane.b32.xlu0 %v220_v11, %s175_s22  ;;  %v52_v34 = vmax.bf16 %v169_v31, %v19_v30  ;;  %v51_v35 = vmax.bf16 %v168_v33, %v18_v32  ;;  %v21_v36 = vld [vmem:[%s386_s0 + $0x68] sm:$0xf]  ;;  %v171_v37 = vld [vmem:[%s386_s0 + $0x6c] sm:$0xf]  ;;  %v20_v38 = vld [vmem:[%s386_s0 + $0x60] sm:$0xf] }
   0xa   :  { %v170_v39 = vld [vmem:[%s386_s0 + $0x64] sm:$0xf]  ;;  %v54_v40 = vmax.bf16 %v171_v37, %v21_v36  ;;  %v23_v42 = vld [vmem:[%s386_s0 + $0x78] sm:$0xf]  ;;  %v173_v43 = vld [vmem:[%s386_s0 + $0x7c] sm:$0xf] }
   0xb   :  { %v53_v41 = vmax.bf16 %v170_v39, %v20_v38  ;;  %v22_v44 = vld [vmem:[%s386_s0 + $0x70] sm:$0xf]  ;;  %v172_v45 = vld [vmem:[%s386_s0 + $0x74] sm:$0xf]  ;;  %v56_v46 = vmax.bf16 %v173_v43, %v23_v42 }
   0xc   :  { %83 = vrot.lane.b32.xlu1 %v236_v16, %s175_s22  ;;  %v55_v47 = vmax.bf16 %v172_v45, %v22_v44 }
   0xd   :  { %81 = vrot.lane.b32.xlu0 %v240_v17, %s175_s22 }
  0x10   :  { %87 = vrot.lane.b32.xlu1 %v48_v22, %s175_s22 }
  0x11   :  { %85 = vrot.lane.b32.xlu0 %v47_v23, %s175_s22 }
  0x14   :  { %91 = vrot.lane.b32.xlu1 %v50_v28, %s175_s22 }
  0x15   :  { %89 = vrot.lane.b32.xlu0 %v49_v29, %s175_s22 }
  0x18   :  { %95 = vrot.lane.b32.xlu1 %v52_v34, %s175_s22 }
  0x19   :  { %93 = vrot.lane.b32.xlu0 %v51_v35, %s175_s22 }
  0x1c   :  { %99 = vrot.lane.b32.xlu1 %v54_v40, %s175_s22 }
  0x1d   :  { %97 = vrot.lane.b32.xlu0 %v53_v41, %s175_s22 }
  0x20   :  { %103 = vrot.lane.b32.xlu1 %v56_v46, %s175_s22 }
  0x21   :  { %101 = vrot.lane.b32.xlu0 %v55_v47, %s175_s22 }
  0x76   :  { %v78_v48 = vpop.permute.xlu1 %77 }
  0x77   :  { %v123_v49 = vmax.bf16 %v78_v48, %v195_v3  ;;  %v74_v50 = vpop.permute.xlu0 %73 }
  0x78   :  { %v121_v51 = vmax.bf16 %v74_v50, %v206_v7 }
  0x79   :  { %140 = vst.msk [vmem:[%s387_s1 + $0x8] sm:$0xf] %vm137_vm0, %v123_v49 }
  0x7a   :  { %138 = vst.msk [vmem:[%s387_s1] sm:$0xf] %vm137_vm0, %v121_v51  ;;  %v80_v52 = vpop.permute.xlu1 %79 }
  0x7b   :  { %v124_v53 = vmax.bf16 %v80_v52, %v216_v10  ;;  %v76_v54 = vpop.permute.xlu0 %75 }
  0x7c   :  { %v122_v55 = vmax.bf16 %v76_v54, %v220_v11 }
  0x7d   :  { %141 = vst.msk [vmem:[%s387_s1 + $0xc] sm:$0xf] %vm137_vm0, %v124_v53 }
  0x7e   :  { %139 = vst.msk [vmem:[%s387_s1 + $0x4] sm:$0xf] %vm137_vm0, %v122_v55  ;;  %v84_v56 = vpop.permute.xlu1 %83 }
  0x7f   :  { %v126_v57 = vmax.bf16 %v84_v56, %v236_v16  ;;  %v82_v58 = vpop.permute.xlu0 %81 }
  0x80   :  { %v125_v59 = vmax.bf16 %v82_v58, %v240_v17 }
  0x81   :  { %143 = vst.msk [vmem:[%s387_s1 + $0x14] sm:$0xf] %vm137_vm0, %v126_v57 }
  0x82   :  { %142 = vst.msk [vmem:[%s387_s1 + $0x10] sm:$0xf] %vm137_vm0, %v125_v59  ;;  %v88_v60 = vpop.permute.xlu1 %87 }
  0x83   :  { %v128_v61 = vmax.bf16 %v88_v60, %v48_v22  ;;  %v86_v62 = vpop.permute.xlu0 %85 }
  0x84   :  { %v127_v63 = vmax.bf16 %v86_v62, %v47_v23 }
  0x85   :  { %145 = vst.msk [vmem:[%s387_s1 + $0x1c] sm:$0xf] %vm137_vm0, %v128_v61 }
  0x86   :  { %144 = vst.msk [vmem:[%s387_s1 + $0x18] sm:$0xf] %vm137_vm0, %v127_v63  ;;  %v92_v0 = vpop.permute.xlu1 %91 }
  0x87   :  { %v130_v1 = vmax.bf16 %v92_v0, %v50_v28  ;;  %v90_v2 = vpop.permute.xlu0 %89 }
  0x88   :  { %v129_v3 = vmax.bf16 %v90_v2, %v49_v29 }
  0x89   :  { %147 = vst.msk [vmem:[%s387_s1 + $0x24] sm:$0xf] %vm137_vm0, %v130_v1 }
  0x8a   :  { %146 = vst.msk [vmem:[%s387_s1 + $0x20] sm:$0xf] %vm137_vm0, %v129_v3  ;;  %v96_v4 = vpop.permute.xlu1 %95 }
  0x8b   :  { %v132_v5 = vmax.bf16 %v96_v4, %v52_v34  ;;  %v94_v6 = vpop.permute.xlu0 %93 }
  0x8c   :  { %v131_v7 = vmax.bf16 %v94_v6, %v51_v35 }
  0x8d   :  { %149 = vst.msk [vmem:[%s387_s1 + $0x2c] sm:$0xf] %vm137_vm0, %v132_v5 }
  0x8e   :  { %148 = vst.msk [vmem:[%s387_s1 + $0x28] sm:$0xf] %vm137_vm0, %v131_v7  ;;  %v100_v8 = vpop.permute.xlu1 %99 }
  0x8f   :  { %v134_v9 = vmax.bf16 %v100_v8, %v54_v40  ;;  %v98_v10 = vpop.permute.xlu0 %97 }
  0x90   :  { %v133_v11 = vmax.bf16 %v98_v10, %v53_v41 }
  0x91   :  { %151 = vst.msk [vmem:[%s387_s1 + $0x34] sm:$0xf] %vm137_vm0, %v134_v9 }
  0x92   :  { %150 = vst.msk [vmem:[%s387_s1 + $0x30] sm:$0xf] %vm137_vm0, %v133_v11  ;;  %v104_v12 = vpop.permute.xlu1 %103 }
  0x93   :  { %v136_v13 = vmax.bf16 %v104_v12, %v56_v46  ;;  %v102_v14 = vpop.permute.xlu0 %101 }
  0x94   :  { %v135_v15 = vmax.bf16 %v102_v14, %v55_v47 }
  0x95   :  { %153 = vst.msk [vmem:[%s387_s1 + $0x3c] sm:$0xf] %vm137_vm0, %v136_v13 }
  0x96   :  { %152 = vst.msk [vmem:[%s387_s1 + $0x38] sm:$0xf] %vm137_vm0, %v135_v15 }

// kernel: _lambda_.23
= control target key start
LH: loop header
LB: loop body
LE: loop exit
PB: predicated region body
PF: predicated region fallthrough
CT: control target
= control target key end

     0   :  { %v3297_v0 = vmov 0   ;;  %vm1295_vm0 = vcmask 523264   ;;  %vm2456_vm1 = vcmask 516096   ;;  %s4747_s1 = inlined_call_operand.vmem [shape: bf16[576,64], index: 1, kind: input, shape index: {}]   ;;  %s4748_s0 = inlined_call_operand.vmem [shape: bf16[512,576], index: 0, kind: input, shape index: {}]   ;;  %s4749_s2 = inlined_call_operand.vmem [shape: f32[512,64], index: 2, kind: output, shape index: {0}]   ;;  %s4750_s3 = inlined_call_operand.vmem [shape: f32[1,1,64], index: 3, kind: output, shape index: {1}]   ;;  %s4751_s4 = inlined_call_operand.vmem [shape: f32[1,1,64], index: 4, kind: output, shape index: {2}]  }
   0x1   :  { %1392 = vmatprep.subr.bf16.mxu0 %v3297_v0  ;;  %3004 = vmatprep.subr.bf16.mxu1 %v3297_v0  ;;  %v3037_v1 = vld [vmem:[%s4747_s1 + $0x38] sm:$0xff]   ;;  %v3038_v2 = vld [vmem:[%s4747_s1 + $0x30] sm:$0xff]   ;;  %v3039_v3 = vld [vmem:[%s4747_s1 + $0x28] sm:$0xff]  }
   0x2   :  { %1393 = vmatpush1.bf16.msra.mxu0 %v3037_v1  ;;  %3020 = vmatpush1.bf16.msra.mxu1 %v3037_v1  ;;  %v3040_v4 = vld [vmem:[%s4747_s1 + $0x20] sm:$0xff]   ;;  %v3041_v5 = vld [vmem:[%s4747_s1 + $0x18] sm:$0xff]   ;;  %v3042_v7 = vld [vmem:[%s4747_s1 + $0x10] sm:$0xff]  }
   0x3   :  { %1394 = vmatprep.subr.bf16.mxu0 %v3297_v0  ;;  %3005 = vmatprep.subr.bf16.mxu1 %v3297_v0  ;;  %v3055_v6 = vld [vmem:[%s4748_s0 + $0x4] ss:$20 sps:$4 sm:$0xff]   ;;  %v3043_v9 = vld [vmem:[%s4747_s1 + $0x8] sm:$0xff]   ;;  %v3046_v12 = vld [vmem:[%s4747_s1 + $0x70] sm:$0xff]  }
   0x4   :  { %v3058_v8 = vld [vmem:[%s4748_s0 + $0x3c4] ss:$20 sps:$4 sm:$0xff]   ;;  %1424 = vmatprep.mubr.bf16.mxu0 %v3055_v6  ;;  %v3047_v13 = vld [vmem:[%s4747_s1 + $0x68] sm:$0xff]   ;;  %v3050_v16 = vld [vmem:[%s4747_s1 + $0x50] sm:$0xff]  }
   0x5   :  { %1616 = vmatprep.mubr.bf16.mxu1 %v3058_v8  ;;  %v3044_v10 = vld [vmem:[%s4747_s1] sm:$0xff]   ;;  %v3045_v11 = vld [vmem:[%s4747_s1 + $0x78] sm:$0xff]   ;;  %v3051_v17 = vld [vmem:[%s4747_s1 + $0x48] sm:$0xff]  }
   0x6   :  { %1395 = vmatpush1.bf16.msra.mxu0 %v3038_v2  ;;  %3021 = vmatpush1.bf16.msra.mxu1 %v3038_v2  ;;  %v3048_v14 = vld [vmem:[%s4747_s1 + $0x60] sm:$0xff]   ;;  %v3049_v15 = vld [vmem:[%s4747_s1 + $0x58] sm:$0xff]   ;;  %v3108_v25 = vld [vmem:[%s4747_s1 + $0x110] sm:$0xff]  }
   0x7   :  { %1396 = vmatprep.subr.bf16.mxu0 %v3297_v0  ;;  %3006 = vmatprep.subr.bf16.mxu1 %v3297_v0  ;;  %v3052_v18 = vld [vmem:[%s4747_s1 + $0x40] sm:$0xff]   ;;  %v3059_v19 = vld [vmem:[%s4747_s1 + $0x118] sm:$0xff]   ;;  %v3061_v26 = vld [vmem:[%s4747_s1 + $0xb0] sm:$0xff]  }
   0x8   :  { %v3053_v20 = vld [vmem:[%s4748_s0] ss:$20 sps:$4 sm:$0xff]   ;;  %v3060_v22 = vld [vmem:[%s4747_s1 + $0xb8] sm:$0xff]   ;;  %v3068_v29 = vld [vmem:[%s4747_s1 + $0xa8] sm:$0xff]  }
   0x9   :  { %v3056_v21 = vld [vmem:[%s4748_s0 + $0x3c0] ss:$20 sps:$4 sm:$0xff]   ;;  %v3066_v27 = vld [vmem:[%s4748_s0 + $0x28] ss:$20 sps:$4 sm:$0xff]   ;;  %v3074_v34 = vld [vmem:[%s4748_s0 + $0x50] ss:$20 sps:$4 sm:$0xff]  }
   0xa   :  { %1397 = vmatpush1.bf16.msra.mxu0 %v3039_v3  ;;  %3022 = vmatpush1.bf16.msra.mxu1 %v3039_v3  ;;  %v3062_v23 = vld [vmem:[%s4748_s0 + $0x2c] ss:$20 sps:$4 sm:$0xff]   ;;  %v3067_v28 = vld [vmem:[%s4748_s0 + $0x3e8] ss:$20 sps:$4 sm:$0xff]   ;;  %v3075_v35 = vld [vmem:[%s4748_s0 + $0x410] ss:$20 sps:$4 sm:$0xff]  }
   0xb   :  { %1398 = vmatprep.subr.bf16.mxu0 %v3297_v0  ;;  %3007 = vmatprep.subr.bf16.mxu1 %v3297_v0  ;;  %v3064_v24 = vld [vmem:[%s4748_s0 + $0x3ec] ss:$20 sps:$4 sm:$0xff]   ;;  %v3070_v31 = vld [vmem:[%s4748_s0 + $0x54] ss:$20 sps:$4 sm:$0xff]   ;;  %v3076_v36 = vld [vmem:[%s4747_s1 + $0x98] sm:$0xff]  }
   0xc   :  { %v3149_v30 = vld [vmem:[%s4747_s1 + $0x108] sm:$0xff]   ;;  %v3069_v33 = vld [vmem:[%s4747_s1 + $0xa0] sm:$0xff]   ;;  %v3078_v37 = vld [vmem:[%s4748_s0 + $0x7c] ss:$20 sps:$4 sm:$0xff]  }
   0xd   :  { %v3072_v32 = vld [vmem:[%s4748_s0 + $0x414] ss:$20 sps:$4 sm:$0xff]   ;;  %v3080_v38 = vld [vmem:[%s4748_s0 + $0x43c] ss:$20 sps:$4 sm:$0xff]   ;;  %v3082_v40 = vld [vmem:[%s4748_s0 + $0x78] ss:$20 sps:$4 sm:$0xff]  }
   0xe   :  { %1399 = vmatpush1.bf16.msra.mxu0 %v3040_v4  ;;  %3023 = vmatpush1.bf16.msra.mxu1 %v3040_v4  ;;  %v3077_v39 = vld [vmem:[%s4747_s1 + $0x90] sm:$0xff]   ;;  %v3083_v41 = vld [vmem:[%s4748_s0 + $0x438] ss:$20 sps:$4 sm:$0xff]   ;;  %v3186_v44 = vld [vmem:[%s4747_s1 + $0x100] sm:$0xff]  }
   0xf   :  { %1400 = vmatprep.subr.bf16.mxu0 %v3297_v0  ;;  %3008 = vmatprep.subr.bf16.mxu1 %v3297_v0  ;;  %v3084_v42 = vld [vmem:[%s4747_s1 + $0x88] sm:$0xff]   ;;  %v3086_v43 = vld [vmem:[%s4748_s0 + $0xa4] ss:$20 sps:$4 sm:$0xff]   ;;  %v3090_v47 = vld [vmem:[%s4748_s0 + $0xa0] ss:$20 sps:$4 sm:$0xff]  }
  0x10   :  { %v3088_v45 = vld [vmem:[%s4748_s0 + $0x464] ss:$20 sps:$4 sm:$0xff]   ;;  %v3091_v48 = vld [vmem:[%s4748_s0 + $0x460] ss:$20 sps:$4 sm:$0xff]   ;;  %v3098_v53 = vld [vmem:[%s4748_s0 + $0xc8] ss:$20 sps:$4 sm:$0xff]  }
  0x11   :  { %v3085_v46 = vld [vmem:[%s4747_s1 + $0x80] sm:$0xff]   ;;  %v3092_v49 = vld [vmem:[%s4747_s1 + $0xf8] sm:$0xff]   ;;  %v3093_v52 = vld [vmem:[%s4747_s1 + $0xf0] sm:$0xff]  }
  0x12   :  { %1401 = vmatpush1.bf16.msra.mxu0 %v3041_v5  ;;  %3024 = vmatpush1.bf16.msra.mxu1 %v3041_v5  ;;  %v3094_v50 = vld [vmem:[%s4748_s0 + $0xcc] ss:$20 sps:$4 sm:$0xff]   ;;  %v3099_v54 = vld [vmem:[%s4748_s0 + $0x488] ss:$20 sps:$4 sm:$0xff]   ;;  %v3106_v59 = vld [vmem:[%s4748_s0 + $0xf0] ss:$20 sps:$4 sm:$0xff]  }
  0x13   :  { %1402 = vmatprep.subr.bf16.mxu0 %v3297_v0  ;;  %3009 = vmatprep.subr.bf16.mxu1 %v3297_v0  ;;  %v3096_v51 = vld [vmem:[%s4748_s0 + $0x48c] ss:$20 sps:$4 sm:$0xff]   ;;  %v3102_v56 = vld [vmem:[%s4748_s0 + $0xf4] ss:$20 sps:$4 sm:$0xff]   ;;  %v3107_v60 = vld [vmem:[%s4748_s0 + $0x4b0] ss:$20 sps:$4 sm:$0xff]  }
  0x14   :  { %v3100_v55 = vld [vmem:[%s4747_s1 + $0xe8] sm:$0xff]   ;;  %v3101_v58 = vld [vmem:[%s4747_s1 + $0xe0] sm:$0xff]   ;;  %v3109_v61 = vld [vmem:[%s4747_s1 + $0xd8] sm:$0xff]  }
  0x15   :  { %v3104_v57 = vld [vmem:[%s4748_s0 + $0x4b4] ss:$20 sps:$4 sm:$0xff]   ;;  %v3111_v62 = vld [vmem:[%s4748_s0 + $0x11c] ss:$20 sps:$4 sm:$0xff]   ;;  %v3115_v2 = vld [vmem:[%s4748_s0 + $0x118] ss:$20 sps:$4 sm:$0xff]  }
  0x16   :  { %1403 = vmatpush1.bf16.msra.mxu0 %v3042_v7  ;;  %3025 = vmatpush1.bf16.msra.mxu1 %v3042_v7  ;;  %v3113_v63 = vld [vmem:[%s4748_s0 + $0x4dc] ss:$20 sps:$4 sm:$0xff]   ;;  %v3116_v3 = vld [vmem:[%s4748_s0 + $0x4d8] ss:$20 sps:$4 sm:$0xff]   ;;  %v3118_v7 = vld [vmem:[%s4747_s1 + $0xc0] sm:$0xff]  }
  0x17   :  { %1404 = vmatprep.subr.bf16.mxu0 %v3297_v0  ;;  %3010 = vmatprep.subr.bf16.mxu1 %v3297_v0  ;;  %v3110_v1 = vld [vmem:[%s4747_s1 + $0xd0] sm:$0xff]   ;;  %v3117_v4 = vld [vmem:[%s4747_s1 + $0xc8] sm:$0xff]   ;;  %v3119_v5 = vld [vmem:[%s4748_s0 + $0x144] ss:$20 sps:$4 sm:$0xff]  }
  0x18   :  { %v3123_v6 = vld [vmem:[%s4748_s0 + $0xc] ss:$20 sps:$4 sm:$0xff]   ;;  %v3121_v8 = vld [vmem:[%s4748_s0 + $0x8] ss:$20 sps:$4 sm:$0xff]  }
  0x1a   :  { %1405 = vmatpush1.bf16.msra.mxu0 %v3043_v9  ;;  %3026 = vmatpush1.bf16.msra.mxu1 %v3043_v9  ;;  %v3124_v9 = vld [vmem:[%s4748_s0 + $0x140] ss:$20 sps:$4 sm:$0xff]  }
  0x1b   :  { %1406 = vmatprep.subr.bf16.mxu0 %v3297_v0  ;;  %3011 = vmatprep.subr.bf16.mxu1 %v3297_v0 }
  0x1e   :  { %1407 = vmatpush1.bf16.msra.mxu0 %v3044_v10  ;;  %3027 = vmatpush1.bf16.msra.mxu1 %v3044_v10  ;;  %v3125_v10 = vld [vmem:[%s4748_s0 + $0x16c] ss:$20 sps:$4 sm:$0xff]  }
  0x1f   :  { %1408 = vmatprep.subr.bf16.mxu0 %v3297_v0  ;;  %3012 = vmatprep.subr.bf16.mxu1 %v3297_v0 }
  0x22   :  { %1409 = vmatpush2.bf16.msra.mxu0 %v3045_v11  ;;  %3028 = vmatpush2.bf16.msra.mxu1 %v3045_v11  ;;  %v3127_v11 = vld [vmem:[%s4748_s0 + $0x34] ss:$20 sps:$4 sm:$0xff]  }
  0x23   :  { %1410 = vmatprep.subr.bf16.mxu0 %v3297_v0  ;;  %3013 = vmatprep.subr.bf16.mxu1 %v3297_v0 }
  0x26   :  { %1411 = vmatpush2.bf16.msra.mxu0 %v3046_v12  ;;  %3029 = vmatpush2.bf16.msra.mxu1 %v3046_v12  ;;  %v3130_v12 = vld [vmem:[%s4748_s0 + $0x30] ss:$20 sps:$4 sm:$0xff]  }
  0x27   :  { %1412 = vmatprep.subr.bf16.mxu0 %v3297_v0  ;;  %3014 = vmatprep.subr.bf16.mxu1 %v3297_v0 }
  0x2a   :  { %1413 = vmatpush2.bf16.msra.mxu0 %v3047_v13  ;;  %3030 = vmatpush2.bf16.msra.mxu1 %v3047_v13  ;;  %v3131_v13 = vld [vmem:[%s4748_s0 + $0x194] ss:$20 sps:$4 sm:$0xff]  }
  0x2b   :  { %1414 = vmatprep.subr.bf16.mxu0 %v3297_v0  ;;  %3015 = vmatprep.subr.bf16.mxu1 %v3297_v0 }
  0x2e   :  { %1415 = vmatpush2.bf16.msra.mxu0 %v3048_v14  ;;  %3031 = vmatpush2.bf16.msra.mxu1 %v3048_v14  ;;  %v3133_v14 = vld [vmem:[%s4748_s0 + $0x5c] ss:$20 sps:$4 sm:$0xff]  }
  0x2f   :  { %1416 = vmatprep.subr.bf16.mxu0 %v3297_v0  ;;  %3016 = vmatprep.subr.bf16.mxu1 %v3297_v0 }
  0x32   :  { %1417 = vmatpush2.bf16.msra.mxu0 %v3049_v15  ;;  %3032 = vmatpush2.bf16.msra.mxu1 %v3049_v15  ;;  %v3135_v15 = vld [vmem:[%s4748_s0 + $0x190] ss:$20 sps:$4 sm:$0xff]  }
  0x33   :  { %1418 = vmatprep.subr.bf16.mxu0 %v3297_v0  ;;  %3017 = vmatprep.subr.bf16.mxu1 %v3297_v0 }
  0x36   :  { %1419 = vmatpush2.bf16.msra.mxu0 %v3050_v16  ;;  %3033 = vmatpush2.bf16.msra.mxu1 %v3050_v16  ;;  %v3136_v16 = vld [vmem:[%s4748_s0 + $0x58] ss:$20 sps:$4 sm:$0xff]  }
  0x37   :  { %1420 = vmatprep.subr.bf16.mxu0 %v3297_v0  ;;  %3018 = vmatprep.subr.bf16.mxu1 %v3297_v0 }
  0x3a   :  { %1421 = vmatpush2.bf16.msra.mxu0 %v3051_v17  ;;  %3034 = vmatpush2.bf16.msra.mxu1 %v3051_v17  ;;  %v3137_v17 = vld [vmem:[%s4748_s0 + $0x1bc] ss:$20 sps:$4 sm:$0xff]  }
  0x3b   :  { %1422 = vmatprep.subr.bf16.mxu0 %v3297_v0  ;;  %3019 = vmatprep.subr.bf16.mxu1 %v3297_v0 }
  0x3e   :  { %1423 = vmatpush2.bf16.msra.mxu0 %v3052_v18  ;;  %3035 = vmatpush2.bf16.msra.mxu1 %v3052_v18  ;;  %v3139_v18 = vld [vmem:[%s4748_s0 + $0x84] ss:$20 sps:$4 sm:$0xff]  }
  0x3f   :  { %1681 = vmatprep.subr.bf16.mxu1 %v3297_v0  ;;  %2932 = vmatprep.subr.bf16.mxu0 %v3059_v19 }
  0x41   :  { %1425 = vmatmul.mubr.bf16.vlgmr.msra.gmra.mxu0 %v3053_v20  ;;  %1617 = vmatmul.mubr.bf16.vlgmr.msra.gmra.mxu1 %v3056_v21  ;;  %v3142_v20 = vld [vmem:[%s4748_s0 + $0x80] ss:$20 sps:$4 sm:$0xff]   ;;  %v3143_v21 = vld [vmem:[%s4748_s0 + $0x1e4] ss:$20 sps:$4 sm:$0xff]  }
  0x42   :  { %1682 = vmatpush1.bf16.msra.mxu1 %v3060_v22  ;;  %2933 = vmatpush3.bf16.msra.mxu0 %v3059_v19  ;;  %v3141_v19 = vld [vmem:[%s4748_s0 + $0x1b8] ss:$20 sps:$4 sm:$0xff]  }
  0x43   :  { %1683 = vmatprep.subr.bf16.mxu1 %v3297_v0  ;;  %1432 = vmatprep.mubr.bf16.mxu0 %v3062_v23  ;;  %v3145_v22 = vld [vmem:[%s4748_s0 + $0xac] ss:$20 sps:$4 sm:$0xff]  }
  0x44   :  { %1624 = vmatprep.mubr.bf16.mxu1 %v3064_v24  ;;  %2934 = vmatprep.subr.bf16.mxu0 %v3108_v25  ;;  %v3147_v23 = vld [vmem:[%s4748_s0 + $0x1e0] ss:$20 sps:$4 sm:$0xff]   ;;  %v3148_v24 = vld [vmem:[%s4748_s0 + $0xa8] ss:$20 sps:$4 sm:$0xff]  }
  0x46   :  { %1684 = vmatpush1.bf16.msra.mxu1 %v3061_v26  ;;  %2935 = vmatpush3.bf16.msra.mxu0 %v3108_v25  ;;  %v3150_v25 = vld [vmem:[%s4748_s0 + $0x20c] ss:$20 sps:$4 sm:$0xff]   ;;  %v3152_v26 = vld [vmem:[%s4748_s0 + $0xd4] ss:$20 sps:$4 sm:$0xff]  }
  0x47   :  { %1685 = vmatprep.subr.bf16.mxu1 %v3297_v0  ;;  %2936 = vmatprep.subr.bf16.mxu0 %v3149_v30 }
  0x49   :  { %1433 = vmatmul.mubr.bf16.gmra.mxu0 %v3066_v27  ;;  %1625 = vmatmul.mubr.bf16.gmra.mxu1 %v3067_v28  ;;  %v3154_v27 = vld [vmem:[%s4748_s0 + $0x208] ss:$20 sps:$4 sm:$0xff]   ;;  %v3155_v28 = vld [vmem:[%s4748_s0 + $0xd0] ss:$20 sps:$4 sm:$0xff]  }
  0x4a   :  { %1686 = vmatpush1.bf16.msra.mxu1 %v3068_v29  ;;  %1440 = vmatprep.mubr.bf16.mxu0 %v3070_v31  ;;  %v3156_v29 = vld [vmem:[%s4748_s0 + $0x234] ss:$20 sps:$4 sm:$0xff]   ;;  %v3160_v31 = vld [vmem:[%s4748_s0 + $0x230] ss:$20 sps:$4 sm:$0xff]  }
  0x4b   :  { %1687 = vmatprep.subr.bf16.mxu1 %v3297_v0  ;;  %1632 = vmatprep.mubr.bf16.mxu1 %v3072_v32  ;;  %v3161_v32 = vld [vmem:[%s4748_s0 + $0xf8] ss:$20 sps:$4 sm:$0xff]  }
  0x4c   :  { %2937 = vmatpush3.bf16.msra.mxu0 %v3149_v30  ;;  %v3158_v30 = vld [vmem:[%s4748_s0 + $0xfc] ss:$20 sps:$4 sm:$0xff]  }
  0x4d   :  { %2938 = vmatprep.subr.bf16.mxu0 %v3186_v44 }
  0x4e   :  { %1688 = vmatpush1.bf16.msra.mxu1 %v3069_v33  ;;  %v3162_v33 = vld [vmem:[%s4748_s0 + $0x25c] ss:$20 sps:$4 sm:$0xff]  }
  0x4f   :  { %1689 = vmatprep.subr.bf16.mxu1 %v3297_v0 }
  0x50   :  { %2939 = vmatpush3.bf16.msra.mxu0 %v3186_v44  ;;  %v3179_v44 = vld [vmem:[%s4748_s0 + $0x170] ss:$20 sps:$4 sm:$0xff]  }
  0x51   :  { %1441 = vmatmul.mubr.bf16.gmra.mxu0 %v3074_v34  ;;  %1633 = vmatmul.mubr.bf16.gmra.mxu1 %v3075_v35  ;;  %v3164_v34 = vld [vmem:[%s4748_s0 + $0x124] ss:$20 sps:$4 sm:$0xff]  }
  0x52   :  { %1690 = vmatpush1.bf16.msra.mxu1 %v3076_v36  ;;  %1448 = vmatprep.mubr.bf16.mxu0 %v3078_v37  ;;  %v3166_v35 = vld [vmem:[%s4748_s0 + $0x258] ss:$20 sps:$4 sm:$0xff]   ;;  %v3167_v36 = vld [vmem:[%s4748_s0 + $0x120] ss:$20 sps:$4 sm:$0xff]  }
  0x53   :  { %1691 = vmatprep.subr.bf16.mxu1 %v3297_v0  ;;  %1640 = vmatprep.mubr.bf16.mxu1 %v3080_v38  ;;  %v3168_v37 = vld [vmem:[%s4748_s0 + $0x284] ss:$20 sps:$4 sm:$0xff]   ;;  %v3170_v38 = vld [vmem:[%s4748_s0 + $0x14c] ss:$20 sps:$4 sm:$0xff]  }
  0x56   :  { %1692 = vmatpush1.bf16.msra.mxu1 %v3077_v39  ;;  %v3172_v39 = vld [vmem:[%s4748_s0 + $0x280] ss:$20 sps:$4 sm:$0xff]  }
  0x57   :  { %1693 = vmatprep.subr.bf16.mxu1 %v3297_v0 }
  0x59   :  { %1449 = vmatmul.mubr.bf16.gmra.mxu0 %v3082_v40  ;;  %1641 = vmatmul.mubr.bf16.gmra.mxu1 %v3083_v41  ;;  %v3173_v40 = vld [vmem:[%s4748_s0 + $0x148] ss:$20 sps:$4 sm:$0xff]   ;;  %v3174_v41 = vld [vmem:[%s4748_s0 + $0x2ac] ss:$20 sps:$4 sm:$0xff]  }
  0x5a   :  { %1694 = vmatpush1.bf16.msra.mxu1 %v3084_v42  ;;  %1456 = vmatprep.mubr.bf16.mxu0 %v3086_v43  ;;  %v3176_v42 = vld [vmem:[%s4748_s0 + $0x174] ss:$20 sps:$4 sm:$0xff]  }
  0x5b   :  { %1695 = vmatprep.subr.bf16.mxu1 %v3297_v0  ;;  %1648 = vmatprep.mubr.bf16.mxu1 %v3088_v45  ;;  %v3178_v43 = vld [vmem:[%s4748_s0 + $0x2a8] ss:$20 sps:$4 sm:$0xff]  }
  0x5c   :  { %v3180_v45 = vld [vmem:[%s4748_s0 + $0x2d4] ss:$20 sps:$4 sm:$0xff]  }
  0x5e   :  { %1696 = vmatpush1.bf16.msra.mxu1 %v3085_v46  ;;  %v3182_v46 = vld [vmem:[%s4748_s0 + $0x19c] ss:$20 sps:$4 sm:$0xff]  }
  0x5f   :  { %1697 = vmatprep.subr.bf16.mxu1 %v3297_v0 }
  0x61   :  { %1457 = vmatmul.mubr.bf16.gmra.mxu0 %v3090_v47  ;;  %1649 = vmatmul.mubr.bf16.gmra.mxu1 %v3091_v48  ;;  %v3184_v47 = vld [vmem:[%s4748_s0 + $0x2d0] ss:$20 sps:$4 sm:$0xff]   ;;  %v3185_v48 = vld [vmem:[%s4748_s0 + $0x198] ss:$20 sps:$4 sm:$0xff]  }
  0x62   :  { %1698 = vmatpush2.bf16.msra.mxu1 %v3092_v49  ;;  %1464 = vmatprep.mubr.bf16.mxu0 %v3094_v50  ;;  %v3187_v49 = vld [vmem:[%s4748_s0 + $0x2fc] ss:$20 sps:$4 sm:$0xff]   ;;  %v3189_v50 = vld [vmem:[%s4748_s0 + $0x1c4] ss:$20 sps:$4 sm:$0xff]  }
  0x63   :  { %1699 = vmatprep.subr.bf16.mxu1 %v3297_v0  ;;  %1656 = vmatprep.mubr.bf16.mxu1 %v3096_v51  ;;  %v3191_v51 = vld [vmem:[%s4748_s0 + $0x2f8] ss:$20 sps:$4 sm:$0xff]  }
  0x66   :  { %1700 = vmatpush2.bf16.msra.mxu1 %v3093_v52  ;;  %v3192_v52 = vld [vmem:[%s4748_s0 + $0x1c0] ss:$20 sps:$4 sm:$0xff]  }
  0x67   :  { %1701 = vmatprep.subr.bf16.mxu1 %v3297_v0 }
  0x69   :  { %1465 = vmatmul.mubr.bf16.gmra.mxu0 %v3098_v53  ;;  %1657 = vmatmul.mubr.bf16.gmra.mxu1 %v3099_v54  ;;  %v3193_v53 = vld [vmem:[%s4748_s0 + $0x324] ss:$20 sps:$4 sm:$0xff]   ;;  %v3195_v54 = vld [vmem:[%s4748_s0 + $0x1ec] ss:$20 sps:$4 sm:$0xff]  }
  0x6a   :  { %1702 = vmatpush2.bf16.msra.mxu1 %v3100_v55  ;;  %1472 = vmatprep.mubr.bf16.mxu0 %v3102_v56  ;;  %v3197_v55 = vld [vmem:[%s4748_s0 + $0x320] ss:$20 sps:$4 sm:$0xff]   ;;  %v3198_v56 = vld [vmem:[%s4748_s0 + $0x1e8] ss:$20 sps:$4 sm:$0xff]  }
  0x6b   :  { %1703 = vmatprep.subr.bf16.mxu1 %v3297_v0  ;;  %1664 = vmatprep.mubr.bf16.mxu1 %v3104_v57  ;;  %v3199_v57 = vld [vmem:[%s4748_s0 + $0x34c] ss:$20 sps:$4 sm:$0xff]  }
  0x6e   :  { %1704 = vmatpush2.bf16.msra.mxu1 %v3101_v58  ;;  %v3201_v58 = vld [vmem:[%s4748_s0 + $0x214] ss:$20 sps:$4 sm:$0xff]  }
  0x6f   :  { %1705 = vmatprep.subr.bf16.mxu1 %v3297_v0 }
  0x71   :  { %1473 = vmatmul.mubr.bf16.gmra.mxu0 %v3106_v59  ;;  %1665 = vmatmul.mubr.bf16.gmra.mxu1 %v3107_v60  ;;  %v3203_v59 = vld [vmem:[%s4748_s0 + $0x348] ss:$20 sps:$4 sm:$0xff]   ;;  %v3204_v60 = vld [vmem:[%s4748_s0 + $0x210] ss:$20 sps:$4 sm:$0xff]  }
  0x72   :  { %1706 = vmatpush2.bf16.msra.mxu1 %v3109_v61  ;;  %1480 = vmatprep.mubr.bf16.mxu0 %v3111_v62  ;;  %v3205_v61 = vld [vmem:[%s4748_s0 + $0x374] ss:$20 sps:$4 sm:$0xff]   ;;  %v3207_v62 = vld [vmem:[%s4748_s0 + $0x23c] ss:$20 sps:$4 sm:$0xff]  }
  0x73   :  { %1707 = vmatprep.subr.bf16.mxu1 %v3297_v0  ;;  %1672 = vmatprep.mubr.bf16.mxu1 %v3113_v63  ;;  %v3209_v63 = vld [vmem:[%s4748_s0 + $0x370] ss:$20 sps:$4 sm:$0xff]  }
  0x76   :  { %1708 = vmatpush2.bf16.msra.mxu1 %v3110_v1  ;;  %v3210_v1 = vld [vmem:[%s4748_s0 + $0x238] ss:$20 sps:$4 sm:$0xff]  }
  0x77   :  { %1709 = vmatprep.subr.bf16.mxu1 %v3297_v0 }
  0x79   :  { %1481 = vmatmul.mubr.bf16.gmra.mxu0 %v3115_v2  ;;  %1673 = vmatmul.mubr.bf16.gmra.mxu1 %v3116_v3  ;;  %v3211_v2 = vld [vmem:[%s4748_s0 + $0x39c] ss:$20 sps:$4 sm:$0xff]   ;;  %v3213_v3 = vld [vmem:[%s4748_s0 + $0x264] ss:$20 sps:$4 sm:$0xff]  }
  0x7a   :  { %1710 = vmatpush2.bf16.msra.mxu1 %v3117_v4  ;;  %1488 = vmatprep.mubr.bf16.mxu0 %v3119_v5  ;;  %v3215_v4 = vld [vmem:[%s4748_s0 + $0x398] ss:$20 sps:$4 sm:$0xff]   ;;  %v3216_v5 = vld [vmem:[%s4748_s0 + $0x260] ss:$20 sps:$4 sm:$0xff]  }
  0x7b   :  { %1711 = vmatprep.subr.bf16.mxu1 %v3297_v0  ;;  %1713 = vmatprep.mubr.bf16.mxu1 %v3123_v6  ;;  %v3129_v0 = vld [vmem:[%s4748_s0 + $0x168] ss:$20 sps:$4 sm:$0xff]   ;;  %v3217_v6 = vld [vmem:[%s4748_s0 + $0x28c] ss:$20 sps:$4 sm:$0xff]  }
  0x7e   :  { %1712 = vmatpush2.bf16.msra.mxu1 %v3118_v7  ;;  %v3219_v7 = vld [vmem:[%s4748_s0 + $0x10] ss:$20 sps:$4 sm:$0xff]  }
  0x81   :  { %1489 = vmatmul.mubr.bf16.gmra.mxu0 %v3124_v9  ;;  %1714 = vmatmul.mubr.bf16.vlgmr.msra.gmra.mxu1 %v3121_v8  ;;  %v3220_v8 = vld [vmem:[%s4748_s0 + $0x288] ss:$20 sps:$4 sm:$0xff]   ;;  %v3221_v9 = vld [vmem:[%s4748_s0 + $0x38] ss:$20 sps:$4 sm:$0xff]  }
  0x82   :  { %1496 = vmatprep.mubr.bf16.mxu0 %v3125_v10  ;;  %1721 = vmatprep.mubr.bf16.mxu1 %v3127_v11  ;;  %v3222_v10 = vld [vmem:[%s4748_s0 + $0x2b4] ss:$20 sps:$4 sm:$0xff]  }
  0x83   :  { %v3224_v11 = vld [vmem:[%s4748_s0 + $0x60] ss:$20 sps:$4 sm:$0xff]  }
  0x89   :  { %1497 = vmatmul.mubr.bf16.gmra.mxu0 %v3129_v0  ;;  %1722 = vmatmul.mubr.bf16.gmra.mxu1 %v3130_v12 }
  0x8a   :  { %1504 = vmatprep.mubr.bf16.mxu0 %v3131_v13  ;;  %1729 = vmatprep.mubr.bf16.mxu1 %v3133_v14 }
  0x91   :  { %1505 = vmatmul.mubr.bf16.gmra.mxu0 %v3135_v15  ;;  %1730 = vmatmul.mubr.bf16.gmra.mxu1 %v3136_v16 }
  0x92   :  { %1512 = vmatprep.mubr.bf16.mxu0 %v3137_v17  ;;  %1737 = vmatprep.mubr.bf16.mxu1 %v3139_v18  ;;  %v3225_v17 = vld [vmem:[%s4748_s0 + $0x2b0] ss:$20 sps:$4 sm:$0xff]   ;;  %v3226_v18 = vld [vmem:[%s4748_s0 + $0x88] ss:$20 sps:$4 sm:$0xff]  }
  0x99   :  { %1513 = vmatmul.mubr.bf16.gmra.mxu0 %v3141_v19  ;;  %1738 = vmatmul.mubr.bf16.gmra.mxu1 %v3142_v20  ;;  %v3227_v19 = vld [vmem:[%s4748_s0 + $0x2dc] ss:$20 sps:$4 sm:$0xff]  }
  0x9a   :  { %1520 = vmatprep.mubr.bf16.mxu0 %v3143_v21  ;;  %1745 = vmatprep.mubr.bf16.mxu1 %v3145_v22  ;;  %v3229_v20 = vld [vmem:[%s4748_s0 + $0xb0] ss:$20 sps:$4 sm:$0xff]  }
  0xa1   :  { %1521 = vmatmul.mubr.bf16.gmra.mxu0 %v3147_v23  ;;  %1746 = vmatmul.mubr.bf16.gmra.mxu1 %v3148_v24 }
  0xa2   :  { %1528 = vmatprep.mubr.bf16.mxu0 %v3150_v25  ;;  %1753 = vmatprep.mubr.bf16.mxu1 %v3152_v26 }
  0xa9   :  { %1529 = vmatmul.mubr.bf16.gmra.mxu0 %v3154_v27  ;;  %1754 = vmatmul.mubr.bf16.gmra.mxu1 %v3155_v28 }
  0xaa   :  { %1536 = vmatprep.mubr.bf16.mxu0 %v3156_v29  ;;  %1761 = vmatprep.mubr.bf16.mxu1 %v3158_v30  ;;  %v3230_v29 = vld [vmem:[%s4748_s0 + $0x2d8] ss:$20 sps:$4 sm:$0xff]  }
  0xab   :  { %v3231_v30 = vld [vmem:[%s4748_s0 + $0xd8] ss:$20 sps:$4 sm:$0xff]  }
  0xb1   :  { %1537 = vmatmul.mubr.bf16.gmra.mxu0 %v3160_v31  ;;  %1762 = vmatmul.mubr.bf16.gmra.mxu1 %v3161_v32  ;;  %v3232_v31 = vld [vmem:[%s4748_s0 + $0x304] ss:$20 sps:$4 sm:$0xff]   ;;  %v3234_v32 = vld [vmem:[%s4748_s0 + $0x100] ss:$20 sps:$4 sm:$0xff]  }
  0xb2   :  { %1544 = vmatprep.mubr.bf16.mxu0 %v3162_v33  ;;  %1769 = vmatprep.mubr.bf16.mxu1 %v3164_v34 }
  0xb9   :  { %1545 = vmatmul.mubr.bf16.gmra.mxu0 %v3166_v35  ;;  %1770 = vmatmul.mubr.bf16.gmra.mxu1 %v3167_v36 }
  0xba   :  { %1552 = vmatprep.mubr.bf16.mxu0 %v3168_v37  ;;  %1777 = vmatprep.mubr.bf16.mxu1 %v3170_v38 }
  0xc1   :  { %1553 = vmatmul.mubr.bf16.gmra.mxu0 %v3172_v39  ;;  %1778 = vmatmul.mubr.bf16.gmra.mxu1 %v3173_v40 }
  0xc2   :  { %1560 = vmatprep.mubr.bf16.mxu0 %v3174_v41  ;;  %1785 = vmatprep.mubr.bf16.mxu1 %v3176_v42  ;;  %v3235_v41 = vld [vmem:[%s4748_s0 + $0x300] ss:$20 sps:$4 sm:$0xff]   ;;  %v3236_v42 = vld [vmem:[%s4748_s0 + $0x128] ss:$20 sps:$4 sm:$0xff]  }
  0xc9   :  { %1561 = vmatmul.mubr.bf16.gmra.mxu0 %v3178_v43  ;;  %1786 = vmatmul.mubr.bf16.gmra.mxu1 %v3179_v44  ;;  %v3239_v43 = vld [vmem:[%s4748_s0 + $0x32c] ss:$20 sps:$4 sm:$0xff]   ;;  %v3240_v44 = vld [vmem:[%s4748_s0 + $0x150] ss:$20 sps:$4 sm:$0xff]  }
  0xca   :  { %1568 = vmatprep.mubr.bf16.mxu0 %v3180_v45  ;;  %1793 = vmatprep.mubr.bf16.mxu1 %v3182_v46 }
  0xd1   :  { %1569 = vmatmul.mubr.bf16.gmra.mxu0 %v3184_v47  ;;  %1794 = vmatmul.mubr.bf16.gmra.mxu1 %v3185_v48 }
  0xd2   :  { %1576 = vmatprep.mubr.bf16.mxu0 %v3187_v49  ;;  %1801 = vmatprep.mubr.bf16.mxu1 %v3189_v50 }
  0xd9   :  { %1577 = vmatmul.mubr.bf16.gmra.mxu0 %v3191_v51  ;;  %1802 = vmatmul.mubr.bf16.gmra.mxu1 %v3192_v52 }
  0xda   :  { %1584 = vmatprep.mubr.bf16.mxu0 %v3193_v53  ;;  %1809 = vmatprep.mubr.bf16.mxu1 %v3195_v54  ;;  %v3237_v53 = vld [vmem:[%s4748_s0 + $0x328] ss:$20 sps:$4 sm:$0xff]   ;;  %v3241_v54 = vld [vmem:[%s4748_s0 + $0x178] ss:$20 sps:$4 sm:$0xff]  }
  0xe1   :  { %1585 = vmatmul.mubr.bf16.gmra.mxu0 %v3197_v55  ;;  %1810 = vmatmul.mubr.bf16.gmra.mxu1 %v3198_v56  ;;  %v3244_v55 = vld [vmem:[%s4748_s0 + $0x354] ss:$20 sps:$4 sm:$0xff]  }
  0xe2   :  { %1592 = vmatprep.mubr.bf16.mxu0 %v3199_v57  ;;  %1817 = vmatprep.mubr.bf16.mxu1 %v3201_v58  ;;  %v3245_v56 = vld [vmem:[%s4748_s0 + $0x1a0] ss:$20 sps:$4 sm:$0xff]  }
  0xe9   :  { %1593 = vmatmul.mubr.bf16.gmra.mxu0 %v3203_v59  ;;  %1818 = vmatmul.mubr.bf16.gmra.mxu1 %v3204_v60 }
  0xea   :  { %1600 = vmatprep.mubr.bf16.mxu0 %v3205_v61  ;;  %1825 = vmatprep.mubr.bf16.mxu1 %v3207_v62 }
  0xf1   :  { %1601 = vmatmul.mubr.bf16.gmra.mxu0 %v3209_v63  ;;  %1826 = vmatmul.mubr.bf16.gmra.mxu1 %v3210_v1 }
  0xf2   :  { %1608 = vmatprep.mubr.bf16.mxu0 %v3211_v2  ;;  %1833 = vmatprep.mubr.bf16.mxu1 %v3213_v3  ;;  %v3242_v2 = vld [vmem:[%s4748_s0 + $0x350] ss:$20 sps:$4 sm:$0xff]   ;;  %v3246_v3 = vld [vmem:[%s4748_s0 + $0x1c8] ss:$20 sps:$4 sm:$0xff]  }
  0xf9   :  { %1609 = vmatmul.mubr.bf16.gmra.mxu0 %v3215_v4  ;;  %1834 = vmatmul.mubr.bf16.gmra.mxu1 %v3216_v5  ;;  %v3249_v4 = vld [vmem:[%s4748_s0 + $0x37c] ss:$20 sps:$4 sm:$0xff]  }
  0xfa   :  { %1841 = vmatprep.mubr.bf16.mxu1 %v3217_v6  ;;  %2940 = vmatprep.mubr.msk.bf16.mxu0 %vm1295_vm0, %v3219_v7  ;;  %v3250_v5 = vld [vmem:[%s4748_s0 + $0x1f0] ss:$20 sps:$4 sm:$0xff]  }
 0x101   :  { %v3786_v0 = vpop.f32.mrf.mxu0  ;;  %v3788_v12 = vpop.f32.mrf.mxu1  ;;  %1842 = vmatmul.mubr.bf16.gmra.mxu1 %v3220_v8  ;;  %2941 = vmatmul.mubr.msk.bf16.vlgmr.msra.gmra.mxu0 %vm1295_vm0, %v3221_v9 }
 0x102   :  { %4752 = vst [vmem:[#allocation2_spill] sm:$0xff] %v3788_v12  ;;  %1849 = vmatprep.mubr.bf16.mxu1 %v3222_v10  ;;  %2944 = vmatprep.mubr.msk.bf16.mxu0 %vm1295_vm0, %v3224_v11 }
 0x103   :  { %v1428_v13 = vpop.f32.mrf.mxu0  ;;  %v1620_v14 = vpop.f32.mrf.mxu1 }
 0x105   :  { %v3792_v15 = vpop.f32.mrf.mxu0  ;;  %v3794_v16 = vpop.f32.mrf.mxu1 }
 0x106   :  { %4753 = vst [vmem:[#allocation3_spill] sm:$0xff] %v3794_v16 }
 0x107   :  { %v1431_v21 = vpop.f32.mrf.mxu0  ;;  %v1623_v22 = vpop.f32.mrf.mxu1 }
 0x109   :  { %v3808_v23 = vpop.f32.mrf.mxu0  ;;  %v3810_v24 = vpop.f32.mrf.mxu1  ;;  %1850 = vmatmul.mubr.bf16.gmra.mxu1 %v3225_v17  ;;  %2945 = vmatmul.mubr.msk.bf16.gmra.mxu0 %vm1295_vm0, %v3226_v18  ;;  %v3247_v17 = vld [vmem:[%s4748_s0 + $0x378] ss:$20 sps:$4 sm:$0xff]  }
 0x10a   :  { %4754 = vst [vmem:[#allocation4_spill] sm:$0xff] %v3810_v24  ;;  %1857 = vmatprep.mubr.bf16.mxu1 %v3227_v19  ;;  %2948 = vmatprep.mubr.msk.bf16.mxu0 %vm1295_vm0, %v3229_v20  ;;  %v3251_v18 = vld [vmem:[%s4748_s0 + $0x218] ss:$20 sps:$4 sm:$0xff]   ;;  %v3255_v20 = vld [vmem:[%s4748_s0 + $0x240] ss:$20 sps:$4 sm:$0xff]  }
 0x10b   :  { %v1436_v25 = vpop.f32.mrf.mxu0  ;;  %v1628_v26 = vpop.f32.mrf.mxu1  ;;  %v3254_v19 = vld [vmem:[%s4748_s0 + $0x3a4] ss:$20 sps:$4 sm:$0xff]  }
 0x10d   :  { %v3814_v27 = vpop.f32.mrf.mxu0  ;;  %v3816_v28 = vpop.f32.mrf.mxu1 }
 0x10e   :  { %4755 = vst [vmem:[#allocation5_spill] sm:$0xff] %v3816_v28 }
 0x10f   :  { %v1439_v33 = vpop.f32.mrf.mxu0  ;;  %v1631_v34 = vpop.f32.mrf.mxu1 }
 0x110   :  { %v3252_v33 = vld [vmem:[%s4748_s0 + $0x3a0] ss:$20 sps:$4 sm:$0xff]   ;;  %v3256_v34 = vld [vmem:[%s4748_s0 + $0x268] ss:$20 sps:$4 sm:$0xff]  }
 0x111   :  { %v3830_v35 = vpop.f32.mrf.mxu0  ;;  %v3832_v36 = vpop.f32.mrf.mxu1  ;;  %1858 = vmatmul.mubr.bf16.gmra.mxu1 %v3230_v29  ;;  %2949 = vmatmul.mubr.msk.bf16.gmra.mxu0 %vm1295_vm0, %v3231_v30 }
 0x112   :  { %4756 = vst [vmem:[#allocation6_spill] sm:$0xff] %v3832_v36  ;;  %1865 = vmatprep.mubr.bf16.mxu1 %v3232_v31  ;;  %2952 = vmatprep.mubr.msk.bf16.mxu0 %vm1295_vm0, %v3234_v32 }
 0x113   :  { %v1444_v37 = vpop.f32.mrf.mxu0  ;;  %v1636_v38 = vpop.f32.mrf.mxu1 }
 0x114   :  { %v3259_v37 = vld [vmem:[%s4748_s0 + $0x3cc] ss:$20 sps:$4 sm:$0xff]   ;;  %v3260_v38 = vld [vmem:[%s4748_s0 + $0x290] ss:$20 sps:$4 sm:$0xff]  }
 0x115   :  { %v3836_v39 = vpop.f32.mrf.mxu0  ;;  %v3838_v40 = vpop.f32.mrf.mxu1 }
 0x116   :  { %4757 = vst [vmem:[#allocation7_spill] sm:$0xff] %v3838_v40 }
 0x117   :  { %v1447_v45 = vpop.f32.mrf.mxu0  ;;  %v1639_v46 = vpop.f32.mrf.mxu1 }
 0x119   :  { %v3852_v47 = vpop.f32.mrf.mxu0  ;;  %v3854_v48 = vpop.f32.mrf.mxu1  ;;  %1866 = vmatmul.mubr.bf16.gmra.mxu1 %v3235_v41  ;;  %2953 = vmatmul.mubr.msk.bf16.gmra.mxu0 %vm1295_vm0, %v3236_v42 }
 0x11a   :  { %4758 = vst [vmem:[#allocation8_spill] sm:$0xff] %v3854_v48  ;;  %1873 = vmatprep.mubr.bf16.mxu1 %v3239_v43  ;;  %2956 = vmatprep.mubr.msk.bf16.mxu0 %vm1295_vm0, %v3240_v44 }
 0x11b   :  { %v1452_v49 = vpop.f32.mrf.mxu0  ;;  %v1644_v50 = vpop.f32.mrf.mxu1 }
 0x11d   :  { %v3858_v51 = vpop.f32.mrf.mxu0  ;;  %v3860_v52 = vpop.f32.mrf.mxu1 }
 0x11e   :  { %4759 = vst [vmem:[#allocation9_spill] sm:$0xff] %v3860_v52 }
 0x11f   :  { %v1455_v57 = vpop.f32.mrf.mxu0  ;;  %v1647_v58 = vpop.f32.mrf.mxu1 }
 0x121   :  { %v3874_v59 = vpop.f32.mrf.mxu0  ;;  %v3876_v60 = vpop.f32.mrf.mxu1  ;;  %1874 = vmatmul.mubr.bf16.gmra.mxu1 %v3237_v53  ;;  %2957 = vmatmul.mubr.msk.bf16.gmra.mxu0 %vm1295_vm0, %v3241_v54  ;;  %v3257_v53 = vld [vmem:[%s4748_s0 + $0x3c8] ss:$20 sps:$4 sm:$0xff]   ;;  %v3261_v54 = vld [vmem:[%s4748_s0 + $0x2b8] ss:$20 sps:$4 sm:$0xff]  }
 0x122   :  { %4760 = vst [vmem:[#allocation10_spill] sm:$0xff] %v3876_v60  ;;  %1881 = vmatprep.mubr.bf16.mxu1 %v3244_v55  ;;  %2960 = vmatprep.mubr.msk.bf16.mxu0 %vm1295_vm0, %v3245_v56  ;;  %v3264_v55 = vld [vmem:[%s4748_s0 + $0x3f4] ss:$20 sps:$4 sm:$0xff]  }
 0x123   :  { %v1460_v61 = vpop.f32.mrf.mxu0  ;;  %v1652_v62 = vpop.f32.mrf.mxu1  ;;  %v3265_v56 = vld [vmem:[%s4748_s0 + $0x2e0] ss:$20 sps:$4 sm:$0xff]  }
 0x125   :  { %v3880_v63 = vpop.f32.mrf.mxu0  ;;  %v3882_v1 = vpop.f32.mrf.mxu1 }
 0x126   :  { %4761 = vst [vmem:[#allocation11_spill] sm:$0xff] %v3882_v1 }
 0x127   :  { %v1463_v6 = vpop.f32.mrf.mxu0  ;;  %v1655_v7 = vpop.f32.mrf.mxu1 }
 0x128   :  { %v3262_v7 = vld [vmem:[%s4748_s0 + $0x3f0] ss:$20 sps:$4 sm:$0xff]  }
 0x129   :  { %v3896_v8 = vpop.f32.mrf.mxu0  ;;  %v3898_v9 = vpop.f32.mrf.mxu1  ;;  %1882 = vmatmul.mubr.bf16.gmra.mxu1 %v3242_v2  ;;  %2961 = vmatmul.mubr.msk.bf16.gmra.mxu0 %vm1295_vm0, %v3246_v3 }
 0x12a   :  { %4762 = vst [vmem:[#allocation12_spill] sm:$0xff] %v3898_v9  ;;  %1889 = vmatprep.mubr.bf16.mxu1 %v3249_v4  ;;  %2964 = vmatprep.mubr.msk.bf16.mxu0 %vm1295_vm0, %v3250_v5 }
 0x12b   :  { %v1468_v10 = vpop.f32.mrf.mxu0  ;;  %v1660_v11 = vpop.f32.mrf.mxu1 }
 0x12c   :  { %v3266_v10 = vld [vmem:[%s4748_s0 + $0x308] ss:$20 sps:$4 sm:$0xff]  }
 0x12d   :  { %v3902_v13 = vpop.f32.mrf.mxu0  ;;  %v3904_v14 = vpop.f32.mrf.mxu1 }
 0x12e   :  { %4763 = vst [vmem:[#allocation13_spill] sm:$0xff] %v3904_v14 }
 0x12f   :  { %v1471_v21 = vpop.f32.mrf.mxu0  ;;  %v1663_v22 = vpop.f32.mrf.mxu1 }
 0x131   :  { %v3918_v25 = vpop.f32.mrf.mxu0  ;;  %v3920_v26 = vpop.f32.mrf.mxu1  ;;  %1890 = vmatmul.mubr.bf16.gmra.mxu1 %v3247_v17  ;;  %2965 = vmatmul.mubr.msk.bf16.gmra.mxu0 %vm1295_vm0, %v3251_v18  ;;  %v3270_v17 = vld [vmem:[%s4748_s0 + $0x330] ss:$20 sps:$4 sm:$0xff]  }
 0x132   :  { %4764 = vst [vmem:[#allocation14_spill] sm:$0xff] %v3920_v26  ;;  %1897 = vmatprep.mubr.bf16.mxu1 %v3254_v19  ;;  %2968 = vmatprep.mubr.msk.bf16.mxu0 %vm1295_vm0, %v3255_v20 }
 0x133   :  { %v1476_v29 = vpop.f32.mrf.mxu0  ;;  %v1668_v30 = vpop.f32.mrf.mxu1 }
 0x135   :  { %v3924_v31 = vpop.f32.mrf.mxu0  ;;  %v3926_v32 = vpop.f32.mrf.mxu1 }
 0x136   :  { %4765 = vst [vmem:[#allocation15_spill] sm:$0xff] %v3926_v32 }
 0x137   :  { %v1479_v41 = vpop.f32.mrf.mxu0  ;;  %v1671_v42 = vpop.f32.mrf.mxu1 }
 0x138   :  { %v3275_v41 = vld [vmem:[%s4748_s0 + $0x380] ss:$20 sps:$4 sm:$0xff]  }
 0x139   :  { %v3940_v43 = vpop.f32.mrf.mxu0  ;;  %v3942_v44 = vpop.f32.mrf.mxu1  ;;  %1898 = vmatmul.mubr.bf16.gmra.mxu1 %v3252_v33  ;;  %2969 = vmatmul.mubr.msk.bf16.gmra.mxu0 %vm1295_vm0, %v3256_v34  ;;  %v3267_v34 = vld [vmem:[%s4748_s0 + $0x418] ss:$20 sps:$4 sm:$0xff]  }
 0x13a   :  { %4766 = vst [vmem:[#allocation16_spill] sm:$0xff] %v3942_v44  ;;  %1905 = vmatprep.mubr.bf16.mxu1 %v3259_v37  ;;  %2972 = vmatprep.mubr.msk.bf16.mxu0 %vm1295_vm0, %v3260_v38  ;;  %v3271_v37 = vld [vmem:[%s4748_s0 + $0x358] ss:$20 sps:$4 sm:$0xff]  }
 0x13b   :  { %v1484_v45 = vpop.f32.mrf.mxu0  ;;  %v1676_v46 = vpop.f32.mrf.mxu1 }
 0x13d   :  { %v3946_v49 = vpop.f32.mrf.mxu0  ;;  %v3948_v50 = vpop.f32.mrf.mxu1 }
 0x13e   :  { %4767 = vst [vmem:[#allocation17_spill] sm:$0xff] %v3948_v50 }
 0x13f   :  { %v1487_v57 = vpop.f32.mrf.mxu0  ;;  %v1679_v58 = vpop.f32.mrf.mxu1 }
 0x140   :  { %v3272_v58 = vld [vmem:[%s4748_s0 + $0x440] ss:$20 sps:$4 sm:$0xff]  }
 0x141   :  { %v3962_v61 = vpop.f32.mrf.mxu0  ;;  %v1715_v62 = vpop.f32.mrf.mxu1  ;;  %1906 = vmatmul.mubr.bf16.gmra.mxu1 %v3257_v53  ;;  %2973 = vmatmul.mubr.msk.bf16.gmra.mxu0 %vm1295_vm0, %v3261_v54 }
 0x142   :  { %v3966_v2 = vadd.f32 %v1715_v62, %v3786_v0  ;;  %1913 = vmatprep.mubr.bf16.mxu1 %v3264_v55  ;;  %2976 = vmatprep.mubr.msk.bf16.mxu0 %vm1295_vm0, %v3265_v56  ;;  %v3269_v0 = vld [vmem:[%s4748_s0 + $0x41c] ss:$20 sps:$4 sm:$0xff]  }
 0x143   :  { %v1492_v3 = vpop.f32.mrf.mxu0  ;;  %v1717_v4 = vpop.f32.mrf.mxu1  ;;  %v3276_v62 = vld [vmem:[%s4748_s0 + $0x3a8] ss:$20 sps:$4 sm:$0xff]  }
 0x144   :  { %v3280_v4 = vld [vmem:[%s4748_s0 + $0x3d0] ss:$20 sps:$4 sm:$0xff]  }
 0x145   :  { %v3969_v5 = vpop.f32.mrf.mxu0  ;;  %v1718_v6 = vpop.f32.mrf.mxu1 }
 0x146   :  { %v3978_v11 = vadd.f32 %v1718_v6, %v3792_v15 }
 0x147   :  { %v1495_v18 = vpop.f32.mrf.mxu0  ;;  %v1720_v19 = vpop.f32.mrf.mxu1 }
 0x149   :  { %v3986_v20 = vpop.f32.mrf.mxu0  ;;  %v1723_v21 = vpop.f32.mrf.mxu1  ;;  %1914 = vmatmul.mubr.bf16.gmra.mxu1 %v3262_v7  ;;  %2977 = vmatmul.mubr.msk.bf16.gmra.mxu0 %vm1295_vm0, %v3266_v10 }
 0x14a   :  { %v3990_v22 = vadd.f32 %v1723_v21, %v3808_v23  ;;  %1921 = vmatprep.mubr.bf16.mxu1 %v3269_v0  ;;  %2980 = vmatprep.mubr.msk.bf16.mxu0 %vm1295_vm0, %v3270_v17  ;;  %v3274_v23 = vld [vmem:[%s4748_s0 + $0x444] ss:$20 sps:$4 sm:$0xff]  }
 0x14b   :  { %v1500_v15 = vpop.f32.mrf.mxu0  ;;  %v1725_v29 = vpop.f32.mrf.mxu1 }
 0x14c   :  { %v3277_v15 = vld [vmem:[%s4748_s0 + $0x468] ss:$20 sps:$4 sm:$0xff]   ;;  %v3281_v29 = vld [vmem:[%s4748_s0 + $0x3f8] ss:$20 sps:$4 sm:$0xff]  }
 0x14d   :  { %v3993_v30 = vpop.f32.mrf.mxu0  ;;  %v1726_v33 = vpop.f32.mrf.mxu1 }
 0x14e   :  { %v4002_v38 = vadd.f32 %v1726_v33, %v3814_v27 }
 0x14f   :  { %v1503_v42 = vpop.f32.mrf.mxu0  ;;  %v1728_v45 = vpop.f32.mrf.mxu1 }
 0x151   :  { %v4010_v46 = vpop.f32.mrf.mxu0  ;;  %v1731_v53 = vpop.f32.mrf.mxu1  ;;  %1922 = vmatmul.mubr.bf16.gmra.mxu1 %v3267_v34  ;;  %2981 = vmatmul.mubr.msk.bf16.gmra.mxu0 %vm1295_vm0, %v3271_v37  ;;  %v3285_v34 = vld [vmem:[%s4748_s0 + $0x420] ss:$20 sps:$4 sm:$0xff]  }
 0x152   :  { %v4014_v54 = vadd.f32 %v1731_v53, %v3830_v35  ;;  %1929 = vmatprep.mubr.bf16.mxu1 %v3274_v23  ;;  %2984 = vmatprep.mubr.msk.bf16.mxu0 %vm1295_vm0, %v3275_v41  ;;  %v3279_v35 = vld [vmem:[%s4748_s0 + $0x46c] ss:$20 sps:$4 sm:$0xff]  }
 0x153   :  { %v1508_v27 = vpop.f32.mrf.mxu0  ;;  %v1733_v55 = vpop.f32.mrf.mxu1 }
 0x155   :  { %v4017_v56 = vpop.f32.mrf.mxu0  ;;  %v1734_v57 = vpop.f32.mrf.mxu1 }
 0x156   :  { %v4026_v3 = vadd.f32 %v1734_v57, %v3836_v39  ;;  %v3282_v57 = vld [vmem:[%s4748_s0 + $0x490] ss:$20 sps:$4 sm:$0xff]  }
 0x157   :  { %v1511_v6 = vpop.f32.mrf.mxu0  ;;  %v1736_v7 = vpop.f32.mrf.mxu1 }
 0x159   :  { %v4034_v10 = vpop.f32.mrf.mxu0  ;;  %v1739_v0 = vpop.f32.mrf.mxu1  ;;  %1930 = vmatmul.mubr.bf16.gmra.mxu1 %v3272_v58  ;;  %2985 = vmatmul.mubr.msk.bf16.gmra.mxu0 %vm1295_vm0, %v3276_v62  ;;  %v3286_v58 = vld [vmem:[%s4748_s0 + $0x448] ss:$20 sps:$4 sm:$0xff]  }
 0x15a   :  { %v4038_v17 = vadd.f32 %v1739_v0, %v3852_v47  ;;  %1937 = vmatprep.mubr.bf16.mxu1 %v3279_v35  ;;  %2988 = vmatprep.mubr.msk.bf16.mxu0 %vm1295_vm0, %v3280_v4  ;;  %v3284_v47 = vld [vmem:[%s4748_s0 + $0x494] ss:$20 sps:$4 sm:$0xff]   ;;  %v3290_v35 = vld [vmem:[%s4748_s0 + $0x470] ss:$20 sps:$4 sm:$0xff]  }
 0x15b   :  { %v1516_v39 = vpop.f32.mrf.mxu0  ;;  %v1741_v18 = vpop.f32.mrf.mxu1 }
 0x15d   :  { %v4041_v19 = vpop.f32.mrf.mxu0  ;;  %v1742_v21 = vpop.f32.mrf.mxu1 }
 0x15e   :  { %v4050_v33 = vadd.f32 %v1742_v21, %v3858_v51 }
 0x15f   :  { %v1519_v37 = vpop.f32.mrf.mxu0  ;;  %v1744_v23 = vpop.f32.mrf.mxu1 }
 0x160   :  { %v3295_v37 = vld [vmem:[%s4748_s0 + $0x4c0] ss:$20 sps:$4 sm:$0xff]  }
 0x161   :  { %v4058_v41 = vpop.f32.mrf.mxu0  ;;  %v1747_v42 = vpop.f32.mrf.mxu1  ;;  %1938 = vmatmul.mubr.bf16.gmra.mxu1 %v3277_v15  ;;  %2989 = vmatmul.mubr.msk.bf16.gmra.mxu0 %vm1295_vm0, %v3281_v29  ;;  %v3287_v29 = vld [vmem:[%s4748_s0 + $0x4b8] ss:$20 sps:$4 sm:$0xff]  }
 0x162   :  { %v4062_v45 = vadd.f32 %v1747_v42, %v3874_v59  ;;  %1945 = vmatprep.mubr.bf16.mxu1 %v3284_v47  ;;  %2992 = vmatprep.mubr.msk.bf16.mxu0 %vm1295_vm0, %v3285_v34  ;;  %v3289_v59 = vld [vmem:[%s4748_s0 + $0x4bc] ss:$20 sps:$4 sm:$0xff]   ;;  %v3291_v47 = vld [vmem:[%s4748_s0 + $0x498] ss:$20 sps:$4 sm:$0xff]  }
 0x163   :  { %v1524_v51 = vpop.f32.mrf.mxu0  ;;  %v1749_v53 = vpop.f32.mrf.mxu1 }
 0x165   :  { %v4065_v27 = vpop.f32.mrf.mxu0  ;;  %v1750_v55 = vpop.f32.mrf.mxu1 }
 0x166   :  { %v4074_v62 = vadd.f32 %v1750_v55, %v3880_v63 }
 0x167   :  { %v1527_v4 = vpop.f32.mrf.mxu0  ;;  %v1752_v6 = vpop.f32.mrf.mxu1 }
 0x168   :  { %v3296_v4 = vld [vmem:[%s4748_s0 + $0x4e8] ss:$20 sps:$4 sm:$0xff]  }
 0x169   :  { %v4082_v7 = vpop.f32.mrf.mxu0  ;;  %v1755_v0 = vpop.f32.mrf.mxu1  ;;  %1946 = vmatmul.mubr.bf16.gmra.mxu1 %v3282_v57  ;;  %2993 = vmatmul.mubr.msk.bf16.gmra.mxu0 %vm1295_vm0, %v3286_v58 }
 0x16a   :  { %v4086_v39 = vadd.f32 %v1755_v0, %v3896_v8  ;;  %1953 = vmatprep.mubr.bf16.mxu1 %v3289_v59  ;;  %2996 = vmatprep.mubr.msk.bf16.mxu0 %vm1295_vm0, %v3290_v35  ;;  %v3294_v8 = vld [vmem:[%s4748_s0 + $0x4e4] ss:$20 sps:$4 sm:$0xff]   ;;  %v3292_v35 = vld [vmem:[%s4748_s0 + $0x4e0] ss:$20 sps:$4 sm:$0xff]  }
 0x16b   :  { %v1532_v63 = vpop.f32.mrf.mxu0  ;;  %v1757_v18 = vpop.f32.mrf.mxu1 }
 0x16d   :  { %v4089_v21 = vpop.f32.mrf.mxu0  ;;  %v1758_v15 = vpop.f32.mrf.mxu1 }
 0x16e   :  { %v4098_v34 = vadd.f32 %v1758_v15, %v3902_v13 }
 0x16f   :  { %v1535_v23 = vpop.f32.mrf.mxu0  ;;  %v1760_v42 = vpop.f32.mrf.mxu1 }
 0x171   :  { %v4106_v51 = vpop.f32.mrf.mxu0  ;;  %v1763_v53 = vpop.f32.mrf.mxu1  ;;  %1954 = vmatmul.mubr.bf16.gmra.mxu1 %v3287_v29  ;;  %2997 = vmatmul.mubr.msk.bf16.gmra.mxu0 %vm1295_vm0, %v3291_v47 }
 0x172   :  { %v4110_v55 = vadd.f32 %v1763_v53, %v3918_v25  ;;  %1961 = vmatprep.mubr.bf16.mxu1 %v3294_v8  ;;  %3000 = vmatprep.mubr.msk.bf16.mxu0 %vm1295_vm0, %v3295_v37 }
 0x173   :  { %v1540_v13 = vpop.f32.mrf.mxu0  ;;  %v1765_v57 = vpop.f32.mrf.mxu1 }
 0x175   :  { %v4113_v58 = vpop.f32.mrf.mxu0  ;;  %v1766_v59 = vpop.f32.mrf.mxu1 }
 0x176   :  { %v4122_v6 = vadd.f32 %v1766_v59, %v3924_v31 }
 0x177   :  { %v1543_v25 = vpop.f32.mrf.mxu0  ;;  %v1768_v0 = vpop.f32.mrf.mxu1 }
 0x179   :  { %v4124_v63 = vpop.f32.mrf.mxu0  ;;  %v1771_v18 = vpop.f32.mrf.mxu1  ;;  %1962 = vmatmul.mubr.bf16.gmra.mxu1 %v3292_v35  ;;  %3001 = vmatmul.mubr.msk.bf16.gmra.mxu0 %vm1295_vm0, %v3296_v4 }
 0x17a   :  { %v4128_v15 = vadd.f32 %v1771_v18, %v3940_v43 }
 0x17b   :  { %v1548_v29 = vpop.f32.mrf.mxu0  ;;  %v1773_v47 = vpop.f32.mrf.mxu1 }
 0x17d   :  { %v4130_v8 = vpop.f32.mrf.mxu0  ;;  %v1774_v37 = vpop.f32.mrf.mxu1 }
 0x17e   :  { %v4133_v23 = vadd.f32 %v1774_v37, %v3946_v49 }
 0x17f   :  { %v1551_v31 = vpop.f32.mrf.mxu0  ;;  %v1776_v42 = vpop.f32.mrf.mxu1 }
 0x181   :  { %v4135_v53 = vpop.f32.mrf.mxu0  ;;  %v1779_v13 = vpop.f32.mrf.mxu1 }
 0x182   :  { %v4138_v57 = vadd.f32 %v1779_v13, %v3962_v61 }
 0x183   :  { %v1556_v59 = vpop.f32.mrf.mxu0  ;;  %v1781_v35 = vpop.f32.mrf.mxu1 }
 0x185   :  { %v4140_v43 = vpop.f32.mrf.mxu0  ;;  %v1782_v4 = vpop.f32.mrf.mxu1 }
 0x186   :  { %v4143_v25 = vadd.f32 %v1782_v4, %v3969_v5 }
 0x187   :  { %v1559_v0 = vpop.f32.mrf.mxu0  ;;  %v1784_v18 = vpop.f32.mrf.mxu1 }
 0x189   :  { %v4145_v49 = vpop.f32.mrf.mxu0  ;;  %v1787_v29 = vpop.f32.mrf.mxu1 }
 0x18a   :  { %v4148_v47 = vadd.f32 %v1787_v29, %v3986_v20 }
 0x18b   :  { %v1564_v37 = vpop.f32.mrf.mxu0  ;;  %v1789_v31 = vpop.f32.mrf.mxu1 }
 0x18d   :  { %v4150_v61 = vpop.f32.mrf.mxu0  ;;  %v1790_v42 = vpop.f32.mrf.mxu1 }
 0x18e   :  { %v4153_v13 = vadd.f32 %v1790_v42, %v3993_v30 }
 0x18f   :  { %v1567_v59 = vpop.f32.mrf.mxu0  ;;  %v1792_v35 = vpop.f32.mrf.mxu1 }
 0x191   :  { %v4155_v5 = vpop.f32.mrf.mxu0  ;;  %v1795_v4 = vpop.f32.mrf.mxu1 }
 0x192   :  { %v4158_v0 = vadd.f32 %v1795_v4, %v4010_v46 }
 0x193   :  { %v1572_v18 = vpop.f32.mrf.mxu0  ;;  %v1797_v50 = vpop.f32.mrf.mxu1 }
 0x195   :  { %v4160_v20 = vpop.f32.mrf.mxu0  ;;  %v1798_v29 = vpop.f32.mrf.mxu1 }
 0x196   :  { %v4163_v37 = vadd.f32 %v1798_v29, %v4017_v56 }
 0x197   :  { %v1575_v31 = vpop.f32.mrf.mxu0  ;;  %v1800_v32 = vpop.f32.mrf.mxu1 }
 0x199   :  { %v4165_v30 = vpop.f32.mrf.mxu0  ;;  %v1803_v42 = vpop.f32.mrf.mxu1 }
 0x19a   :  { %v4168_v59 = vadd.f32 %v1803_v42, %v4034_v10 }
 0x19b   :  { %v1580_v35 = vpop.f32.mrf.mxu0  ;;  %v1805_v44 = vpop.f32.mrf.mxu1 }
 0x19d   :  { %v4170_v46 = vpop.f32.mrf.mxu0  ;;  %v1806_v4 = vpop.f32.mrf.mxu1 }
 0x19e   :  { %v4173_v50 = vadd.f32 %v1806_v4, %v4041_v19 }
 0x19f   :  { %v1583_v18 = vpop.f32.mrf.mxu0  ;;  %v1808_v26 = vpop.f32.mrf.mxu1 }
 0x1a1   :  { %v4175_v56 = vpop.f32.mrf.mxu0  ;;  %v1811_v29 = vpop.f32.mrf.mxu1 }
 0x1a2   :  { %v4178_v32 = vadd.f32 %v1811_v29, %v4058_v41 }
 0x1a3   :  { %v1588_v31 = vpop.f32.mrf.mxu0  ;;  %v1813_v1 = vpop.f32.mrf.mxu1 }
 0x1a5   :  { %v4180_v10 = vpop.f32.mrf.mxu0  ;;  %v1814_v42 = vpop.f32.mrf.mxu1 }
 0x1a6   :  { %v4183_v44 = vadd.f32 %v1814_v42, %v4065_v27 }
 0x1a7   :  { %v1591_v35 = vpop.f32.mrf.mxu0  ;;  %v1816_v14 = vpop.f32.mrf.mxu1 }
 0x1a9   :  { %v4185_v19 = vpop.f32.mrf.mxu0  ;;  %v1819_v4 = vpop.f32.mrf.mxu1 }
 0x1aa   :  { %v4188_v26 = vadd.f32 %v1819_v4, %v4082_v7 }
 0x1ab   :  { %v1596_v18 = vpop.f32.mrf.mxu0  ;;  %v1821_v60 = vpop.f32.mrf.mxu1 }
 0x1ad   :  { %v4190_v41 = vpop.f32.mrf.mxu0  ;;  %v1822_v29 = vpop.f32.mrf.mxu1 }
 0x1ae   :  { %v4193_v1 = vadd.f32 %v1822_v29, %v4089_v21 }
 0x1af   :  { %v1599_v31 = vpop.f32.mrf.mxu0  ;;  %v1824_v9 = vpop.f32.mrf.mxu1 }
 0x1b1   :  { %v4195_v27 = vpop.f32.mrf.mxu0  ;;  %v1827_v42 = vpop.f32.mrf.mxu1 }
 0x1b2   :  { %v4198_v14 = vadd.f32 %v1827_v42, %v4106_v51 }
 0x1b3   :  { %v1604_v35 = vpop.f32.mrf.mxu0  ;;  %v1829_v40 = vpop.f32.mrf.mxu1 }
 0x1b5   :  { %v4200_v7 = vpop.f32.mrf.mxu0  ;;  %v1830_v4 = vpop.f32.mrf.mxu1 }
 0x1b6   :  { %4768 = vst [vmem:[#allocation18_spill] sm:$0xff] %v4200_v7  ;;  %v4203_v60 = vadd.f32 %v1830_v4, %v4113_v58 }
 0x1b7   :  { %v1607_v18 = vpop.f32.mrf.mxu0  ;;  %v1832_v52 = vpop.f32.mrf.mxu1 }
 0x1b9   :  { %v4205_v21 = vpop.f32.mrf.mxu0  ;;  %v4207_v29 = vpop.f32.mrf.mxu1 }
 0x1bb   :  { %v1612_v9 = vpop.f32.mrf.mxu0  ;;  %v1837_v31 = vpop.f32.mrf.mxu1 }
 0x1bd   :  { %v4209_v36 = vpop.f32.mrf.mxu0  ;;  %v4211_v51 = vpop.f32.mrf.mxu1 }
 0x1be   :  { %4769 = vst [vmem:[#allocation19_spill] sm:$0xff] %v4209_v36 }
 0x1bf   :  { %v1615_v42 = vpop.f32.mrf.mxu0  ;;  %v1840_v40 = vpop.f32.mrf.mxu1 }
 0x1c1   :  { %v1843_v35 = vpop.f32.mrf.mxu1  ;;  %v2942_v48 = vpop.f32.mrf.mxu0 }
 0x1c2   :  { %v4214_v16 = vadd.f32 %v1843_v35, %v4135_v53  ;;  %v2013_v58 = vadd.f32 %v2942_v48, %v3990_v22 }
 0x1c3   :  { %v1845_v52 = vpop.f32.mrf.mxu1  ;;  %v2004_v4 = vpop.f32.mrf.mxu0 }
 0x1c4   :  { %2261 = vst.msk [vmem:[%s4749_s2 + $0x10] sm:$0xff] %vm1295_vm0, %v2013_v58  ;;  %v2005_v18 = vadd.f32 %v2004_v4, %v3966_v2  ;;  %v2460_v52 = vmul.f32 %v2013_v58, %v2013_v58 }
 0x1c5   :  { %v1846_v9 = vpop.f32.mrf.mxu1  ;;  %v2943_v31 = vpop.f32.mrf.mxu0 }
 0x1c6   :  { %2259 = vst.msk [vmem:[%s4749_s2] sm:$0xff] %vm1295_vm0, %v2005_v18  ;;  %v4227_v53 = vadd.f32 %v1846_v9, %v4140_v43  ;;  %v2016_v48 = vadd.f32 %v2943_v31, %v4002_v38  ;;  %v2458_v40 = vmul.f32 %v2005_v18, %v2005_v18  ;;  %v2323_v28 = vsel %vm1295_vm0, %v2005_v18, 0.0 }
 0x1c7   :  { %v1848_v22 = vpop.f32.mrf.mxu1  ;;  %v2007_v42 = vpop.f32.mrf.mxu0  ;;  %v2326_v9 = vsel %vm1295_vm0, %v2013_v58, 0.0 }
 0x1c8   :  { %v2008_v35 = vadd.f32 %v2007_v42, %v3978_v11  ;;  %2262 = vst.msk [vmem:[%s4749_s2 + $0x18] sm:$0xff] %vm1295_vm0, %v2016_v48  ;;  %v2522_v12 = vsel %vm1295_vm0, %v2458_v40, 0.0  ;;  %v2461_v24 = vmul.f32 %v2016_v48, %v2016_v48 }
 0x1c9   :  { %v4235_v2 = vpop.f32.mrf.mxu1  ;;  %v2946_v4 = vpop.f32.mrf.mxu0 }
 0x1ca   :  { %2260 = vst.msk [vmem:[%s4749_s2 + $0x8] sm:$0xff] %vm1295_vm0, %v2008_v35  ;;  %v2324_v38 = vsel %vm1295_vm0, %v2008_v35, 0.0  ;;  %v2459_v43 = vmul.f32 %v2008_v35, %v2008_v35  ;;  %v2029_v11 = vadd.f32 %v2946_v4, %v4038_v17  ;;  %v2328_v4 = vsel %vm1295_vm0, %v2016_v48, 0.0 }
 0x1cb   :  { %v2325_v31 = vadd.f32 %v2324_v38, %v2323_v28  ;;  %v1853_v22 = vpop.f32.mrf.mxu1  ;;  %v2020_v42 = vpop.f32.mrf.mxu0  ;;  %v2525_v28 = vsel %vm1295_vm0, %v2460_v52, 0.0 }
 0x1cc   :  { %v2523_v18 = vsel %vm1295_vm0, %v2459_v43, 0.0  ;;  %2265 = vst.msk [vmem:[%s4749_s2 + $0x30] sm:$0xff] %vm1295_vm0, %v2029_v11  ;;  %v2021_v7 = vadd.f32 %v2020_v42, %v4014_v54  ;;  %v2464_v42 = vmul.f32 %v2029_v11, %v2029_v11 }
 0x1cd   :  { %v2327_v35 = vadd.f32 %v2326_v9, %v2325_v31  ;;  %v2524_v36 = vadd.f32 %v2523_v18, %v2522_v12  ;;  %v4252_v17 = vpop.f32.mrf.mxu1  ;;  %v2947_v58 = vpop.f32.mrf.mxu0  ;;  %v2527_v12 = vsel %vm1295_vm0, %v2461_v24, 0.0 }
 0x1ce   :  { %2263 = vst.msk [vmem:[%s4749_s2 + $0x20] sm:$0xff] %vm1295_vm0, %v2021_v7  ;;  %v2462_v40 = vmul.f32 %v2021_v7, %v2021_v7  ;;  %v2032_v22 = vadd.f32 %v2947_v58, %v4050_v33  ;;  %v2330_v31 = vsel %vm1295_vm0, %v2021_v7, 0.0 }
 0x1cf   :  { %v2526_v38 = vadd.f32 %v2525_v28, %v2524_v36  ;;  %v2329_v43 = vadd.f32 %v2328_v4, %v2327_v35  ;;  %v1856_v54 = vpop.f32.mrf.mxu1  ;;  %v2023_v9 = vpop.f32.mrf.mxu0 }
 0x1d0   :  { %v2024_v52 = vadd.f32 %v2023_v9, %v4026_v3  ;;  %2266 = vst.msk [vmem:[%s4749_s2 + $0x38] sm:$0xff] %vm1295_vm0, %v2032_v22  ;;  %v2529_v33 = vsel %vm1295_vm0, %v2462_v40, 0.0  ;;  %v2465_v54 = vmul.f32 %v2032_v22, %v2032_v22 }
 0x1d1   :  { %v2331_v48 = vadd.f32 %v2330_v31, %v2329_v43  ;;  %v2528_v18 = vadd.f32 %v2527_v12, %v2526_v38  ;;  %v4268_v36 = vpop.f32.mrf.mxu1  ;;  %v2950_v35 = vpop.f32.mrf.mxu0  ;;  %v2334_v43 = vsel %vm1295_vm0, %v2029_v11, 0.0 }
 0x1d2   :  { %2264 = vst.msk [vmem:[%s4749_s2 + $0x28] sm:$0xff] %vm1295_vm0, %v2024_v52  ;;  %v2332_v24 = vsel %vm1295_vm0, %v2024_v52, 0.0  ;;  %v2463_v3 = vmul.f32 %v2024_v52, %v2024_v52  ;;  %v2045_v7 = vadd.f32 %v2950_v35, %v4086_v39 }
 0x1d3   :  { %v2530_v58 = vadd.f32 %v2529_v33, %v2528_v18  ;;  %v2333_v28 = vadd.f32 %v2332_v24, %v2331_v48  ;;  %v1861_v4 = vpop.f32.mrf.mxu1  ;;  %v2036_v38 = vpop.f32.mrf.mxu0  ;;  %v2533_v48 = vsel %vm1295_vm0, %v2464_v42, 0.0  ;;  %v2336_v18 = vsel %vm1295_vm0, %v2032_v22, 0.0 }
 0x1d4   :  { %v2531_v9 = vsel %vm1295_vm0, %v2463_v3, 0.0  ;;  %2269 = vst.msk [vmem:[%s4749_s2 + $0x50] sm:$0xff] %vm1295_vm0, %v2045_v7  ;;  %v2037_v40 = vadd.f32 %v2036_v38, %v4062_v45  ;;  %v2468_v4 = vmul.f32 %v2045_v7, %v2045_v7 }
 0x1d5   :  { %v2335_v12 = vadd.f32 %v2334_v43, %v2333_v28  ;;  %v2532_v31 = vadd.f32 %v2531_v9, %v2530_v58  ;;  %v4284_v52 = vpop.f32.mrf.mxu1  ;;  %v2951_v39 = vpop.f32.mrf.mxu0  ;;  %v2535_v58 = vsel %vm1295_vm0, %v2465_v54, 0.0 }
 0x1d6   :  { %2267 = vst.msk [vmem:[%s4749_s2 + $0x40] sm:$0xff] %vm1295_vm0, %v2037_v40  ;;  %v2466_v11 = vmul.f32 %v2037_v40, %v2037_v40  ;;  %v2048_v24 = vadd.f32 %v2951_v39, %v4098_v34  ;;  %v2338_v28 = vsel %vm1295_vm0, %v2037_v40, 0.0 }
 0x1d7   :  { %v2534_v35 = vadd.f32 %v2533_v48, %v2532_v31  ;;  %v2337_v33 = vadd.f32 %v2336_v18, %v2335_v12  ;;  %v1864_v45 = vpop.f32.mrf.mxu1  ;;  %v2039_v3 = vpop.f32.mrf.mxu0  ;;  %v2342_v18 = vsel %vm1295_vm0, %v2045_v7, 0.0 }
 0x1d8   :  { %v2040_v42 = vadd.f32 %v2039_v3, %v4074_v62  ;;  %2270 = vst.msk [vmem:[%s4749_s2 + $0x58] sm:$0xff] %vm1295_vm0, %v2048_v24  ;;  %v2537_v34 = vsel %vm1295_vm0, %v2466_v11, 0.0 }
 0x1d9   :  { %v2339_v22 = vadd.f32 %v2338_v28, %v2337_v33  ;;  %v2536_v38 = vadd.f32 %v2535_v58, %v2534_v35  ;;  %v4300_v43 = vpop.f32.mrf.mxu1  ;;  %v2954_v9 = vpop.f32.mrf.mxu0  ;;  %v2469_v35 = vmul.f32 %v2048_v24, %v2048_v24  ;;  %v2541_v28 = vsel %vm1295_vm0, %v2468_v4, 0.0 }
 0x1da   :  { %2268 = vst.msk [vmem:[%s4749_s2 + $0x48] sm:$0xff] %vm1295_vm0, %v2040_v42  ;;  %v2340_v62 = vsel %vm1295_vm0, %v2040_v42, 0.0  ;;  %v2467_v54 = vmul.f32 %v2040_v42, %v2040_v42  ;;  %v2061_v40 = vadd.f32 %v2954_v9, %v4128_v15  ;;  %v2344_v42 = vsel %vm1295_vm0, %v2048_v24, 0.0 }
 0x1db   :  { %v2538_v12 = vadd.f32 %v2537_v34, %v2536_v38  ;;  %v2341_v31 = vadd.f32 %v2340_v62, %v2339_v22  ;;  %v1869_v39 = vpop.f32.mrf.mxu1  ;;  %v2052_v48 = vpop.f32.mrf.mxu0  ;;  %v2543_v62 = vsel %vm1295_vm0, %v2469_v35, 0.0 }
 0x1dc   :  { %v2539_v33 = vsel %vm1295_vm0, %v2467_v54, 0.0  ;;  %2273 = vst.msk [vmem:[%s4749_s2 + $0x70] sm:$0xff] %vm1295_vm0, %v2061_v40  ;;  %v2053_v11 = vadd.f32 %v2052_v48, %v4110_v55 }
 0x1dd   :  { %v2343_v45 = vadd.f32 %v2342_v18, %v2341_v31  ;;  %v2540_v3 = vadd.f32 %v2539_v33, %v2538_v12  ;;  %v4316_v58 = vpop.f32.mrf.mxu1  ;;  %v2955_v15 = vpop.f32.mrf.mxu0  ;;  %v2472_v12 = vmul.f32 %v2061_v40, %v2061_v40 }
 0x1de   :  { %2271 = vst.msk [vmem:[%s4749_s2 + $0x60] sm:$0xff] %vm1295_vm0, %v2053_v11  ;;  %v2470_v7 = vmul.f32 %v2053_v11, %v2053_v11  ;;  %v2064_v9 = vadd.f32 %v2955_v15, %v4133_v23  ;;  %v2346_v54 = vsel %vm1295_vm0, %v2053_v11, 0.0  ;;  %v2350_v15 = vsel %vm1295_vm0, %v2061_v40, 0.0 }
 0x1df   :  { %v2542_v22 = vadd.f32 %v2541_v28, %v2540_v3  ;;  %v2345_v38 = vadd.f32 %v2344_v42, %v2343_v45  ;;  %v1872_v55 = vpop.f32.mrf.mxu1  ;;  %v2055_v34 = vpop.f32.mrf.mxu0 }
 0x1e0   :  { %v2056_v4 = vadd.f32 %v2055_v34, %v4122_v6  ;;  %2274 = vst.msk [vmem:[%s4749_s2 + $0x78] sm:$0xff] %vm1295_vm0, %v2064_v9  ;;  %v2545_v23 = vsel %vm1295_vm0, %v2470_v7, 0.0  ;;  %v2473_v28 = vmul.f32 %v2064_v9, %v2064_v9  ;;  %v2549_v34 = vsel %vm1295_vm0, %v2472_v12, 0.0 }
 0x1e1   :  { %v2347_v24 = vadd.f32 %v2346_v54, %v2345_v38  ;;  %v2544_v31 = vadd.f32 %v2543_v62, %v2542_v22  ;;  %v4332_v39 = vpop.f32.mrf.mxu1  ;;  %v2958_v48 = vpop.f32.mrf.mxu0  ;;  %v2352_v62 = vsel %vm1295_vm0, %v2064_v9, 0.0 }
 0x1e2   :  { %2272 = vst.msk [vmem:[%s4749_s2 + $0x68] sm:$0xff] %vm1295_vm0, %v2056_v4  ;;  %v2348_v6 = vsel %vm1295_vm0, %v2056_v4, 0.0  ;;  %v2471_v18 = vmul.f32 %v2056_v4, %v2056_v4  ;;  %v2077_v35 = vadd.f32 %v2958_v48, %v4148_v47  ;;  %v2551_v48 = vsel %vm1295_vm0, %v2473_v28, 0.0 }
 0x1e3   :  { %v2546_v33 = vadd.f32 %v2545_v23, %v2544_v31  ;;  %v2349_v11 = vadd.f32 %v2348_v6, %v2347_v24  ;;  %v1877_v45 = vpop.f32.mrf.mxu1  ;;  %v2068_v3 = vpop.f32.mrf.mxu0 }
 0x1e4   :  { %v2547_v42 = vsel %vm1295_vm0, %v2471_v18, 0.0  ;;  %2277 = vst.msk [vmem:[%s4749_s2 + $0x90] sm:$0xff] %vm1295_vm0, %v2077_v35  ;;  %v2069_v7 = vadd.f32 %v2068_v3, %v4138_v57  ;;  %v2476_v6 = vmul.f32 %v2077_v35, %v2077_v35 }
 0x1e5   :  { %v2351_v22 = vadd.f32 %v2350_v15, %v2349_v11  ;;  %v2548_v38 = vadd.f32 %v2547_v42, %v2546_v33  ;;  %v4348_v55 = vpop.f32.mrf.mxu1  ;;  %v2959_v47 = vpop.f32.mrf.mxu0 }
 0x1e6   :  { %2275 = vst.msk [vmem:[%s4749_s2 + $0x80] sm:$0xff] %vm1295_vm0, %v2069_v7  ;;  %v2474_v40 = vmul.f32 %v2069_v7, %v2069_v7  ;;  %v2080_v24 = vadd.f32 %v2959_v47, %v4153_v13  ;;  %v2354_v23 = vsel %vm1295_vm0, %v2069_v7, 0.0 }
 0x1e7   :  { %v2550_v54 = vadd.f32 %v2549_v34, %v2548_v38  ;;  %v2353_v4 = vadd.f32 %v2352_v62, %v2351_v22  ;;  %v1880_v57 = vpop.f32.mrf.mxu1  ;;  %v2071_v31 = vpop.f32.mrf.mxu0  ;;  %v2358_v22 = vsel %vm1295_vm0, %v2077_v35, 0.0 }
 0x1e8   :  { %v2072_v12 = vadd.f32 %v2071_v31, %v4143_v25  ;;  %2278 = vst.msk [vmem:[%s4749_s2 + $0x98] sm:$0xff] %vm1295_vm0, %v2080_v24  ;;  %v2553_v13 = vsel %vm1295_vm0, %v2474_v40, 0.0  ;;  %v2477_v38 = vmul.f32 %v2080_v24, %v2080_v24  ;;  %v2360_v57 = vsel %vm1295_vm0, %v2080_v24, 0.0 }
 0x1e9   :  { %v2355_v9 = vadd.f32 %v2354_v23, %v2353_v4  ;;  %v2552_v18 = vadd.f32 %v2551_v48, %v2550_v54  ;;  %v4364_v33 = vpop.f32.mrf.mxu1  ;;  %v2962_v11 = vpop.f32.mrf.mxu0  ;;  %v2557_v4 = vsel %vm1295_vm0, %v2476_v6, 0.0 }
 0x1ea   :  { %2276 = vst.msk [vmem:[%s4749_s2 + $0x88] sm:$0xff] %vm1295_vm0, %v2072_v12  ;;  %v2356_v25 = vsel %vm1295_vm0, %v2072_v12, 0.0  ;;  %v2475_v45 = vmul.f32 %v2072_v12, %v2072_v12  ;;  %v2093_v3 = vadd.f32 %v2962_v11, %v4168_v59 }
 0x1eb   :  { %v2554_v15 = vadd.f32 %v2553_v13, %v2552_v18  ;;  %v2357_v28 = vadd.f32 %v2356_v25, %v2355_v9  ;;  %v1885_v42 = vpop.f32.mrf.mxu1  ;;  %v2084_v7 = vpop.f32.mrf.mxu0  ;;  %v2559_v9 = vsel %vm1295_vm0, %v2477_v38, 0.0 }
 0x1ec   :  { %v2555_v47 = vsel %vm1295_vm0, %v2475_v45, 0.0  ;;  %2281 = vst.msk [vmem:[%s4749_s2 + $0xb0] sm:$0xff] %vm1295_vm0, %v2093_v3  ;;  %v2085_v34 = vadd.f32 %v2084_v7, %v4158_v0  ;;  %v2480_v11 = vmul.f32 %v2093_v3, %v2093_v3 }
 0x1ed   :  { %v2359_v62 = vadd.f32 %v2358_v22, %v2357_v28  ;;  %v2556_v40 = vadd.f32 %v2555_v47, %v2554_v15  ;;  %v4380_v54 = vpop.f32.mrf.mxu1  ;;  %v2963_v59 = vpop.f32.mrf.mxu0  ;;  %v2366_v47 = vsel %vm1295_vm0, %v2093_v3, 0.0 }
 0x1ee   :  { %2279 = vst.msk [vmem:[%s4749_s2 + $0xa0] sm:$0xff] %vm1295_vm0, %v2085_v34  ;;  %v2478_v35 = vmul.f32 %v2085_v34, %v2085_v34  ;;  %v2096_v23 = vadd.f32 %v2963_v59, %v4173_v50  ;;  %v2362_v18 = vsel %vm1295_vm0, %v2085_v34, 0.0 }
 0x1ef   :  { %v2558_v31 = vadd.f32 %v2557_v4, %v2556_v40  ;;  %v2361_v48 = vadd.f32 %v2360_v57, %v2359_v62  ;;  %v1888_v0 = vpop.f32.mrf.mxu1  ;;  %v2087_v12 = vpop.f32.mrf.mxu0 }
 0x1f0   :  { %v2088_v6 = vadd.f32 %v2087_v12, %v4163_v37  ;;  %2282 = vst.msk [vmem:[%s4749_s2 + $0xb8] sm:$0xff] %vm1295_vm0, %v2096_v23  ;;  %v2561_v50 = vsel %vm1295_vm0, %v2478_v35, 0.0  ;;  %v2481_v34 = vmul.f32 %v2096_v23, %v2096_v23  ;;  %v2565_v35 = vsel %vm1295_vm0, %v2480_v11, 0.0 }
 0x1f1   :  { %v2363_v24 = vadd.f32 %v2362_v18, %v2361_v48  ;;  %v2560_v13 = vadd.f32 %v2559_v9, %v2558_v31  ;;  %v4396_v25 = vpop.f32.mrf.mxu1  ;;  %v2966_v45 = vpop.f32.mrf.mxu0  ;;  %v2368_v31 = vsel %vm1295_vm0, %v2096_v23, 0.0  ;;  %v1836_v18 = vadd.f32 %v4207_v29, %v4124_v63 }
 0x1f2   :  { %2280 = vst.msk [vmem:[%s4749_s2 + $0xa8] sm:$0xff] %vm1295_vm0, %v2088_v6  ;;  %v2364_v37 = vsel %vm1295_vm0, %v2088_v6, 0.0  ;;  %v2479_v15 = vmul.f32 %v2088_v6, %v2088_v6  ;;  %v2109_v28 = vadd.f32 %v2966_v45, %v4188_v26  ;;  %v2567_v6 = vsel %vm1295_vm0, %v2481_v34, 0.0 }
 0x1f3   :  { %v2562_v42 = vadd.f32 %v2561_v50, %v2560_v13  ;;  %v2365_v7 = vadd.f32 %v2364_v37, %v2363_v24  ;;  %v1893_v22 = vpop.f32.mrf.mxu1  ;;  %v2100_v38 = vpop.f32.mrf.mxu0 }
 0x1f4   :  { %v2563_v62 = vsel %vm1295_vm0, %v2479_v15, 0.0  ;;  %2285 = vst.msk [vmem:[%s4749_s2 + $0xd0] sm:$0xff] %vm1295_vm0, %v2109_v28  ;;  %v2101_v40 = vadd.f32 %v2100_v38, %v4178_v32  ;;  %v2484_v24 = vmul.f32 %v2109_v28, %v2109_v28  ;;  %v2374_v38 = vsel %vm1295_vm0, %v2109_v28, 0.0 }
 0x1f5   :  { %v2367_v59 = vadd.f32 %v2366_v47, %v2365_v7  ;;  %v2564_v4 = vadd.f32 %v2563_v62, %v2562_v42  ;;  %v4412_v57 = vpop.f32.mrf.mxu1  ;;  %v2967_v26 = vpop.f32.mrf.mxu0 }
 0x1f6   :  { %2283 = vst.msk [vmem:[%s4749_s2 + $0xc0] sm:$0xff] %vm1295_vm0, %v2101_v40  ;;  %v2482_v3 = vmul.f32 %v2101_v40, %v2101_v40  ;;  %v2112_v12 = vadd.f32 %v2967_v26, %v4193_v1  ;;  %v2370_v11 = vsel %vm1295_vm0, %v2101_v40, 0.0  ;;  %v1839_v40 = vadd.f32 %v4211_v51, %v4130_v8 }
 0x1f7   :  { %v2566_v48 = vadd.f32 %v2565_v35, %v2564_v4  ;;  %v2369_v0 = vadd.f32 %v2368_v31, %v2367_v59  ;;  %v1896_v32 = vpop.f32.mrf.mxu1  ;;  %v2103_v9 = vpop.f32.mrf.mxu0  ;;  %v2573_v28 = vsel %vm1295_vm0, %v2484_v24, 0.0  ;;  %v1852_v51 = vadd.f32 %v4235_v2, %v4145_v49 }
 0x1f8   :  { %v2104_v23 = vadd.f32 %v2103_v9, %v4183_v44  ;;  %2286 = vst.msk [vmem:[%s4749_s2 + $0xd8] sm:$0xff] %vm1295_vm0, %v2112_v12  ;;  %v2569_v37 = vsel %vm1295_vm0, %v2482_v3, 0.0  ;;  %v2485_v47 = vmul.f32 %v2112_v12, %v2112_v12  ;;  %v2376_v31 = vsel %vm1295_vm0, %v2112_v12, 0.0 }
 0x1f9   :  { %v2371_v13 = vadd.f32 %v2370_v11, %v2369_v0  ;;  %v2568_v45 = vadd.f32 %v2567_v6, %v2566_v48  ;;  %v4430_v1 = vpop.f32.mrf.mxu1  ;;  %v2970_v50 = vpop.f32.mrf.mxu0 }
 0x1fa   :  { %2284 = vst.msk [vmem:[%s4749_s2 + $0xc8] sm:$0xff] %vm1295_vm0, %v2104_v23  ;;  %v2372_v63 = vsel %vm1295_vm0, %v2104_v23, 0.0  ;;  %v2483_v44 = vmul.f32 %v2104_v23, %v2104_v23  ;;  %v2125_v29 = vadd.f32 %v2970_v50, %v1836_v18  ;;  %v2575_v9 = vsel %vm1295_vm0, %v2485_v47, 0.0 }
 0x1fb   :  { %v2570_v15 = vadd.f32 %v2569_v37, %v2568_v45  ;;  %v2373_v42 = vadd.f32 %v2372_v63, %v2371_v13  ;;  %v1901_v7 = vpop.f32.mrf.mxu1  ;;  %v2116_v22 = vpop.f32.mrf.mxu0 }
 0x1fc   :  { %v2571_v34 = vsel %vm1295_vm0, %v2483_v44, 0.0  ;;  %2289 = vst.msk [vmem:[%s4749_s2 + $0xf0] sm:$0xff] %vm1295_vm0, %v2125_v29  ;;  %v2117_v62 = vadd.f32 %v2116_v22, %v4198_v14  ;;  %v2488_v6 = vmul.f32 %v2125_v29, %v2125_v29 }
 0x1fd   :  { %v2375_v59 = vadd.f32 %v2374_v38, %v2373_v42  ;;  %v2572_v4 = vadd.f32 %v2571_v34, %v2570_v15  ;;  %v4447_v26 = vpop.f32.mrf.mxu1  ;;  %v2971_v35 = vpop.f32.mrf.mxu0  ;;  %v2382_v15 = vsel %vm1295_vm0, %v2125_v29, 0.0  ;;  %v1855_v38 = vadd.f32 %v4252_v17, %v4150_v61 }
 0x1fe   :  { %2287 = vst.msk [vmem:[%s4749_s2 + $0xe0] sm:$0xff] %vm1295_vm0, %v2117_v62  ;;  %v2486_v3 = vmul.f32 %v2117_v62, %v2117_v62  ;;  %v2128_v0 = vadd.f32 %v2971_v35, %v1839_v40  ;;  %v2378_v18 = vsel %vm1295_vm0, %v2117_v62, 0.0  ;;  %v2581_v29 = vsel %vm1295_vm0, %v2488_v6, 0.0 }
 0x1ff   :  { %v2574_v48 = vadd.f32 %v2573_v28, %v2572_v4  ;;  %v2377_v14 = vadd.f32 %v2376_v31, %v2375_v59  ;;  %v1904_v32 = vpop.f32.mrf.mxu1  ;;  %v2119_v8 = vpop.f32.mrf.mxu0  ;;  %v1868_v17 = vadd.f32 %v4300_v43, %v4165_v30 }
 0x200   :  { %v2120_v12 = vadd.f32 %v2119_v8, %v4203_v60  ;;  %2290 = vst.msk [vmem:[%s4749_s2 + $0xf8] sm:$0xff] %vm1295_vm0, %v2128_v0  ;;  %v2577_v45 = vsel %vm1295_vm0, %v2486_v3, 0.0  ;;  %v2489_v42 = vmul.f32 %v2128_v0, %v2128_v0  ;;  %v2384_v59 = vsel %vm1295_vm0, %v2128_v0, 0.0 }
 0x201   :  { %v2379_v11 = vadd.f32 %v2378_v18, %v2377_v14  ;;  %v2576_v23 = vadd.f32 %v2575_v9, %v2574_v48  ;;  %v4464_v24 = vpop.f32.mrf.mxu1  ;;  %v2974_v13 = vpop.f32.mrf.mxu0  ;;  %v1860_v0 = vadd.f32 %v4268_v36, %v4155_v5 }
 0x202   :  { %2288 = vst.msk [vmem:[%s4749_s2 + $0xe8] sm:$0xff] %vm1295_vm0, %v2120_v12  ;;  %v2380_v49 = vsel %vm1295_vm0, %v2120_v12, 0.0  ;;  %v2487_v60 = vmul.f32 %v2120_v12, %v2120_v12  ;;  %v2141_v2 = vadd.f32 %v2974_v13, %v1852_v51  ;;  %v2583_v3 = vsel %vm1295_vm0, %v2489_v42, 0.0 }
 0x203   :  { %v2578_v50 = vadd.f32 %v2577_v45, %v2576_v23  ;;  %v2381_v37 = vadd.f32 %v2380_v49, %v2379_v11  ;;  %v1909_v63 = vpop.f32.mrf.mxu1  ;;  %v2132_v44 = vpop.f32.mrf.mxu0 }
 0x204   :  { %v2579_v7 = vsel %vm1295_vm0, %v2487_v60, 0.0  ;;  %2293 = vst.msk [vmem:[%s4749_s2 + $0x110] sm:$0xff] %vm1295_vm0, %v2141_v2  ;;  %v2133_v22 = vadd.f32 %v2132_v44, %v4214_v16  ;;  %v2492_v32 = vmul.f32 %v2141_v2, %v2141_v2  ;;  %v2390_v23 = vsel %vm1295_vm0, %v2141_v2, 0.0 }
 0x205   :  { %v2383_v47 = vadd.f32 %v2382_v15, %v2381_v37  ;;  %v2580_v34 = vadd.f32 %v2579_v7, %v2578_v50  ;;  %v4481_v62 = vpop.f32.mrf.mxu1  ;;  %v2975_v40 = vpop.f32.mrf.mxu0  ;;  %v1871_v60 = vadd.f32 %v4316_v58, %v4170_v46  ;;  %v1863_v2 = vadd.f32 %v4284_v52, %v4160_v20 }
 0x206   :  { %2291 = vst.msk [vmem:[%s4749_s2 + $0x100] sm:$0xff] %vm1295_vm0, %v2133_v22  ;;  %v2490_v4 = vmul.f32 %v2133_v22, %v2133_v22  ;;  %v2144_v28 = vadd.f32 %v2975_v40, %v1855_v38  ;;  %v2386_v48 = vsel %vm1295_vm0, %v2133_v22, 0.0  ;;  %v2589_v15 = vsel %vm1295_vm0, %v2492_v32, 0.0 }
 0x207   :  { %v2582_v35 = vadd.f32 %v2581_v29, %v2580_v34  ;;  %v2385_v16 = vadd.f32 %v2384_v59, %v2383_v47  ;;  %v1912_v31 = vpop.f32.mrf.mxu1  ;;  %v2135_v61 = vpop.f32.mrf.mxu0  ;;  %v1884_v34 = vadd.f32 %v4364_v33, %v4185_v19  ;;  %v1876_v29 = vadd.f32 %v4332_v39, %v4175_v56 }
 0x208   :  { %v2136_v14 = vadd.f32 %v2135_v61, %v4227_v53  ;;  %2294 = vst.msk [vmem:[%s4749_s2 + $0x118] sm:$0xff] %vm1295_vm0, %v2144_v28  ;;  %v2585_v43 = vsel %vm1295_vm0, %v2490_v4, 0.0  ;;  %v2493_v13 = vmul.f32 %v2144_v28, %v2144_v28  ;;  %v2392_v42 = vsel %vm1295_vm0, %v2144_v28, 0.0 }
 0x209   :  { %v2387_v8 = vadd.f32 %v2386_v48, %v2385_v16  ;;  %v2584_v51 = vadd.f32 %v2583_v3, %v2582_v35  ;;  %v4500_v9 = vpop.f32.mrf.mxu1  ;;  %v2978_v30 = vpop.f32.mrf.mxu0 }
 0x20a   :  { %2292 = vst.msk [vmem:[%s4749_s2 + $0x108] sm:$0xff] %vm1295_vm0, %v2136_v14  ;;  %v2388_v5 = vsel %vm1295_vm0, %v2136_v14, 0.0  ;;  %v2491_v53 = vmul.f32 %v2136_v14, %v2136_v14  ;;  %v2157_v36 = vadd.f32 %v2978_v30, %v1868_v17  ;;  %v2591_v20 = vsel %vm1295_vm0, %v2493_v13, 0.0 }
 0x20b   :  { %v2586_v18 = vadd.f32 %v2585_v43, %v2584_v51  ;;  %v2389_v12 = vadd.f32 %v2388_v5, %v2387_v8  ;;  %v1917_v6 = vpop.f32.mrf.mxu1  ;;  %v2148_v11 = vpop.f32.mrf.mxu0  ;;  %v1887_v8 = vadd.f32 %v4380_v54, %v4190_v41  ;;  %v1900_v13 = vadd.f32 %v4430_v1, %v4205_v21 }
 0x20c   :  { %v2587_v45 = vsel %vm1295_vm0, %v2491_v53, 0.0  ;;  %2297 = vst.msk [vmem:[%s4749_s2 + $0x130] sm:$0xff] %vm1295_vm0, %v2157_v36  ;;  %v2149_v49 = vadd.f32 %v2148_v11, %v1860_v0  ;;  %v2496_v59 = vmul.f32 %v2157_v36, %v2157_v36  ;;  %v2398_v48 = vsel %vm1295_vm0, %v2157_v36, 0.0 }
 0x20d   :  { %v2391_v50 = vadd.f32 %v2390_v23, %v2389_v12  ;;  %v2588_v37 = vadd.f32 %v2587_v45, %v2586_v18  ;;  %v4516_v63 = vpop.f32.mrf.mxu1  ;;  %v2979_v44 = vpop.f32.mrf.mxu0  ;;  %v1879_v53 = vadd.f32 %v4348_v55, %v4180_v10 }
 0x20e   :  { %2295 = vst.msk [vmem:[%s4749_s2 + $0x120] sm:$0xff] %vm1295_vm0, %v2149_v49  ;;  %v2494_v7 = vmul.f32 %v2149_v49, %v2149_v49  ;;  %v2160_v58 = vadd.f32 %v2979_v44, %v1871_v60  ;;  %v2394_v52 = vsel %vm1295_vm0, %v2149_v49, 0.0  ;;  %v2597_v36 = vsel %vm1295_vm0, %v2496_v59, 0.0 }
 0x20f   :  { %v2590_v22 = vadd.f32 %v2589_v15, %v2588_v37  ;;  %v2393_v46 = vadd.f32 %v2392_v42, %v2391_v50  ;;  %v1920_v38 = vpop.f32.mrf.mxu1  ;;  %v2151_v47 = vpop.f32.mrf.mxu0  ;;  %v1892_v49 = vadd.f32 %v4396_v25, %v4195_v27 }
 0x210   :  { %v2152_v40 = vadd.f32 %v2151_v47, %v1863_v2  ;;  %2298 = vst.msk [vmem:[%s4749_s2 + $0x138] sm:$0xff] %vm1295_vm0, %v2160_v58  ;;  %v2593_v19 = vsel %vm1295_vm0, %v2494_v7, 0.0  ;;  %v2497_v14 = vmul.f32 %v2160_v58, %v2160_v58  ;;  %v2400_v18 = vsel %vm1295_vm0, %v2160_v58, 0.0 }
 0x211   :  { %v2395_v4 = vadd.f32 %v2394_v52, %v2393_v46  ;;  %v2592_v35 = vadd.f32 %v2591_v20, %v2590_v22  ;;  %v4536_v16 = vpop.f32.mrf.mxu1  ;;  %v2982_v28 = vpop.f32.mrf.mxu0 }
 0x212   :  { %2296 = vst.msk [vmem:[%s4749_s2 + $0x128] sm:$0xff] %vm1295_vm0, %v2152_v40  ;;  %v2396_v56 = vsel %vm1295_vm0, %v2152_v40, 0.0  ;;  %v2495_v39 = vmul.f32 %v2152_v40, %v2152_v40  ;;  %v2173_v33 = vadd.f32 %v2982_v28, %v1884_v34  ;;  %v2599_v10 = vsel %vm1295_vm0, %v2497_v14, 0.0  ;;  %v4770_v34 = vld [vmem:[#allocation19_spill] sm:$0xff] }
 0x213   :  { %v2594_v31 = vadd.f32 %v2593_v19, %v2592_v35  ;;  %v2397_v61 = vadd.f32 %v2396_v56, %v2395_v4  ;;  %v1925_v17 = vpop.f32.mrf.mxu1  ;;  %v2164_v3 = vpop.f32.mrf.mxu0  ;;  %v1903_v20 = vadd.f32 %v4447_v26, %v4770_v34  ;;  %v4771_v4 = vld [vmem:[#allocation18_spill] sm:$0xff] }
 0x214   :  { %v2595_v0 = vsel %vm1295_vm0, %v2495_v39, 0.0  ;;  %2301 = vst.msk [vmem:[%s4749_s2 + $0x150] sm:$0xff] %vm1295_vm0, %v2173_v33  ;;  %v2165_v32 = vadd.f32 %v2164_v3, %v1876_v29  ;;  %v2500_v60 = vmul.f32 %v2173_v33, %v2173_v33  ;;  %v2406_v46 = vsel %vm1295_vm0, %v2173_v33, 0.0  ;;  %v4772_v17 = vld [vmem:[#allocation4_spill] sm:$0xff]  ;;  %v4777_v34 = vld [vmem:[#allocation6_spill] sm:$0xff] }
 0x215   :  { %v2399_v51 = vadd.f32 %v2398_v48, %v2397_v61  ;;  %v2596_v30 = vadd.f32 %v2595_v0, %v2594_v31  ;;  %v4552_v43 = vpop.f32.mrf.mxu1  ;;  %v2983_v5 = vpop.f32.mrf.mxu0  ;;  %v1895_v35 = vadd.f32 %v4412_v57, %v4771_v4  ;;  %v1916_v3 = vadd.f32 %v4500_v9, %v4772_v17  ;;  %v4773_v0 = vld [vmem:[#allocation2_spill] sm:$0xff] }
 0x216   :  { %2299 = vst.msk [vmem:[%s4749_s2 + $0x140] sm:$0xff] %vm1295_vm0, %v2165_v32  ;;  %v2498_v12 = vmul.f32 %v2165_v32, %v2165_v32  ;;  %v2176_v54 = vadd.f32 %v2983_v5, %v1887_v8  ;;  %v2402_v55 = vsel %vm1295_vm0, %v2165_v32, 0.0  ;;  %v2605_v28 = vsel %vm1295_vm0, %v2500_v60, 0.0 }
 0x217   :  { %v2598_v6 = vadd.f32 %v2597_v36, %v2596_v30  ;;  %v2401_v41 = vadd.f32 %v2400_v18, %v2399_v51  ;;  %v1928_v11 = vpop.f32.mrf.mxu1  ;;  %v2167_v23 = vpop.f32.mrf.mxu0  ;;  %v1908_v32 = vadd.f32 %v4464_v24, %v4773_v0 }
 0x218   :  { %v2168_v45 = vadd.f32 %v2167_v23, %v1879_v53  ;;  %2302 = vst.msk [vmem:[%s4749_s2 + $0x158] sm:$0xff] %vm1295_vm0, %v2176_v54  ;;  %v2601_v21 = vsel %vm1295_vm0, %v2498_v12, 0.0  ;;  %v2501_v58 = vmul.f32 %v2176_v54, %v2176_v54  ;;  %v2408_v19 = vsel %vm1295_vm0, %v2176_v54, 0.0 }
 0x219   :  { %v2403_v50 = vadd.f32 %v2402_v55, %v2401_v41  ;;  %v2600_v37 = vadd.f32 %v2599_v10, %v2598_v6  ;;  %v4572_v44 = vpop.f32.mrf.mxu1  ;;  %v2986_v2 = vpop.f32.mrf.mxu0  ;;  %v4774_v55 = vld [vmem:[#allocation5_spill] sm:$0xff] }
 0x21a   :  { %2300 = vst.msk [vmem:[%s4749_s2 + $0x148] sm:$0xff] %vm1295_vm0, %v2168_v45  ;;  %v2404_v27 = vsel %vm1295_vm0, %v2168_v45, 0.0  ;;  %v2499_v25 = vmul.f32 %v2168_v45, %v2168_v45  ;;  %v2189_v1 = vadd.f32 %v2986_v2, %v1900_v13  ;;  %v2607_v57 = vsel %vm1295_vm0, %v2501_v58, 0.0  ;;  %v4775_v2 = vld [vmem:[#allocation3_spill] sm:$0xff] }
 0x21b   :  { %v2602_v15 = vadd.f32 %v2601_v21, %v2600_v37  ;;  %v2405_v42 = vadd.f32 %v2404_v27, %v2403_v50  ;;  %v1933_v7 = vpop.f32.mrf.mxu1  ;;  %v2180_v22 = vpop.f32.mrf.mxu0  ;;  %v1919_v45 = vadd.f32 %v4516_v63, %v4774_v55  ;;  %v1911_v21 = vadd.f32 %v4481_v62, %v4775_v2 }
 0x21c   :  { %v2603_v38 = vsel %vm1295_vm0, %v2499_v25, 0.0  ;;  %2305 = vst.msk [vmem:[%s4749_s2 + $0x170] sm:$0xff] %vm1295_vm0, %v2189_v1  ;;  %v2181_v47 = vadd.f32 %v2180_v22, %v1892_v49  ;;  %v2504_v8 = vmul.f32 %v2189_v1, %v2189_v1  ;;  %v2414_v11 = vsel %vm1295_vm0, %v2189_v1, 0.0 }
 0x21d   :  { %v2407_v52 = vadd.f32 %v2406_v46, %v2405_v42  ;;  %v2604_v40 = vadd.f32 %v2603_v38, %v2602_v15  ;;  %v4588_v29 = vpop.f32.mrf.mxu1  ;;  %v2987_v59 = vpop.f32.mrf.mxu0  ;;  %v4776_v46 = vld [vmem:[#allocation8_spill] sm:$0xff] }
 0x21e   :  { %2303 = vst.msk [vmem:[%s4749_s2 + $0x160] sm:$0xff] %vm1295_vm0, %v2181_v47  ;;  %v2502_v56 = vmul.f32 %v2181_v47, %v2181_v47  ;;  %v2192_v33 = vadd.f32 %v2987_v59, %v1903_v20  ;;  %v2410_v48 = vsel %vm1295_vm0, %v2181_v47, 0.0  ;;  %v2613_v27 = vsel %vm1295_vm0, %v2504_v8, 0.0 }
 0x21f   :  { %v2606_v39 = vadd.f32 %v2605_v28, %v2604_v40  ;;  %v2409_v26 = vadd.f32 %v2408_v19, %v2407_v52  ;;  %v1936_v31 = vpop.f32.mrf.mxu1  ;;  %v2183_v61 = vpop.f32.mrf.mxu0  ;;  %v1932_v58 = vadd.f32 %v4572_v44, %v4776_v46  ;;  %v1924_v20 = vadd.f32 %v4536_v16, %v4777_v34 }
 0x220   :  { %v2184_v14 = vadd.f32 %v2183_v61, %v1895_v35  ;;  %2306 = vst.msk [vmem:[%s4749_s2 + $0x178] sm:$0xff] %vm1295_vm0, %v2192_v33  ;;  %v2609_v9 = vsel %vm1295_vm0, %v2502_v56, 0.0  ;;  %v2505_v23 = vmul.f32 %v2192_v33, %v2192_v33  ;;  %v2416_v25 = vsel %vm1295_vm0, %v2192_v33, 0.0 }
 0x221   :  { %v2411_v51 = vadd.f32 %v2410_v48, %v2409_v26  ;;  %v2608_v30 = vadd.f32 %v2607_v57, %v2606_v39  ;;  %v4608_v5 = vpop.f32.mrf.mxu1  ;;  %v2990_v53 = vpop.f32.mrf.mxu0  ;;  %v4778_v57 = vld [vmem:[#allocation9_spill] sm:$0xff] }
 0x222   :  { %2304 = vst.msk [vmem:[%s4749_s2 + $0x168] sm:$0xff] %vm1295_vm0, %v2184_v14  ;;  %v2412_v24 = vsel %vm1295_vm0, %v2184_v14, 0.0  ;;  %v2503_v36 = vmul.f32 %v2184_v14, %v2184_v14  ;;  %v2205_v18 = vadd.f32 %v2990_v53, %v1916_v3  ;;  %v2615_v62 = vsel %vm1295_vm0, %v2505_v23, 0.0 }
 0x223   :  { %v2610_v12 = vadd.f32 %v2609_v9, %v2608_v30  ;;  %v2413_v6 = vadd.f32 %v2412_v24, %v2411_v51  ;;  %v1941_v41 = vpop.f32.mrf.mxu1  ;;  %v2196_v54 = vpop.f32.mrf.mxu0  ;;  %v1935_v48 = vadd.f32 %v4588_v29, %v4778_v57  ;;  %v4779_v51 = vld [vmem:[#allocation7_spill] sm:$0xff] }
 0x224   :  { %v2611_v13 = vsel %vm1295_vm0, %v2503_v36, 0.0  ;;  %2309 = vst.msk [vmem:[%s4749_s2 + $0x190] sm:$0xff] %vm1295_vm0, %v2205_v18  ;;  %v2197_v10 = vadd.f32 %v2196_v54, %v1908_v32  ;;  %v2508_v52 = vmul.f32 %v2205_v18, %v2205_v18  ;;  %v2422_v31 = vsel %vm1295_vm0, %v2205_v18, 0.0  ;;  %v4780_v54 = vld [vmem:[#allocation12_spill] sm:$0xff] }
 0x225   :  { %v2415_v49 = vadd.f32 %v2414_v11, %v2413_v6  ;;  %v2612_v60 = vadd.f32 %v2611_v13, %v2610_v12  ;;  %v4624_v50 = vpop.f32.mrf.mxu1  ;;  %v2991_v37 = vpop.f32.mrf.mxu0  ;;  %v1927_v30 = vadd.f32 %v4552_v43, %v4779_v51  ;;  %v4781_v13 = vld [vmem:[#allocation10_spill] sm:$0xff] }
 0x226   :  { %2307 = vst.msk [vmem:[%s4749_s2 + $0x180] sm:$0xff] %vm1295_vm0, %v2197_v10  ;;  %v2506_v1 = vmul.f32 %v2197_v10, %v2197_v10  ;;  %v2208_v42 = vadd.f32 %v2991_v37, %v1919_v45  ;;  %v2418_v38 = vsel %vm1295_vm0, %v2197_v10, 0.0  ;;  %v2621_v53 = vsel %vm1295_vm0, %v2508_v52, 0.0  ;;  %v4783_v52 = vld [vmem:[#allocation11_spill] sm:$0xff] }
 0x227   :  { %v2614_v15 = vadd.f32 %v2613_v27, %v2612_v60  ;;  %v2417_v63 = vadd.f32 %v2416_v25, %v2415_v49  ;;  %v1944_v7 = vpop.f32.mrf.mxu1  ;;  %v2199_v22 = vpop.f32.mrf.mxu0  ;;  %v1940_v10 = vadd.f32 %v4608_v5, %v4781_v13  ;;  %v4786_v13 = vld [vmem:[#allocation15_spill] sm:$0xff] }
 0x228   :  { %v2200_v47 = vadd.f32 %v2199_v22, %v1911_v21  ;;  %2310 = vst.msk [vmem:[%s4749_s2 + $0x198] sm:$0xff] %vm1295_vm0, %v2208_v42  ;;  %v2617_v44 = vsel %vm1295_vm0, %v2506_v1, 0.0  ;;  %v2509_v61 = vmul.f32 %v2208_v42, %v2208_v42  ;;  %v2424_v9 = vsel %vm1295_vm0, %v2208_v42, 0.0 }
 0x229   :  { %v2419_v40 = vadd.f32 %v2418_v38, %v2417_v63  ;;  %v2616_v59 = vadd.f32 %v2615_v62, %v2614_v15  ;;  %v1947_v4 = vpop.f32.mrf.mxu1  ;;  %v2994_v35 = vpop.f32.mrf.mxu0 }
 0x22a   :  { %2308 = vst.msk [vmem:[%s4749_s2 + $0x188] sm:$0xff] %vm1295_vm0, %v2200_v47  ;;  %v2420_v28 = vsel %vm1295_vm0, %v2200_v47, 0.0  ;;  %v2507_v16 = vmul.f32 %v2200_v47, %v2200_v47  ;;  %v2221_v19 = vadd.f32 %v2994_v35, %v1932_v58  ;;  %v2623_v41 = vsel %vm1295_vm0, %v2509_v61, 0.0  ;;  %v4782_v58 = vld [vmem:[#allocation13_spill] sm:$0xff] }
 0x22b   :  { %v2618_v56 = vadd.f32 %v2617_v44, %v2616_v59  ;;  %v2421_v39 = vadd.f32 %v2420_v28, %v2419_v40  ;;  %v1949_v26 = vpop.f32.mrf.mxu1  ;;  %v2212_v33 = vpop.f32.mrf.mxu0  ;;  %v1948_v11 = vadd.f32 %v1947_v4, %v4780_v54  ;;  %v1943_v40 = vadd.f32 %v4624_v50, %v4783_v52 }
 0x22c   :  { %v2619_v17 = vsel %vm1295_vm0, %v2507_v16, 0.0  ;;  %2313 = vst.msk [vmem:[%s4749_s2 + $0x1b0] sm:$0xff] %vm1295_vm0, %v2221_v19  ;;  %v2213_v3 = vadd.f32 %v2212_v33, %v1924_v20  ;;  %v2512_v55 = vmul.f32 %v2221_v19, %v2221_v19  ;;  %v2430_v42 = vsel %vm1295_vm0, %v2221_v19, 0.0  ;;  %v4784_v33 = vld [vmem:[#allocation14_spill] sm:$0xff] }
 0x22d   :  { %v2423_v14 = vadd.f32 %v2422_v31, %v2421_v39  ;;  %v2620_v0 = vadd.f32 %v2619_v17, %v2618_v56  ;;  %v1950_v32 = vpop.f32.mrf.mxu1  ;;  %v2995_v8 = vpop.f32.mrf.mxu0 }
 0x22e   :  { %2311 = vst.msk [vmem:[%s4749_s2 + $0x1a0] sm:$0xff] %vm1295_vm0, %v2213_v3  ;;  %v2510_v24 = vmul.f32 %v2213_v3, %v2213_v3  ;;  %v2224_v29 = vadd.f32 %v2995_v8, %v1935_v48  ;;  %v2426_v43 = vsel %vm1295_vm0, %v2213_v3, 0.0  ;;  %v1951_v62 = vadd.f32 %v1950_v32, %v4782_v58  ;;  %v4785_v8 = vld [vmem:[#allocation16_spill] sm:$0xff] }
 0x22f   :  { %v2622_v36 = vadd.f32 %v2621_v53, %v2620_v0  ;;  %v2425_v18 = vadd.f32 %v2424_v9, %v2423_v14  ;;  %v1952_v12 = vpop.f32.mrf.mxu1  ;;  %v2215_v6 = vpop.f32.mrf.mxu0  ;;  %v2629_v59 = vsel %vm1295_vm0, %v2512_v55, 0.0 }
 0x230   :  { %v2216_v23 = vadd.f32 %v2215_v6, %v1927_v30  ;;  %2314 = vst.msk [vmem:[%s4749_s2 + $0x1b8] sm:$0xff] %vm1295_vm0, %v2224_v29  ;;  %v2625_v2 = vsel %vm1295_vm0, %v2510_v24, 0.0  ;;  %v2513_v7 = vmul.f32 %v2224_v29, %v2224_v29  ;;  %v2432_v4 = vsel %vm1295_vm0, %v2224_v29, 0.0 }
 0x231   :  { %v2427_v45 = vadd.f32 %v2426_v43, %v2425_v18  ;;  %v2624_v49 = vadd.f32 %v2623_v41, %v2622_v36  ;;  %v1955_v60 = vpop.f32.mrf.mxu1  ;;  %v2998_v37 = vpop.f32.mrf.mxu0 }
 0x232   :  { %2312 = vst.msk [vmem:[%s4749_s2 + $0x1a8] sm:$0xff] %vm1295_vm0, %v2216_v23  ;;  %v2428_v21 = vsel %vm1295_vm0, %v2216_v23, 0.0  ;;  %v2511_v5 = vmul.f32 %v2216_v23, %v2216_v23  ;;  %v2237_v27 = vadd.f32 %v2998_v37, %v1948_v11  ;;  %v2631_v39 = vsel %vm1295_vm0, %v2513_v7, 0.0  ;;  %v4787_v37 = vld [vmem:[#allocation17_spill] sm:$0xff] }
 0x233   :  { %v2626_v25 = vadd.f32 %v2625_v2, %v2624_v49  ;;  %v2429_v1 = vadd.f32 %v2428_v21, %v2427_v45  ;;  %v1957_v15 = vpop.f32.mrf.mxu1  ;;  %v2228_v63 = vpop.f32.mrf.mxu0  ;;  %v1956_v31 = vadd.f32 %v1955_v60, %v4784_v33 }
 0x234   :  { %v2627_v22 = vsel %vm1295_vm0, %v2511_v5, 0.0  ;;  %2317 = vst.msk [vmem:[%s4749_s2 + $0x1d0] sm:$0xff] %vm1295_vm0, %v2237_v27  ;;  %v2229_v46 = vadd.f32 %v2228_v63, %v1940_v10  ;;  %v2516_v61 = vmul.f32 %v2237_v27, %v2237_v27  ;;  %v2438_v30 = vsel %vm1295_vm0, %v2237_v27, 0.0 }
 0x235   :  { %v2431_v38 = vadd.f32 %v2430_v42, %v2429_v1  ;;  %v2628_v47 = vadd.f32 %v2627_v22, %v2626_v25  ;;  %v1958_v34 = vpop.f32.mrf.mxu1  ;;  %v2999_v20 = vpop.f32.mrf.mxu0 }
 0x236   :  { %2315 = vst.msk [vmem:[%s4749_s2 + $0x1c0] sm:$0xff] %vm1295_vm0, %v2229_v46  ;;  %v2514_v35 = vmul.f32 %v2229_v46, %v2229_v46  ;;  %v2240_v16 = vadd.f32 %v2999_v20, %v1951_v62  ;;  %v2434_v26 = vsel %vm1295_vm0, %v2229_v46, 0.0  ;;  %v2637_v23 = vsel %vm1295_vm0, %v2516_v61, 0.0 }
 0x237   :  { %v2630_v44 = vadd.f32 %v2629_v59, %v2628_v47  ;;  %v2433_v28 = vadd.f32 %v2432_v4, %v2431_v38  ;;  %v1960_v19 = vpop.f32.mrf.mxu1  ;;  %v2231_v56 = vpop.f32.mrf.mxu0  ;;  %v1959_v10 = vadd.f32 %v1958_v34, %v4786_v13 }
 0x238   :  { %v2232_v50 = vadd.f32 %v2231_v56, %v1943_v40  ;;  %2318 = vst.msk [vmem:[%s4749_s2 + $0x1d8] sm:$0xff] %vm1295_vm0, %v2240_v16  ;;  %v2633_v14 = vsel %vm1295_vm0, %v2514_v35, 0.0  ;;  %v2517_v18 = vmul.f32 %v2240_v16, %v2240_v16  ;;  %v2440_v55 = vsel %vm1295_vm0, %v2240_v16, 0.0 }
 0x239   :  { %v2435_v17 = vadd.f32 %v2434_v26, %v2433_v28  ;;  %v2632_v3 = vadd.f32 %v2631_v39, %v2630_v44  ;;  %v1963_v57 = vpop.f32.mrf.mxu1  ;;  %v3002_v48 = vpop.f32.mrf.mxu0 }
 0x23a   :  { %2316 = vst.msk [vmem:[%s4749_s2 + $0x1c8] sm:$0xff] %vm1295_vm0, %v2232_v50  ;;  %v2436_v0 = vsel %vm1295_vm0, %v2232_v50, 0.0  ;;  %v2515_v32 = vmul.f32 %v2232_v50, %v2232_v50  ;;  %v1964_v51 = vadd.f32 %v1963_v57, %v4785_v8  ;;  %v2639_v27 = vsel %vm1295_vm0, %v2517_v18, 0.0 }
 0x23b   :  { %v2634_v53 = vadd.f32 %v2633_v14, %v2632_v3  ;;  %v2437_v9 = vadd.f32 %v2436_v0, %v2435_v17  ;;  %v1965_v24 = vpop.f32.mrf.mxu1  ;;  %v2244_v36 = vpop.f32.mrf.mxu0 }
 0x23c   :  { %v2635_v29 = vsel %vm1295_vm0, %v2515_v32, 0.0  ;;  %v2253_v12 = vadd.f32 %v3002_v48, %v1964_v51  ;;  %v2245_v6 = vadd.f32 %v2244_v36, %v1956_v31 }
 0x23d   :  { %v2439_v41 = vadd.f32 %v2438_v30, %v2437_v9  ;;  %v2636_v54 = vadd.f32 %v2635_v29, %v2634_v53  ;;  %v1966_v11 = vpop.f32.mrf.mxu1  ;;  %v3003_v43 = vpop.f32.mrf.mxu0 }
 0x23e   :  { %2321 = vst.msk [vmem:[%s4749_s2 + $0x1f0] sm:$0xff] %vm1295_vm0, %v2253_v12  ;;  %2319 = vst.msk [vmem:[%s4749_s2 + $0x1e0] sm:$0xff] %vm1295_vm0, %v2245_v6  ;;  %v2518_v45 = vmul.f32 %v2245_v6, %v2245_v6  ;;  %v1967_v2 = vadd.f32 %v1966_v11, %v4787_v37  ;;  %v2442_v25 = vsel %vm1295_vm0, %v2245_v6, 0.0  ;;  %v2520_v7 = vmul.f32 %v2253_v12, %v2253_v12 }
 0x23f   :  { %v2638_v49 = vadd.f32 %v2637_v23, %v2636_v54  ;;  %v2441_v60 = vadd.f32 %v2440_v55, %v2439_v41  ;;  %v1968_v21 = vpop.f32.mrf.mxu1  ;;  %v2247_v5 = vpop.f32.mrf.mxu0  ;;  %v2446_v47 = vsel %vm1295_vm0, %v2253_v12, 0.0 }
 0x240   :  { %v2248_v1 = vadd.f32 %v2247_v5, %v1959_v10  ;;  %v2256_v42 = vadd.f32 %v3003_v43, %v1967_v2  ;;  %v2641_v22 = vsel %vm1295_vm0, %v2518_v45, 0.0  ;;  %v2645_v59 = vsel %vm1295_vm0, %v2520_v7, 0.0 }
 0x241   :  { %v2443_v15 = vadd.f32 %v2442_v25, %v2441_v60  ;;  %v2640_v63 = vadd.f32 %v2639_v27, %v2638_v49 }
 0x242   :  { %2320 = vst.msk [vmem:[%s4749_s2 + $0x1e8] sm:$0xff] %vm1295_vm0, %v2248_v1  ;;  %v2444_v46 = vsel %vm1295_vm0, %v2248_v1, 0.0  ;;  %v2519_v58 = vmul.f32 %v2248_v1, %v2248_v1  ;;  %2322 = vst.msk [vmem:[%s4749_s2 + $0x1f8] sm:$0xff] %vm1295_vm0, %v2256_v42  ;;  %v2521_v34 = vmul.f32 %v2256_v42, %v2256_v42  ;;  %v2448_v4 = vsel %vm1295_vm0, %v2256_v42, 0.0 }
 0x243   :  { %v2642_v62 = vadd.f32 %v2641_v22, %v2640_v63  ;;  %v2445_v38 = vadd.f32 %v2444_v46, %v2443_v15 }
 0x244   :  { %v2643_v20 = vsel %vm1295_vm0, %v2519_v58, 0.0  ;;  %v2647_v28 = vsel %vm1295_vm0, %v2521_v34, 0.0 }
 0x245   :  { %v2447_v52 = vadd.f32 %v2446_v47, %v2445_v38  ;;  %v2644_v40 = vadd.f32 %v2643_v20, %v2642_v62 }
 0x247   :  { %v2449_v35 = vadd.f32 %v2448_v4, %v2447_v52  ;;  %v2646_v44 = vadd.f32 %v2645_v59, %v2644_v40 }
 0x249   :  { %v2450_v16 = vrot.slane %v2449_v35, 4  ;;  %v2648_v19 = vadd.f32 %v2647_v28, %v2646_v44 }
 0x24b   :  { %v2451_v56 = vadd.f32 %v2450_v16, %v2449_v35  ;;  %v2649_v39 = vrot.slane %v2648_v19, 4 }
 0x24d   :  { %v2452_v26 = vrot.slane %v2451_v56, 2  ;;  %v2650_v50 = vadd.f32 %v2649_v39, %v2648_v19 }
 0x24f   :  { %v2453_v33 = vadd.f32 %v2452_v26, %v2451_v56  ;;  %v2651_v31 = vrot.slane %v2650_v50, 2 }
 0x251   :  { %v2454_v61 = vrot.slane %v2453_v33, 1  ;;  %v2652_v17 = vadd.f32 %v2651_v31, %v2650_v50 }
 0x253   :  { %v2455_v3 = vadd.f32 %v2454_v61, %v2453_v33  ;;  %v2653_v57 = vrot.slane %v2652_v17, 1 }
 0x255   :  { %2457 = vst.msk [vmem:[%s4750_s3] sm:$0x1] %vm2456_vm1, %v2455_v3  ;;  %v2654_v48 = vadd.f32 %v2653_v57, %v2652_v17 }
 0x257   :  { %2655 = vst.msk [vmem:[%s4751_s4] sm:$0x1] %vm2456_vm1, %v2654_v48 }

// kernel: _lambda_.27
= control target key start
LH: loop header
LB: loop body
LE: loop exit
PB: predicated region body
PF: predicated region fallthrough
CT: control target
= control target key end

     0   :  { %v52_v7 = vlaneseq  ;;  %s408_s1 = inlined_call_operand.vmem [shape: f32[1,1,128], index: 1, kind: input, shape index: {}]   ;;  %s409_s2 = inlined_call_operand.vmem [shape: f32[1,1,128], index: 2, kind: input, shape index: {}]   ;;  %s410_s3 = inlined_call_operand.vmem [shape: f32[1,128], index: 3, kind: input, shape index: {}]   ;;  %s411_s0 = inlined_call_operand.vmem [shape: f32[128,128], index: 0, kind: input, shape index: {}]   ;;  %s412_s4 = inlined_call_operand.vmem [shape: f32[1,128], index: 4, kind: input, shape index: {}]   ;;  %s413_s5 = inlined_call_operand.vmem [shape: bf16[128,128], index: 5, kind: output, shape index: {}]  }
   0x1   :  { %v20_v0 = vld [vmem:[%s408_s1] sm:$0x1]  ;;  %v36_v15 = vld [vmem:[%s411_s0 + $0x8] sm:$0xff]  ;;  %v37_v16 = vld [vmem:[%s411_s0 + $0x10] sm:$0xff] }
   0x2   :  { %v23_v1 = vld [vmem:[%s409_s2] sm:$0x1]  ;;  %v22_v2 = vmul.f32 0.0078125, %v20_v0  ;;  %v53_v8 = vshrl.u32 %v52_v7, 7  ;;  %v38_v17 = vld [vmem:[%s411_s0 + $0x18] sm:$0xff]  ;;  %v40_v21 = vld [vmem:[%s411_s0 + $0x28] sm:$0xff] }
   0x3   :  { %v25_v3 = vmul.f32 0.0078125, %v23_v1  ;;  %v28_v9 = vld [vmem:[%s410_s3] sm:$0x1]  ;;  %v41_v22 = vld [vmem:[%s411_s0 + $0x30] sm:$0xff]  ;;  %v42_v23 = vld [vmem:[%s411_s0 + $0x38] sm:$0xff] }
   0x4   :  { %v26_v4 = vmul.f32 %v22_v2, %v22_v2  ;;  %v54_v10 = vsub.s32 0, %v53_v8  ;;  %v32_v13 = vld [vmem:[%s412_s4] sm:$0x1]  ;;  %v44_v25 = vld [vmem:[%s411_s0 + $0x48] sm:$0xff]  ;;  %v45_v26 = vld [vmem:[%s411_s0 + $0x50] sm:$0xff] }
   0x5   :  { %v35_v14 = vld [vmem:[%s411_s0] sm:$0xff]  ;;  %v46_v31 = vld [vmem:[%s411_s0 + $0x58] sm:$0xff]  ;;  %v48_v33 = vld [vmem:[%s411_s0 + $0x68] sm:$0xff] }
   0x6   :  { %v27_v5 = vsub.f32 %v25_v3, %v26_v4  ;;  %v39_v18 = vld [vmem:[%s411_s0 + $0x20] sm:$0xff]  ;;  %v50_v3 = vld [vmem:[%s411_s0 + $0x78] sm:$0xff] }
   0x7   :  { %v43_v24 = vld [vmem:[%s411_s0 + $0x40] sm:$0xff] }
   0x8   :  { %v29_v6 = vadd.f32 1e-05, %v27_v5  ;;  %v47_v32 = vld [vmem:[%s411_s0 + $0x60] sm:$0xff] }
   0xa   :  { %274 = vrsqrt.f32 %v29_v6 }
  0x17   :  { %v275_v11 = vpop.eup %274 }
  0x18   :  { %v31_v12 = vmul.f32 %v275_v11, %v28_v9 }
  0x1a   :  { %v33_v19 = vmul.f32 %v31_v12, %v22_v2  ;;  %v333_v20 = vrot.slane %v31_v12, %v54_v10  ;;  %v49_v2 = vld [vmem:[%s411_s0 + $0x70] sm:$0xff] }
  0x1c   :  { %v34_v27 = vsub.f32 %v32_v13, %v33_v19  ;;  %v57_v28 = vmul.f32 %v333_v20, %v35_v14  ;;  %v58_v29 = vmul.f32 %v333_v20, %v36_v15  ;;  %v59_v30 = vmul.f32 %v333_v20, %v37_v16 }
  0x1d   :  { %v60_v34 = vmul.f32 %v333_v20, %v38_v17  ;;  %v61_v35 = vmul.f32 %v333_v20, %v39_v18  ;;  %v62_v36 = vmul.f32 %v333_v20, %v40_v21  ;;  %v63_v37 = vmul.f32 %v333_v20, %v41_v22 }
  0x1e   :  { %v77_v38 = vrot.slane %v34_v27, %v54_v10  ;;  %v64_v39 = vmul.f32 %v333_v20, %v42_v23  ;;  %v65_v40 = vmul.f32 %v333_v20, %v43_v24  ;;  %v66_v41 = vmul.f32 %v333_v20, %v44_v25 }
  0x1f   :  { %v67_v42 = vmul.f32 %v333_v20, %v45_v26  ;;  %v68_v43 = vmul.f32 %v333_v20, %v46_v31  ;;  %v69_v44 = vmul.f32 %v333_v20, %v47_v32  ;;  %v70_v45 = vmul.f32 %v333_v20, %v48_v33 }
  0x20   :  { %v79_v46 = vadd.f32 %v77_v38, %v57_v28  ;;  %v80_v47 = vadd.f32 %v77_v38, %v58_v29  ;;  %v81_v48 = vadd.f32 %v77_v38, %v59_v30  ;;  %v82_v49 = vadd.f32 %v77_v38, %v60_v34 }
  0x21   :  { %v83_v50 = vadd.f32 %v77_v38, %v61_v35  ;;  %v84_v51 = vadd.f32 %v77_v38, %v62_v36  ;;  %v85_v52 = vadd.f32 %v77_v38, %v63_v37  ;;  %v86_v53 = vadd.f32 %v77_v38, %v64_v39 }
  0x22   :  { %v95_v54 = vmax.f32 %v79_v46, 0.0  ;;  %v96_v55 = vmax.f32 %v80_v47, 0.0  ;;  %v97_v56 = vmax.f32 %v81_v48, 0.0  ;;  %v98_v57 = vmax.f32 %v82_v49, 0.0 }
  0x23   :  { %v99_v58 = vmax.f32 %v83_v50, 0.0  ;;  %v100_v59 = vmax.f32 %v84_v51, 0.0  ;;  %v101_v60 = vmax.f32 %v85_v52, 0.0  ;;  %v102_v61 = vmax.f32 %v86_v53, 0.0 }
  0x24   :  { %v230_v62 = vpack.c.bf16 %v96_v55, %v95_v54  ;;  %v235_v63 = vpack.c.bf16 %v98_v57, %v97_v56  ;;  %v87_v0 = vadd.f32 %v77_v38, %v65_v40  ;;  %v88_v1 = vadd.f32 %v77_v38, %v66_v41 }
  0x25   :  { %v240_v4 = vpack.c.bf16 %v100_v59, %v99_v58  ;;  %v245_v5 = vpack.c.bf16 %v102_v61, %v101_v60  ;;  %v89_v6 = vadd.f32 %v77_v38, %v67_v42  ;;  %v90_v7 = vadd.f32 %v77_v38, %v68_v43 }
  0x26   :  { %231 = vst [vmem:[%s413_s5] sm:$0xff] %v230_v62   ;;  %267 = vst [vmem:[%s413_s5 + $0x8] sm:$0xff] %v235_v63   ;;  %v103_v8 = vmax.f32 %v87_v0, 0.0  ;;  %v104_v9 = vmax.f32 %v88_v1, 0.0  ;;  %v91_v10 = vadd.f32 %v77_v38, %v69_v44  ;;  %v92_v11 = vadd.f32 %v77_v38, %v70_v45 }
  0x27   :  { %268 = vst [vmem:[%s413_s5 + $0x10] sm:$0xff] %v240_v4   ;;  %269 = vst [vmem:[%s413_s5 + $0x18] sm:$0xff] %v245_v5   ;;  %v105_v12 = vmax.f32 %v89_v6, 0.0  ;;  %v106_v13 = vmax.f32 %v90_v7, 0.0  ;;  %v71_v14 = vmul.f32 %v333_v20, %v49_v2  ;;  %v72_v15 = vmul.f32 %v333_v20, %v50_v3 }
  0x28   :  { %v250_v16 = vpack.c.bf16 %v104_v9, %v103_v8  ;;  %v107_v17 = vmax.f32 %v91_v10, 0.0  ;;  %v108_v18 = vmax.f32 %v92_v11, 0.0 }
  0x29   :  { %v255_v19 = vpack.c.bf16 %v106_v13, %v105_v12  ;;  %v93_v21 = vadd.f32 %v77_v38, %v71_v14  ;;  %v94_v22 = vadd.f32 %v77_v38, %v72_v15 }
  0x2a   :  { %270 = vst [vmem:[%s413_s5 + $0x20] sm:$0xff] %v250_v16   ;;  %v260_v23 = vpack.c.bf16 %v108_v18, %v107_v17 }
  0x2b   :  { %271 = vst [vmem:[%s413_s5 + $0x28] sm:$0xff] %v255_v19   ;;  %v109_v24 = vmax.f32 %v93_v21, 0.0  ;;  %v110_v25 = vmax.f32 %v94_v22, 0.0 }
  0x2c   :  { %272 = vst [vmem:[%s413_s5 + $0x30] sm:$0xff] %v260_v23  }
  0x2d   :  { %v265_v20 = vpack.c.bf16 %v110_v25, %v109_v24 }
  0x2f   :  { %273 = vst [vmem:[%s413_s5 + $0x38] sm:$0xff] %v265_v20  }

// kernel: _lambda_.26
= control target key start
LH: loop header
LB: loop body
LE: loop exit
PB: predicated region body
PF: predicated region fallthrough
CT: control target
= control target key end

     0   :  { %vm551_vm0 = vcmask 523264   ;;  %s1708_s1 = inlined_call_operand.vmem [shape: bf16[576,128], index: 1, kind: input, shape index: {}]   ;;  %s1709_s0 = inlined_call_operand.vmem [shape: bf16[128,576], index: 0, kind: input, shape index: {}]   ;;  %s1710_s2 = inlined_call_operand.vmem [shape: f32[128,128], index: 2, kind: output, shape index: {0}]   ;;  %s1711_s3 = inlined_call_operand.vmem [shape: f32[1,1,128], index: 3, kind: output, shape index: {1}]   ;;  %s1712_s4 = inlined_call_operand.vmem [shape: f32[1,1,128], index: 4, kind: output, shape index: {2}]  }
   0x1   :  { %v1211_v0 = vld [vmem:[%s1708_s1 + $0x78] sm:$0xff]   ;;  %v1215_v4 = vld [vmem:[%s1708_s1 + $0x70] sm:$0xff]   ;;  %v1219_v8 = vld [vmem:[%s1708_s1 + $0x68] sm:$0xff]  }
   0x2   :  { %v1212_v1 = vld [vmem:[%s1708_s1 + $0xf8] sm:$0xff]   ;;  %1039 = vmatprep.subr.bf16.mxu0 %v1211_v0  ;;  %v1216_v5 = vld [vmem:[%s1708_s1 + $0xf0] sm:$0xff]   ;;  %v1220_v9 = vld [vmem:[%s1708_s1 + $0xe8] sm:$0xff]  }
   0x3   :  { %v1213_v2 = vld [vmem:[%s1708_s1 + $0x38] sm:$0xff]   ;;  %1103 = vmatprep.subr.bf16.mxu1 %v1212_v1  ;;  %v1217_v6 = vld [vmem:[%s1708_s1 + $0x30] sm:$0xff]   ;;  %v1221_v10 = vld [vmem:[%s1708_s1 + $0x28] sm:$0xff]  }
   0x4   :  { %v1214_v3 = vld [vmem:[%s1708_s1 + $0xb8] sm:$0xff]   ;;  %1040 = vmatpush3.bf16.msra.mxu0 %v1213_v2  ;;  %v1218_v7 = vld [vmem:[%s1708_s1 + $0xb0] sm:$0xff]   ;;  %v1222_v11 = vld [vmem:[%s1708_s1 + $0xa8] sm:$0xff]  }
   0x5   :  { %1104 = vmatpush3.bf16.msra.mxu1 %v1214_v3  ;;  %1041 = vmatprep.subr.bf16.mxu0 %v1215_v4  ;;  %v1223_v12 = vld [vmem:[%s1708_s1 + $0x60] sm:$0xff]   ;;  %v1227_v16 = vld [vmem:[%s1708_s1 + $0x58] sm:$0xff]   ;;  %v1231_v20 = vld [vmem:[%s1708_s1 + $0x50] sm:$0xff]  }
   0x6   :  { %1105 = vmatprep.subr.bf16.mxu1 %v1216_v5  ;;  %v1224_v13 = vld [vmem:[%s1708_s1 + $0xe0] sm:$0xff]   ;;  %v1228_v17 = vld [vmem:[%s1708_s1 + $0xd8] sm:$0xff]   ;;  %v1232_v21 = vld [vmem:[%s1708_s1 + $0xd0] sm:$0xff]  }
   0x7   :  { %v1225_v14 = vld [vmem:[%s1708_s1 + $0x20] sm:$0xff]   ;;  %v1229_v18 = vld [vmem:[%s1708_s1 + $0x18] sm:$0xff]   ;;  %v1233_v22 = vld [vmem:[%s1708_s1 + $0x10] sm:$0xff]  }
   0x8   :  { %1042 = vmatpush3.bf16.msra.mxu0 %v1217_v6  ;;  %v1226_v15 = vld [vmem:[%s1708_s1 + $0xa0] sm:$0xff]   ;;  %v1230_v19 = vld [vmem:[%s1708_s1 + $0x98] sm:$0xff]   ;;  %v1234_v23 = vld [vmem:[%s1708_s1 + $0x90] sm:$0xff]  }
   0x9   :  { %1106 = vmatpush3.bf16.msra.mxu1 %v1218_v7  ;;  %1043 = vmatprep.subr.bf16.mxu0 %v1219_v8  ;;  %v1235_v24 = vld [vmem:[%s1708_s1 + $0x48] sm:$0xff]   ;;  %v1239_v28 = vld [vmem:[%s1708_s1 + $0x40] sm:$0xff]   ;;  %v1249_v36 = vld [vmem:[%s1708_s1 + $0x118] sm:$0xff]  }
   0xa   :  { %1107 = vmatprep.subr.bf16.mxu1 %v1220_v9  ;;  %v1236_v25 = vld [vmem:[%s1708_s1 + $0xc8] sm:$0xff]   ;;  %v1240_v29 = vld [vmem:[%s1708_s1 + $0xc0] sm:$0xff]   ;;  %v1262_v42 = vld [vmem:[%s1708_s1 + $0x110] sm:$0xff]  }
   0xb   :  { %v1237_v26 = vld [vmem:[%s1708_s1 + $0x8] sm:$0xff]   ;;  %v1241_v30 = vld [vmem:[%s1708_s1] sm:$0xff]   ;;  %v1258_v43 = vld [vmem:[%s1709_s0 + $0x5c] ss:$20 sps:$4 sm:$0xff]  }
   0xc   :  { %1044 = vmatpush3.bf16.msra.mxu0 %v1221_v10  ;;  %v1238_v27 = vld [vmem:[%s1708_s1 + $0x88] sm:$0xff]   ;;  %v1242_v31 = vld [vmem:[%s1708_s1 + $0x80] sm:$0xff]   ;;  %v1263_v47 = vld [vmem:[%s1709_s0 + $0x7c] ss:$20 sps:$4 sm:$0xff]  }
   0xd   :  { %1108 = vmatpush3.bf16.msra.mxu1 %v1222_v11  ;;  %1045 = vmatprep.subr.bf16.mxu0 %v1223_v12  ;;  %v1243_v32 = vld [vmem:[%s1709_s0] ss:$20 sps:$4 sm:$0xff]   ;;  %v1245_v33 = vld [vmem:[%s1709_s0 + $0x4] ss:$20 sps:$4 sm:$0xff]   ;;  %v1246_v34 = vld [vmem:[%s1709_s0 + $0x8] ss:$20 sps:$4 sm:$0xff]  }
   0xe   :  { %1109 = vmatprep.subr.bf16.mxu1 %v1224_v13  ;;  %v1248_v35 = vld [vmem:[%s1709_s0 + $0xc] ss:$20 sps:$4 sm:$0xff]   ;;  %608 = vmatprep.mubr.bf16.mxu0 %v1245_v33  ;;  %v1252_v38 = vld [vmem:[%s1709_s0 + $0x34] ss:$20 sps:$4 sm:$0xff]   ;;  %v1255_v40 = vld [vmem:[%s1709_s0 + $0x30] ss:$20 sps:$4 sm:$0xff]  }
   0xf   :  { %705 = vmatprep.mubr.bf16.mxu1 %v1248_v35  ;;  %v1250_v37 = vld [vmem:[%s1709_s0 + $0x2c] ss:$20 sps:$4 sm:$0xff]   ;;  %v1254_v39 = vld [vmem:[%s1709_s0 + $0x28] ss:$20 sps:$4 sm:$0xff]   ;;  %v1260_v44 = vld [vmem:[%s1709_s0 + $0x50] ss:$20 sps:$4 sm:$0xff]  }
  0x10   :  { %1046 = vmatpush3.bf16.msra.mxu0 %v1225_v14  ;;  %v1256_v41 = vld [vmem:[%s1709_s0 + $0x54] ss:$20 sps:$4 sm:$0xff]   ;;  %v1261_v45 = vld [vmem:[%s1709_s0 + $0x58] ss:$20 sps:$4 sm:$0xff]   ;;  %v1288_v49 = vld [vmem:[%s1708_s1 + $0x100] sm:$0xff]  }
  0x11   :  { %1110 = vmatpush3.bf16.msra.mxu1 %v1226_v15  ;;  %1047 = vmatprep.subr.bf16.mxu0 %v1227_v16  ;;  %v1275_v46 = vld [vmem:[%s1708_s1 + $0x108] sm:$0xff]   ;;  %v1265_v48 = vld [vmem:[%s1709_s0 + $0x84] ss:$20 sps:$4 sm:$0xff]   ;;  %v1268_v51 = vld [vmem:[%s1709_s0 + $0x80] ss:$20 sps:$4 sm:$0xff]  }
  0x12   :  { %1111 = vmatprep.subr.bf16.mxu1 %v1228_v17  ;;  %v1267_v50 = vld [vmem:[%s1709_s0 + $0x78] ss:$20 sps:$4 sm:$0xff]   ;;  %v1273_v54 = vld [vmem:[%s1709_s0 + $0xa0] ss:$20 sps:$4 sm:$0xff]   ;;  %v1274_v55 = vld [vmem:[%s1709_s0 + $0xa8] ss:$20 sps:$4 sm:$0xff]  }
  0x13   :  { %v1269_v52 = vld [vmem:[%s1709_s0 + $0xa4] ss:$20 sps:$4 sm:$0xff]   ;;  %v1271_v53 = vld [vmem:[%s1709_s0 + $0xac] ss:$20 sps:$4 sm:$0xff]   ;;  %v1278_v57 = vld [vmem:[%s1709_s0 + $0xd4] ss:$20 sps:$4 sm:$0xff]  }
  0x14   :  { %1048 = vmatpush3.bf16.msra.mxu0 %v1229_v18  ;;  %v1276_v56 = vld [vmem:[%s1709_s0 + $0xcc] ss:$20 sps:$4 sm:$0xff]   ;;  %v1280_v58 = vld [vmem:[%s1709_s0 + $0xc8] ss:$20 sps:$4 sm:$0xff]   ;;  %v1281_v59 = vld [vmem:[%s1709_s0 + $0xd0] ss:$20 sps:$4 sm:$0xff]  }
  0x15   :  { %1112 = vmatpush3.bf16.msra.mxu1 %v1230_v19  ;;  %1049 = vmatprep.subr.bf16.mxu0 %v1231_v20  ;;  %v1282_v60 = vld [vmem:[%s1709_s0 + $0xf4] ss:$20 sps:$4 sm:$0xff]   ;;  %v1284_v61 = vld [vmem:[%s1709_s0 + $0xfc] ss:$20 sps:$4 sm:$0xff]   ;;  %v1287_v63 = vld [vmem:[%s1709_s0 + $0xf8] ss:$20 sps:$4 sm:$0xff]  }
  0x16   :  { %1113 = vmatprep.subr.bf16.mxu1 %v1232_v21  ;;  %v1286_v62 = vld [vmem:[%s1709_s0 + $0xf0] ss:$20 sps:$4 sm:$0xff]   ;;  %v1293_v2 = vld [vmem:[%s1709_s0 + $0x118] ss:$20 sps:$4 sm:$0xff]   ;;  %v1294_v3 = vld [vmem:[%s1709_s0 + $0x120] ss:$20 sps:$4 sm:$0xff]  }
  0x17   :  { %v1289_v0 = vld [vmem:[%s1709_s0 + $0x11c] ss:$20 sps:$4 sm:$0xff]   ;;  %v1291_v1 = vld [vmem:[%s1709_s0 + $0x124] ss:$20 sps:$4 sm:$0xff]   ;;  %v1299_v8 = vld [vmem:[%s1709_s0 + $0x60] ss:$20 sps:$4 sm:$0xff]  }
  0x18   :  { %1050 = vmatpush3.bf16.msra.mxu0 %v1233_v22  ;;  %v1295_v4 = vld [vmem:[%s1709_s0 + $0x10] ss:$20 sps:$4 sm:$0xff]   ;;  %v1297_v6 = vld [vmem:[%s1709_s0 + $0x38] ss:$20 sps:$4 sm:$0xff]   ;;  %v1300_v9 = vld [vmem:[%s1709_s0 + $0x100] ss:$20 sps:$4 sm:$0xff]  }
  0x19   :  { %1114 = vmatpush3.bf16.msra.mxu1 %v1234_v23  ;;  %1051 = vmatprep.subr.bf16.mxu0 %v1235_v24  ;;  %v1296_v5 = vld [vmem:[%s1709_s0 + $0xb0] ss:$20 sps:$4 sm:$0xff]   ;;  %v1298_v7 = vld [vmem:[%s1709_s0 + $0xd8] ss:$20 sps:$4 sm:$0xff]   ;;  %v1301_v10 = vld [vmem:[%s1709_s0 + $0x88] ss:$20 sps:$4 sm:$0xff]  }
  0x1a   :  { %1115 = vmatprep.subr.bf16.mxu1 %v1236_v25  ;;  %v1302_v11 = vld [vmem:[%s1709_s0 + $0x128] ss:$20 sps:$4 sm:$0xff]  }
  0x1c   :  { %1052 = vmatpush3.bf16.msra.mxu0 %v1237_v26 }
  0x1d   :  { %1116 = vmatpush3.bf16.msra.mxu1 %v1238_v27  ;;  %1053 = vmatprep.subr.bf16.mxu0 %v1239_v28 }
  0x1e   :  { %1117 = vmatprep.subr.bf16.mxu1 %v1240_v29 }
  0x20   :  { %1054 = vmatpush3.bf16.msra.mxu0 %v1241_v30 }
  0x21   :  { %1118 = vmatpush3.bf16.msra.mxu1 %v1242_v31  ;;  %1179 = vmatprep.subr.bf16.mxu0 %v1249_v36 }
  0x22   :  { %1203 = vmatprep.subr.bf16.mxu1 %v1249_v36 }
  0x23   :  { %609 = vmatmul.mubr.bf16.vlgmr.msra.gmra.mxu0 %v1243_v32 }
  0x24   :  { %706 = vmatmul.mubr.bf16.vlgmr.msra.gmra.mxu1 %v1246_v34  ;;  %1180 = vmatpush3.bf16.msra.mxu0 %v1249_v36 }
  0x25   :  { %616 = vmatprep.mubr.bf16.mxu0 %v1250_v37  ;;  %713 = vmatprep.mubr.bf16.mxu1 %v1252_v38 }
  0x26   :  { %1207 = vmatpush3.bf16.msra.mxu1 %v1249_v36  ;;  %1181 = vmatprep.subr.bf16.mxu0 %v1262_v42 }
  0x27   :  { %1204 = vmatprep.subr.bf16.mxu1 %v1262_v42 }
  0x28   :  { %1182 = vmatpush3.bf16.msra.mxu0 %v1262_v42 }
  0x29   :  { %1183 = vmatprep.subr.bf16.mxu0 %v1275_v46 }
  0x2a   :  { %1208 = vmatpush3.bf16.msra.mxu1 %v1262_v42 }
  0x2b   :  { %617 = vmatmul.mubr.bf16.gmra.mxu0 %v1254_v39  ;;  %1205 = vmatprep.subr.bf16.mxu1 %v1275_v46 }
  0x2c   :  { %714 = vmatmul.mubr.bf16.gmra.mxu1 %v1255_v40  ;;  %624 = vmatprep.mubr.bf16.mxu0 %v1256_v41 }
  0x2d   :  { %721 = vmatprep.mubr.bf16.mxu1 %v1258_v43  ;;  %1184 = vmatpush3.bf16.msra.mxu0 %v1275_v46 }
  0x2e   :  { %1209 = vmatpush3.bf16.msra.mxu1 %v1275_v46  ;;  %1185 = vmatprep.subr.bf16.mxu0 %v1288_v49 }
  0x2f   :  { %1206 = vmatprep.subr.bf16.mxu1 %v1288_v49 }
  0x31   :  { %1186 = vmatpush3.bf16.msra.mxu0 %v1288_v49 }
  0x32   :  { %1210 = vmatpush3.bf16.msra.mxu1 %v1288_v49 }
  0x33   :  { %625 = vmatmul.mubr.bf16.gmra.mxu0 %v1260_v44 }
  0x34   :  { %722 = vmatmul.mubr.bf16.gmra.mxu1 %v1261_v45  ;;  %632 = vmatprep.mubr.bf16.mxu0 %v1263_v47 }
  0x35   :  { %729 = vmatprep.mubr.bf16.mxu1 %v1265_v48 }
  0x3b   :  { %633 = vmatmul.mubr.bf16.gmra.mxu0 %v1267_v50 }
  0x3c   :  { %730 = vmatmul.mubr.bf16.gmra.mxu1 %v1268_v51  ;;  %640 = vmatprep.mubr.bf16.mxu0 %v1269_v52 }
  0x3d   :  { %737 = vmatprep.mubr.bf16.mxu1 %v1271_v53 }
  0x43   :  { %641 = vmatmul.mubr.bf16.gmra.mxu0 %v1273_v54 }
  0x44   :  { %738 = vmatmul.mubr.bf16.gmra.mxu1 %v1274_v55  ;;  %648 = vmatprep.mubr.bf16.mxu0 %v1276_v56 }
  0x45   :  { %745 = vmatprep.mubr.bf16.mxu1 %v1278_v57 }
  0x4b   :  { %649 = vmatmul.mubr.bf16.gmra.mxu0 %v1280_v58 }
  0x4c   :  { %746 = vmatmul.mubr.bf16.gmra.mxu1 %v1281_v59  ;;  %656 = vmatprep.mubr.bf16.mxu0 %v1282_v60 }
  0x4d   :  { %753 = vmatprep.mubr.bf16.mxu1 %v1284_v61 }
  0x53   :  { %657 = vmatmul.mubr.bf16.gmra.mxu0 %v1286_v62 }
  0x54   :  { %754 = vmatmul.mubr.bf16.gmra.mxu1 %v1287_v63  ;;  %664 = vmatprep.mubr.bf16.mxu0 %v1289_v0 }
  0x55   :  { %761 = vmatprep.mubr.bf16.mxu1 %v1291_v1 }
  0x5b   :  { %665 = vmatmul.mubr.bf16.gmra.mxu0 %v1293_v2 }
  0x5c   :  { %762 = vmatmul.mubr.bf16.gmra.mxu1 %v1294_v3  ;;  %1187 = vmatprep.mubr.msk.bf16.mxu0 %vm551_vm0, %v1295_v4 }
  0x5d   :  { %1195 = vmatprep.mubr.msk.bf16.mxu1 %vm551_vm0, %v1296_v5 }
  0x63   :  { %1188 = vmatmul.mubr.msk.bf16.vlgmr.msra.gmra.mxu0 %vm551_vm0, %v1297_v6 }
  0x64   :  { %1196 = vmatmul.mubr.msk.bf16.vlgmr.msra.gmra.mxu1 %vm551_vm0, %v1298_v7  ;;  %1191 = vmatprep.mubr.msk.bf16.mxu0 %vm551_vm0, %v1299_v8 }
  0x65   :  { %1199 = vmatprep.mubr.msk.bf16.mxu1 %vm551_vm0, %v1300_v9 }
  0x6b   :  { %1192 = vmatmul.mubr.msk.bf16.gmra.mxu0 %vm551_vm0, %v1301_v10 }
  0x6c   :  { %1200 = vmatmul.mubr.msk.bf16.gmra.mxu1 %vm551_vm0, %v1302_v11 }
  0xe3   :  { %v1055_v12 = vpop.f32.mrf.mxu0 }
  0xe4   :  { %v1119_v13 = vpop.f32.mrf.mxu1 }
  0xe5   :  { %v1056_v14 = vpop.f32.mrf.mxu0 }
  0xe6   :  { %v1120_v15 = vpop.f32.mrf.mxu1  ;;  %v1057_v7 = vadd.f32 %v1056_v14, %v1055_v12 }
  0xe7   :  { %v1564_v16 = vpop.f32.mrf.mxu0  ;;  %v1121_v8 = vadd.f32 %v1120_v15, %v1119_v13 }
  0xe8   :  { %v1566_v17 = vpop.f32.mrf.mxu1 }
  0xe9   :  { %v1568_v18 = vpop.f32.mrf.mxu0  ;;  %v708_v14 = vadd.f32 %v1121_v8, %v1057_v7 }
  0xea   :  { %v1570_v19 = vpop.f32.mrf.mxu1 }
  0xeb   :  { %v1061_v20 = vpop.f32.mrf.mxu0 }
  0xec   :  { %v1125_v21 = vpop.f32.mrf.mxu1 }
  0xed   :  { %v1062_v22 = vpop.f32.mrf.mxu0 }
  0xee   :  { %v1126_v23 = vpop.f32.mrf.mxu1  ;;  %v1063_v9 = vadd.f32 %v1062_v22, %v1061_v20 }
  0xef   :  { %v1064_v24 = vpop.f32.mrf.mxu0  ;;  %v1127_v10 = vadd.f32 %v1126_v23, %v1125_v21 }
  0xf0   :  { %v1128_v25 = vpop.f32.mrf.mxu1 }
  0xf1   :  { %v1065_v26 = vpop.f32.mrf.mxu0  ;;  %v716_v13 = vadd.f32 %v1127_v10, %v1063_v9 }
  0xf2   :  { %v1129_v27 = vpop.f32.mrf.mxu1 }
  0xf3   :  { %v1572_v28 = vpop.f32.mrf.mxu0 }
  0xf4   :  { %v1574_v29 = vpop.f32.mrf.mxu1 }
  0xf5   :  { %v1576_v30 = vpop.f32.mrf.mxu0 }
  0xf6   :  { %v1578_v31 = vpop.f32.mrf.mxu1 }
  0xf7   :  { %v1580_v32 = vpop.f32.mrf.mxu0 }
  0xf8   :  { %1713 = vst [vmem:[#allocation2_spill] sm:$0xff] %v1580_v32  ;;  %v1582_v33 = vpop.f32.mrf.mxu1 }
  0xf9   :  { %1714 = vst [vmem:[#allocation3_spill] sm:$0xff] %v1582_v33  ;;  %v1584_v34 = vpop.f32.mrf.mxu0  ;;  %v1130_v33 = vadd.f32 %v1129_v27, %v1128_v25  ;;  %v1133_v25 = vadd.f32 %v1578_v31, %v1574_v29 }
  0xfa   :  { %1715 = vst [vmem:[#allocation4_spill] sm:$0xff] %v1584_v34  ;;  %v1586_v35 = vpop.f32.mrf.mxu1 }
  0xfb   :  { %1716 = vst [vmem:[#allocation5_spill] sm:$0xff] %v1586_v35  ;;  %v1073_v36 = vpop.f32.mrf.mxu0  ;;  %v1066_v35 = vadd.f32 %v1065_v26, %v1064_v24  ;;  %v1069_v24 = vadd.f32 %v1576_v30, %v1572_v28 }
  0xfc   :  { %v1588_v37 = vpop.f32.mrf.mxu1 }
  0xfd   :  { %v1074_v38 = vpop.f32.mrf.mxu0  ;;  %v719_v23 = vadd.f32 %v1130_v33, %v1066_v35 }
  0xfe   :  { %v1590_v39 = vpop.f32.mrf.mxu1  ;;  %v1075_v26 = vadd.f32 %v1074_v38, %v1073_v36 }
  0xff   :  { %v1592_v40 = vpop.f32.mrf.mxu0 }
 0x100   :  { %v1594_v41 = vpop.f32.mrf.mxu1 }
 0x101   :  { %v1596_v42 = vpop.f32.mrf.mxu0 }
 0x102   :  { %v1598_v43 = vpop.f32.mrf.mxu1  ;;  %v1078_v33 = vadd.f32 %v1596_v42, %v1592_v40  ;;  %v1726_v40 = vld [vmem:[#allocation4_spill] sm:$0xff] }
 0x103   :  { %1717 = vst [vmem:[#allocation6_spill] sm:$0xff] %v1598_v43  ;;  %v1079_v44 = vpop.f32.mrf.mxu0 }
 0x104   :  { %v1143_v45 = vpop.f32.mrf.mxu1 }
 0x105   :  { %v1080_v46 = vpop.f32.mrf.mxu0 }
 0x106   :  { %v1144_v47 = vpop.f32.mrf.mxu1  ;;  %v1081_v32 = vadd.f32 %v1080_v46, %v1079_v44  ;;  %v1139_v46 = vadd.f32 %v1590_v39, %v1588_v37  ;;  %v1725_v39 = vld [vmem:[#allocation2_spill] sm:$0xff] }
 0x107   :  { %v1082_v48 = vpop.f32.mrf.mxu0 }
 0x108   :  { %v1146_v49 = vpop.f32.mrf.mxu1 }
 0x109   :  { %v1083_v50 = vpop.f32.mrf.mxu0 }
 0x10a   :  { %v1147_v51 = vpop.f32.mrf.mxu1  ;;  %v1724_v28 = vld [vmem:[#allocation6_spill] sm:$0xff] }
 0x10b   :  { %v1085_v52 = vpop.f32.mrf.mxu0  ;;  %v1148_v44 = vadd.f32 %v1147_v51, %v1146_v49  ;;  %v1142_v30 = vadd.f32 %v1724_v28, %v1594_v41  ;;  %v1072_v41 = vadd.f32 %v1726_v40, %v1725_v39  ;;  %v724_v49 = vadd.f32 %v1133_v25, %v1069_v24 }
 0x10c   :  { %v1149_v53 = vpop.f32.mrf.mxu1 }
 0x10d   :  { %v1086_v54 = vpop.f32.mrf.mxu0 }
 0x10e   :  { %v1150_v55 = vpop.f32.mrf.mxu1 }
 0x10f   :  { %v1088_v56 = vpop.f32.mrf.mxu0 }
 0x110   :  { %v1152_v57 = vpop.f32.mrf.mxu1 }
 0x111   :  { %v1089_v58 = vpop.f32.mrf.mxu0 }
 0x112   :  { %v1153_v59 = vpop.f32.mrf.mxu1  ;;  %v1090_v15 = vadd.f32 %v1089_v58, %v1088_v56  ;;  %v1730_v58 = vld [vmem:[#allocation5_spill] sm:$0xff] }
 0x113   :  { %v1600_v60 = vpop.f32.mrf.mxu0  ;;  %v1154_v20 = vadd.f32 %v1153_v59, %v1152_v57  ;;  %v1729_v57 = vld [vmem:[#allocation3_spill] sm:$0xff] }
 0x114   :  { %1718 = vst [vmem:[#allocation7_spill] sm:$0xff] %v1600_v60  ;;  %v1602_v61 = vpop.f32.mrf.mxu1  ;;  %v1151_v60 = vadd.f32 %v1150_v55, %v1149_v53  ;;  %v1136_v59 = vadd.f32 %v1730_v58, %v1729_v57 }
 0x115   :  { %1719 = vst [vmem:[#allocation8_spill] sm:$0xff] %v1602_v61  ;;  %v1092_v62 = vpop.f32.mrf.mxu0  ;;  %v1087_v61 = vadd.f32 %v1086_v54, %v1085_v52  ;;  %v751_v38 = vadd.f32 %v1154_v20, %v1090_v15 }
 0x116   :  { %v1156_v63 = vpop.f32.mrf.mxu1 }
 0x117   :  { %v1604_v0 = vpop.f32.mrf.mxu0  ;;  %v748_v22 = vadd.f32 %v1151_v60, %v1087_v61 }
 0x118   :  { %1720 = vst [vmem:[#allocation9_spill] sm:$0xff] %v1604_v0  ;;  %v1606_v1 = vpop.f32.mrf.mxu1 }
 0x119   :  { %1721 = vst [vmem:[#allocation10_spill] sm:$0xff] %v1606_v1  ;;  %v1608_v2 = vpop.f32.mrf.mxu0  ;;  %v1145_v1 = vadd.f32 %v1144_v47, %v1143_v45 }
 0x11a   :  { %1722 = vst [vmem:[#allocation11_spill] sm:$0xff] %v1608_v2  ;;  %v1610_v3 = vpop.f32.mrf.mxu1  ;;  %v1124_v2 = vadd.f32 %v1570_v19, %v1566_v17 }
 0x11b   :  { %1723 = vst [vmem:[#allocation12_spill] sm:$0xff] %v1610_v3  ;;  %v1097_v4 = vpop.f32.mrf.mxu0  ;;  %v1060_v3 = vadd.f32 %v1568_v18, %v1564_v16  ;;  %v1084_v18 = vadd.f32 %v1083_v50, %v1082_v48  ;;  %v740_v45 = vadd.f32 %v1145_v1, %v1081_v32  ;;  %v1727_v50 = vld [vmem:[#allocation7_spill] sm:$0xff] }
 0x11c   :  { %v1161_v5 = vpop.f32.mrf.mxu1  ;;  %v1093_v51 = vadd.f32 %v1092_v62, %v1727_v50  ;;  %v1728_v52 = vld [vmem:[#allocation8_spill] sm:$0xff]  ;;  %v732_v62 = vadd.f32 %v1139_v46, %v1075_v26 }
 0x11d   :  { %v1098_v6 = vpop.f32.mrf.mxu0  ;;  %v711_v48 = vadd.f32 %v1124_v2, %v1060_v3  ;;  %v1157_v53 = vadd.f32 %v1156_v63, %v1728_v52  ;;  %v743_v56 = vadd.f32 %v1148_v44, %v1084_v18  ;;  %v735_v63 = vadd.f32 %v1142_v30, %v1078_v33 }
 0x11e   :  { %v1162_v11 = vpop.f32.mrf.mxu1  ;;  %v1099_v35 = vadd.f32 %v1098_v6, %v1097_v4  ;;  %v727_v44 = vadd.f32 %v1136_v59, %v1072_v41 }
 0x11f   :  { %v1100_v34 = vpop.f32.mrf.mxu0  ;;  %v1163_v36 = vadd.f32 %v1162_v11, %v1161_v5  ;;  %v1731_v11 = vld [vmem:[#allocation9_spill] sm:$0xff]  ;;  %v756_v20 = vadd.f32 %v1157_v53, %v1093_v51 }
 0x120   :  { %v1164_v0 = vpop.f32.mrf.mxu1 }
 0x121   :  { %v1101_v43 = vpop.f32.mrf.mxu0  ;;  %v764_v5 = vadd.f32 %v1163_v36, %v1099_v35 }
 0x122   :  { %v1165_v12 = vpop.f32.mrf.mxu1  ;;  %v1102_v1 = vadd.f32 %v1101_v43, %v1100_v34  ;;  %v1732_v34 = vld [vmem:[#allocation11_spill] sm:$0xff] }
 0x123   :  { %v1189_v21 = vpop.f32.mrf.mxu0  ;;  %v1166_v2 = vadd.f32 %v1165_v12, %v1164_v0  ;;  %v1096_v43 = vadd.f32 %v1732_v34, %v1731_v11  ;;  %v1733_v0 = vld [vmem:[#allocation10_spill] sm:$0xff]  ;;  %v1734_v12 = vld [vmem:[#allocation12_spill] sm:$0xff] }
 0x124   :  { %v813_v27 = vadd.f32 %v1189_v21, %v716_v13  ;;  %v1197_v16 = vpop.f32.mrf.mxu1  ;;  %v1160_v13 = vadd.f32 %v1734_v12, %v1733_v0 }
 0x125   :  { %v1620_v17 = vadd.f32 %v1197_v16, %v748_v22  ;;  %v804_v19 = vpop.f32.mrf.mxu0  ;;  %v767_v18 = vadd.f32 %v1166_v2, %v1102_v1 }
 0x126   :  { %869 = vst [vmem:[%s1710_s2 + $0x10] sm:$0xff] %v813_v27  ;;  %v805_v29 = vadd.f32 %v804_v19, %v708_v14  ;;  %v836_v31 = vpop.f32.mrf.mxu1  ;;  %v907_v21 = vmul.f32 %v813_v27, %v813_v27 }
 0x127   :  { %877 = vst [vmem:[%s1710_s2 + $0x50] sm:$0xff] %v1620_v17  ;;  %v1635_v32 = vadd.f32 %v836_v31, %v740_v45  ;;  %v1190_v37 = vpop.f32.mrf.mxu0 }
 0x128   :  { %867 = vst [vmem:[%s1710_s2] sm:$0xff] %v805_v29  ;;  %v816_v42 = vadd.f32 %v1190_v37, %v719_v23  ;;  %v1198_v47 = vpop.f32.mrf.mxu1  ;;  %v905_v6 = vmul.f32 %v805_v29, %v805_v29 }
 0x129   :  { %875 = vst [vmem:[%s1710_s2 + $0x40] sm:$0xff] %v1635_v32  ;;  %v1648_v54 = vadd.f32 %v1198_v47, %v751_v38  ;;  %v807_v55 = vpop.f32.mrf.mxu0  ;;  %v913_v53 = vmul.f32 %v1635_v32, %v1635_v32 }
 0x12a   :  { %870 = vst [vmem:[%s1710_s2 + $0x18] sm:$0xff] %v816_v42  ;;  %v808_v60 = vadd.f32 %v807_v55, %v711_v48  ;;  %v839_v61 = vpop.f32.mrf.mxu1  ;;  %v908_v19 = vmul.f32 %v816_v42, %v816_v42 }
 0x12b   :  { %878 = vst [vmem:[%s1710_s2 + $0x58] sm:$0xff] %v1648_v54  ;;  %v840_v3 = vadd.f32 %v839_v61, %v743_v56  ;;  %v1193_v4 = vpop.f32.mrf.mxu0 }
 0x12c   :  { %868 = vst [vmem:[%s1710_s2 + $0x8] sm:$0xff] %v808_v60  ;;  %v883_v7 = vadd.f32 %v808_v60, %v805_v29  ;;  %v906_v8 = vmul.f32 %v808_v60, %v808_v60  ;;  %v829_v9 = vadd.f32 %v1193_v4, %v732_v62  ;;  %v1201_v10 = vpop.f32.mrf.mxu1  ;;  %v759_v29 = vadd.f32 %v1160_v13, %v1096_v43 }
 0x12d   :  { %876 = vst [vmem:[%s1710_s2 + $0x48] sm:$0xff] %v840_v3  ;;  %v861_v14 = vadd.f32 %v1201_v10, %v764_v5  ;;  %v820_v15 = vpop.f32.mrf.mxu0  ;;  %v914_v57 = vmul.f32 %v840_v3, %v840_v3  ;;  %v915_v60 = vmul.f32 %v1620_v17, %v1620_v17 }
 0x12e   :  { %v884_v22 = vadd.f32 %v883_v7, %v813_v27  ;;  %v921_v23 = vadd.f32 %v906_v8, %v905_v6  ;;  %873 = vst [vmem:[%s1710_s2 + $0x30] sm:$0xff] %v829_v9  ;;  %v821_v24 = vadd.f32 %v820_v15, %v724_v49  ;;  %v852_v25 = vpop.f32.mrf.mxu1  ;;  %v911_v47 = vmul.f32 %v829_v9, %v829_v9 }
 0x12f   :  { %881 = vst [vmem:[%s1710_s2 + $0x70] sm:$0xff] %v861_v14  ;;  %v853_v26 = vadd.f32 %v852_v25, %v756_v20  ;;  %v1194_v16 = vpop.f32.mrf.mxu0 }
 0x130   :  { %v922_v45 = vadd.f32 %v921_v23, %v907_v21  ;;  %871 = vst [vmem:[%s1710_s2 + $0x20] sm:$0xff] %v821_v24  ;;  %v885_v27 = vadd.f32 %v884_v22, %v816_v42  ;;  %v832_v46 = vadd.f32 %v1194_v16, %v735_v63  ;;  %v1202_v33 = vpop.f32.mrf.mxu1  ;;  %v909_v35 = vmul.f32 %v821_v24, %v821_v24 }
 0x131   :  { %879 = vst [vmem:[%s1710_s2 + $0x60] sm:$0xff] %v853_v26  ;;  %v864_v28 = vadd.f32 %v1202_v33, %v767_v18  ;;  %v823_v30 = vpop.f32.mrf.mxu0  ;;  %v916_v63 = vmul.f32 %v1648_v54, %v1648_v54  ;;  %v917_v4 = vmul.f32 %v853_v26, %v853_v26 }
 0x132   :  { %v886_v31 = vadd.f32 %v885_v27, %v821_v24  ;;  %v923_v36 = vadd.f32 %v922_v45, %v908_v19  ;;  %874 = vst [vmem:[%s1710_s2 + $0x38] sm:$0xff] %v832_v46  ;;  %v824_v37 = vadd.f32 %v823_v30, %v727_v44  ;;  %v855_v38 = vpop.f32.mrf.mxu1  ;;  %v912_v50 = vmul.f32 %v832_v46, %v832_v46 }
 0x133   :  { %882 = vst [vmem:[%s1710_s2 + $0x78] sm:$0xff] %v864_v28  ;;  %v856_v39 = vadd.f32 %v855_v38, %v759_v29  ;;  %v920_v11 = vmul.f32 %v864_v28, %v864_v28 }
 0x134   :  { %v924_v40 = vadd.f32 %v923_v36, %v909_v35  ;;  %872 = vst [vmem:[%s1710_s2 + $0x28] sm:$0xff] %v824_v37  ;;  %v887_v41 = vadd.f32 %v886_v31, %v824_v37  ;;  %v910_v42 = vmul.f32 %v824_v37, %v824_v37 }
 0x135   :  { %880 = vst [vmem:[%s1710_s2 + $0x68] sm:$0xff] %v856_v39  ;;  %v918_v7 = vmul.f32 %v856_v39, %v856_v39 }
 0x136   :  { %v888_v48 = vadd.f32 %v887_v41, %v829_v9  ;;  %v925_v49 = vadd.f32 %v924_v40, %v910_v42  ;;  %v919_v9 = vmul.f32 %v861_v14, %v861_v14 }
 0x138   :  { %v889_v51 = vadd.f32 %v888_v48, %v832_v46  ;;  %v926_v52 = vadd.f32 %v925_v49, %v911_v47 }
 0x13a   :  { %v890_v55 = vadd.f32 %v889_v51, %v1635_v32  ;;  %v927_v56 = vadd.f32 %v926_v52, %v912_v50 }
 0x13c   :  { %v928_v58 = vadd.f32 %v927_v56, %v913_v53  ;;  %v891_v59 = vadd.f32 %v890_v55, %v840_v3 }
 0x13e   :  { %v892_v61 = vadd.f32 %v891_v59, %v1620_v17  ;;  %v929_v62 = vadd.f32 %v928_v58, %v914_v57 }
 0x140   :  { %v893_v1 = vadd.f32 %v892_v61, %v1648_v54  ;;  %v930_v2 = vadd.f32 %v929_v62, %v915_v60 }
 0x142   :  { %v894_v5 = vadd.f32 %v893_v1, %v853_v26  ;;  %v931_v6 = vadd.f32 %v930_v2, %v916_v63 }
 0x144   :  { %v895_v32 = vadd.f32 %v894_v5, %v856_v39  ;;  %v932_v8 = vadd.f32 %v931_v6, %v917_v4 }
 0x146   :  { %v896_v3 = vadd.f32 %v895_v32, %v861_v14  ;;  %v933_v10 = vadd.f32 %v932_v8, %v918_v7 }
 0x148   :  { %v897_v34 = vadd.f32 %v896_v3, %v864_v28  ;;  %v934_v43 = vadd.f32 %v933_v10, %v919_v9 }
 0x14a   :  { %v898_v17 = vrot.slane %v897_v34, 4  ;;  %v935_v0 = vadd.f32 %v934_v43, %v920_v11 }
 0x14c   :  { %v899_v12 = vadd.f32 %v898_v17, %v897_v34  ;;  %v936_v13 = vrot.slane %v935_v0, 4 }
 0x14e   :  { %v900_v15 = vrot.slane %v899_v12, 2  ;;  %v937_v20 = vadd.f32 %v936_v13, %v935_v0 }
 0x150   :  { %v901_v54 = vadd.f32 %v900_v15, %v899_v12  ;;  %v938_v21 = vrot.slane %v937_v20, 2 }
 0x152   :  { %v902_v22 = vrot.slane %v901_v54, 1  ;;  %v939_v23 = vadd.f32 %v938_v21, %v937_v20 }
 0x154   :  { %v903_v24 = vadd.f32 %v902_v22, %v901_v54  ;;  %v940_v25 = vrot.slane %v939_v23, 1 }
 0x156   :  { %904 = vst [vmem:[%s1711_s3] sm:$0x1] %v903_v24  ;;  %v941_v14 = vadd.f32 %v940_v25, %v939_v23 }
 0x158   :  { %942 = vst [vmem:[%s1712_s4] sm:$0x1] %v941_v14 }

// kernel: _lambda_.36
= control target key start
LH: loop header
LB: loop body
LE: loop exit
PB: predicated region body
PF: predicated region fallthrough
CT: control target
= control target key end

     0   :  { %s169_s0 = inlined_call_operand.vmem [shape: bf16[4,4,2,512], index: 0, kind: input, shape index: {}]   ;;  %s170_s1 = inlined_call_operand.vmem [shape: bf16[4,2,128], index: 1, kind: output, shape index: {}]  }
   0x1   :  { %v8_v0 = vld [vmem:[%s169_s0] sm:$0xf]  ;;  %v87_v1 = vld [vmem:[%s169_s0 + $0x4] sm:$0xf]  ;;  %v91_v2 = vld [vmem:[%s169_s0 + $0x8] sm:$0xf] }
   0x2   :  { %v17_v3 = vmax.bf16 %v87_v1, %v8_v0  ;;  %v9_v4 = vld [vmem:[%s169_s0 + $0x10] sm:$0xf]  ;;  %v88_v5 = vld [vmem:[%s169_s0 + $0x14] sm:$0xf]  ;;  %v95_v6 = vld [vmem:[%s169_s0 + $0xc] sm:$0xf] }
   0x3   :  { %v18_v7 = vmax.bf16 %v88_v5, %v9_v4  ;;  %v92_v8 = vld [vmem:[%s169_s0 + $0x18] sm:$0xf]  ;;  %v10_v9 = vld [vmem:[%s169_s0 + $0x20] sm:$0xf]  ;;  %v96_v11 = vld [vmem:[%s169_s0 + $0x1c] sm:$0xf] }
   0x4   :  { %v26_v10 = vmax.bf16 %v91_v2, %v17_v3  ;;  %v89_v12 = vld [vmem:[%s169_s0 + $0x24] sm:$0xf]  ;;  %v93_v13 = vld [vmem:[%s169_s0 + $0x28] sm:$0xf]  ;;  %v11_v16 = vld [vmem:[%s169_s0 + $0x30] sm:$0xf] }
   0x5   :  { %v27_v14 = vmax.bf16 %v92_v8, %v18_v7  ;;  %v19_v15 = vmax.bf16 %v89_v12, %v10_v9  ;;  %v90_v17 = vld [vmem:[%s169_s0 + $0x34] sm:$0xf]  ;;  %v94_v18 = vld [vmem:[%s169_s0 + $0x38] sm:$0xf]  ;;  %v97_v20 = vld [vmem:[%s169_s0 + $0x2c] sm:$0xf] }
   0x6   :  { %v35_v19 = vmax.bf16 %v95_v6, %v26_v10  ;;  %v20_v21 = vmax.bf16 %v90_v17, %v11_v16  ;;  %v98_v24 = vld [vmem:[%s169_s0 + $0x3c] sm:$0xf] }
   0x7   :  { %v36_v22 = vmax.bf16 %v96_v11, %v27_v14  ;;  %v28_v23 = vmax.bf16 %v93_v13, %v19_v15 }
   0x8   :  { %v43_v25 = vrot.slane %v35_v19, 1  ;;  %v55_v26 = vrot.slane %v35_v19, 2  ;;  %v29_v27 = vmax.bf16 %v94_v18, %v20_v21  ;;  %v67_v32 = vrot.slane %v35_v19, 3 }
   0x9   :  { %v44_v28 = vrot.slane %v36_v22, 1  ;;  %v56_v29 = vrot.slane %v36_v22, 2  ;;  %v37_v30 = vmax.bf16 %v97_v20, %v28_v23  ;;  %v68_v35 = vrot.slane %v36_v22, 3 }
   0xa   :  { %v51_v31 = vmax.bf16 %v43_v25, %v35_v19  ;;  %v38_v33 = vmax.bf16 %v98_v24, %v29_v27 }
   0xb   :  { %v52_v34 = vmax.bf16 %v44_v28, %v36_v22  ;;  %v45_v36 = vrot.slane %v37_v30, 1  ;;  %v57_v37 = vrot.slane %v37_v30, 2  ;;  %v69_v43 = vrot.slane %v37_v30, 3 }
   0xc   :  { %v63_v38 = vmax.bf16 %v55_v26, %v51_v31  ;;  %v46_v39 = vrot.slane %v38_v33, 1  ;;  %v58_v40 = vrot.slane %v38_v33, 2  ;;  %v70_v46 = vrot.slane %v38_v33, 3 }
   0xd   :  { %v64_v41 = vmax.bf16 %v56_v29, %v52_v34  ;;  %v53_v42 = vmax.bf16 %v45_v36, %v37_v30 }
   0xe   :  { %v75_v44 = vmax.bf16 %v67_v32, %v63_v38  ;;  %v54_v45 = vmax.bf16 %v46_v39, %v38_v33 }
   0xf   :  { %v76_v47 = vmax.bf16 %v68_v35, %v64_v41  ;;  %v65_v48 = vmax.bf16 %v57_v37, %v53_v42 }
  0x10   :  { %79 = vst [vmem:[%s170_s1] sm:$0x1] %v75_v44  ;;  %v66_v49 = vmax.bf16 %v58_v40, %v54_v45 }
  0x11   :  { %80 = vst [vmem:[%s170_s1 + $0x1] sm:$0x1] %v76_v47  ;;  %v77_v50 = vmax.bf16 %v69_v43, %v65_v48 }
  0x12   :  { %v78_v51 = vmax.bf16 %v70_v46, %v66_v49 }
  0x13   :  { %81 = vst [vmem:[%s170_s1 + $0x2] sm:$0x1] %v77_v50 }
  0x14   :  { %82 = vst [vmem:[%s170_s1 + $0x3] sm:$0x1] %v78_v51 }

// kernel: _lambda_.30
= control target key start
LH: loop header
LB: loop body
LE: loop exit
PB: predicated region body
PF: predicated region fallthrough
CT: control target
= control target key end

     0   :  { %s167_s0 = inlined_call_operand.vmem [shape: bf16[8,2,4,256], index: 0, kind: input, shape index: {}]   ;;  %s168_s1 = inlined_call_operand.vmem [shape: bf16[8,4,128], index: 1, kind: output, shape index: {}]  }
   0x1   :  { %v8_v0 = vld [vmem:[%s167_s0] sm:$0xf]  ;;  %v77_v1 = vld [vmem:[%s167_s0 + $0x4] sm:$0xf]  ;;  %v9_v2 = vld [vmem:[%s167_s0 + $0x8] sm:$0xf] }
   0x2   :  { %v25_v3 = vmax.bf16 %v77_v1, %v8_v0  ;;  %v78_v4 = vld [vmem:[%s167_s0 + $0xc] sm:$0xf]  ;;  %v10_v5 = vld [vmem:[%s167_s0 + $0x10] sm:$0xf]  ;;  %v79_v6 = vld [vmem:[%s167_s0 + $0x14] sm:$0xf] }
   0x3   :  { %v26_v7 = vmax.bf16 %v78_v4, %v9_v2  ;;  %v27_v8 = vmax.bf16 %v79_v6, %v10_v5  ;;  %v11_v9 = vld [vmem:[%s167_s0 + $0x18] sm:$0xf]  ;;  %v80_v10 = vld [vmem:[%s167_s0 + $0x1c] sm:$0xf]  ;;  %v12_v11 = vld [vmem:[%s167_s0 + $0x20] sm:$0xf] }
   0x4   :  { %v41_v12 = vrot.slane %v25_v3, 2  ;;  %v28_v13 = vmax.bf16 %v80_v10, %v11_v9  ;;  %v81_v14 = vld [vmem:[%s167_s0 + $0x24] sm:$0xf]  ;;  %v13_v15 = vld [vmem:[%s167_s0 + $0x28] sm:$0xf] }
   0x5   :  { %v42_v16 = vrot.slane %v26_v7, 2  ;;  %v43_v17 = vrot.slane %v27_v8, 2  ;;  %v29_v18 = vmax.bf16 %v81_v14, %v12_v11  ;;  %v82_v19 = vld [vmem:[%s167_s0 + $0x2c] sm:$0xf]  ;;  %v14_v20 = vld [vmem:[%s167_s0 + $0x30] sm:$0xf] }
   0x6   :  { %v57_v21 = vmax.bf16 %v41_v12, %v25_v3  ;;  %v44_v22 = vrot.slane %v28_v13, 2  ;;  %v30_v23 = vmax.bf16 %v82_v19, %v13_v15  ;;  %v83_v24 = vld [vmem:[%s167_s0 + $0x34] sm:$0xf]  ;;  %v15_v25 = vld [vmem:[%s167_s0 + $0x38] sm:$0xf] }
   0x7   :  { %v58_v26 = vmax.bf16 %v42_v16, %v26_v7  ;;  %v59_v27 = vmax.bf16 %v43_v17, %v27_v8  ;;  %v45_v28 = vrot.slane %v29_v18, 2  ;;  %v31_v29 = vmax.bf16 %v83_v24, %v14_v20  ;;  %v84_v30 = vld [vmem:[%s167_s0 + $0x3c] sm:$0xf] }
   0x8   :  { %65 = vst [vmem:[%s168_s1] sm:$0x3] %v57_v21  ;;  %v60_v31 = vmax.bf16 %v44_v22, %v28_v13  ;;  %v46_v32 = vrot.slane %v30_v23, 2  ;;  %v32_v33 = vmax.bf16 %v84_v30, %v15_v25 }
   0x9   :  { %66 = vst [vmem:[%s168_s1 + $0x2] sm:$0x3] %v58_v26  ;;  %67 = vst [vmem:[%s168_s1 + $0x4] sm:$0x3] %v59_v27  ;;  %v61_v34 = vmax.bf16 %v45_v28, %v29_v18  ;;  %v47_v35 = vrot.slane %v31_v29, 2 }
   0xa   :  { %68 = vst [vmem:[%s168_s1 + $0x6] sm:$0x3] %v60_v31  ;;  %v62_v36 = vmax.bf16 %v46_v32, %v30_v23  ;;  %v48_v37 = vrot.slane %v32_v33, 2 }
   0xb   :  { %69 = vst [vmem:[%s168_s1 + $0x8] sm:$0x3] %v61_v34  ;;  %v63_v38 = vmax.bf16 %v47_v35, %v31_v29 }
   0xc   :  { %70 = vst [vmem:[%s168_s1 + $0xa] sm:$0x3] %v62_v36  ;;  %v64_v39 = vmax.bf16 %v48_v37, %v32_v33 }
   0xd   :  { %71 = vst [vmem:[%s168_s1 + $0xc] sm:$0x3] %v63_v38 }
   0xe   :  { %72 = vst [vmem:[%s168_s1 + $0xe] sm:$0x3] %v64_v39 }

// kernel: _lambda_.38
= control target key start
LH: loop header
LB: loop body
LE: loop exit
PB: predicated region body
PF: predicated region fallthrough
CT: control target
= control target key end

     0   :  { %v195_v0 = vmov 0.0   ;;  %vm196_vm0 = vmmov 0   ;;  %s258_s1 = inlined_call_operand.vmem [shape: bf16[128,128], index: 1, kind: input, shape index: {}]   ;;  %s259_s0 = inlined_call_operand.vmem [shape: bf16[8,128], index: 0, kind: input, shape index: {}]   ;;  %s260_s2 = inlined_call_operand.vmem [shape: f32[8,128], index: 2, kind: output, shape index: {0}]   ;;  %s261_s3 = inlined_call_operand.vmem [shape: f32[1,1,128], index: 3, kind: output, shape index: {1}]   ;;  %s262_s4 = inlined_call_operand.vmem [shape: f32[1,1,128], index: 4, kind: output, shape index: {2}]  }
   0x1   :  { %165 = vmatprep.subr.bf16.mxu0 %v195_v0  ;;  %v187_v1 = vld [vmem:[%s258_s1 + $0x38] sm:$0xff]   ;;  %181 = vmatprep.mubr.msk.bf16.mxu0 %vm196_vm0, %v195_v0  ;;  %v188_v2 = vld [vmem:[%s258_s1 + $0x30] sm:$0xff]   ;;  %v189_v3 = vld [vmem:[%s258_s1 + $0x28] sm:$0xff]  }
   0x2   :  { %166 = vmatpush3.bf16.msra.mxu0 %v187_v1  ;;  %v190_v4 = vld [vmem:[%s258_s1 + $0x20] sm:$0xff]   ;;  %v191_v5 = vld [vmem:[%s258_s1 + $0x18] sm:$0xff]   ;;  %v192_v6 = vld [vmem:[%s258_s1 + $0x10] sm:$0xff]  }
   0x3   :  { %167 = vmatprep.subr.bf16.mxu0 %v195_v0  ;;  %v193_v7 = vld [vmem:[%s258_s1 + $0x8] sm:$0xff]   ;;  %v194_v8 = vld [vmem:[%s258_s1] sm:$0xff]  }
   0x4   :  { %v15_v9 = vld [vmem:[%s259_s0] sm:$0xf] }
   0x6   :  { %168 = vmatpush3.bf16.msra.mxu0 %v188_v2 }
   0x7   :  { %169 = vmatprep.subr.bf16.mxu0 %v195_v0 }
   0xa   :  { %170 = vmatpush3.bf16.msra.mxu0 %v189_v3 }
   0xb   :  { %171 = vmatprep.subr.bf16.mxu0 %v195_v0 }
   0xe   :  { %172 = vmatpush3.bf16.msra.mxu0 %v190_v4 }
   0xf   :  { %173 = vmatprep.subr.bf16.mxu0 %v195_v0 }
  0x12   :  { %174 = vmatpush3.bf16.msra.mxu0 %v191_v5 }
  0x13   :  { %175 = vmatprep.subr.bf16.mxu0 %v195_v0 }
  0x16   :  { %176 = vmatpush3.bf16.msra.mxu0 %v192_v6 }
  0x17   :  { %177 = vmatprep.subr.bf16.mxu0 %v195_v0 }
  0x1a   :  { %178 = vmatpush3.bf16.msra.mxu0 %v193_v7 }
  0x1b   :  { %179 = vmatprep.subr.bf16.mxu0 %v195_v0 }
  0x1e   :  { %180 = vmatpush3.bf16.msra.mxu0 %v194_v8 }
  0x21   :  { %182 = vmatmul.mubr.bf16.vlgmr.msra.gmra.mxu0 %v15_v9 }
  0xe1   :  { %v114_v10 = vpop.f32.mrf.mxu0 }
  0xe2   :  { %120 = vst [vmem:[%s260_s2] sm:$0xff] %v114_v10  ;;  %v121_v11 = vrot.slane %v114_v10, 4  ;;  %v128_v12 = vmul.f32 %v114_v10, %v114_v10 }
  0xe3   :  { %v183_v13 = vpop.f32.mrf.mxu0 }
  0xe4   :  { %v122_v14 = vadd.f32 %v121_v11, %v114_v10  ;;  %v129_v15 = vrot.slane %v128_v12, 4 }
  0xe5   :  { %v117_v16 = vpop.f32.mrf.mxu0 }
  0xe6   :  { %v123_v17 = vrot.slane %v122_v14, 2  ;;  %v130_v18 = vadd.f32 %v129_v15, %v128_v12 }
  0xe7   :  { %v184_v19 = vpop.f32.mrf.mxu0 }
  0xe8   :  { %v124_v20 = vadd.f32 %v123_v17, %v122_v14  ;;  %v131_v21 = vrot.slane %v130_v18, 2 }
  0xea   :  { %v125_v22 = vrot.slane %v124_v20, 1  ;;  %v132_v23 = vadd.f32 %v131_v21, %v130_v18 }
  0xec   :  { %v126_v24 = vadd.f32 %v125_v22, %v124_v20  ;;  %v133_v25 = vrot.slane %v132_v23, 1 }
  0xee   :  { %127 = vst [vmem:[%s261_s3] sm:$0x1] %v126_v24  ;;  %v134_v26 = vadd.f32 %v133_v25, %v132_v23 }
  0xf0   :  { %135 = vst [vmem:[%s262_s4] sm:$0x1] %v134_v26 }

// kernel: _lambda_.28
= control target key start
LH: loop header
LB: loop body
LE: loop exit
PB: predicated region body
PF: predicated region fallthrough
CT: control target
= control target key end

     0   :  { %s2883_s1 = inlined_call_operand.vmem [shape: bf16[1152,128], index: 1, kind: input, shape index: {}]   ;;  %s2884_s0 = inlined_call_operand.vmem [shape: bf16[128,1152], index: 0, kind: input, shape index: {}]   ;;  %s2885_s2 = inlined_call_operand.vmem [shape: f32[128,128], index: 2, kind: output, shape index: {0}]   ;;  %s2886_s3 = inlined_call_operand.vmem [shape: f32[1,1,128], index: 3, kind: output, shape index: {1}]   ;;  %s2887_s4 = inlined_call_operand.vmem [shape: f32[1,1,128], index: 4, kind: output, shape index: {2}]  }
   0x1   :  { %v2076_v0 = vld [vmem:[%s2883_s1 + $0x78] sm:$0xff]   ;;  %v2080_v4 = vld [vmem:[%s2883_s1 + $0x70] sm:$0xff]   ;;  %v2084_v8 = vld [vmem:[%s2883_s1 + $0x68] sm:$0xff]  }
   0x2   :  { %v2077_v1 = vld [vmem:[%s2883_s1 + $0xf8] sm:$0xff]   ;;  %1756 = vmatprep.subr.bf16.mxu0 %v2076_v0  ;;  %v2081_v5 = vld [vmem:[%s2883_s1 + $0xf0] sm:$0xff]   ;;  %v2085_v9 = vld [vmem:[%s2883_s1 + $0xe8] sm:$0xff]  }
   0x3   :  { %v2078_v2 = vld [vmem:[%s2883_s1 + $0x38] sm:$0xff]   ;;  %1820 = vmatprep.subr.bf16.mxu1 %v2077_v1  ;;  %v2082_v6 = vld [vmem:[%s2883_s1 + $0x30] sm:$0xff]   ;;  %v2086_v10 = vld [vmem:[%s2883_s1 + $0x28] sm:$0xff]  }
   0x4   :  { %v2079_v3 = vld [vmem:[%s2883_s1 + $0xb8] sm:$0xff]   ;;  %1757 = vmatpush3.bf16.msra.mxu0 %v2078_v2  ;;  %v2083_v7 = vld [vmem:[%s2883_s1 + $0xb0] sm:$0xff]   ;;  %v2087_v11 = vld [vmem:[%s2883_s1 + $0xa8] sm:$0xff]  }
   0x5   :  { %1821 = vmatpush3.bf16.msra.mxu1 %v2079_v3  ;;  %1758 = vmatprep.subr.bf16.mxu0 %v2080_v4  ;;  %v2088_v12 = vld [vmem:[%s2883_s1 + $0x60] sm:$0xff]   ;;  %v2092_v16 = vld [vmem:[%s2883_s1 + $0x58] sm:$0xff]   ;;  %v2096_v20 = vld [vmem:[%s2883_s1 + $0x50] sm:$0xff]  }
   0x6   :  { %1822 = vmatprep.subr.bf16.mxu1 %v2081_v5  ;;  %v2089_v13 = vld [vmem:[%s2883_s1 + $0xe0] sm:$0xff]   ;;  %v2093_v17 = vld [vmem:[%s2883_s1 + $0xd8] sm:$0xff]   ;;  %v2097_v21 = vld [vmem:[%s2883_s1 + $0xd0] sm:$0xff]  }
   0x7   :  { %v2090_v14 = vld [vmem:[%s2883_s1 + $0x20] sm:$0xff]   ;;  %v2094_v18 = vld [vmem:[%s2883_s1 + $0x18] sm:$0xff]   ;;  %v2098_v22 = vld [vmem:[%s2883_s1 + $0x10] sm:$0xff]  }
   0x8   :  { %1759 = vmatpush3.bf16.msra.mxu0 %v2082_v6  ;;  %v2091_v15 = vld [vmem:[%s2883_s1 + $0xa0] sm:$0xff]   ;;  %v2095_v19 = vld [vmem:[%s2883_s1 + $0x98] sm:$0xff]   ;;  %v2099_v23 = vld [vmem:[%s2883_s1 + $0x90] sm:$0xff]  }
   0x9   :  { %1823 = vmatpush3.bf16.msra.mxu1 %v2083_v7  ;;  %1760 = vmatprep.subr.bf16.mxu0 %v2084_v8  ;;  %v2100_v24 = vld [vmem:[%s2883_s1 + $0x48] sm:$0xff]   ;;  %v2104_v28 = vld [vmem:[%s2883_s1 + $0x40] sm:$0xff]   ;;  %v2114_v36 = vld [vmem:[%s2883_s1 + $0x178] sm:$0xff]  }
   0xa   :  { %1824 = vmatprep.subr.bf16.mxu1 %v2085_v9  ;;  %v2101_v25 = vld [vmem:[%s2883_s1 + $0xc8] sm:$0xff]   ;;  %v2105_v29 = vld [vmem:[%s2883_s1 + $0xc0] sm:$0xff]   ;;  %v2115_v37 = vld [vmem:[%s2883_s1 + $0x138] sm:$0xff]  }
   0xb   :  { %v2102_v26 = vld [vmem:[%s2883_s1 + $0x8] sm:$0xff]   ;;  %v2106_v30 = vld [vmem:[%s2883_s1] sm:$0xff]   ;;  %v2118_v39 = vld [vmem:[%s2884_s0 + $0x54] ss:$36 sps:$4 sm:$0xff]  }
   0xc   :  { %1761 = vmatpush3.bf16.msra.mxu0 %v2086_v10  ;;  %v2103_v27 = vld [vmem:[%s2883_s1 + $0x88] sm:$0xff]   ;;  %v2107_v31 = vld [vmem:[%s2883_s1 + $0x80] sm:$0xff]   ;;  %v2121_v41 = vld [vmem:[%s2884_s0 + $0x50] ss:$36 sps:$4 sm:$0xff]  }
   0xd   :  { %1825 = vmatpush3.bf16.msra.mxu1 %v2087_v11  ;;  %1762 = vmatprep.subr.bf16.mxu0 %v2088_v12  ;;  %v2108_v32 = vld [vmem:[%s2884_s0] ss:$36 sps:$4 sm:$0xff]   ;;  %v2111_v34 = vld [vmem:[%s2884_s0 + $0x8] ss:$36 sps:$4 sm:$0xff]   ;;  %v2122_v42 = vld [vmem:[%s2883_s1 + $0x170] sm:$0xff]  }
   0xe   :  { %1826 = vmatprep.subr.bf16.mxu1 %v2089_v13  ;;  %v2110_v33 = vld [vmem:[%s2884_s0 + $0x4] ss:$36 sps:$4 sm:$0xff]   ;;  %v2113_v35 = vld [vmem:[%s2884_s0 + $0xc] ss:$36 sps:$4 sm:$0xff]   ;;  %v2124_v44 = vld [vmem:[%s2884_s0 + $0x94] ss:$36 sps:$4 sm:$0xff]  }
   0xf   :  { %1071 = vmatprep.mubr.bf16.mxu0 %v2110_v33  ;;  %1168 = vmatprep.mubr.bf16.mxu1 %v2113_v35  ;;  %v2116_v38 = vld [vmem:[%s2884_s0 + $0x4c] ss:$36 sps:$4 sm:$0xff]   ;;  %v2126_v45 = vld [vmem:[%s2884_s0 + $0x9c] ss:$36 sps:$4 sm:$0xff]   ;;  %v2136_v53 = vld [vmem:[%s2884_s0 + $0xe4] ss:$36 sps:$4 sm:$0xff]  }
  0x10   :  { %1763 = vmatpush3.bf16.msra.mxu0 %v2090_v14  ;;  %v2120_v40 = vld [vmem:[%s2884_s0 + $0x48] ss:$36 sps:$4 sm:$0xff]   ;;  %v2123_v43 = vld [vmem:[%s2883_s1 + $0x130] sm:$0xff]   ;;  %v2131_v47 = vld [vmem:[%s2883_s1 + $0x1f8] sm:$0xff]  }
  0x11   :  { %1827 = vmatpush3.bf16.msra.mxu1 %v2091_v15  ;;  %1764 = vmatprep.subr.bf16.mxu0 %v2092_v16  ;;  %v2130_v46 = vld [vmem:[%s2883_s1 + $0x168] sm:$0xff]   ;;  %v2128_v48 = vld [vmem:[%s2884_s0 + $0x90] ss:$36 sps:$4 sm:$0xff]   ;;  %v2133_v50 = vld [vmem:[%s2883_s1 + $0x1b8] sm:$0xff]  }
  0x12   :  { %1828 = vmatprep.subr.bf16.mxu1 %v2093_v17  ;;  %v2132_v49 = vld [vmem:[%s2883_s1 + $0x128] sm:$0xff]   ;;  %v2129_v51 = vld [vmem:[%s2884_s0 + $0x98] ss:$36 sps:$4 sm:$0xff]   ;;  %v2140_v54 = vld [vmem:[%s2883_s1 + $0x160] sm:$0xff]  }
  0x13   :  { %v2134_v52 = vld [vmem:[%s2884_s0 + $0xdc] ss:$36 sps:$4 sm:$0xff]   ;;  %v2141_v55 = vld [vmem:[%s2883_s1 + $0x1f0] sm:$0xff]   ;;  %v2144_v60 = vld [vmem:[%s2884_s0 + $0x124] ss:$36 sps:$4 sm:$0xff]  }
  0x14   :  { %1765 = vmatpush3.bf16.msra.mxu0 %v2094_v18  ;;  %v2142_v56 = vld [vmem:[%s2883_s1 + $0x120] sm:$0xff]   ;;  %v2143_v57 = vld [vmem:[%s2883_s1 + $0x1b0] sm:$0xff]   ;;  %v2138_v58 = vld [vmem:[%s2884_s0 + $0xd8] ss:$36 sps:$4 sm:$0xff]  }
  0x15   :  { %1829 = vmatpush3.bf16.msra.mxu1 %v2095_v19  ;;  %1766 = vmatprep.subr.bf16.mxu0 %v2096_v20  ;;  %v2139_v59 = vld [vmem:[%s2884_s0 + $0xe0] ss:$36 sps:$4 sm:$0xff]   ;;  %v2146_v61 = vld [vmem:[%s2884_s0 + $0x12c] ss:$36 sps:$4 sm:$0xff]   ;;  %v2150_v62 = vld [vmem:[%s2883_s1 + $0x158] sm:$0xff]  }
  0x16   :  { %1830 = vmatprep.subr.bf16.mxu1 %v2097_v21  ;;  %v2151_v63 = vld [vmem:[%s2883_s1 + $0x1e8] sm:$0xff]   ;;  %v2152_v0 = vld [vmem:[%s2883_s1 + $0x118] sm:$0xff]   ;;  %v2148_v2 = vld [vmem:[%s2884_s0 + $0x120] ss:$36 sps:$4 sm:$0xff]  }
  0x17   :  { %v2153_v1 = vld [vmem:[%s2883_s1 + $0x1a8] sm:$0xff]   ;;  %v2156_v5 = vld [vmem:[%s2884_s0 + $0x174] ss:$36 sps:$4 sm:$0xff]   ;;  %v2161_v7 = vld [vmem:[%s2883_s1 + $0x1e0] sm:$0xff]  }
  0x18   :  { %1767 = vmatpush3.bf16.msra.mxu0 %v2098_v22  ;;  %v2149_v3 = vld [vmem:[%s2884_s0 + $0x128] ss:$36 sps:$4 sm:$0xff]   ;;  %v2160_v6 = vld [vmem:[%s2883_s1 + $0x150] sm:$0xff]   ;;  %v2163_v9 = vld [vmem:[%s2883_s1 + $0x1a0] sm:$0xff]  }
  0x19   :  { %1831 = vmatpush3.bf16.msra.mxu1 %v2099_v23  ;;  %1768 = vmatprep.subr.bf16.mxu0 %v2100_v24  ;;  %v2154_v4 = vld [vmem:[%s2884_s0 + $0x16c] ss:$36 sps:$4 sm:$0xff]   ;;  %v2164_v12 = vld [vmem:[%s2884_s0 + $0x1b4] ss:$36 sps:$4 sm:$0xff]   ;;  %v2166_v14 = vld [vmem:[%s2884_s0 + $0x1bc] ss:$36 sps:$4 sm:$0xff]  }
  0x1a   :  { %1832 = vmatprep.subr.bf16.mxu1 %v2101_v25  ;;  %v2162_v8 = vld [vmem:[%s2883_s1 + $0x110] sm:$0xff]   ;;  %v2158_v10 = vld [vmem:[%s2884_s0 + $0x168] ss:$36 sps:$4 sm:$0xff]   ;;  %v2171_v15 = vld [vmem:[%s2883_s1 + $0x1d8] sm:$0xff]  }
  0x1b   :  { %v2159_v11 = vld [vmem:[%s2884_s0 + $0x170] ss:$36 sps:$4 sm:$0xff]   ;;  %v2170_v13 = vld [vmem:[%s2883_s1 + $0x148] sm:$0xff]   ;;  %v2173_v17 = vld [vmem:[%s2883_s1 + $0x198] sm:$0xff]  }
  0x1c   :  { %1769 = vmatpush3.bf16.msra.mxu0 %v2102_v26  ;;  %v2172_v16 = vld [vmem:[%s2883_s1 + $0x108] sm:$0xff]   ;;  %v2174_v18 = vld [vmem:[%s2883_s1 + $0x1d0] sm:$0xff]   ;;  %v2169_v21 = vld [vmem:[%s2884_s0 + $0x1b8] ss:$36 sps:$4 sm:$0xff]  }
  0x1d   :  { %1833 = vmatpush3.bf16.msra.mxu1 %v2103_v27  ;;  %1770 = vmatprep.subr.bf16.mxu0 %v2104_v28  ;;  %v2175_v19 = vld [vmem:[%s2883_s1 + $0x190] sm:$0xff]   ;;  %v2176_v22 = vld [vmem:[%s2884_s0 + $0x1fc] ss:$36 sps:$4 sm:$0xff]   ;;  %v2178_v23 = vld [vmem:[%s2884_s0 + $0x204] ss:$36 sps:$4 sm:$0xff]  }
  0x1e   :  { %1834 = vmatprep.subr.bf16.mxu1 %v2105_v29  ;;  %v2168_v20 = vld [vmem:[%s2884_s0 + $0x1b0] ss:$36 sps:$4 sm:$0xff]   ;;  %v2182_v24 = vld [vmem:[%s2883_s1 + $0x140] sm:$0xff]   ;;  %v2183_v25 = vld [vmem:[%s2883_s1 + $0x1c8] sm:$0xff]  }
  0x1f   :  { %v2184_v26 = vld [vmem:[%s2883_s1 + $0x100] sm:$0xff]   ;;  %v2185_v27 = vld [vmem:[%s2883_s1 + $0x188] sm:$0xff]   ;;  %v2180_v29 = vld [vmem:[%s2884_s0 + $0x1f8] ss:$36 sps:$4 sm:$0xff]  }
  0x20   :  { %1771 = vmatpush3.bf16.msra.mxu0 %v2106_v30  ;;  %v2186_v28 = vld [vmem:[%s2883_s1 + $0x1c0] sm:$0xff]   ;;  %v2190_v33 = vld [vmem:[%s2884_s0 + $0x14] ss:$36 sps:$4 sm:$0xff]  }
  0x21   :  { %1835 = vmatpush3.bf16.msra.mxu1 %v2107_v31  ;;  %1884 = vmatprep.subr.bf16.mxu0 %v2114_v36  ;;  %v2181_v30 = vld [vmem:[%s2884_s0 + $0x200] ss:$36 sps:$4 sm:$0xff]   ;;  %v2188_v35 = vld [vmem:[%s2884_s0 + $0x10] ss:$36 sps:$4 sm:$0xff]   ;;  %v2191_v36 = vld [vmem:[%s2884_s0 + $0x18] ss:$36 sps:$4 sm:$0xff]  }
  0x22   :  { %1948 = vmatprep.subr.bf16.mxu1 %v2131_v47  ;;  %v2187_v31 = vld [vmem:[%s2883_s1 + $0x180] sm:$0xff]  }
  0x23   :  { %1072 = vmatmul.mubr.bf16.vlgmr.msra.gmra.mxu0 %v2108_v32  ;;  %v2194_v32 = vld [vmem:[%s2883_s1 + $0x238] sm:$0xff]   ;;  %v2206_v47 = vld [vmem:[%s2884_s0 + $0xa0] ss:$36 sps:$4 sm:$0xff]  }
  0x24   :  { %1169 = vmatmul.mubr.bf16.vlgmr.msra.gmra.mxu1 %v2111_v34  ;;  %1885 = vmatpush3.bf16.msra.mxu0 %v2115_v37  ;;  %v2193_v34 = vld [vmem:[%s2884_s0 + $0x1c] ss:$36 sps:$4 sm:$0xff]  }
  0x25   :  { %1079 = vmatprep.mubr.bf16.mxu0 %v2116_v38  ;;  %1176 = vmatprep.mubr.bf16.mxu1 %v2118_v39  ;;  %v2195_v37 = vld [vmem:[%s2884_s0 + $0x5c] ss:$36 sps:$4 sm:$0xff]   ;;  %v2197_v38 = vld [vmem:[%s2884_s0 + $0x64] ss:$36 sps:$4 sm:$0xff]   ;;  %v2201_v39 = vld [vmem:[%s2883_s1 + $0x230] sm:$0xff]  }
  0x26   :  { %1886 = vmatprep.subr.bf16.mxu0 %v2122_v42  ;;  %1949 = vmatpush3.bf16.msra.mxu1 %v2133_v50  ;;  %v2200_v42 = vld [vmem:[%s2884_s0 + $0x60] ss:$36 sps:$4 sm:$0xff]   ;;  %v2211_v50 = vld [vmem:[%s2884_s0 + $0xf4] ss:$36 sps:$4 sm:$0xff]  }
  0x27   :  { %1950 = vmatprep.subr.bf16.mxu1 %v2141_v55  ;;  %v2216_v55 = vld [vmem:[%s2884_s0 + $0x134] ss:$36 sps:$4 sm:$0xff]  }
  0x28   :  { %1887 = vmatpush3.bf16.msra.mxu0 %v2123_v43  ;;  %v2202_v43 = vld [vmem:[%s2884_s0 + $0xa4] ss:$36 sps:$4 sm:$0xff]  }
  0x29   :  { %1888 = vmatprep.subr.bf16.mxu0 %v2130_v46  ;;  %v2222_v46 = vld [vmem:[%s2883_s1 + $0x218] sm:$0xff]  }
  0x2a   :  { %1951 = vmatpush3.bf16.msra.mxu1 %v2143_v57  ;;  %v2243_v57 = vld [vmem:[%s2883_s1 + $0x200] sm:$0xff]  }
  0x2b   :  { %1080 = vmatmul.mubr.bf16.gmra.mxu0 %v2120_v40  ;;  %1952 = vmatprep.subr.bf16.mxu1 %v2151_v63  ;;  %v2208_v40 = vld [vmem:[%s2883_s1 + $0x228] sm:$0xff]   ;;  %v2228_v63 = vld [vmem:[%s2884_s0 + $0x180] ss:$36 sps:$4 sm:$0xff]  }
  0x2c   :  { %1177 = vmatmul.mubr.bf16.gmra.mxu1 %v2121_v41  ;;  %1087 = vmatprep.mubr.bf16.mxu0 %v2124_v44  ;;  %v2199_v41 = vld [vmem:[%s2884_s0 + $0x58] ss:$36 sps:$4 sm:$0xff]   ;;  %v2204_v44 = vld [vmem:[%s2884_s0 + $0xac] ss:$36 sps:$4 sm:$0xff]  }
  0x2d   :  { %1184 = vmatprep.mubr.bf16.mxu1 %v2126_v45  ;;  %1889 = vmatpush3.bf16.msra.mxu0 %v2132_v49  ;;  %v2215_v45 = vld [vmem:[%s2883_s1 + $0x220] sm:$0xff]   ;;  %v2209_v49 = vld [vmem:[%s2884_s0 + $0xec] ss:$36 sps:$4 sm:$0xff]  }
  0x2e   :  { %1890 = vmatprep.subr.bf16.mxu0 %v2140_v54  ;;  %1953 = vmatpush3.bf16.msra.mxu1 %v2153_v1  ;;  %v2214_v54 = vld [vmem:[%s2884_s0 + $0xf0] ss:$36 sps:$4 sm:$0xff]  }
  0x2f   :  { %1954 = vmatprep.subr.bf16.mxu1 %v2161_v7  ;;  %v2232_v1 = vld [vmem:[%s2884_s0 + $0x1cc] ss:$36 sps:$4 sm:$0xff]  }
  0x30   :  { %v2242_v7 = vld [vmem:[%s2884_s0 + $0x210] ss:$36 sps:$4 sm:$0xff]  }
  0x31   :  { %1891 = vmatpush3.bf16.msra.mxu0 %v2142_v56  ;;  %v2218_v56 = vld [vmem:[%s2884_s0 + $0x13c] ss:$36 sps:$4 sm:$0xff]  }
  0x32   :  { %1892 = vmatprep.subr.bf16.mxu0 %v2150_v62  ;;  %1955 = vmatpush3.bf16.msra.mxu1 %v2163_v9  ;;  %v2227_v62 = vld [vmem:[%s2884_s0 + $0x178] ss:$36 sps:$4 sm:$0xff]   ;;  %v2245_v9 = vld [vmem:[%s2884_s0 + $0x140] ss:$36 sps:$4 sm:$0xff]  }
  0x33   :  { %1088 = vmatmul.mubr.bf16.gmra.mxu0 %v2128_v48  ;;  %1956 = vmatprep.subr.bf16.mxu1 %v2171_v15  ;;  %v2207_v48 = vld [vmem:[%s2884_s0 + $0xa8] ss:$36 sps:$4 sm:$0xff]   ;;  %v2251_v15 = vld [vmem:[%s2884_s0 + $0x218] ss:$36 sps:$4 sm:$0xff]  }
  0x34   :  { %1185 = vmatmul.mubr.bf16.gmra.mxu1 %v2129_v51  ;;  %1095 = vmatprep.mubr.bf16.mxu0 %v2134_v52  ;;  %v2229_v51 = vld [vmem:[%s2883_s1 + $0x210] sm:$0xff]   ;;  %v2213_v52 = vld [vmem:[%s2884_s0 + $0xe8] ss:$36 sps:$4 sm:$0xff]  }
  0x35   :  { %1192 = vmatprep.mubr.bf16.mxu1 %v2136_v53  ;;  %1893 = vmatpush3.bf16.msra.mxu0 %v2152_v0  ;;  %v2236_v53 = vld [vmem:[%s2883_s1 + $0x208] sm:$0xff]  }
  0x36   :  { %1894 = vmatprep.subr.bf16.mxu0 %v2160_v6  ;;  %1957 = vmatpush3.bf16.msra.mxu1 %v2173_v17  ;;  %v2230_v0 = vld [vmem:[%s2884_s0 + $0x1c4] ss:$36 sps:$4 sm:$0xff]  }
  0x37   :  { %1958 = vmatprep.subr.bf16.mxu1 %v2174_v18  ;;  %v2241_v6 = vld [vmem:[%s2884_s0 + $0x208] ss:$36 sps:$4 sm:$0xff]  }
  0x39   :  { %1895 = vmatpush3.bf16.msra.mxu0 %v2162_v8  ;;  %v2244_v8 = vld [vmem:[%s2884_s0 + $0x20] ss:$36 sps:$4 sm:$0xff]  }
  0x3a   :  { %1896 = vmatprep.subr.bf16.mxu0 %v2170_v13  ;;  %1959 = vmatpush3.bf16.msra.mxu1 %v2175_v19  ;;  %v2249_v13 = vld [vmem:[%s2884_s0 + $0x1d0] ss:$36 sps:$4 sm:$0xff]  }
  0x3b   :  { %1096 = vmatmul.mubr.bf16.gmra.mxu0 %v2138_v58  ;;  %1960 = vmatprep.subr.bf16.mxu1 %v2183_v25  ;;  %v2220_v58 = vld [vmem:[%s2884_s0 + $0x130] ss:$36 sps:$4 sm:$0xff]  }
  0x3c   :  { %1193 = vmatmul.mubr.bf16.gmra.mxu1 %v2139_v59  ;;  %1103 = vmatprep.mubr.bf16.mxu0 %v2144_v60  ;;  %v2221_v59 = vld [vmem:[%s2884_s0 + $0x138] ss:$36 sps:$4 sm:$0xff]  }
  0x3d   :  { %1200 = vmatprep.mubr.bf16.mxu1 %v2146_v61  ;;  %1897 = vmatpush3.bf16.msra.mxu0 %v2172_v16  ;;  %v2223_v60 = vld [vmem:[%s2884_s0 + $0x17c] ss:$36 sps:$4 sm:$0xff]   ;;  %v2225_v61 = vld [vmem:[%s2884_s0 + $0x184] ss:$36 sps:$4 sm:$0xff]  }
  0x3e   :  { %1898 = vmatprep.subr.bf16.mxu0 %v2182_v24  ;;  %1961 = vmatpush3.bf16.msra.mxu1 %v2185_v27 }
  0x3f   :  { %1962 = vmatprep.subr.bf16.mxu1 %v2186_v28 }
  0x41   :  { %1899 = vmatpush3.bf16.msra.mxu0 %v2184_v26 }
  0x42   :  { %2028 = vmatprep.subr.bf16.mxu0 %v2194_v32  ;;  %1963 = vmatpush3.bf16.msra.mxu1 %v2187_v31 }
  0x43   :  { %1104 = vmatmul.mubr.bf16.gmra.mxu0 %v2148_v2  ;;  %2060 = vmatprep.subr.bf16.mxu1 %v2194_v32  ;;  %v2234_v2 = vld [vmem:[%s2884_s0 + $0x1c0] ss:$36 sps:$4 sm:$0xff]  }
  0x44   :  { %1201 = vmatmul.mubr.bf16.gmra.mxu1 %v2149_v3  ;;  %1111 = vmatprep.mubr.bf16.mxu0 %v2154_v4  ;;  %v2235_v3 = vld [vmem:[%s2884_s0 + $0x1c8] ss:$36 sps:$4 sm:$0xff]  }
  0x45   :  { %1208 = vmatprep.mubr.bf16.mxu1 %v2156_v5  ;;  %v2237_v4 = vld [vmem:[%s2884_s0 + $0x20c] ss:$36 sps:$4 sm:$0xff]   ;;  %v2239_v5 = vld [vmem:[%s2884_s0 + $0x214] ss:$36 sps:$4 sm:$0xff]  }
  0x4b   :  { %1112 = vmatmul.mubr.bf16.gmra.mxu0 %v2158_v10  ;;  %v2246_v10 = vld [vmem:[%s2884_s0 + $0x68] ss:$36 sps:$4 sm:$0xff]  }
  0x4c   :  { %1209 = vmatmul.mubr.bf16.gmra.mxu1 %v2159_v11  ;;  %1119 = vmatprep.mubr.bf16.mxu0 %v2164_v12  ;;  %v2247_v11 = vld [vmem:[%s2884_s0 + $0x188] ss:$36 sps:$4 sm:$0xff]   ;;  %v2248_v12 = vld [vmem:[%s2884_s0 + $0xb0] ss:$36 sps:$4 sm:$0xff]  }
  0x4d   :  { %1216 = vmatprep.mubr.bf16.mxu1 %v2166_v14  ;;  %v2250_v14 = vld [vmem:[%s2884_s0 + $0xf8] ss:$36 sps:$4 sm:$0xff]  }
  0x53   :  { %1120 = vmatmul.mubr.bf16.gmra.mxu0 %v2168_v20 }
  0x54   :  { %1217 = vmatmul.mubr.bf16.gmra.mxu1 %v2169_v21  ;;  %1127 = vmatprep.mubr.bf16.mxu0 %v2176_v22 }
  0x55   :  { %1224 = vmatprep.mubr.bf16.mxu1 %v2178_v23 }
  0x5b   :  { %1128 = vmatmul.mubr.bf16.gmra.mxu0 %v2180_v29 }
  0x5c   :  { %1225 = vmatmul.mubr.bf16.gmra.mxu1 %v2181_v30  ;;  %1265 = vmatprep.mubr.bf16.mxu0 %v2190_v33 }
  0x5d   :  { %1362 = vmatprep.mubr.bf16.mxu1 %v2193_v34 }
  0x63   :  { %1266 = vmatmul.mubr.bf16.vlgmr.msra.gmra.mxu0 %v2188_v35 }
  0x64   :  { %1363 = vmatmul.mubr.bf16.vlgmr.msra.gmra.mxu1 %v2191_v36  ;;  %2029 = vmatpush3.bf16.msra.mxu0 %v2194_v32 }
  0x65   :  { %1273 = vmatprep.mubr.bf16.mxu0 %v2195_v37  ;;  %1370 = vmatprep.mubr.bf16.mxu1 %v2197_v38 }
  0x66   :  { %2030 = vmatprep.subr.bf16.mxu0 %v2201_v39  ;;  %2068 = vmatpush3.bf16.msra.mxu1 %v2194_v32 }
  0x67   :  { %2061 = vmatprep.subr.bf16.mxu1 %v2201_v39 }
  0x68   :  { %2031 = vmatpush3.bf16.msra.mxu0 %v2201_v39 }
  0x69   :  { %2032 = vmatprep.subr.bf16.mxu0 %v2208_v40 }
  0x6a   :  { %2069 = vmatpush3.bf16.msra.mxu1 %v2201_v39 }
  0x6b   :  { %1274 = vmatmul.mubr.bf16.gmra.mxu0 %v2199_v41  ;;  %2062 = vmatprep.subr.bf16.mxu1 %v2208_v40 }
  0x6c   :  { %1371 = vmatmul.mubr.bf16.gmra.mxu1 %v2200_v42  ;;  %1281 = vmatprep.mubr.bf16.mxu0 %v2202_v43 }
  0x6d   :  { %1378 = vmatprep.mubr.bf16.mxu1 %v2204_v44  ;;  %2033 = vmatpush3.bf16.msra.mxu0 %v2208_v40 }
  0x6e   :  { %2034 = vmatprep.subr.bf16.mxu0 %v2215_v45  ;;  %2070 = vmatpush3.bf16.msra.mxu1 %v2208_v40 }
  0x6f   :  { %2063 = vmatprep.subr.bf16.mxu1 %v2215_v45 }
  0x71   :  { %2035 = vmatpush3.bf16.msra.mxu0 %v2215_v45 }
  0x72   :  { %2036 = vmatprep.subr.bf16.mxu0 %v2222_v46  ;;  %2071 = vmatpush3.bf16.msra.mxu1 %v2215_v45 }
  0x73   :  { %1282 = vmatmul.mubr.bf16.gmra.mxu0 %v2206_v47  ;;  %2064 = vmatprep.subr.bf16.mxu1 %v2222_v46 }
  0x74   :  { %1379 = vmatmul.mubr.bf16.gmra.mxu1 %v2207_v48  ;;  %1289 = vmatprep.mubr.bf16.mxu0 %v2209_v49 }
  0x75   :  { %1386 = vmatprep.mubr.bf16.mxu1 %v2211_v50  ;;  %2037 = vmatpush3.bf16.msra.mxu0 %v2222_v46 }
  0x76   :  { %2038 = vmatprep.subr.bf16.mxu0 %v2229_v51  ;;  %2072 = vmatpush3.bf16.msra.mxu1 %v2222_v46 }
  0x77   :  { %2065 = vmatprep.subr.bf16.mxu1 %v2229_v51 }
  0x79   :  { %2039 = vmatpush3.bf16.msra.mxu0 %v2229_v51 }
  0x7a   :  { %2040 = vmatprep.subr.bf16.mxu0 %v2236_v53  ;;  %2073 = vmatpush3.bf16.msra.mxu1 %v2229_v51 }
  0x7b   :  { %1290 = vmatmul.mubr.bf16.gmra.mxu0 %v2213_v52  ;;  %2066 = vmatprep.subr.bf16.mxu1 %v2236_v53 }
  0x7c   :  { %1387 = vmatmul.mubr.bf16.gmra.mxu1 %v2214_v54  ;;  %1297 = vmatprep.mubr.bf16.mxu0 %v2216_v55 }
  0x7d   :  { %1394 = vmatprep.mubr.bf16.mxu1 %v2218_v56  ;;  %2041 = vmatpush3.bf16.msra.mxu0 %v2236_v53 }
  0x7e   :  { %2042 = vmatprep.subr.bf16.mxu0 %v2243_v57  ;;  %2074 = vmatpush3.bf16.msra.mxu1 %v2236_v53 }
  0x7f   :  { %2067 = vmatprep.subr.bf16.mxu1 %v2243_v57 }
  0x81   :  { %2043 = vmatpush3.bf16.msra.mxu0 %v2243_v57 }
  0x82   :  { %2075 = vmatpush3.bf16.msra.mxu1 %v2243_v57 }
  0x83   :  { %1298 = vmatmul.mubr.bf16.gmra.mxu0 %v2220_v58 }
  0x84   :  { %1395 = vmatmul.mubr.bf16.gmra.mxu1 %v2221_v59  ;;  %1305 = vmatprep.mubr.bf16.mxu0 %v2223_v60 }
  0x85   :  { %1402 = vmatprep.mubr.bf16.mxu1 %v2225_v61 }
  0x8b   :  { %1306 = vmatmul.mubr.bf16.gmra.mxu0 %v2227_v62 }
  0x8c   :  { %1403 = vmatmul.mubr.bf16.gmra.mxu1 %v2228_v63  ;;  %1313 = vmatprep.mubr.bf16.mxu0 %v2230_v0 }
  0x8d   :  { %1410 = vmatprep.mubr.bf16.mxu1 %v2232_v1 }
  0x93   :  { %1314 = vmatmul.mubr.bf16.gmra.mxu0 %v2234_v2 }
  0x94   :  { %1411 = vmatmul.mubr.bf16.gmra.mxu1 %v2235_v3  ;;  %1321 = vmatprep.mubr.bf16.mxu0 %v2237_v4 }
  0x95   :  { %1418 = vmatprep.mubr.bf16.mxu1 %v2239_v5 }
  0x9b   :  { %1322 = vmatmul.mubr.bf16.gmra.mxu0 %v2241_v6 }
  0x9c   :  { %1419 = vmatmul.mubr.bf16.gmra.mxu1 %v2242_v7  ;;  %2044 = vmatprep.mubr.bf16.mxu0 %v2244_v8 }
  0x9d   :  { %2052 = vmatprep.mubr.bf16.mxu1 %v2245_v9 }
  0xa3   :  { %2045 = vmatmul.mubr.bf16.vlgmr.msra.gmra.mxu0 %v2246_v10 }
  0xa4   :  { %2053 = vmatmul.mubr.bf16.vlgmr.msra.gmra.mxu1 %v2247_v11  ;;  %2048 = vmatprep.mubr.bf16.mxu0 %v2248_v12 }
  0xa5   :  { %2056 = vmatprep.mubr.bf16.mxu1 %v2249_v13 }
  0xab   :  { %2049 = vmatmul.mubr.bf16.gmra.mxu0 %v2250_v14 }
  0xac   :  { %2057 = vmatmul.mubr.bf16.gmra.mxu1 %v2251_v15 }
  0xe3   :  { %v1772_v16 = vpop.f32.mrf.mxu0 }
  0xe4   :  { %v1836_v17 = vpop.f32.mrf.mxu1 }
  0xe5   :  { %v1773_v18 = vpop.f32.mrf.mxu0 }
  0xe6   :  { %v1774_v19 = vadd.f32 %v1773_v18, %v1772_v16  ;;  %v1837_v20 = vpop.f32.mrf.mxu1 }
  0xe7   :  { %v1838_v21 = vadd.f32 %v1837_v20, %v1836_v17  ;;  %v1775_v22 = vpop.f32.mrf.mxu0 }
  0xe8   :  { %v1839_v23 = vpop.f32.mrf.mxu1 }
  0xe9   :  { %v2709_v24 = vadd.f32 %v1838_v21, %v1774_v19  ;;  %v1776_v25 = vpop.f32.mrf.mxu0 }
  0xea   :  { %v1777_v26 = vadd.f32 %v1776_v25, %v1775_v22  ;;  %v1840_v27 = vpop.f32.mrf.mxu1 }
  0xeb   :  { %v1841_v28 = vadd.f32 %v1840_v27, %v1839_v23  ;;  %v1778_v29 = vpop.f32.mrf.mxu0 }
  0xec   :  { %v1842_v30 = vpop.f32.mrf.mxu1 }
  0xed   :  { %v2711_v31 = vadd.f32 %v1841_v28, %v1777_v26  ;;  %v1779_v32 = vpop.f32.mrf.mxu0 }
  0xee   :  { %v1780_v33 = vadd.f32 %v1779_v32, %v1778_v29  ;;  %v1843_v34 = vpop.f32.mrf.mxu1 }
  0xef   :  { %v1844_v35 = vadd.f32 %v1843_v34, %v1842_v30  ;;  %v1781_v36 = vpop.f32.mrf.mxu0 }
  0xf0   :  { %v1845_v37 = vpop.f32.mrf.mxu1 }
  0xf1   :  { %v2713_v38 = vadd.f32 %v1844_v35, %v1780_v33  ;;  %v1782_v39 = vpop.f32.mrf.mxu0 }
  0xf2   :  { %v1783_v40 = vadd.f32 %v1782_v39, %v1781_v36  ;;  %v1846_v41 = vpop.f32.mrf.mxu1 }
  0xf3   :  { %v1847_v42 = vadd.f32 %v1846_v41, %v1845_v37  ;;  %v1784_v43 = vpop.f32.mrf.mxu0 }
  0xf4   :  { %v1848_v44 = vpop.f32.mrf.mxu1 }
  0xf5   :  { %v2715_v45 = vadd.f32 %v1847_v42, %v1783_v40  ;;  %v1785_v46 = vpop.f32.mrf.mxu0 }
  0xf6   :  { %v1786_v47 = vadd.f32 %v1785_v46, %v1784_v43  ;;  %v1849_v48 = vpop.f32.mrf.mxu1 }
  0xf7   :  { %v1850_v49 = vadd.f32 %v1849_v48, %v1848_v44  ;;  %v1787_v50 = vpop.f32.mrf.mxu0 }
  0xf8   :  { %v1851_v51 = vpop.f32.mrf.mxu1 }
  0xf9   :  { %v2717_v52 = vadd.f32 %v1850_v49, %v1786_v47  ;;  %v1788_v53 = vpop.f32.mrf.mxu0 }
  0xfa   :  { %v1789_v54 = vadd.f32 %v1788_v53, %v1787_v50  ;;  %v1852_v55 = vpop.f32.mrf.mxu1 }
  0xfb   :  { %v1853_v56 = vadd.f32 %v1852_v55, %v1851_v51  ;;  %v1790_v57 = vpop.f32.mrf.mxu0 }
  0xfc   :  { %v1854_v58 = vpop.f32.mrf.mxu1 }
  0xfd   :  { %v2719_v59 = vadd.f32 %v1853_v56, %v1789_v54  ;;  %v1791_v60 = vpop.f32.mrf.mxu0 }
  0xfe   :  { %v1792_v61 = vadd.f32 %v1791_v60, %v1790_v57  ;;  %v1855_v62 = vpop.f32.mrf.mxu1 }
  0xff   :  { %2888 = vst [vmem:[#allocation2_spill] sm:$0xff] %v2719_v59  ;;  %v1856_v63 = vadd.f32 %v1855_v62, %v1854_v58  ;;  %v1793_v0 = vpop.f32.mrf.mxu0 }
 0x100   :  { %v1857_v1 = vpop.f32.mrf.mxu1 }
 0x101   :  { %v2721_v2 = vadd.f32 %v1856_v63, %v1792_v61  ;;  %v1794_v3 = vpop.f32.mrf.mxu0 }
 0x102   :  { %v1795_v4 = vadd.f32 %v1794_v3, %v1793_v0  ;;  %v1858_v5 = vpop.f32.mrf.mxu1 }
 0x103   :  { %2889 = vst [vmem:[#allocation3_spill] sm:$0xff] %v2721_v2  ;;  %v1859_v6 = vadd.f32 %v1858_v5, %v1857_v1  ;;  %v1796_v7 = vpop.f32.mrf.mxu0 }
 0x104   :  { %v1860_v8 = vpop.f32.mrf.mxu1 }
 0x105   :  { %v2723_v9 = vadd.f32 %v1859_v6, %v1795_v4  ;;  %v1797_v10 = vpop.f32.mrf.mxu0 }
 0x106   :  { %v1798_v11 = vadd.f32 %v1797_v10, %v1796_v7  ;;  %v1861_v12 = vpop.f32.mrf.mxu1 }
 0x107   :  { %2890 = vst [vmem:[#allocation4_spill] sm:$0xff] %v2723_v9  ;;  %v1862_v13 = vadd.f32 %v1861_v12, %v1860_v8  ;;  %v1799_v14 = vpop.f32.mrf.mxu0 }
 0x108   :  { %v1863_v15 = vpop.f32.mrf.mxu1 }
 0x109   :  { %v2725_v16 = vadd.f32 %v1862_v13, %v1798_v11  ;;  %v1800_v17 = vpop.f32.mrf.mxu0 }
 0x10a   :  { %v1801_v18 = vadd.f32 %v1800_v17, %v1799_v14  ;;  %v1864_v19 = vpop.f32.mrf.mxu1 }
 0x10b   :  { %v1865_v20 = vadd.f32 %v1864_v19, %v1863_v15  ;;  %v1802_v21 = vpop.f32.mrf.mxu0 }
 0x10c   :  { %v1866_v22 = vpop.f32.mrf.mxu1 }
 0x10d   :  { %v2727_v23 = vadd.f32 %v1865_v20, %v1801_v18  ;;  %v1803_v25 = vpop.f32.mrf.mxu0 }
 0x10e   :  { %v1804_v26 = vadd.f32 %v1803_v25, %v1802_v21  ;;  %v1867_v27 = vpop.f32.mrf.mxu1 }
 0x10f   :  { %2891 = vst [vmem:[#allocation5_spill] sm:$0xff] %v2727_v23  ;;  %v1868_v28 = vadd.f32 %v1867_v27, %v1866_v22  ;;  %v1805_v29 = vpop.f32.mrf.mxu0 }
 0x110   :  { %v1869_v30 = vpop.f32.mrf.mxu1 }
 0x111   :  { %v2729_v32 = vadd.f32 %v1868_v28, %v1804_v26  ;;  %v1806_v33 = vpop.f32.mrf.mxu0 }
 0x112   :  { %v1807_v34 = vadd.f32 %v1806_v33, %v1805_v29  ;;  %v1870_v35 = vpop.f32.mrf.mxu1 }
 0x113   :  { %v1871_v36 = vadd.f32 %v1870_v35, %v1869_v30  ;;  %v1808_v37 = vpop.f32.mrf.mxu0 }
 0x114   :  { %v1872_v39 = vpop.f32.mrf.mxu1 }
 0x115   :  { %v2731_v40 = vadd.f32 %v1871_v36, %v1807_v34  ;;  %v1809_v41 = vpop.f32.mrf.mxu0 }
 0x116   :  { %v1810_v42 = vadd.f32 %v1809_v41, %v1808_v37  ;;  %v1873_v43 = vpop.f32.mrf.mxu1 }
 0x117   :  { %v1874_v44 = vadd.f32 %v1873_v43, %v1872_v39  ;;  %v1811_v46 = vpop.f32.mrf.mxu0 }
 0x118   :  { %v1875_v47 = vpop.f32.mrf.mxu1 }
 0x119   :  { %v2733_v48 = vadd.f32 %v1874_v44, %v1810_v42  ;;  %v1812_v49 = vpop.f32.mrf.mxu0 }
 0x11a   :  { %v1813_v50 = vadd.f32 %v1812_v49, %v1811_v46  ;;  %v1876_v51 = vpop.f32.mrf.mxu1 }
 0x11b   :  { %2892 = vst [vmem:[#allocation6_spill] sm:$0xff] %v2733_v48  ;;  %v1877_v53 = vadd.f32 %v1876_v51, %v1875_v47  ;;  %v1814_v54 = vpop.f32.mrf.mxu0 }
 0x11c   :  { %v1878_v55 = vpop.f32.mrf.mxu1 }
 0x11d   :  { %v2735_v56 = vadd.f32 %v1877_v53, %v1813_v50  ;;  %v1815_v57 = vpop.f32.mrf.mxu0 }
 0x11e   :  { %v1816_v58 = vadd.f32 %v1815_v57, %v1814_v54  ;;  %v1879_v60 = vpop.f32.mrf.mxu1 }
 0x11f   :  { %2893 = vst [vmem:[#allocation7_spill] sm:$0xff] %v2735_v56  ;;  %v1880_v61 = vadd.f32 %v1879_v60, %v1878_v55  ;;  %v1817_v62 = vpop.f32.mrf.mxu0 }
 0x120   :  { %v1881_v63 = vpop.f32.mrf.mxu1 }
 0x121   :  { %v2737_v0 = vadd.f32 %v1880_v61, %v1816_v58  ;;  %v1818_v1 = vpop.f32.mrf.mxu0 }
 0x122   :  { %v1819_v3 = vadd.f32 %v1818_v1, %v1817_v62  ;;  %v1882_v4 = vpop.f32.mrf.mxu1 }
 0x123   :  { %2894 = vst [vmem:[#allocation8_spill] sm:$0xff] %v2737_v0  ;;  %v1883_v5 = vadd.f32 %v1882_v4, %v1881_v63  ;;  %v1900_v6 = vpop.f32.mrf.mxu0 }
 0x124   :  { %v1964_v7 = vpop.f32.mrf.mxu1 }
 0x125   :  { %v2739_v8 = vadd.f32 %v1883_v5, %v1819_v3  ;;  %v1901_v10 = vpop.f32.mrf.mxu0 }
 0x126   :  { %v1965_v11 = vpop.f32.mrf.mxu1 }
 0x127   :  { %2895 = vst [vmem:[#allocation9_spill] sm:$0xff] %v2739_v8  ;;  %v1903_v12 = vpop.f32.mrf.mxu0  ;;  %v1966_v23 = vadd.f32 %v1965_v11, %v1964_v7 }
 0x128   :  { %v1967_v13 = vpop.f32.mrf.mxu1 }
 0x129   :  { %v1904_v14 = vpop.f32.mrf.mxu0 }
 0x12a   :  { %v1968_v15 = vpop.f32.mrf.mxu1  ;;  %v1905_v0 = vadd.f32 %v1904_v14, %v1903_v12 }
 0x12b   :  { %v1906_v17 = vpop.f32.mrf.mxu0 }
 0x12c   :  { %v1970_v18 = vpop.f32.mrf.mxu1 }
 0x12d   :  { %v1907_v19 = vpop.f32.mrf.mxu0 }
 0x12e   :  { %v1971_v20 = vpop.f32.mrf.mxu1 }
 0x12f   :  { %v1909_v21 = vpop.f32.mrf.mxu0 }
 0x130   :  { %v1973_v22 = vpop.f32.mrf.mxu1 }
 0x131   :  { %v1910_v25 = vpop.f32.mrf.mxu0 }
 0x132   :  { %v1974_v26 = vpop.f32.mrf.mxu1  ;;  %v1911_v9 = vadd.f32 %v1910_v25, %v1909_v21 }
 0x133   :  { %v1912_v27 = vpop.f32.mrf.mxu0 }
 0x134   :  { %v2741_v28 = vpop.f32.mrf.mxu1  ;;  %v1279_v14 = vadd.f32 %v1911_v9, %v2715_v45 }
 0x135   :  { %v1913_v29 = vpop.f32.mrf.mxu0 }
 0x136   :  { %v2743_v30 = vpop.f32.mrf.mxu1 }
 0x137   :  { %v2745_v33 = vpop.f32.mrf.mxu0 }
 0x138   :  { %v2747_v34 = vpop.f32.mrf.mxu1 }
 0x139   :  { %2896 = vst [vmem:[#allocation10_spill] sm:$0xff] %v2747_v34  ;;  %v2749_v35 = vpop.f32.mrf.mxu0 }
 0x13a   :  { %v2751_v36 = vpop.f32.mrf.mxu1 }
 0x13b   :  { %2897 = vst [vmem:[#allocation11_spill] sm:$0xff] %v2751_v36  ;;  %v1918_v37 = vpop.f32.mrf.mxu0  ;;  %v1902_v36 = vadd.f32 %v1901_v10, %v1900_v6  ;;  %v1972_v10 = vadd.f32 %v1971_v20, %v1970_v18  ;;  %v1978_v20 = vadd.f32 %v2743_v30, %v2741_v28 }
 0x13c   :  { %v2753_v39 = vpop.f32.mrf.mxu1 }
 0x13d   :  { %2898 = vst [vmem:[#allocation12_spill] sm:$0xff] %v2753_v39  ;;  %v1919_v41 = vpop.f32.mrf.mxu0  ;;  %v1271_v39 = vadd.f32 %v1905_v0, %v2711_v31 }
 0x13e   :  { %v2755_v42 = vpop.f32.mrf.mxu1 }
 0x13f   :  { %2899 = vst [vmem:[#allocation13_spill] sm:$0xff] %v2755_v42  ;;  %v1921_v43 = vpop.f32.mrf.mxu0 }
 0x140   :  { %v2757_v44 = vpop.f32.mrf.mxu1 }
 0x141   :  { %2900 = vst [vmem:[#allocation14_spill] sm:$0xff] %v2757_v44  ;;  %v1922_v46 = vpop.f32.mrf.mxu0 }
 0x142   :  { %v2759_v47 = vpop.f32.mrf.mxu1 }
 0x143   :  { %2901 = vst [vmem:[#allocation15_spill] sm:$0xff] %v2759_v47  ;;  %v1924_v49 = vpop.f32.mrf.mxu0  ;;  %v1908_v47 = vadd.f32 %v1907_v19, %v1906_v17  ;;  %v1975_v17 = vadd.f32 %v1974_v26, %v1973_v22  ;;  %v1923_v22 = vadd.f32 %v1922_v46, %v1921_v43  ;;  %v2913_v46 = vld [vmem:[#allocation3_spill] sm:$0xff] }
 0x144   :  { %v1988_v50 = vpop.f32.mrf.mxu1 }
 0x145   :  { %v1925_v51 = vpop.f32.mrf.mxu0  ;;  %v1276_v6 = vadd.f32 %v1908_v47, %v2713_v38  ;;  %v1920_v38 = vadd.f32 %v1919_v41, %v1918_v37  ;;  %v1376_v9 = vadd.f32 %v1975_v17, %v1279_v14  ;;  %v2910_v47 = vld [vmem:[#allocation5_spill] sm:$0xff] }
 0x146   :  { %v1989_v53 = vpop.f32.mrf.mxu1  ;;  %v1926_v19 = vadd.f32 %v1925_v51, %v1924_v49  ;;  %v2909_v41 = vld [vmem:[#allocation13_spill] sm:$0xff] }
 0x147   :  { %v1927_v54 = vpop.f32.mrf.mxu0  ;;  %v1373_v31 = vadd.f32 %v1972_v10, %v1276_v6  ;;  %v1990_v18 = vadd.f32 %v1989_v53, %v1988_v50  ;;  %v1292_v51 = vadd.f32 %v1920_v38, %v2913_v46  ;;  %v2918_v6 = vld [vmem:[#allocation10_spill] sm:$0xff]  ;;  %v2919_v10 = vld [vmem:[#allocation11_spill] sm:$0xff] }
 0x148   :  { %v2761_v55 = vpop.f32.mrf.mxu1  ;;  %v1981_v14 = vadd.f32 %v2919_v10, %v2918_v6  ;;  %v2923_v38 = vld [vmem:[#allocation2_spill] sm:$0xff] }
 0x149   :  { %2902 = vst [vmem:[#allocation16_spill] sm:$0xff] %v2761_v55  ;;  %v1928_v57 = vpop.f32.mrf.mxu0  ;;  %v1268_v55 = vadd.f32 %v1902_v36, %v2709_v24 }
 0x14a   :  { %v2763_v58 = vpop.f32.mrf.mxu1  ;;  %v1929_v36 = vadd.f32 %v1928_v57, %v1927_v54  ;;  %v2916_v57 = vld [vmem:[#allocation15_spill] sm:$0xff] }
 0x14b   :  { %2903 = vst [vmem:[#allocation17_spill] sm:$0xff] %v2763_v58  ;;  %v1930_v60 = vpop.f32.mrf.mxu0  ;;  %v1365_v0 = vadd.f32 %v1966_v23, %v1268_v55  ;;  %v1917_v23 = vadd.f32 %v2749_v35, %v2745_v33  ;;  %v2915_v55 = vld [vmem:[#allocation14_spill] sm:$0xff] }
 0x14c   :  { %v1994_v61 = vpop.f32.mrf.mxu1  ;;  %v1303_v49 = vadd.f32 %v1929_v36, %v2910_v47 }
 0x14d   :  { %v1931_v62 = vpop.f32.mrf.mxu0 }
 0x14e   :  { %v1995_v63 = vpop.f32.mrf.mxu1  ;;  %v1932_v42 = vadd.f32 %v1931_v62, %v1930_v60 }
 0x14f   :  { %v1933_v1 = vpop.f32.mrf.mxu0  ;;  %v1996_v7 = vadd.f32 %v1995_v63, %v1994_v61 }
 0x150   :  { %v1997_v3 = vpop.f32.mrf.mxu1  ;;  %v1308_v24 = vadd.f32 %v1932_v42, %v2729_v32  ;;  %v2911_v50 = vld [vmem:[#allocation16_spill] sm:$0xff] }
 0x151   :  { %v1934_v4 = vpop.f32.mrf.mxu0 }
 0x152   :  { %v1998_v5 = vpop.f32.mrf.mxu1  ;;  %v1935_v25 = vadd.f32 %v1934_v4, %v1933_v1  ;;  %v2912_v28 = vld [vmem:[#allocation17_spill] sm:$0xff]  ;;  %v2917_v1 = vld [vmem:[#allocation8_spill] sm:$0xff] }
 0x153   :  { %v1936_v56 = vpop.f32.mrf.mxu0  ;;  %v1999_v32 = vadd.f32 %v1998_v5, %v1997_v3  ;;  %v1993_v30 = vadd.f32 %v2912_v28, %v2911_v50 }
 0x154   :  { %v2765_v8 = vpop.f32.mrf.mxu1  ;;  %v1311_v26 = vadd.f32 %v1935_v25, %v2731_v40 }
 0x155   :  { %2904 = vst [vmem:[#allocation18_spill] sm:$0xff] %v2765_v8  ;;  %v1937_v59 = vpop.f32.mrf.mxu0 }
 0x156   :  { %v2767_v48 = vpop.f32.mrf.mxu1  ;;  %v1938_v53 = vadd.f32 %v1937_v59, %v1936_v56  ;;  %v1408_v63 = vadd.f32 %v1999_v32, %v1311_v26 }
 0x157   :  { %2905 = vst [vmem:[#allocation19_spill] sm:$0xff] %v2767_v48  ;;  %v2769_v34 = vpop.f32.mrf.mxu0  ;;  %v1969_v48 = vadd.f32 %v1968_v15, %v1967_v13  ;;  %v1300_v15 = vadd.f32 %v1926_v19, %v2725_v16  ;;  %v2908_v16 = vld [vmem:[#allocation12_spill] sm:$0xff] }
 0x158   :  { %v2771_v44 = vpop.f32.mrf.mxu1  ;;  %v1984_v42 = vadd.f32 %v2909_v41, %v2908_v16  ;;  %v2925_v16 = vld [vmem:[#allocation7_spill] sm:$0xff] }
 0x159   :  { %2906 = vst [vmem:[#allocation20_spill] sm:$0xff] %v2771_v44  ;;  %v2773_v2 = vpop.f32.mrf.mxu0  ;;  %v1368_v13 = vadd.f32 %v1969_v48, %v1271_v39  ;;  %v1405_v39 = vadd.f32 %v1996_v7, %v1308_v24  ;;  %v1397_v33 = vadd.f32 %v1990_v18, %v1300_v15  ;;  %v1287_v15 = vadd.f32 %v1917_v23, %v2923_v38 }
 0x15a   :  { %v2775_v58 = vpop.f32.mrf.mxu1  ;;  %v1941_v36 = vadd.f32 %v2773_v2, %v2769_v34 }
 0x15b   :  { %2907 = vst [vmem:[#allocation21_spill] sm:$0xff] %v2775_v58  ;;  %v1942_v8 = vpop.f32.mrf.mxu0  ;;  %v1914_v58 = vadd.f32 %v1913_v29, %v1912_v27 }
 0x15c   :  { %v2006_v12 = vpop.f32.mrf.mxu1  ;;  %v2921_v24 = vld [vmem:[#allocation18_spill] sm:$0xff]  ;;  %v1319_v41 = vadd.f32 %v1941_v36, %v2925_v16 }
 0x15d   :  { %v1943_v21 = vpop.f32.mrf.mxu0  ;;  %v1284_v29 = vadd.f32 %v1914_v58, %v2717_v52  ;;  %v1987_v58 = vadd.f32 %v2916_v57, %v2915_v55 }
 0x15e   :  { %v2007_v44 = vpop.f32.mrf.mxu1  ;;  %v1944_v48 = vadd.f32 %v1943_v21, %v1942_v8  ;;  %v2914_v8 = vld [vmem:[#allocation4_spill] sm:$0xff]  ;;  %v1400_v21 = vadd.f32 %v1993_v30, %v1303_v49  ;;  %v2922_v7 = vld [vmem:[#allocation19_spill] sm:$0xff] }
 0x15f   :  { %v1945_v11 = vpop.f32.mrf.mxu0  ;;  %v1295_v35 = vadd.f32 %v1923_v22, %v2914_v8  ;;  %v2008_v4 = vadd.f32 %v2007_v44, %v2006_v12  ;;  %v1381_v44 = vadd.f32 %v1978_v20, %v1284_v29  ;;  %v2920_v12 = vld [vmem:[#allocation6_spill] sm:$0xff]  ;;  %v2924_v22 = vld [vmem:[#allocation9_spill] sm:$0xff]  ;;  %v1384_v8 = vadd.f32 %v1981_v14, %v1287_v15 }
 0x160   :  { %v2009_v60 = vpop.f32.mrf.mxu1  ;;  %v1324_v3 = vadd.f32 %v1944_v48, %v2917_v1  ;;  %v1316_v25 = vadd.f32 %v1938_v53, %v2920_v12 }
 0x161   :  { %v1946_v45 = vpop.f32.mrf.mxu0  ;;  %v1392_v20 = vadd.f32 %v1987_v58, %v1295_v35 }
 0x162   :  { %v2010_v27 = vpop.f32.mrf.mxu1  ;;  %v1947_v59 = vadd.f32 %v1946_v45, %v1945_v11  ;;  %v2002_v11 = vadd.f32 %v2922_v7, %v2921_v24  ;;  %v1421_v29 = vadd.f32 %v2008_v4, %v1324_v3 }
 0x163   :  { %v2046_v37 = vpop.f32.mrf.mxu0  ;;  %v2011_v34 = vadd.f32 %v2010_v27, %v2009_v60  ;;  %v2926_v60 = vld [vmem:[#allocation20_spill] sm:$0xff]  ;;  %v2927_v27 = vld [vmem:[#allocation21_spill] sm:$0xff] }
 0x164   :  { %v1470_v43 = vadd.f32 %v2046_v37, %v1373_v31  ;;  %v2054_v40 = vpop.f32.mrf.mxu1  ;;  %v1327_v2 = vadd.f32 %v1947_v59, %v2924_v22  ;;  %v1413_v50 = vadd.f32 %v2002_v11, %v1316_v25 }
 0x165   :  { %v2795_v52 = vadd.f32 %v2054_v40, %v1405_v39  ;;  %v1461_v54 = vpop.f32.mrf.mxu0 }
 0x166   :  { %1526 = vst [vmem:[%s2885_s2 + $0x10] sm:$0xff] %v1470_v43  ;;  %v1462_v61 = vadd.f32 %v1461_v54, %v1365_v0  ;;  %v1493_v62 = vpop.f32.mrf.mxu1  ;;  %v1564_v28 = vmul.f32 %v1470_v43, %v1470_v43 }
 0x167   :  { %1534 = vst [vmem:[%s2885_s2 + $0x50] sm:$0xff] %v2795_v52  ;;  %v2808_v56 = vadd.f32 %v1493_v62, %v1397_v33  ;;  %v2047_v5 = vpop.f32.mrf.mxu0  ;;  %v1424_v33 = vadd.f32 %v2011_v34, %v1327_v2 }
 0x168   :  { %1524 = vst [vmem:[%s2885_s2] sm:$0xff] %v1462_v61  ;;  %v1473_v17 = vadd.f32 %v2047_v5, %v1376_v9  ;;  %v2055_v19 = vpop.f32.mrf.mxu1  ;;  %v1389_v9 = vadd.f32 %v1984_v42, %v1292_v51  ;;  %v1562_v23 = vmul.f32 %v1462_v61, %v1462_v61  ;;  %v2005_v42 = vadd.f32 %v2927_v27, %v2926_v60 }
 0x169   :  { %1532 = vst [vmem:[%s2885_s2 + $0x40] sm:$0xff] %v2808_v56  ;;  %v2824_v31 = vadd.f32 %v2055_v19, %v1408_v63  ;;  %v1464_v0 = vpop.f32.mrf.mxu0  ;;  %v1570_v7 = vmul.f32 %v2808_v56, %v2808_v56 }
 0x16a   :  { %1527 = vst [vmem:[%s2885_s2 + $0x18] sm:$0xff] %v1473_v17  ;;  %v1465_v18 = vadd.f32 %v1464_v0, %v1368_v13  ;;  %v1496_v45 = vpop.f32.mrf.mxu1  ;;  %v1565_v35 = vmul.f32 %v1473_v17, %v1473_v17  ;;  %v1416_v63 = vadd.f32 %v2005_v42, %v1319_v41 }
 0x16b   :  { %1535 = vst [vmem:[%s2885_s2 + $0x58] sm:$0xff] %v2824_v31  ;;  %v1497_v26 = vadd.f32 %v1496_v45, %v1400_v21  ;;  %v2050_v32 = vpop.f32.mrf.mxu0 }
 0x16c   :  { %1525 = vst [vmem:[%s2885_s2 + $0x8] sm:$0xff] %v1465_v18  ;;  %v1540_v13 = vadd.f32 %v1465_v18, %v1462_v61  ;;  %v1563_v48 = vmul.f32 %v1465_v18, %v1465_v18  ;;  %v1486_v37 = vadd.f32 %v2050_v32, %v1389_v9  ;;  %v2058_v39 = vpop.f32.mrf.mxu1  ;;  %v1572_v18 = vmul.f32 %v2795_v52, %v2795_v52 }
 0x16d   :  { %1533 = vst [vmem:[%s2885_s2 + $0x48] sm:$0xff] %v1497_v26  ;;  %v1518_v47 = vadd.f32 %v2058_v39, %v1421_v29  ;;  %v1477_v49 = vpop.f32.mrf.mxu0  ;;  %v1571_v0 = vmul.f32 %v1497_v26, %v1497_v26 }
 0x16e   :  { %v1541_v30 = vadd.f32 %v1540_v13, %v1470_v43  ;;  %v1578_v40 = vadd.f32 %v1563_v48, %v1562_v23  ;;  %1530 = vst [vmem:[%s2885_s2 + $0x30] sm:$0xff] %v1486_v37  ;;  %v1478_v46 = vadd.f32 %v1477_v49, %v1381_v44  ;;  %v1509_v51 = vpop.f32.mrf.mxu1  ;;  %v1568_v19 = vmul.f32 %v1486_v37, %v1486_v37 }
 0x16f   :  { %1538 = vst [vmem:[%s2885_s2 + $0x70] sm:$0xff] %v1518_v47  ;;  %v1510_v53 = vadd.f32 %v1509_v51, %v1413_v50  ;;  %v2051_v54 = vpop.f32.mrf.mxu0  ;;  %v1576_v48 = vmul.f32 %v1518_v47, %v1518_v47 }
 0x170   :  { %v1579_v55 = vadd.f32 %v1578_v40, %v1564_v28  ;;  %1528 = vst [vmem:[%s2885_s2 + $0x20] sm:$0xff] %v1478_v46  ;;  %v1542_v43 = vadd.f32 %v1541_v30, %v1473_v17  ;;  %v1489_v57 = vadd.f32 %v2051_v54, %v1392_v20  ;;  %v2059_v58 = vpop.f32.mrf.mxu1  ;;  %v1566_v3 = vmul.f32 %v1478_v46, %v1478_v46 }
 0x171   :  { %1536 = vst [vmem:[%s2885_s2 + $0x60] sm:$0xff] %v1510_v53  ;;  %v1521_v61 = vadd.f32 %v2059_v58, %v1424_v33  ;;  %v1480_v62 = vpop.f32.mrf.mxu0  ;;  %v1573_v20 = vmul.f32 %v2824_v31, %v2824_v31  ;;  %v1574_v34 = vmul.f32 %v1510_v53, %v1510_v53 }
 0x172   :  { %v1543_v1 = vadd.f32 %v1542_v43, %v1478_v46  ;;  %v1580_v4 = vadd.f32 %v1579_v55, %v1565_v35  ;;  %1531 = vst [vmem:[%s2885_s2 + $0x38] sm:$0xff] %v1489_v57  ;;  %v1481_v59 = vadd.f32 %v1480_v62, %v1384_v8  ;;  %v1512_v5 = vpop.f32.mrf.mxu1  ;;  %v1569_v12 = vmul.f32 %v1489_v57, %v1489_v57 }
 0x173   :  { %1539 = vst [vmem:[%s2885_s2 + $0x78] sm:$0xff] %v1521_v61  ;;  %v1513_v6 = vadd.f32 %v1512_v5, %v1416_v63  ;;  %v1577_v39 = vmul.f32 %v1521_v61, %v1521_v61 }
 0x174   :  { %v1581_v10 = vadd.f32 %v1580_v4, %v1566_v3  ;;  %1529 = vst [vmem:[%s2885_s2 + $0x28] sm:$0xff] %v1481_v59  ;;  %v1544_v14 = vadd.f32 %v1543_v1, %v1481_v59  ;;  %v1567_v17 = vmul.f32 %v1481_v59, %v1481_v59 }
 0x175   :  { %1537 = vst [vmem:[%s2885_s2 + $0x68] sm:$0xff] %v1513_v6  ;;  %v1575_v23 = vmul.f32 %v1513_v6, %v1513_v6 }
 0x176   :  { %v1545_v21 = vadd.f32 %v1544_v14, %v1486_v37  ;;  %v1582_v44 = vadd.f32 %v1581_v10, %v1567_v17 }
 0x178   :  { %v1546_v25 = vadd.f32 %v1545_v21, %v1489_v57  ;;  %v1583_v24 = vadd.f32 %v1582_v44, %v1568_v19 }
 0x17a   :  { %v1547_v11 = vadd.f32 %v1546_v25, %v2808_v56  ;;  %v1584_v36 = vadd.f32 %v1583_v24, %v1569_v12 }
 0x17c   :  { %v1585_v38 = vadd.f32 %v1584_v36, %v1570_v7  ;;  %v1548_v15 = vadd.f32 %v1547_v11, %v1497_v26 }
 0x17e   :  { %v1549_v45 = vadd.f32 %v1548_v15, %v2795_v52  ;;  %v1586_v9 = vadd.f32 %v1585_v38, %v1571_v0 }
 0x180   :  { %v1550_v22 = vadd.f32 %v1549_v45, %v2824_v31  ;;  %v1587_v2 = vadd.f32 %v1586_v9, %v1572_v18 }
 0x182   :  { %v1551_v32 = vadd.f32 %v1550_v22, %v1510_v53  ;;  %v1588_v29 = vadd.f32 %v1587_v2, %v1573_v20 }
 0x184   :  { %v1552_v56 = vadd.f32 %v1551_v32, %v1513_v6  ;;  %v1589_v13 = vadd.f32 %v1588_v29, %v1574_v34 }
 0x186   :  { %v1553_v26 = vadd.f32 %v1552_v56, %v1518_v47  ;;  %v1590_v37 = vadd.f32 %v1589_v13, %v1575_v23 }
 0x188   :  { %v1554_v16 = vadd.f32 %v1553_v26, %v1521_v61  ;;  %v1591_v41 = vadd.f32 %v1590_v37, %v1576_v48 }
 0x18a   :  { %v1555_v52 = vrot.slane %v1554_v16, 4  ;;  %v1592_v60 = vadd.f32 %v1591_v41, %v1577_v39 }
 0x18c   :  { %v1556_v27 = vadd.f32 %v1555_v52, %v1554_v16  ;;  %v1593_v42 = vrot.slane %v1592_v60, 4 }
 0x18e   :  { %v1557_v49 = vrot.slane %v1556_v27, 2  ;;  %v1594_v50 = vadd.f32 %v1593_v42, %v1592_v60 }
 0x190   :  { %v1558_v31 = vadd.f32 %v1557_v49, %v1556_v27  ;;  %v1595_v28 = vrot.slane %v1594_v50, 2 }
 0x192   :  { %v1559_v30 = vrot.slane %v1558_v31, 1  ;;  %v1596_v40 = vadd.f32 %v1595_v28, %v1594_v50 }
 0x194   :  { %v1560_v46 = vadd.f32 %v1559_v30, %v1558_v31  ;;  %v1597_v51 = vrot.slane %v1596_v40, 1 }
 0x196   :  { %1561 = vst [vmem:[%s2886_s3] sm:$0x1] %v1560_v46  ;;  %v1598_v47 = vadd.f32 %v1597_v51, %v1596_v40 }
 0x198   :  { %1599 = vst [vmem:[%s2887_s4] sm:$0x1] %v1598_v47 }

// kernel: _lambda_.32
= control target key start
LH: loop header
LB: loop body
LE: loop exit
PB: predicated region body
PF: predicated region fallthrough
CT: control target
= control target key end

     0   :  { %s720_s18 = smov 0   ;;  %s722_s19 = smov 0   ;;  %s806_s0 = inlined_call_operand.vmem [shape: f32[32,256], index: 0, kind: input, shape index: {}]   ;;  %s807_s1 = inlined_call_operand.vmem [shape: f32[1,1,256], index: 1, kind: input, shape index: {}]   ;;  %s808_s2 = inlined_call_operand.vmem [shape: f32[1,1,256], index: 2, kind: input, shape index: {}]   ;;  %s809_s3 = inlined_call_operand.vmem [shape: f32[1,256], index: 3, kind: input, shape index: {}]   ;;  %s810_s4 = inlined_call_operand.vmem [shape: f32[1,256], index: 4, kind: input, shape index: {}]   ;;  %s811_s5 = inlined_call_operand.vmem [shape: bf16[32,256], index: 5, kind: output, shape index: {}]  }
   0x1   :  { %s724_s20 = smov 0   ;;  %s726_s21 = smov 0  }
   0x2   :  { %s728_s22 = smov 0  }
   0x3 LB: > { %s27_s23 = sadd.s32 1, %s684_s21  ;;  %s576_s24 = sadd.s32 4294967295, %s688_s22   ;;  %s688_s22 = sphi %s728_s22, %s15_s22   ;;  %s684_s21 = sphi %s726_s21, %s816_s21   ;;  %s680_s20 = sphi %s724_s20, %s815_s20   ;;  %s676_s19 = sphi %s722_s19, %s814_s19   ;;  %s672_s18 = sphi %s720_s18, %s813_s18  }
   0x4   : > { %p29_p0 = scmp.ge.s32.totalorder %s27_s23, 2  ;;  %p43_p1 = scmp.ne.s32.totalorder %s676_s19, %s672_s18 }
   0x5   : > { %p44_p2 = scmp.eq.s32.totalorder %s688_s22, 0  ;;  %p179_p4 = scmp.eq.s32.totalorder %s576_s24, 1 }
   0x6   : > { %s818_s23 = smov (%p29_p0, %s27_s23), 0  ;;  %s36_s26 = sadd.s32 1, %s676_s19 }
   0x7   : > { %p45_p3 = por %p44_p2, %p43_p1  ;;  %s32_s25 = ssub.s32 %s684_s21, %s818_s23 }
   0x8   : > { %p34_p5 = scmp.eq.s32.totalorder %s32_s25, 0  ;;  %p755_p6 = por %p179_p4, %p43_p1 }
   0x9   : > { %p579_p7 = scmp.ge.s32.totalorder %s688_s22, 2 }
   0xa   : > { %s760_s28 = scalar_select %p34_p5, %s676_s19, %s36_s26  }
   0xb   : > { %201 = sbr.rel (%p579_p7) target bundleno = 22 (0x16), region = 16 }
  0x10   : > { %204 = sbr.rel (!%p45_p3) target bundleno = 22 (0x16), region = 20  ;;  %s206_s29 = sand.u32 (%p45_p3), 1, %s676_s19  }
  0x11   : > { %s581_s30 = sshll.u32 (%p45_p3), %s684_s21, 3  ;;  %s580_s6 = sshll.u32 (%p45_p3), %s206_s29, 5 }
  0x12   : > { %s213_s9 = scalar_lea.vmem (%p45_p3), %s806_s0, %s581_s30  ;;  %s208_s10 = scalar_lea.vmem (%p45_p3), [#allocation2], %s580_s6 }
  0x13   : > { %v248_v0 = vld [vmem:[%s213_s9] sm:$0xff] (%p45_p3)  ;;  %v250_v1 = vld [vmem:[%s213_s9 + $0x10] sm:$0xff] (%p45_p3) }
  0x14   : > { %v252_v2 = vld [vmem:[%s213_s9 + $0x20] sm:$0xff] (%p45_p3)  ;;  %249 = vst [vmem:[%s208_s10] sm:$0xff] (%p45_p3), %v248_v0  ;;  %251 = vst [vmem:[%s208_s10 + $0x8] sm:$0xff] (%p45_p3), %v250_v1  ;;  %v254_v3 = vld [vmem:[%s213_s9 + $0x30] sm:$0xff] (%p45_p3) }
  0x15   : > { %253 = vst [vmem:[%s208_s10 + $0x10] sm:$0xff] %v252_v2  ;;  %255 = vst [vmem:[%s208_s10 + $0x18] sm:$0xff] %v254_v3 }
  0x16 PF: > { %p582_p8 = scmp.ge.s32.totalorder %s688_s22, 1  ;;  %p284_p9 = scmp.lt.s32.totalorder %s688_s22, 3 }
  0x18   : > { %p285_p10 = pnand %p582_p8, %p284_p9 }
  0x19   : > { %p330_p11 = scmp.lt.s32.totalorder (!%p285_p10), %s680_s20, 1  ;;  %s291_s24 = sand.u32 (!%p285_p10), 1, %s672_s18  }
  0x1a   : > { %288 = sbr.rel (%p285_p10) target bundleno = 81 (0x51), region = 74  ;;  %s583_s25 = sshll.u32 (!%p285_p10), %s291_s24, 5 }
  0x1b   : > { %s293_s9 = scalar_lea.vmem (!%p285_p10), [#allocation2], %s583_s25  ;;  %s584_s18 = sshll.u32 (!%p285_p10), %s291_s24, 4 }
  0x1c   : > { %s328_s10 = scalar_lea.vmem (!%p285_p10), [#allocation3], %s584_s18 }
  0x1f   : > { %s331_s11 = scalar_select %p330_p11, %s680_s20, 1  ;;  %v363_v11 = vlaneseq  ;;  %v358_v17 = vld [vmem:[%s293_s9] sm:$0xff]  ;;  %v359_v19 = vld [vmem:[%s293_s9 + $0x8] sm:$0xff]  ;;  %v360_v20 = vld [vmem:[%s293_s9 + $0x10] sm:$0xff] }
  0x20   : > { %v361_v23 = vld [vmem:[%s293_s9 + $0x18] sm:$0xff] }
  0x21   : > { %s332_s14 = scalar_lea.vmem %s807_s1, %s331_s11  ;;  %s335_s17 = scalar_lea.vmem %s808_s2, %s331_s11  ;;  %v364_v12 = vshrl.u32 %v363_v11, 7 }
  0x22   : > { %v343_v4 = vld [vmem:[%s332_s14] sm:$0x1]  ;;  %s338_s30 = scalar_lea.vmem %s809_s3, %s331_s11  ;;  %s341_s8 = scalar_lea.vmem %s810_s4, %s331_s11 }
  0x23   : > { %v346_v5 = vld [vmem:[%s335_s17] sm:$0x1]  ;;  %v345_v6 = vmul.f32 0.03125, %v343_v4  ;;  %v365_v14 = vsub.s32 0, %v364_v12  ;;  %s590_s11 = sshll.u32 (%p755_p6), %s680_s20, 2 }
  0x24   : > { %v348_v7 = vmul.f32 0.03125, %v346_v5  ;;  %v351_v13 = vld [vmem:[%s338_s30] sm:$0x1]  ;;  %s417_s14 = scalar_lea.vmem (%p755_p6), %s811_s5, %s590_s11 }
  0x25   : > { %v349_v8 = vmul.f32 %v345_v6, %v345_v6  ;;  %v355_v18 = vld [vmem:[%s341_s8] sm:$0x1] }
  0x27   : > { %v350_v9 = vsub.f32 %v348_v7, %v349_v8 }
  0x29   : > { %v352_v10 = vadd.f32 1e-05, %v350_v9 }
  0x2b   : > { %648 = vrsqrt.f32 %v352_v10 }
  0x38   : > { %v649_v15 = vpop.eup %648 }
  0x39   : > { %v354_v16 = vmul.f32 %v649_v15, %v351_v13 }
  0x3b   : > { %v356_v21 = vmul.f32 %v354_v16, %v345_v6  ;;  %v366_v22 = vrot.slane %v354_v16, %v365_v14 }
  0x3d   : > { %v357_v24 = vsub.f32 %v355_v18, %v356_v21  ;;  %v368_v25 = vmul.f32 %v366_v22, %v358_v17  ;;  %v369_v26 = vmul.f32 %v366_v22, %v359_v19  ;;  %v370_v27 = vmul.f32 %v366_v22, %v360_v20 }
  0x3e   : > { %v371_v28 = vmul.f32 %v366_v22, %v361_v23 }
  0x3f   : > { %v376_v29 = vrot.slane %v357_v24, %v365_v14 }
  0x41   : > { %v378_v30 = vadd.f32 %v376_v29, %v368_v25  ;;  %v379_v31 = vadd.f32 %v376_v29, %v369_v26  ;;  %v380_v32 = vadd.f32 %v376_v29, %v370_v27  ;;  %v381_v33 = vadd.f32 %v376_v29, %v371_v28 }
  0x43   : > { %v382_v34 = vmax.f32 %v378_v30, 0.0  ;;  %v383_v35 = vmax.f32 %v379_v31, 0.0  ;;  %v384_v36 = vmax.f32 %v380_v32, 0.0  ;;  %v385_v37 = vmax.f32 %v381_v33, 0.0  ;;  %412 = sbr.rel (!%p755_p6) target bundleno = 81 (0x51), region = 82 }
  0x45   : > { %v600_v38 = vpack.c.bf16 %v383_v35, %v382_v34  ;;  %v605_v39 = vpack.c.bf16 %v385_v37, %v384_v36 }
  0x47   : > { %601 = vst [vmem:[%s328_s10] sm:$0xff] %v600_v38   ;;  %607 = vst [vmem:[%s328_s10 + $0x8] sm:$0xff] %v605_v39  }
  0x4e   : > { %v434_v40 = vld [vmem:[%s328_s10] sm:$0xf]  ;;  %v436_v41 = vld [vmem:[%s328_s10 + $0x4] sm:$0xf]  ;;  %v438_v42 = vld [vmem:[%s328_s10 + $0x8] sm:$0xf] }
  0x4f   : > { %v440_v43 = vld [vmem:[%s328_s10 + $0xc] sm:$0xf]  ;;  %435 = vst [vmem:[%s417_s14] sm:$0xf] %v434_v40  ;;  %437 = vst [vmem:[%s417_s14 + $0x8] sm:$0xf] %v436_v41 }
  0x50   : > { %439 = vst [vmem:[%s417_s14 + $0x10] sm:$0xf] %v438_v42  ;;  %441 = vst [vmem:[%s417_s14 + $0x18] sm:$0xf] %v440_v43 }
  0x51 PF: > { %s15_s22 = sadd.s32 1, %s688_s22   ;;  %s813_s18 = smov %s676_s19 }
  0x52   : > { %p12_p12 = scmp.ge.s32.totalorder %s15_s22, 4   ;;  %s814_s19 = smov %s760_s28 }
  0x53   : > { %s815_s20 = smov %s684_s21  ;;  %s816_s21 = smov %s818_s23 }
  0x54   :  { %14 = sbr.rel (!%p12_p12) target bundleno = 3 (0x3), region = 166 }

// kernel: _lambda_.31
= control target key start
LH: loop header
LB: loop body
LE: loop exit
PB: predicated region body
PF: predicated region fallthrough
CT: control target
= control target key end

     0   :  { %s2516_s15 = smov 0   ;;  %s2518_s16 = smov 0   ;;  %s3030_s0 = inlined_call_operand.vmem [shape: bf16[32,1152], index: 0, kind: input, shape index: {}]   ;;  %s3031_s1 = inlined_call_operand.vmem [shape: bf16[1152,256], index: 1, kind: input, shape index: {}]   ;;  %s3032_s2 = inlined_call_operand.vmem [shape: f32[32,256], index: 2, kind: output, shape index: {0}]   ;;  %s3033_s3 = inlined_call_operand.vmem [shape: f32[1,1,256], index: 3, kind: output, shape index: {1}]   ;;  %s3034_s4 = inlined_call_operand.vmem [shape: f32[1,1,256], index: 4, kind: output, shape index: {2}]  }
   0x1   :  { %s2520_s17 = smov 0   ;;  %s2522_s18 = smov 0  }
   0x2   :  { %s2524_s19 = smov 0  }
   0x3 LB: > { %s27_s20 = sadd.s32 1, %s2485_s18  ;;  %s2067_s21 = sadd.s32 4294967295, %s2489_s19   ;;  %s2489_s19 = sphi %s2524_s19, %s15_s19   ;;  %s2485_s18 = sphi %s2522_s18, %s3039_s18   ;;  %s2481_s17 = sphi %s2520_s17, %s3038_s17   ;;  %s2477_s16 = sphi %s2518_s16, %s3037_s16   ;;  %s2473_s15 = sphi %s2516_s15, %s3036_s15  }
   0x4   : > { %p29_p0 = scmp.ge.s32.totalorder %s27_s20, 2  ;;  %p67_p1 = scmp.ne.s32.totalorder %s2477_s16, %s2473_s15 }
   0x5   : > { %p68_p2 = scmp.eq.s32.totalorder %s2489_s19, 0  ;;  %p99_p4 = scmp.eq.s32.totalorder %s2067_s21, 1 }
   0x6   : > { %s3041_s20 = smov (%p29_p0, %s27_s20), 0  ;;  %s60_s23 = sadd.s32 1, %s2477_s16 }
   0x7   : > { %p69_p3 = por %p68_p2, %p67_p1  ;;  %s57_s22 = ssub.s32 %s2485_s18, %s3041_s20 }
   0x8   : > { %p58_p5 = scmp.eq.s32.totalorder %s57_s22, 0  ;;  %p2551_p6 = por %p99_p4, %p67_p1 }
   0x9   : > { %p2071_p7 = scmp.ge.s32.totalorder %s2489_s19, 2 }
   0xa   : > { %s2556_s25 = scalar_select %p58_p5, %s2477_s16, %s60_s23  }
   0xb   : > { %187 = sbr.rel (%p2071_p7) target bundleno = 116 (0x74), region = 20 }
  0x10   : > { %190 = sbr.rel (!%p69_p3) target bundleno = 116 (0x74), region = 24  ;;  %s192_s26 = sand.u32 (%p69_p3), 1, %s2477_s16  }
  0x11   : > { %s2072_s27 = sshll.u32 (%p69_p3), %s2485_s18, 2  ;;  %s2311_s28 = smul.u32 (%p69_p3), 576, %s192_s26 }
  0x12   : > { %s2564_s5 = scalar_lea.vmem (%p69_p3), %s3031_s1, %s2072_s27 }
  0x13   : > { %v213_v0 = vld [vmem:[%s2564_s5] sm:$0xf] (%p69_p3)  ;;  %v215_v1 = vld [vmem:[%s2564_s5 + $0x8] sm:$0xf] (%p69_p3)  ;;  %v217_v2 = vld [vmem:[%s2564_s5 + $0x10] sm:$0xf] (%p69_p3) }
  0x14   : > { %v219_v3 = vld [vmem:[%s2564_s5 + $0x18] sm:$0xf] (%p69_p3)  ;;  %v221_v4 = vld [vmem:[%s2564_s5 + $0x20] sm:$0xf] (%p69_p3)  ;;  %s2571_s6 = scalar_lea.vmem (%p69_p3), [#allocation2], %s2311_s28 }
  0x15   : > { %214 = vst [vmem:[%s2571_s6] sm:$0xf] %v213_v0  ;;  %216 = vst [vmem:[%s2571_s6 + $0x4] sm:$0xf] %v215_v1  ;;  %v223_v5 = vld [vmem:[%s2564_s5 + $0x28] sm:$0xf] }
  0x16   : > { %218 = vst [vmem:[%s2571_s6 + $0x8] sm:$0xf] %v217_v2  ;;  %220 = vst [vmem:[%s2571_s6 + $0xc] sm:$0xf] %v219_v3  ;;  %v225_v6 = vld [vmem:[%s2564_s5 + $0x30] sm:$0xf] }
  0x17   : > { %222 = vst [vmem:[%s2571_s6 + $0x10] sm:$0xf] %v221_v4  ;;  %v227_v7 = vld [vmem:[%s2564_s5 + $0x38] sm:$0xf]  ;;  %224 = vst [vmem:[%s2571_s6 + $0x14] sm:$0xf] %v223_v5 }
  0x18   : > { %226 = vst [vmem:[%s2571_s6 + $0x18] sm:$0xf] %v225_v6  ;;  %228 = vst [vmem:[%s2571_s6 + $0x1c] sm:$0xf] %v227_v7  ;;  %v229_v8 = vld [vmem:[%s2564_s5 + $0x40] sm:$0xf] }
  0x19   : > { %v231_v9 = vld [vmem:[%s2564_s5 + $0x48] sm:$0xf]  ;;  %v233_v10 = vld [vmem:[%s2564_s5 + $0x50] sm:$0xf]  ;;  %230 = vst [vmem:[%s2571_s6 + $0x20] sm:$0xf] %v229_v8 }
  0x1a   : > { %232 = vst [vmem:[%s2571_s6 + $0x24] sm:$0xf] %v231_v9  ;;  %234 = vst [vmem:[%s2571_s6 + $0x28] sm:$0xf] %v233_v10  ;;  %v235_v11 = vld [vmem:[%s2564_s5 + $0x58] sm:$0xf] }
  0x1b   : > { %v237_v12 = vld [vmem:[%s2564_s5 + $0x60] sm:$0xf]  ;;  %v239_v13 = vld [vmem:[%s2564_s5 + $0x68] sm:$0xf]  ;;  %236 = vst [vmem:[%s2571_s6 + $0x2c] sm:$0xf] %v235_v11 }
  0x1c   : > { %238 = vst [vmem:[%s2571_s6 + $0x30] sm:$0xf] %v237_v12  ;;  %240 = vst [vmem:[%s2571_s6 + $0x34] sm:$0xf] %v239_v13  ;;  %v241_v14 = vld [vmem:[%s2564_s5 + $0x70] sm:$0xf] }
  0x1d   : > { %v243_v15 = vld [vmem:[%s2564_s5 + $0x78] sm:$0xf]  ;;  %v245_v16 = vld [vmem:[%s2564_s5 + $0x80] sm:$0xf]  ;;  %242 = vst [vmem:[%s2571_s6 + $0x38] sm:$0xf] %v241_v14 }
  0x1e   : > { %244 = vst [vmem:[%s2571_s6 + $0x3c] sm:$0xf] %v243_v15  ;;  %246 = vst [vmem:[%s2571_s6 + $0x40] sm:$0xf] %v245_v16  ;;  %v247_v17 = vld [vmem:[%s2564_s5 + $0x88] sm:$0xf] }
  0x1f   : > { %v249_v18 = vld [vmem:[%s2564_s5 + $0x90] sm:$0xf]  ;;  %v251_v19 = vld [vmem:[%s2564_s5 + $0x98] sm:$0xf]  ;;  %248 = vst [vmem:[%s2571_s6 + $0x44] sm:$0xf] %v247_v17 }
  0x20   : > { %250 = vst [vmem:[%s2571_s6 + $0x48] sm:$0xf] %v249_v18  ;;  %252 = vst [vmem:[%s2571_s6 + $0x4c] sm:$0xf] %v251_v19  ;;  %v253_v20 = vld [vmem:[%s2564_s5 + $0xa0] sm:$0xf] }
  0x21   : > { %v255_v21 = vld [vmem:[%s2564_s5 + $0xa8] sm:$0xf]  ;;  %v257_v22 = vld [vmem:[%s2564_s5 + $0xb0] sm:$0xf]  ;;  %254 = vst [vmem:[%s2571_s6 + $0x50] sm:$0xf] %v253_v20 }
  0x22   : > { %256 = vst [vmem:[%s2571_s6 + $0x54] sm:$0xf] %v255_v21  ;;  %258 = vst [vmem:[%s2571_s6 + $0x58] sm:$0xf] %v257_v22  ;;  %v259_v23 = vld [vmem:[%s2564_s5 + $0xb8] sm:$0xf] }
  0x23   : > { %v261_v24 = vld [vmem:[%s2564_s5 + $0xc0] sm:$0xf]  ;;  %v263_v25 = vld [vmem:[%s2564_s5 + $0xc8] sm:$0xf]  ;;  %260 = vst [vmem:[%s2571_s6 + $0x5c] sm:$0xf] %v259_v23 }
  0x24   : > { %262 = vst [vmem:[%s2571_s6 + $0x60] sm:$0xf] %v261_v24  ;;  %264 = vst [vmem:[%s2571_s6 + $0x64] sm:$0xf] %v263_v25  ;;  %v265_v26 = vld [vmem:[%s2564_s5 + $0xd0] sm:$0xf] }
  0x25   : > { %v267_v27 = vld [vmem:[%s2564_s5 + $0xd8] sm:$0xf]  ;;  %v269_v28 = vld [vmem:[%s2564_s5 + $0xe0] sm:$0xf]  ;;  %266 = vst [vmem:[%s2571_s6 + $0x68] sm:$0xf] %v265_v26 }
  0x26   : > { %268 = vst [vmem:[%s2571_s6 + $0x6c] sm:$0xf] %v267_v27  ;;  %270 = vst [vmem:[%s2571_s6 + $0x70] sm:$0xf] %v269_v28  ;;  %v271_v29 = vld [vmem:[%s2564_s5 + $0xe8] sm:$0xf] }
  0x27   : > { %v273_v30 = vld [vmem:[%s2564_s5 + $0xf0] sm:$0xf]  ;;  %v275_v31 = vld [vmem:[%s2564_s5 + $0xf8] sm:$0xf]  ;;  %272 = vst [vmem:[%s2571_s6 + $0x74] sm:$0xf] %v271_v29 }
  0x28   : > { %274 = vst [vmem:[%s2571_s6 + $0x78] sm:$0xf] %v273_v30  ;;  %276 = vst [vmem:[%s2571_s6 + $0x7c] sm:$0xf] %v275_v31  ;;  %v277_v32 = vld [vmem:[%s2564_s5 + $0x100] sm:$0xf] }
  0x29   : > { %v279_v33 = vld [vmem:[%s2564_s5 + $0x108] sm:$0xf]  ;;  %v281_v34 = vld [vmem:[%s2564_s5 + $0x110] sm:$0xf]  ;;  %278 = vst [vmem:[%s2571_s6 + $0x80] sm:$0xf] %v277_v32 }
  0x2a   : > { %280 = vst [vmem:[%s2571_s6 + $0x84] sm:$0xf] %v279_v33  ;;  %282 = vst [vmem:[%s2571_s6 + $0x88] sm:$0xf] %v281_v34  ;;  %v283_v35 = vld [vmem:[%s2564_s5 + $0x118] sm:$0xf] }
  0x2b   : > { %v285_v36 = vld [vmem:[%s2564_s5 + $0x120] sm:$0xf]  ;;  %v287_v37 = vld [vmem:[%s2564_s5 + $0x128] sm:$0xf]  ;;  %284 = vst [vmem:[%s2571_s6 + $0x8c] sm:$0xf] %v283_v35 }
  0x2c   : > { %286 = vst [vmem:[%s2571_s6 + $0x90] sm:$0xf] %v285_v36  ;;  %288 = vst [vmem:[%s2571_s6 + $0x94] sm:$0xf] %v287_v37  ;;  %v289_v38 = vld [vmem:[%s2564_s5 + $0x130] sm:$0xf] }
  0x2d   : > { %v291_v39 = vld [vmem:[%s2564_s5 + $0x138] sm:$0xf]  ;;  %v293_v40 = vld [vmem:[%s2564_s5 + $0x140] sm:$0xf]  ;;  %290 = vst [vmem:[%s2571_s6 + $0x98] sm:$0xf] %v289_v38 }
  0x2e   : > { %292 = vst [vmem:[%s2571_s6 + $0x9c] sm:$0xf] %v291_v39  ;;  %294 = vst [vmem:[%s2571_s6 + $0xa0] sm:$0xf] %v293_v40  ;;  %v295_v41 = vld [vmem:[%s2564_s5 + $0x148] sm:$0xf] }
  0x2f   : > { %v297_v42 = vld [vmem:[%s2564_s5 + $0x150] sm:$0xf]  ;;  %v299_v43 = vld [vmem:[%s2564_s5 + $0x158] sm:$0xf]  ;;  %296 = vst [vmem:[%s2571_s6 + $0xa4] sm:$0xf] %v295_v41 }
  0x30   : > { %298 = vst [vmem:[%s2571_s6 + $0xa8] sm:$0xf] %v297_v42  ;;  %300 = vst [vmem:[%s2571_s6 + $0xac] sm:$0xf] %v299_v43  ;;  %v301_v44 = vld [vmem:[%s2564_s5 + $0x160] sm:$0xf] }
  0x31   : > { %v303_v45 = vld [vmem:[%s2564_s5 + $0x168] sm:$0xf]  ;;  %v305_v46 = vld [vmem:[%s2564_s5 + $0x170] sm:$0xf]  ;;  %302 = vst [vmem:[%s2571_s6 + $0xb0] sm:$0xf] %v301_v44 }
  0x32   : > { %304 = vst [vmem:[%s2571_s6 + $0xb4] sm:$0xf] %v303_v45  ;;  %306 = vst [vmem:[%s2571_s6 + $0xb8] sm:$0xf] %v305_v46  ;;  %v307_v47 = vld [vmem:[%s2564_s5 + $0x178] sm:$0xf] }
  0x33   : > { %v309_v48 = vld [vmem:[%s2564_s5 + $0x180] sm:$0xf]  ;;  %v311_v49 = vld [vmem:[%s2564_s5 + $0x188] sm:$0xf]  ;;  %308 = vst [vmem:[%s2571_s6 + $0xbc] sm:$0xf] %v307_v47 }
  0x34   : > { %310 = vst [vmem:[%s2571_s6 + $0xc0] sm:$0xf] %v309_v48  ;;  %312 = vst [vmem:[%s2571_s6 + $0xc4] sm:$0xf] %v311_v49  ;;  %v313_v50 = vld [vmem:[%s2564_s5 + $0x190] sm:$0xf] }
  0x35   : > { %v315_v51 = vld [vmem:[%s2564_s5 + $0x198] sm:$0xf]  ;;  %v317_v52 = vld [vmem:[%s2564_s5 + $0x1a0] sm:$0xf]  ;;  %314 = vst [vmem:[%s2571_s6 + $0xc8] sm:$0xf] %v313_v50 }
  0x36   : > { %316 = vst [vmem:[%s2571_s6 + $0xcc] sm:$0xf] %v315_v51  ;;  %318 = vst [vmem:[%s2571_s6 + $0xd0] sm:$0xf] %v317_v52  ;;  %v319_v53 = vld [vmem:[%s2564_s5 + $0x1a8] sm:$0xf] }
  0x37   : > { %v321_v54 = vld [vmem:[%s2564_s5 + $0x1b0] sm:$0xf]  ;;  %v323_v55 = vld [vmem:[%s2564_s5 + $0x1b8] sm:$0xf]  ;;  %320 = vst [vmem:[%s2571_s6 + $0xd4] sm:$0xf] %v319_v53 }
  0x38   : > { %322 = vst [vmem:[%s2571_s6 + $0xd8] sm:$0xf] %v321_v54  ;;  %324 = vst [vmem:[%s2571_s6 + $0xdc] sm:$0xf] %v323_v55  ;;  %v325_v56 = vld [vmem:[%s2564_s5 + $0x1c0] sm:$0xf] }
  0x39   : > { %v327_v57 = vld [vmem:[%s2564_s5 + $0x1c8] sm:$0xf]  ;;  %v329_v58 = vld [vmem:[%s2564_s5 + $0x1d0] sm:$0xf]  ;;  %326 = vst [vmem:[%s2571_s6 + $0xe0] sm:$0xf] %v325_v56 }
  0x3a   : > { %328 = vst [vmem:[%s2571_s6 + $0xe4] sm:$0xf] %v327_v57  ;;  %330 = vst [vmem:[%s2571_s6 + $0xe8] sm:$0xf] %v329_v58  ;;  %v331_v59 = vld [vmem:[%s2564_s5 + $0x1d8] sm:$0xf] }
  0x3b   : > { %v333_v60 = vld [vmem:[%s2564_s5 + $0x1e0] sm:$0xf]  ;;  %v335_v61 = vld [vmem:[%s2564_s5 + $0x1e8] sm:$0xf]  ;;  %332 = vst [vmem:[%s2571_s6 + $0xec] sm:$0xf] %v331_v59 }
  0x3c   : > { %334 = vst [vmem:[%s2571_s6 + $0xf0] sm:$0xf] %v333_v60  ;;  %336 = vst [vmem:[%s2571_s6 + $0xf4] sm:$0xf] %v335_v61  ;;  %v337_v62 = vld [vmem:[%s2564_s5 + $0x1f0] sm:$0xf] }
  0x3d   : > { %v339_v63 = vld [vmem:[%s2564_s5 + $0x1f8] sm:$0xf]  ;;  %v341_v0 = vld [vmem:[%s2564_s5 + $0x200] sm:$0xf]  ;;  %338 = vst [vmem:[%s2571_s6 + $0xf8] sm:$0xf] %v337_v62 }
  0x3e   : > { %340 = vst [vmem:[%s2571_s6 + $0xfc] sm:$0xf] %v339_v63  ;;  %342 = vst [vmem:[%s2571_s6 + $0x100] sm:$0xf] %v341_v0  ;;  %v343_v1 = vld [vmem:[%s2564_s5 + $0x208] sm:$0xf] }
  0x3f   : > { %v345_v2 = vld [vmem:[%s2564_s5 + $0x210] sm:$0xf]  ;;  %v347_v3 = vld [vmem:[%s2564_s5 + $0x218] sm:$0xf]  ;;  %344 = vst [vmem:[%s2571_s6 + $0x104] sm:$0xf] %v343_v1 }
  0x40   : > { %346 = vst [vmem:[%s2571_s6 + $0x108] sm:$0xf] %v345_v2  ;;  %348 = vst [vmem:[%s2571_s6 + $0x10c] sm:$0xf] %v347_v3  ;;  %v349_v4 = vld [vmem:[%s2564_s5 + $0x220] sm:$0xf] }
  0x41   : > { %v351_v5 = vld [vmem:[%s2564_s5 + $0x228] sm:$0xf]  ;;  %v353_v6 = vld [vmem:[%s2564_s5 + $0x230] sm:$0xf]  ;;  %350 = vst [vmem:[%s2571_s6 + $0x110] sm:$0xf] %v349_v4 }
  0x42   : > { %352 = vst [vmem:[%s2571_s6 + $0x114] sm:$0xf] %v351_v5  ;;  %354 = vst [vmem:[%s2571_s6 + $0x118] sm:$0xf] %v353_v6  ;;  %v355_v7 = vld [vmem:[%s2564_s5 + $0x238] sm:$0xf] }
  0x43   : > { %v357_v8 = vld [vmem:[%s2564_s5 + $0x240] sm:$0xf]  ;;  %v359_v9 = vld [vmem:[%s2564_s5 + $0x248] sm:$0xf]  ;;  %356 = vst [vmem:[%s2571_s6 + $0x11c] sm:$0xf] %v355_v7 }
  0x44   : > { %358 = vst [vmem:[%s2571_s6 + $0x120] sm:$0xf] %v357_v8  ;;  %360 = vst [vmem:[%s2571_s6 + $0x124] sm:$0xf] %v359_v9  ;;  %v361_v10 = vld [vmem:[%s2564_s5 + $0x250] sm:$0xf] }
  0x45   : > { %v363_v11 = vld [vmem:[%s2564_s5 + $0x258] sm:$0xf]  ;;  %v365_v12 = vld [vmem:[%s2564_s5 + $0x260] sm:$0xf]  ;;  %362 = vst [vmem:[%s2571_s6 + $0x128] sm:$0xf] %v361_v10 }
  0x46   : > { %364 = vst [vmem:[%s2571_s6 + $0x12c] sm:$0xf] %v363_v11  ;;  %366 = vst [vmem:[%s2571_s6 + $0x130] sm:$0xf] %v365_v12  ;;  %v367_v13 = vld [vmem:[%s2564_s5 + $0x268] sm:$0xf] }
  0x47   : > { %v369_v14 = vld [vmem:[%s2564_s5 + $0x270] sm:$0xf]  ;;  %v371_v15 = vld [vmem:[%s2564_s5 + $0x278] sm:$0xf]  ;;  %368 = vst [vmem:[%s2571_s6 + $0x134] sm:$0xf] %v367_v13 }
  0x48   : > { %370 = vst [vmem:[%s2571_s6 + $0x138] sm:$0xf] %v369_v14  ;;  %372 = vst [vmem:[%s2571_s6 + $0x13c] sm:$0xf] %v371_v15  ;;  %v373_v16 = vld [vmem:[%s2564_s5 + $0x280] sm:$0xf] }
  0x49   : > { %v375_v17 = vld [vmem:[%s2564_s5 + $0x288] sm:$0xf]  ;;  %v377_v18 = vld [vmem:[%s2564_s5 + $0x290] sm:$0xf]  ;;  %374 = vst [vmem:[%s2571_s6 + $0x140] sm:$0xf] %v373_v16 }
  0x4a   : > { %376 = vst [vmem:[%s2571_s6 + $0x144] sm:$0xf] %v375_v17  ;;  %378 = vst [vmem:[%s2571_s6 + $0x148] sm:$0xf] %v377_v18  ;;  %v379_v19 = vld [vmem:[%s2564_s5 + $0x298] sm:$0xf] }
  0x4b   : > { %v381_v20 = vld [vmem:[%s2564_s5 + $0x2a0] sm:$0xf]  ;;  %v383_v21 = vld [vmem:[%s2564_s5 + $0x2a8] sm:$0xf]  ;;  %380 = vst [vmem:[%s2571_s6 + $0x14c] sm:$0xf] %v379_v19 }
  0x4c   : > { %382 = vst [vmem:[%s2571_s6 + $0x150] sm:$0xf] %v381_v20  ;;  %384 = vst [vmem:[%s2571_s6 + $0x154] sm:$0xf] %v383_v21  ;;  %v385_v22 = vld [vmem:[%s2564_s5 + $0x2b0] sm:$0xf] }
  0x4d   : > { %v387_v23 = vld [vmem:[%s2564_s5 + $0x2b8] sm:$0xf]  ;;  %v389_v24 = vld [vmem:[%s2564_s5 + $0x2c0] sm:$0xf]  ;;  %386 = vst [vmem:[%s2571_s6 + $0x158] sm:$0xf] %v385_v22 }
  0x4e   : > { %388 = vst [vmem:[%s2571_s6 + $0x15c] sm:$0xf] %v387_v23  ;;  %390 = vst [vmem:[%s2571_s6 + $0x160] sm:$0xf] %v389_v24  ;;  %v391_v25 = vld [vmem:[%s2564_s5 + $0x2c8] sm:$0xf] }
  0x4f   : > { %v393_v26 = vld [vmem:[%s2564_s5 + $0x2d0] sm:$0xf]  ;;  %v395_v27 = vld [vmem:[%s2564_s5 + $0x2d8] sm:$0xf]  ;;  %392 = vst [vmem:[%s2571_s6 + $0x164] sm:$0xf] %v391_v25 }
  0x50   : > { %394 = vst [vmem:[%s2571_s6 + $0x168] sm:$0xf] %v393_v26  ;;  %396 = vst [vmem:[%s2571_s6 + $0x16c] sm:$0xf] %v395_v27  ;;  %v397_v28 = vld [vmem:[%s2564_s5 + $0x2e0] sm:$0xf] }
  0x51   : > { %v399_v29 = vld [vmem:[%s2564_s5 + $0x2e8] sm:$0xf]  ;;  %v401_v30 = vld [vmem:[%s2564_s5 + $0x2f0] sm:$0xf]  ;;  %398 = vst [vmem:[%s2571_s6 + $0x170] sm:$0xf] %v397_v28 }
  0x52   : > { %400 = vst [vmem:[%s2571_s6 + $0x174] sm:$0xf] %v399_v29  ;;  %402 = vst [vmem:[%s2571_s6 + $0x178] sm:$0xf] %v401_v30  ;;  %v403_v31 = vld [vmem:[%s2564_s5 + $0x2f8] sm:$0xf] }
  0x53   : > { %v405_v32 = vld [vmem:[%s2564_s5 + $0x300] sm:$0xf]  ;;  %v407_v33 = vld [vmem:[%s2564_s5 + $0x308] sm:$0xf]  ;;  %404 = vst [vmem:[%s2571_s6 + $0x17c] sm:$0xf] %v403_v31 }
  0x54   : > { %406 = vst [vmem:[%s2571_s6 + $0x180] sm:$0xf] %v405_v32  ;;  %408 = vst [vmem:[%s2571_s6 + $0x184] sm:$0xf] %v407_v33  ;;  %v409_v34 = vld [vmem:[%s2564_s5 + $0x310] sm:$0xf] }
  0x55   : > { %v411_v35 = vld [vmem:[%s2564_s5 + $0x318] sm:$0xf]  ;;  %v413_v36 = vld [vmem:[%s2564_s5 + $0x320] sm:$0xf]  ;;  %410 = vst [vmem:[%s2571_s6 + $0x188] sm:$0xf] %v409_v34 }
  0x56   : > { %412 = vst [vmem:[%s2571_s6 + $0x18c] sm:$0xf] %v411_v35  ;;  %414 = vst [vmem:[%s2571_s6 + $0x190] sm:$0xf] %v413_v36  ;;  %v415_v37 = vld [vmem:[%s2564_s5 + $0x328] sm:$0xf] }
  0x57   : > { %v417_v38 = vld [vmem:[%s2564_s5 + $0x330] sm:$0xf]  ;;  %v419_v39 = vld [vmem:[%s2564_s5 + $0x338] sm:$0xf]  ;;  %416 = vst [vmem:[%s2571_s6 + $0x194] sm:$0xf] %v415_v37 }
  0x58   : > { %418 = vst [vmem:[%s2571_s6 + $0x198] sm:$0xf] %v417_v38  ;;  %420 = vst [vmem:[%s2571_s6 + $0x19c] sm:$0xf] %v419_v39  ;;  %v421_v40 = vld [vmem:[%s2564_s5 + $0x340] sm:$0xf] }
  0x59   : > { %v423_v41 = vld [vmem:[%s2564_s5 + $0x348] sm:$0xf]  ;;  %v425_v42 = vld [vmem:[%s2564_s5 + $0x350] sm:$0xf]  ;;  %422 = vst [vmem:[%s2571_s6 + $0x1a0] sm:$0xf] %v421_v40 }
  0x5a   : > { %424 = vst [vmem:[%s2571_s6 + $0x1a4] sm:$0xf] %v423_v41  ;;  %426 = vst [vmem:[%s2571_s6 + $0x1a8] sm:$0xf] %v425_v42  ;;  %v427_v43 = vld [vmem:[%s2564_s5 + $0x358] sm:$0xf] }
  0x5b   : > { %v429_v44 = vld [vmem:[%s2564_s5 + $0x360] sm:$0xf]  ;;  %v431_v45 = vld [vmem:[%s2564_s5 + $0x368] sm:$0xf]  ;;  %428 = vst [vmem:[%s2571_s6 + $0x1ac] sm:$0xf] %v427_v43 }
  0x5c   : > { %430 = vst [vmem:[%s2571_s6 + $0x1b0] sm:$0xf] %v429_v44  ;;  %432 = vst [vmem:[%s2571_s6 + $0x1b4] sm:$0xf] %v431_v45  ;;  %v433_v46 = vld [vmem:[%s2564_s5 + $0x370] sm:$0xf] }
  0x5d   : > { %v435_v47 = vld [vmem:[%s2564_s5 + $0x378] sm:$0xf]  ;;  %v437_v48 = vld [vmem:[%s2564_s5 + $0x380] sm:$0xf]  ;;  %434 = vst [vmem:[%s2571_s6 + $0x1b8] sm:$0xf] %v433_v46 }
  0x5e   : > { %436 = vst [vmem:[%s2571_s6 + $0x1bc] sm:$0xf] %v435_v47  ;;  %438 = vst [vmem:[%s2571_s6 + $0x1c0] sm:$0xf] %v437_v48  ;;  %v439_v49 = vld [vmem:[%s2564_s5 + $0x388] sm:$0xf] }
  0x5f   : > { %v441_v50 = vld [vmem:[%s2564_s5 + $0x390] sm:$0xf]  ;;  %v443_v51 = vld [vmem:[%s2564_s5 + $0x398] sm:$0xf]  ;;  %440 = vst [vmem:[%s2571_s6 + $0x1c4] sm:$0xf] %v439_v49 }
  0x60   : > { %442 = vst [vmem:[%s2571_s6 + $0x1c8] sm:$0xf] %v441_v50  ;;  %444 = vst [vmem:[%s2571_s6 + $0x1cc] sm:$0xf] %v443_v51  ;;  %v445_v52 = vld [vmem:[%s2564_s5 + $0x3a0] sm:$0xf] }
  0x61   : > { %v447_v53 = vld [vmem:[%s2564_s5 + $0x3a8] sm:$0xf]  ;;  %v449_v54 = vld [vmem:[%s2564_s5 + $0x3b0] sm:$0xf]  ;;  %446 = vst [vmem:[%s2571_s6 + $0x1d0] sm:$0xf] %v445_v52 }
  0x62   : > { %448 = vst [vmem:[%s2571_s6 + $0x1d4] sm:$0xf] %v447_v53  ;;  %450 = vst [vmem:[%s2571_s6 + $0x1d8] sm:$0xf] %v449_v54  ;;  %v451_v55 = vld [vmem:[%s2564_s5 + $0x3b8] sm:$0xf] }
  0x63   : > { %v453_v56 = vld [vmem:[%s2564_s5 + $0x3c0] sm:$0xf]  ;;  %v455_v57 = vld [vmem:[%s2564_s5 + $0x3c8] sm:$0xf]  ;;  %452 = vst [vmem:[%s2571_s6 + $0x1dc] sm:$0xf] %v451_v55 }
  0x64   : > { %454 = vst [vmem:[%s2571_s6 + $0x1e0] sm:$0xf] %v453_v56  ;;  %456 = vst [vmem:[%s2571_s6 + $0x1e4] sm:$0xf] %v455_v57  ;;  %v457_v58 = vld [vmem:[%s2564_s5 + $0x3d0] sm:$0xf] }
  0x65   : > { %v459_v59 = vld [vmem:[%s2564_s5 + $0x3d8] sm:$0xf]  ;;  %v461_v60 = vld [vmem:[%s2564_s5 + $0x3e0] sm:$0xf]  ;;  %458 = vst [vmem:[%s2571_s6 + $0x1e8] sm:$0xf] %v457_v58 }
  0x66   : > { %460 = vst [vmem:[%s2571_s6 + $0x1ec] sm:$0xf] %v459_v59  ;;  %462 = vst [vmem:[%s2571_s6 + $0x1f0] sm:$0xf] %v461_v60  ;;  %v463_v61 = vld [vmem:[%s2564_s5 + $0x3e8] sm:$0xf] }
  0x67   : > { %v465_v62 = vld [vmem:[%s2564_s5 + $0x3f0] sm:$0xf]  ;;  %v467_v63 = vld [vmem:[%s2564_s5 + $0x3f8] sm:$0xf]  ;;  %464 = vst [vmem:[%s2571_s6 + $0x1f4] sm:$0xf] %v463_v61 }
  0x68   : > { %466 = vst [vmem:[%s2571_s6 + $0x1f8] sm:$0xf] %v465_v62  ;;  %468 = vst [vmem:[%s2571_s6 + $0x1fc] sm:$0xf] %v467_v63  ;;  %v469_v0 = vld [vmem:[%s2564_s5 + $0x400] sm:$0xf] }
  0x69   : > { %v471_v1 = vld [vmem:[%s2564_s5 + $0x408] sm:$0xf]  ;;  %v473_v2 = vld [vmem:[%s2564_s5 + $0x410] sm:$0xf]  ;;  %470 = vst [vmem:[%s2571_s6 + $0x200] sm:$0xf] %v469_v0 }
  0x6a   : > { %472 = vst [vmem:[%s2571_s6 + $0x204] sm:$0xf] %v471_v1  ;;  %474 = vst [vmem:[%s2571_s6 + $0x208] sm:$0xf] %v473_v2  ;;  %v475_v3 = vld [vmem:[%s2564_s5 + $0x418] sm:$0xf] }
  0x6b   : > { %v477_v4 = vld [vmem:[%s2564_s5 + $0x420] sm:$0xf]  ;;  %v479_v5 = vld [vmem:[%s2564_s5 + $0x428] sm:$0xf]  ;;  %476 = vst [vmem:[%s2571_s6 + $0x20c] sm:$0xf] %v475_v3 }
  0x6c   : > { %478 = vst [vmem:[%s2571_s6 + $0x210] sm:$0xf] %v477_v4  ;;  %480 = vst [vmem:[%s2571_s6 + $0x214] sm:$0xf] %v479_v5  ;;  %v481_v6 = vld [vmem:[%s2564_s5 + $0x430] sm:$0xf] }
  0x6d   : > { %v483_v7 = vld [vmem:[%s2564_s5 + $0x438] sm:$0xf]  ;;  %v485_v8 = vld [vmem:[%s2564_s5 + $0x440] sm:$0xf]  ;;  %482 = vst [vmem:[%s2571_s6 + $0x218] sm:$0xf] %v481_v6 }
  0x6e   : > { %484 = vst [vmem:[%s2571_s6 + $0x21c] sm:$0xf] %v483_v7  ;;  %486 = vst [vmem:[%s2571_s6 + $0x220] sm:$0xf] %v485_v8  ;;  %v487_v9 = vld [vmem:[%s2564_s5 + $0x448] sm:$0xf] }
  0x6f   : > { %v489_v10 = vld [vmem:[%s2564_s5 + $0x450] sm:$0xf]  ;;  %v491_v11 = vld [vmem:[%s2564_s5 + $0x458] sm:$0xf]  ;;  %488 = vst [vmem:[%s2571_s6 + $0x224] sm:$0xf] %v487_v9 }
  0x70   : > { %490 = vst [vmem:[%s2571_s6 + $0x228] sm:$0xf] %v489_v10  ;;  %492 = vst [vmem:[%s2571_s6 + $0x22c] sm:$0xf] %v491_v11  ;;  %v493_v12 = vld [vmem:[%s2564_s5 + $0x460] sm:$0xf] }
  0x71   : > { %v495_v13 = vld [vmem:[%s2564_s5 + $0x468] sm:$0xf]  ;;  %v497_v14 = vld [vmem:[%s2564_s5 + $0x470] sm:$0xf]  ;;  %494 = vst [vmem:[%s2571_s6 + $0x230] sm:$0xf] %v493_v12 }
  0x72   : > { %496 = vst [vmem:[%s2571_s6 + $0x234] sm:$0xf] %v495_v13  ;;  %498 = vst [vmem:[%s2571_s6 + $0x238] sm:$0xf] %v497_v14  ;;  %v499_v15 = vld [vmem:[%s2564_s5 + $0x478] sm:$0xf] }
  0x73   : > { %500 = vst [vmem:[%s2571_s6 + $0x23c] sm:$0xf] %v499_v15 }
  0x74 PF: > { %p2073_p8 = scmp.ge.s32.totalorder %s2489_s19, 1  ;;  %p811_p9 = scmp.lt.s32.totalorder %s2489_s19, 3 }
  0x76   : > { %p812_p10 = pnand %p2073_p8, %p811_p9 }
  0x77   : > { %s818_s7 = sand.u32 (!%p812_p10), 1, %s2473_s15   ;;  %p872_p11 = scmp.lt.s32.totalorder (!%p812_p10), %s2481_s17, 1 }
  0x78   : > { %815 = sbr.rel (%p812_p10) target bundleno = 445 (0x1bd), region = 65 }
  0x79   : > { %s2312_s8 = smul.u32 (!%p812_p10), 576, %s818_s7 }
  0x7b   : > { %s2867_s13 = scalar_lea.vmem (!%p812_p10), [#allocation2], %s2312_s8 }
  0x7d   : > { %v2387_v16 = vld [vmem:[%s3030_s0 + $0x4] ss:$36 sps:$4 sm:$0xff]   ;;  %v2390_v17 = vld [vmem:[%s3030_s0 + $0xc] ss:$36 sps:$4 sm:$0xff]   ;;  %v2353_v18 = vld [vmem:[%s2867_s13 + $0x78] sm:$0xff]   ;;  %s873_s15 = scalar_select %p872_p11, %s2481_s17, 1 }
  0x7e   : > { %1605 = vmatprep.mubr.bf16.mxu0 %v2387_v16  ;;  %1654 = vmatprep.mubr.bf16.mxu1 %v2390_v17  ;;  %v2354_v19 = vld [vmem:[%s2867_s13 + $0xf8] sm:$0xff]   ;;  %v2357_v22 = vld [vmem:[%s2867_s13 + $0x70] sm:$0xff]   ;;  %v2361_v26 = vld [vmem:[%s2867_s13 + $0x68] sm:$0xff]   ;;  %s2166_s28 = sshll.u32 (%p2551_p6), %s2481_s17, 3 }
  0x7f   : > { %2169 = vmatprep.subr.bf16.mxu0 %v2353_v18  ;;  %v2355_v20 = vld [vmem:[%s2867_s13 + $0x38] sm:$0xff]   ;;  %2197 = vmatprep.subr.bf16.mxu1 %v2354_v19  ;;  %v2358_v23 = vld [vmem:[%s2867_s13 + $0xf0] sm:$0xff]   ;;  %v2362_v27 = vld [vmem:[%s2867_s13 + $0xe8] sm:$0xff]   ;;  %s876_s22 = scalar_lea.vmem %s3033_s3, %s873_s15  ;;  %s883_s27 = scalar_lea.vmem %s3034_s4, %s873_s15 }
  0x80   : > { %v2356_v21 = vld [vmem:[%s2867_s13 + $0xb8] sm:$0xff]   ;;  %2170 = vmatpush3.bf16.msra.mxu0 %v2355_v20  ;;  %v2359_v24 = vld [vmem:[%s2867_s13 + $0x30] sm:$0xff]   ;;  %v2363_v28 = vld [vmem:[%s2867_s13 + $0x28] sm:$0xff]   ;;  %s1871_s5 = scalar_lea.vmem (%p2551_p6), %s3032_s2, %s2166_s28 }
  0x81   : > { %2198 = vmatpush3.bf16.msra.mxu1 %v2356_v21  ;;  %2171 = vmatprep.subr.bf16.mxu0 %v2357_v22  ;;  %v2360_v25 = vld [vmem:[%s2867_s13 + $0xb0] sm:$0xff]   ;;  %v2364_v29 = vld [vmem:[%s2867_s13 + $0xa8] sm:$0xff]   ;;  %v2365_v30 = vld [vmem:[%s2867_s13 + $0x60] sm:$0xff]  }
  0x82   : > { %2199 = vmatprep.subr.bf16.mxu1 %v2358_v23  ;;  %v2366_v31 = vld [vmem:[%s2867_s13 + $0xe0] sm:$0xff]   ;;  %v2369_v34 = vld [vmem:[%s2867_s13 + $0x58] sm:$0xff]   ;;  %v2373_v38 = vld [vmem:[%s2867_s13 + $0x50] sm:$0xff]  }
  0x83   : > { %v2367_v32 = vld [vmem:[%s2867_s13 + $0x20] sm:$0xff]   ;;  %v2370_v35 = vld [vmem:[%s2867_s13 + $0xd8] sm:$0xff]   ;;  %v2374_v39 = vld [vmem:[%s2867_s13 + $0xd0] sm:$0xff]  }
  0x84   : > { %2172 = vmatpush3.bf16.msra.mxu0 %v2359_v24  ;;  %v2368_v33 = vld [vmem:[%s2867_s13 + $0xa0] sm:$0xff]   ;;  %v2371_v36 = vld [vmem:[%s2867_s13 + $0x18] sm:$0xff]   ;;  %v2375_v40 = vld [vmem:[%s2867_s13 + $0x10] sm:$0xff]  }
  0x85   : > { %2200 = vmatpush3.bf16.msra.mxu1 %v2360_v25  ;;  %2173 = vmatprep.subr.bf16.mxu0 %v2361_v26  ;;  %v2372_v37 = vld [vmem:[%s2867_s13 + $0x98] sm:$0xff]   ;;  %v2376_v41 = vld [vmem:[%s2867_s13 + $0x90] sm:$0xff]   ;;  %v2377_v42 = vld [vmem:[%s2867_s13 + $0x48] sm:$0xff]  }
  0x86   : > { %2201 = vmatprep.subr.bf16.mxu1 %v2362_v27  ;;  %v2378_v43 = vld [vmem:[%s2867_s13 + $0xc8] sm:$0xff]   ;;  %v2381_v46 = vld [vmem:[%s2867_s13 + $0x40] sm:$0xff]   ;;  %v2391_v53 = vld [vmem:[%s2867_s13 + $0x178] sm:$0xff]  }
  0x87   : > { %v2379_v44 = vld [vmem:[%s2867_s13 + $0x8] sm:$0xff]   ;;  %v2382_v47 = vld [vmem:[%s2867_s13 + $0xc0] sm:$0xff]   ;;  %v2392_v54 = vld [vmem:[%s2867_s13 + $0x138] sm:$0xff]  }
  0x88   : > { %2174 = vmatpush3.bf16.msra.mxu0 %v2363_v28  ;;  %v2380_v45 = vld [vmem:[%s2867_s13 + $0x88] sm:$0xff]   ;;  %v2385_v48 = vld [vmem:[%s3030_s0] ss:$36 sps:$4 sm:$0xff]   ;;  %v2393_v55 = vld [vmem:[%s2867_s13 + $0x1f8] sm:$0xff]  }
  0x89   : > { %2202 = vmatpush3.bf16.msra.mxu1 %v2364_v29  ;;  %2175 = vmatprep.subr.bf16.mxu0 %v2365_v30  ;;  %v2383_v49 = vld [vmem:[%s2867_s13] sm:$0xff]   ;;  %v2388_v50 = vld [vmem:[%s3030_s0 + $0x8] ss:$36 sps:$4 sm:$0xff]   ;;  %v2394_v56 = vld [vmem:[%s2867_s13 + $0x1b8] sm:$0xff]  }
  0x8a   : > { %2203 = vmatprep.subr.bf16.mxu1 %v2366_v31  ;;  %v2384_v51 = vld [vmem:[%s2867_s13 + $0x80] sm:$0xff]   ;;  %v2409_v52 = vld [vmem:[%s3030_s0 + $0x4c] ss:$36 sps:$4 sm:$0xff]   ;;  %v2407_v5 = vld [vmem:[%s2867_s13 + $0x158] sm:$0xff]  }
  0x8b   : > { %v2395_v57 = vld [vmem:[%s2867_s13 + $0x170] sm:$0xff]   ;;  %v2399_v61 = vld [vmem:[%s2867_s13 + $0x168] sm:$0xff]   ;;  %v2403_v1 = vld [vmem:[%s2867_s13 + $0x160] sm:$0xff]  }
  0x8c   : > { %2176 = vmatpush3.bf16.msra.mxu0 %v2367_v32  ;;  %v2396_v58 = vld [vmem:[%s2867_s13 + $0x130] sm:$0xff]   ;;  %v2400_v62 = vld [vmem:[%s2867_s13 + $0x128] sm:$0xff]   ;;  %v2404_v2 = vld [vmem:[%s2867_s13 + $0x120] sm:$0xff]  }
  0x8d   : > { %2204 = vmatpush3.bf16.msra.mxu1 %v2368_v33  ;;  %2177 = vmatprep.subr.bf16.mxu0 %v2369_v34  ;;  %v2397_v59 = vld [vmem:[%s2867_s13 + $0x1f0] sm:$0xff]   ;;  %v2401_v63 = vld [vmem:[%s2867_s13 + $0x1e8] sm:$0xff]   ;;  %v2405_v3 = vld [vmem:[%s2867_s13 + $0x1e0] sm:$0xff]  }
  0x8e   : > { %2205 = vmatprep.subr.bf16.mxu1 %v2370_v35  ;;  %v2398_v60 = vld [vmem:[%s2867_s13 + $0x1b0] sm:$0xff]   ;;  %v2402_v0 = vld [vmem:[%s2867_s13 + $0x1a8] sm:$0xff]   ;;  %v2406_v4 = vld [vmem:[%s2867_s13 + $0x1a0] sm:$0xff]  }
  0x8f   : > { %v2408_v6 = vld [vmem:[%s2867_s13 + $0x118] sm:$0xff]   ;;  %v2414_v9 = vld [vmem:[%s3030_s0 + $0x48] ss:$36 sps:$4 sm:$0xff]   ;;  %v2415_v10 = vld [vmem:[%s3030_s0 + $0x50] ss:$36 sps:$4 sm:$0xff]  }
  0x90   : > { %2178 = vmatpush3.bf16.msra.mxu0 %v2371_v36  ;;  %v2411_v7 = vld [vmem:[%s3030_s0 + $0x54] ss:$36 sps:$4 sm:$0xff]   ;;  %v2421_v16 = vld [vmem:[%s2867_s13 + $0x148] sm:$0xff]   ;;  %v2425_v20 = vld [vmem:[%s2867_s13 + $0x140] sm:$0xff]  }
  0x91   : > { %2206 = vmatpush3.bf16.msra.mxu1 %v2372_v37  ;;  %2179 = vmatprep.subr.bf16.mxu0 %v2373_v38  ;;  %v2413_v8 = vld [vmem:[%s2867_s13 + $0x1d8] sm:$0xff]   ;;  %v2417_v12 = vld [vmem:[%s2867_s13 + $0x150] sm:$0xff]   ;;  %v2422_v17 = vld [vmem:[%s2867_s13 + $0x108] sm:$0xff]  }
  0x92   : > { %2207 = vmatprep.subr.bf16.mxu1 %v2374_v39  ;;  %v2416_v11 = vld [vmem:[%s2867_s13 + $0x198] sm:$0xff]   ;;  %v2418_v13 = vld [vmem:[%s2867_s13 + $0x110] sm:$0xff]   ;;  %v2423_v18 = vld [vmem:[%s2867_s13 + $0x1c8] sm:$0xff]  }
  0x93   : > { %v2419_v14 = vld [vmem:[%s2867_s13 + $0x1d0] sm:$0xff]   ;;  %v2424_v19 = vld [vmem:[%s2867_s13 + $0x188] sm:$0xff]   ;;  %v2426_v21 = vld [vmem:[%s2867_s13 + $0x100] sm:$0xff]  }
  0x94   : > { %2180 = vmatpush3.bf16.msra.mxu0 %v2375_v40  ;;  %v2420_v15 = vld [vmem:[%s2867_s13 + $0x190] sm:$0xff]   ;;  %v2427_v22 = vld [vmem:[%s2867_s13 + $0x1c0] sm:$0xff]   ;;  %v2432_v26 = vld [vmem:[%s2867_s13 + $0x238] sm:$0xff]  }
  0x95   : > { %2208 = vmatpush3.bf16.msra.mxu1 %v2376_v41  ;;  %2181 = vmatprep.subr.bf16.mxu0 %v2377_v42  ;;  %v2428_v23 = vld [vmem:[%s3030_s0 + $0x10] ss:$36 sps:$4 sm:$0xff]   ;;  %v2431_v25 = vld [vmem:[%s2867_s13 + $0x180] sm:$0xff]   ;;  %v2433_v27 = vld [vmem:[%s3030_s0 + $0x18] ss:$36 sps:$4 sm:$0xff]  }
  0x96   : > { %2209 = vmatprep.subr.bf16.mxu1 %v2378_v43  ;;  %v2430_v24 = vld [vmem:[%s3030_s0 + $0x14] ss:$36 sps:$4 sm:$0xff]   ;;  %v2435_v28 = vld [vmem:[%s3030_s0 + $0x1c] ss:$36 sps:$4 sm:$0xff]   ;;  %v2440_v32 = vld [vmem:[%s2867_s13 + $0x228] sm:$0xff]  }
  0x97   : > { %v2436_v29 = vld [vmem:[%s2867_s13 + $0x230] sm:$0xff]   ;;  %v2437_v30 = vld [vmem:[%s3030_s0 + $0x5c] ss:$36 sps:$4 sm:$0xff]   ;;  %v2441_v33 = vld [vmem:[%s3030_s0 + $0x64] ss:$36 sps:$4 sm:$0xff]  }
  0x98   : > { %2182 = vmatpush3.bf16.msra.mxu0 %v2379_v44  ;;  %v2439_v31 = vld [vmem:[%s3030_s0 + $0x58] ss:$36 sps:$4 sm:$0xff]   ;;  %v2443_v34 = vld [vmem:[%s3030_s0 + $0x60] ss:$36 sps:$4 sm:$0xff]   ;;  %v2446_v38 = vld [vmem:[%s2867_s13 + $0x210] sm:$0xff]  }
  0x99   : > { %2210 = vmatpush3.bf16.msra.mxu1 %v2380_v45  ;;  %2183 = vmatprep.subr.bf16.mxu0 %v2381_v46  ;;  %v2444_v35 = vld [vmem:[%s2867_s13 + $0x220] sm:$0xff]   ;;  %v2445_v36 = vld [vmem:[%s2867_s13 + $0x218] sm:$0xff]   ;;  %v2447_v39 = vld [vmem:[%s2867_s13 + $0x208] sm:$0xff]  }
  0x9a   : > { %2211 = vmatprep.subr.bf16.mxu1 %v2382_v47  ;;  %v2449_v37 = vld [vmem:[%s3030_s0 + $0x20] ss:$36 sps:$4 sm:$0xff]   ;;  %v2450_v41 = vld [vmem:[%s3030_s0 + $0x68] ss:$36 sps:$4 sm:$0xff]  }
  0x9b   : > { %v2448_v40 = vld [vmem:[%s2867_s13 + $0x200] sm:$0xff]   ;;  %s2074_s13 = sshll.u32 %s818_s7, 5 }
  0x9c   : > { %2184 = vmatpush3.bf16.msra.mxu0 %v2383_v49  ;;  %s2991_s14 = scalar_lea.vmem [#allocation3], %s2074_s13 }
  0x9d   : > { %2212 = vmatpush3.bf16.msra.mxu1 %v2384_v51  ;;  %2225 = vmatprep.subr.bf16.mxu0 %v2391_v53 }
  0x9e   : > { %2253 = vmatprep.subr.bf16.mxu1 %v2393_v55 }
  0x9f   : > { %1606 = vmatmul.mubr.bf16.vlgmr.msra.gmra.mxu0 %v2385_v48 }
  0xa0   : > { %1655 = vmatmul.mubr.bf16.vlgmr.msra.gmra.mxu1 %v2388_v50  ;;  %2226 = vmatpush3.bf16.msra.mxu0 %v2392_v54 }
  0xa1   : > { %1613 = vmatprep.mubr.bf16.mxu0 %v2409_v52  ;;  %2254 = vmatpush3.bf16.msra.mxu1 %v2394_v56 }
  0xa2   : > { %2227 = vmatprep.subr.bf16.mxu0 %v2395_v57  ;;  %2255 = vmatprep.subr.bf16.mxu1 %v2397_v59 }
  0xa3   : > { %1662 = vmatprep.mubr.bf16.mxu1 %v2411_v7 }
  0xa4   : > { %2228 = vmatpush3.bf16.msra.mxu0 %v2396_v58 }
  0xa5   : > { %2256 = vmatpush3.bf16.msra.mxu1 %v2398_v60  ;;  %2229 = vmatprep.subr.bf16.mxu0 %v2399_v61 }
  0xa6   : > { %2257 = vmatprep.subr.bf16.mxu1 %v2401_v63 }
  0xa7   : > { %1614 = vmatmul.mubr.bf16.gmra.mxu0 %v2414_v9 }
  0xa8   : > { %2230 = vmatpush3.bf16.msra.mxu0 %v2400_v62  ;;  %1663 = vmatmul.mubr.bf16.gmra.mxu1 %v2415_v10 }
  0xa9   : > { %2258 = vmatpush3.bf16.msra.mxu1 %v2402_v0  ;;  %2231 = vmatprep.subr.bf16.mxu0 %v2403_v1 }
  0xaa   : > { %2259 = vmatprep.subr.bf16.mxu1 %v2405_v3  ;;  %1703 = vmatprep.mubr.bf16.mxu0 %v2430_v24 }
  0xab   : > { %1752 = vmatprep.mubr.bf16.mxu1 %v2435_v28 }
  0xac   : > { %2232 = vmatpush3.bf16.msra.mxu0 %v2404_v2 }
  0xad   : > { %2260 = vmatpush3.bf16.msra.mxu1 %v2406_v4  ;;  %2233 = vmatprep.subr.bf16.mxu0 %v2407_v5 }
  0xae   : > { %2261 = vmatprep.subr.bf16.mxu1 %v2413_v8 }
  0xb0   : > { %2234 = vmatpush3.bf16.msra.mxu0 %v2408_v6 }
  0xb1   : > { %2262 = vmatpush3.bf16.msra.mxu1 %v2416_v11  ;;  %2235 = vmatprep.subr.bf16.mxu0 %v2417_v12 }
  0xb2   : > { %2263 = vmatprep.subr.bf16.mxu1 %v2419_v14 }
  0xb4   : > { %2236 = vmatpush3.bf16.msra.mxu0 %v2418_v13 }
  0xb5   : > { %2264 = vmatpush3.bf16.msra.mxu1 %v2420_v15  ;;  %2237 = vmatprep.subr.bf16.mxu0 %v2421_v16 }
  0xb6   : > { %2265 = vmatprep.subr.bf16.mxu1 %v2423_v18 }
  0xb8   : > { %2238 = vmatpush3.bf16.msra.mxu0 %v2422_v17 }
  0xb9   : > { %2266 = vmatpush3.bf16.msra.mxu1 %v2424_v19  ;;  %2239 = vmatprep.subr.bf16.mxu0 %v2425_v20 }
  0xba   : > { %2267 = vmatprep.subr.bf16.mxu1 %v2427_v22 }
  0xbc   : > { %2240 = vmatpush3.bf16.msra.mxu0 %v2426_v21 }
  0xbd   : > { %2268 = vmatpush3.bf16.msra.mxu1 %v2431_v25  ;;  %2291 = vmatprep.subr.bf16.mxu0 %v2432_v26 }
  0xbf   : > { %1704 = vmatmul.mubr.bf16.vlgmr.msra.gmra.mxu0 %v2428_v23 }
  0xc0   : > { %2292 = vmatpush3.bf16.msra.mxu0 %v2432_v26  ;;  %1753 = vmatmul.mubr.bf16.vlgmr.msra.gmra.mxu1 %v2433_v27 }
  0xc1   : > { %2293 = vmatprep.subr.bf16.mxu0 %v2436_v29  ;;  %1711 = vmatprep.mubr.bf16.mxu0 %v2437_v30 }
  0xc2   : > { %1760 = vmatprep.mubr.bf16.mxu1 %v2441_v33 }
  0xc4   : > { %2294 = vmatpush3.bf16.msra.mxu0 %v2436_v29 }
  0xc5   : > { %2295 = vmatprep.subr.bf16.mxu0 %v2440_v32 }
  0xc7   : > { %1712 = vmatmul.mubr.bf16.gmra.mxu0 %v2439_v31 }
  0xc8   : > { %2296 = vmatpush3.bf16.msra.mxu0 %v2440_v32  ;;  %1761 = vmatmul.mubr.bf16.gmra.mxu1 %v2443_v34 }
  0xc9   : > { %2297 = vmatprep.subr.bf16.mxu0 %v2444_v35  ;;  %2307 = vmatprep.mubr.bf16.mxu0 %v2449_v37 }
  0xcc   : > { %2298 = vmatpush3.bf16.msra.mxu0 %v2444_v35 }
  0xcd   : > { %2299 = vmatprep.subr.bf16.mxu0 %v2445_v36 }
  0xd0   : > { %2300 = vmatpush3.bf16.msra.mxu0 %v2445_v36 }
  0xd1   : > { %2301 = vmatprep.subr.bf16.mxu0 %v2446_v38 }
  0xd4   : > { %2302 = vmatpush3.bf16.msra.mxu0 %v2446_v38 }
  0xd5   : > { %2303 = vmatprep.subr.bf16.mxu0 %v2447_v39 }
  0xd8   : > { %2304 = vmatpush3.bf16.msra.mxu0 %v2447_v39 }
  0xd9   : > { %2305 = vmatprep.subr.bf16.mxu0 %v2448_v40 }
  0xdc   : > { %2306 = vmatpush3.bf16.msra.mxu0 %v2448_v40 }
  0xdf   : > { %2308 = vmatmul.mubr.bf16.vlgmr.msra.gmra.mxu0 %v2450_v41 }
 0x15f   : > { %v2185_v42 = vpop.f32.mrf.mxu0 }
 0x160   : > { %v2213_v43 = vpop.f32.mrf.mxu1 }
 0x161   : > { %v2186_v44 = vpop.f32.mrf.mxu0 }
 0x162   : > { %v2214_v45 = vpop.f32.mrf.mxu1  ;;  %v2187_v9 = vadd.f32 %v2186_v44, %v2185_v42 }
 0x163   : > { %v2188_v46 = vpop.f32.mrf.mxu0  ;;  %v2215_v10 = vadd.f32 %v2214_v45, %v2213_v43 }
 0x164   : > { %v2216_v47 = vpop.f32.mrf.mxu1 }
 0x165   : > { %v2189_v48 = vpop.f32.mrf.mxu0  ;;  %v1657_v18 = vadd.f32 %v2215_v10, %v2187_v9 }
 0x166   : > { %v2217_v50 = vpop.f32.mrf.mxu1  ;;  %v2190_v19 = vadd.f32 %v2189_v48, %v2188_v46 }
 0x167   : > { %v2191_v49 = vpop.f32.mrf.mxu0  ;;  %v2218_v20 = vadd.f32 %v2217_v50, %v2216_v47 }
 0x168   : > { %v2219_v51 = vpop.f32.mrf.mxu1 }
 0x169   : > { %v2192_v52 = vpop.f32.mrf.mxu0  ;;  %v1660_v29 = vadd.f32 %v2218_v20, %v2190_v19 }
 0x16a   : > { %v2220_v53 = vpop.f32.mrf.mxu1  ;;  %v2193_v7 = vadd.f32 %v2192_v52, %v2191_v49 }
 0x16b   : > { %v2194_v54 = vpop.f32.mrf.mxu0  ;;  %v2221_v8 = vadd.f32 %v2220_v53, %v2219_v51 }
 0x16c   : > { %v2222_v55 = vpop.f32.mrf.mxu1 }
 0x16d   : > { %v2195_v56 = vpop.f32.mrf.mxu0  ;;  %v1665_v14 = vadd.f32 %v2221_v8, %v2193_v7 }
 0x16e   : > { %v2223_v58 = vpop.f32.mrf.mxu1  ;;  %v2196_v15 = vadd.f32 %v2195_v56, %v2194_v54 }
 0x16f   : > { %v2224_v16 = vadd.f32 %v2223_v58, %v2222_v55 }
 0x171   : > { %v1668_v25 = vadd.f32 %v2224_v16, %v2196_v15 }
 0x17f   : > { %v2241_v57 = vpop.f32.mrf.mxu0 }
 0x180   : > { %v2269_v60 = vpop.f32.mrf.mxu1 }
 0x181   : > { %v2242_v59 = vpop.f32.mrf.mxu0 }
 0x182   : > { %v2270_v62 = vpop.f32.mrf.mxu1  ;;  %v2243_v17 = vadd.f32 %v2242_v59, %v2241_v57 }
 0x183   : > { %v2244_v61 = vpop.f32.mrf.mxu0  ;;  %v2271_v27 = vadd.f32 %v2270_v62, %v2269_v60 }
 0x184   : > { %v2272_v0 = vpop.f32.mrf.mxu1  ;;  %v1706_v26 = vadd.f32 %v2243_v17, %v1657_v18 }
 0x185   : > { %v2245_v63 = vpop.f32.mrf.mxu0 }
 0x186   : > { %v2273_v2 = vpop.f32.mrf.mxu1  ;;  %v2246_v28 = vadd.f32 %v2245_v63, %v2244_v61  ;;  %v1755_v37 = vadd.f32 %v2271_v27, %v1706_v26 }
 0x187   : > { %v2247_v1 = vpop.f32.mrf.mxu0  ;;  %v2274_v35 = vadd.f32 %v2273_v2, %v2272_v0 }
 0x188   : > { %v2275_v4 = vpop.f32.mrf.mxu1  ;;  %v1709_v34 = vadd.f32 %v2246_v28, %v1660_v29 }
 0x189   : > { %v2248_v3 = vpop.f32.mrf.mxu0 }
 0x18a   : > { %v2276_v6 = vpop.f32.mrf.mxu1  ;;  %v2249_v11 = vadd.f32 %v2248_v3, %v2247_v1  ;;  %v1758_v43 = vadd.f32 %v2274_v35, %v1709_v34 }
 0x18b   : > { %v2250_v5 = vpop.f32.mrf.mxu0  ;;  %v2277_v22 = vadd.f32 %v2276_v6, %v2275_v4 }
 0x18c   : > { %v2278_v13 = vpop.f32.mrf.mxu1  ;;  %v1714_v21 = vadd.f32 %v2249_v11, %v1665_v14 }
 0x18d   : > { %v2251_v12 = vpop.f32.mrf.mxu0 }
 0x18e   : > { %v2252_v23 = vadd.f32 %v2251_v12, %v2250_v5  ;;  %v2279_v24 = vpop.f32.mrf.mxu1  ;;  %v1763_v32 = vadd.f32 %v2277_v22, %v1714_v21 }
 0x18f   : > { %v2280_v31 = vadd.f32 %v2279_v24, %v2278_v13 }
 0x190   : > { %v1717_v30 = vadd.f32 %v2252_v23, %v1668_v25 }
 0x192   : > { %v1766_v40 = vadd.f32 %v2280_v31, %v1717_v30 }
 0x19f   : > { %v2309_v33 = vpop.f32.mrf.mxu0 }
 0x1a0   : > { %v1812_v36 = vadd.f32 %v2309_v33, %v1763_v32 }
 0x1a1   : > { %v1803_v38 = vpop.f32.mrf.mxu0 }
 0x1a2   : > { %1820 = vst [vmem:[%s2991_s14 + $0x10] sm:$0xff] %v1812_v36  ;;  %v1804_v39 = vadd.f32 %v1803_v38, %v1755_v37  ;;  %v1834_v49 = vmul.f32 %v1812_v36, %v1812_v36 }
 0x1a3   : > { %v2310_v41 = vpop.f32.mrf.mxu0 }
 0x1a4   : > { %1818 = vst [vmem:[%s2991_s14] sm:$0xff] %v1804_v39  ;;  %v1815_v42 = vadd.f32 %v2310_v41, %v1766_v40  ;;  %v1832_v46 = vmul.f32 %v1804_v39, %v1804_v39 }
 0x1a5   : > { %v1806_v44 = vpop.f32.mrf.mxu0 }
 0x1a6   : > { %1821 = vst [vmem:[%s2991_s14 + $0x18] sm:$0xff] %v1815_v42  ;;  %v1807_v45 = vadd.f32 %v1806_v44, %v1758_v43  ;;  %v1835_v52 = vmul.f32 %v1815_v42, %v1815_v42 }
 0x1a8   : > { %1819 = vst [vmem:[%s2991_s14 + $0x8] sm:$0xff] %v1807_v45  ;;  %v1822_v47 = vadd.f32 %v1807_v45, %v1804_v39  ;;  %v1833_v48 = vmul.f32 %v1807_v45, %v1807_v45 }
 0x1a9   : > { %v1910_v6 = vld [vmem:[%s2991_s14 + $0x10] sm:$0xff] (%p2551_p6) }
 0x1aa   : > { %v1823_v50 = vadd.f32 %v1822_v47, %v1812_v36  ;;  %v1836_v51 = vadd.f32 %v1833_v48, %v1832_v46  ;;  %1911 = vst [vmem:[%s1871_s5 + $0x20] sm:$0xff] (%p2551_p6), %v1910_v6 }
 0x1ab   : > { %v1906_v4 = vld [vmem:[%s2991_s14] sm:$0xff] (%p2551_p6) }
 0x1ac   : > { %v1824_v53 = vadd.f32 %v1823_v50, %v1815_v42  ;;  %v1837_v54 = vadd.f32 %v1836_v51, %v1834_v49  ;;  %1907 = vst [vmem:[%s1871_s5] sm:$0xff] (%p2551_p6), %v1906_v4 }
 0x1ad   : > { %v1912_v7 = vld [vmem:[%s2991_s14 + $0x18] sm:$0xff] (%p2551_p6) }
 0x1ae   : > { %v1825_v55 = vrot.slane %v1824_v53, 4  ;;  %v1838_v56 = vadd.f32 %v1837_v54, %v1835_v52  ;;  %1913 = vst [vmem:[%s1871_s5 + $0x30] sm:$0xff] (%p2551_p6), %v1912_v7 }
 0x1af   : > { %v1908_v5 = vld [vmem:[%s2991_s14 + $0x8] sm:$0xff] (%p2551_p6) }
 0x1b0   : > { %v1826_v57 = vadd.f32 %v1825_v55, %v1824_v53  ;;  %v1839_v58 = vrot.slane %v1838_v56, 4  ;;  %1909 = vst [vmem:[%s1871_s5 + $0x10] sm:$0xff] (%p2551_p6), %v1908_v5 }
 0x1b2   : > { %v1827_v59 = vrot.slane %v1826_v57, 2  ;;  %v1840_v60 = vadd.f32 %v1839_v58, %v1838_v56 }
 0x1b4   : > { %v1828_v61 = vadd.f32 %v1827_v59, %v1826_v57  ;;  %v1841_v62 = vrot.slane %v1840_v60, 2 }
 0x1b6   : > { %v1829_v63 = vrot.slane %v1828_v61, 1  ;;  %v1842_v0 = vadd.f32 %v1841_v62, %v1840_v60 }
 0x1b8   : > { %v1830_v1 = vadd.f32 %v1829_v63, %v1828_v61  ;;  %v1843_v2 = vrot.slane %v1842_v0, 1  ;;  %1866 = sbr.rel (!%p2551_p6) target bundleno = 445 (0x1bd), region = 73 }
 0x1ba   : > { %1831 = vst [vmem:[%s876_s22] sm:$0x1] %v1830_v1  ;;  %v1844_v3 = vadd.f32 %v1843_v2, %v1842_v0 }
 0x1bc   : > { %1845 = vst [vmem:[%s883_s27] sm:$0x1] %v1844_v3 }
 0x1bd PF: > { %s15_s19 = sadd.s32 1, %s2489_s19   ;;  %s3036_s15 = smov %s2477_s16 }
 0x1be   : > { %p12_p12 = scmp.ge.s32.totalorder %s15_s19, 4   ;;  %s3037_s16 = smov %s2556_s25 }
 0x1bf   : > { %s3038_s17 = smov %s2485_s18  ;;  %s3039_s18 = smov %s3041_s20 }
 0x1c0   :  { %14 = sbr.rel (!%p12_p12) target bundleno = 3 (0x3), region = 169 }

// kernel: _lambda_.35
= control target key start
LH: loop header
LB: loop body
LE: loop exit
PB: predicated region body
PF: predicated region fallthrough
CT: control target
= control target key end

     0   :  { %s95_s0 = inlined_call_operand.vmem [shape: bf16[4,2,2,512], index: 0, kind: input, shape index: {}]   ;;  %s96_s1 = inlined_call_operand.vmem [shape: bf16[4,2,256], index: 1, kind: output, shape index: {}]  }
   0x1   :  { %v8_v0 = vld [vmem:[%s95_s0] sm:$0xf]  ;;  %v45_v1 = vld [vmem:[%s95_s0 + $0x4] sm:$0xf]  ;;  %v9_v2 = vld [vmem:[%s95_s0 + $0x8] sm:$0xf] }
   0x2   :  { %v17_v3 = vmax.bf16 %v45_v1, %v8_v0  ;;  %v46_v4 = vld [vmem:[%s95_s0 + $0xc] sm:$0xf]  ;;  %v10_v5 = vld [vmem:[%s95_s0 + $0x10] sm:$0xf]  ;;  %v47_v6 = vld [vmem:[%s95_s0 + $0x14] sm:$0xf] }
   0x3   :  { %v18_v7 = vmax.bf16 %v46_v4, %v9_v2  ;;  %v19_v8 = vmax.bf16 %v47_v6, %v10_v5  ;;  %v11_v9 = vld [vmem:[%s95_s0 + $0x18] sm:$0xf]  ;;  %v48_v10 = vld [vmem:[%s95_s0 + $0x1c] sm:$0xf] }
   0x4   :  { %v25_v11 = vrot.slane %v17_v3, 2  ;;  %v20_v12 = vmax.bf16 %v48_v10, %v11_v9 }
   0x5   :  { %v26_v13 = vrot.slane %v18_v7, 2  ;;  %v27_v14 = vrot.slane %v19_v8, 2 }
   0x6   :  { %v33_v15 = vmax.bf16 %v25_v11, %v17_v3  ;;  %v28_v16 = vrot.slane %v20_v12, 2 }
   0x7   :  { %v34_v17 = vmax.bf16 %v26_v13, %v18_v7  ;;  %v35_v18 = vmax.bf16 %v27_v14, %v19_v8 }
   0x8   :  { %37 = vst [vmem:[%s96_s1] sm:$0x3] %v33_v15  ;;  %v36_v19 = vmax.bf16 %v28_v16, %v20_v12 }
   0x9   :  { %38 = vst [vmem:[%s96_s1 + $0x2] sm:$0x3] %v34_v17  ;;  %39 = vst [vmem:[%s96_s1 + $0x4] sm:$0x3] %v35_v18 }
   0xa   :  { %40 = vst [vmem:[%s96_s1 + $0x6] sm:$0x3] %v36_v19 }

// kernel: _lambda_.41
= control target key start
LH: loop header
LB: loop body
LE: loop exit
PB: predicated region body
PF: predicated region fallthrough
CT: control target
= control target key end

     0   :  { %vm26_vm0 = vcmask 1043456   ;;  %v62_v4 = vlaneseq  ;;  %vm81_vm1 = vcmask 1041409   ;;  %vm87_vm2 = vcmask 1041408   ;;  %s144_s0 = inlined_call_operand.vmem [shape: bf16[2,4,256], index: 0, kind: input, shape index: {}]   ;;  %s145_s2 = inlined_call_operand.<no memory space> [shape: f32[1,1], index: 2, kind: input, shape index: {}]   ;;  %s146_s1 = inlined_call_operand.vmem [shape: f32[1,256], index: 1, kind: input, shape index: {}]   ;;  %s147_s3 = inlined_call_operand.vmem [shape: f32[2,1], index: 3, kind: output, shape index: {}]  }
   0x1   :  { %v109_v0 = vld [vmem:[%s144_s0] sm:$0xff]   ;;  %v8_v1 = vstv %s145_s2  ;;  %vm101_vm3 = vcmask 1024  }
   0x2   :  { %v110_v2 = vunpack.c.l.bf16 %v109_v0  ;;  %v111_v3 = vunpack.c.h.bf16 %v109_v0  ;;  %9 = vst [vmem:[#allocation2] sm:$0x1] %v8_v1  ;;  %v63_v13 = vshrl.u32 %v62_v4, 7  ;;  %v60_v27 = vld [vmem:[%s146_s1] sm:$0x3] }
   0x4   :  { %v22_v5 = vcombine.high %v110_v2, %v110_v2  ;;  %v23_v6 = vcombine.high %v111_v3, %v111_v3  ;;  %v27_v7 = vsel %vm26_vm0, %v110_v2, 0.0  ;;  %v41_v8 = vsel %vm26_vm0, %v111_v3, 0.0 }
   0x5   :  { %v28_v9 = vrot.slane %v27_v7, 4  ;;  %v42_v10 = vrot.slane %v41_v8, 4  ;;  %v64_v22 = vsub.s32 0, %v63_v13  ;;  %v68_v28 = vsub.s32 1, %v63_v13 }
   0x6   :  { %v34_v11 = vsel %vm26_vm0, %v22_v5, 0.0  ;;  %v48_v12 = vsel %vm26_vm0, %v23_v6, 0.0 }
   0x7   :  { %v29_v14 = vadd.f32 %v28_v9, %v27_v7  ;;  %v35_v15 = vrot.slane %v34_v11, 4  ;;  %v43_v16 = vadd.f32 %v42_v10, %v41_v8  ;;  %v49_v17 = vrot.slane %v48_v12, 4 }
   0x8   :  { %v65_v33 = vrot.slane %v60_v27, %v64_v22  ;;  %v69_v38 = vrot.slane %v60_v27, %v68_v28 }
   0x9   :  { %v30_v18 = vrot.slane %v29_v14, 2  ;;  %v36_v19 = vadd.f32 %v35_v15, %v34_v11  ;;  %v44_v20 = vrot.slane %v43_v16, 2  ;;  %v50_v21 = vadd.f32 %v49_v17, %v48_v12  ;;  %v107_v56 = vld [vmem:[#allocation2] ss:$0 sm:$0xff] }
   0xb   :  { %v31_v23 = vadd.f32 %v30_v18, %v29_v14  ;;  %v37_v24 = vrot.slane %v36_v19, 2  ;;  %v45_v25 = vadd.f32 %v44_v20, %v43_v16  ;;  %v51_v26 = vrot.slane %v50_v21, 2 }
   0xd   :  { %v32_v29 = vrot.slane %v31_v23, 1  ;;  %v38_v30 = vadd.f32 %v37_v24, %v36_v19  ;;  %v46_v31 = vrot.slane %v45_v25, 1  ;;  %v52_v32 = vadd.f32 %v51_v26, %v50_v21 }
   0xf   :  { %v33_v34 = vadd.f32 %v32_v29, %v31_v23  ;;  %v39_v35 = vrot.slane %v38_v30, 1  ;;  %v47_v36 = vadd.f32 %v46_v31, %v45_v25  ;;  %v53_v37 = vrot.slane %v52_v32, 1 }
  0x11   :  { %v40_v39 = vadd.f32 %v39_v35, %v38_v30  ;;  %v54_v40 = vadd.f32 %v53_v37, %v52_v32  ;;  %v56_v41 = vmul.f32 0.25, %v33_v34  ;;  %v58_v42 = vmul.f32 0.25, %v47_v36 }
  0x13   :  { %v57_v43 = vmul.f32 0.25, %v40_v39  ;;  %v59_v44 = vmul.f32 0.25, %v54_v40  ;;  %v72_v45 = vmul.f32 %v65_v33, %v56_v41  ;;  %v74_v46 = vmul.f32 %v65_v33, %v58_v42 }
  0x15   :  { %v73_v47 = vmul.f32 %v69_v38, %v57_v43  ;;  %v75_v48 = vmul.f32 %v69_v38, %v59_v44  ;;  %v80_v49 = vrot.slane %v74_v46, 7 }
  0x17   :  { %v82_v50 = vsel %vm81_vm1, %v80_v49, %v72_v45  ;;  %v83_v51 = vrot.slane %v75_v48, 7 }
  0x18   :  { %v88_v52 = vsel %vm87_vm2, %v82_v50, 0.0 }
  0x19   :  { %v84_v53 = vsel %vm81_vm1, %v83_v51, %v73_v47 }
  0x1a   :  { %v89_v54 = vsel %vm87_vm2, %v84_v53, 0.0 }
  0x1b   :  { %v90_v55 = vadd.f32 %v89_v54, %v88_v52 }
  0x1d   :  { %91 = vadd.xlane.f32.xlu0 %v90_v55 }
  0xa6   :  { %v92_v57 = vpop.xlane.xlu0 %91 }
  0xa7   :  { %v100_v58 = vadd.f32 %v107_v56, %v92_v57 }
  0xa9   :  { %102 = vst.msk [vmem:[%s147_s3] sm:$0x3] %vm101_vm3, %v100_v58 }

// kernel: _lambda_.37
= control target key start
LH: loop header
LB: loop body
LE: loop exit
PB: predicated region body
PF: predicated region fallthrough
CT: control target
= control target key end

     0   :  { %s362_s1 = inlined_call_operand.vmem [shape: bf16[256,128], index: 1, kind: input, shape index: {}]   ;;  %s363_s0 = inlined_call_operand.vmem [shape: bf16[8,256], index: 0, kind: input, shape index: {}]   ;;  %s364_s2 = inlined_call_operand.vmem [shape: f32[8,128], index: 2, kind: output, shape index: {0}]   ;;  %s365_s3 = inlined_call_operand.vmem [shape: f32[1,1,128], index: 3, kind: output, shape index: {1}]   ;;  %s366_s4 = inlined_call_operand.vmem [shape: f32[1,1,128], index: 4, kind: output, shape index: {2}]  }
   0x1   :  { %v259_v0 = vld [vmem:[%s362_s1 + $0x78] sm:$0xff]   ;;  %v261_v2 = vld [vmem:[%s362_s1 + $0x70] sm:$0xff]   ;;  %v263_v4 = vld [vmem:[%s362_s1 + $0x68] sm:$0xff]  }
   0x2   :  { %v260_v1 = vld [vmem:[%s362_s1 + $0x38] sm:$0xff]   ;;  %237 = vmatprep.subr.bf16.mxu0 %v259_v0  ;;  %v262_v3 = vld [vmem:[%s362_s1 + $0x30] sm:$0xff]   ;;  %v264_v5 = vld [vmem:[%s362_s1 + $0x28] sm:$0xff]  }
   0x3   :  { %238 = vmatpush3.bf16.msra.mxu0 %v260_v1  ;;  %v265_v6 = vld [vmem:[%s362_s1 + $0x60] sm:$0xff]   ;;  %v267_v8 = vld [vmem:[%s362_s1 + $0x58] sm:$0xff]   ;;  %v269_v10 = vld [vmem:[%s362_s1 + $0x50] sm:$0xff]  }
   0x4   :  { %239 = vmatprep.subr.bf16.mxu0 %v261_v2  ;;  %v266_v7 = vld [vmem:[%s362_s1 + $0x20] sm:$0xff]   ;;  %v268_v9 = vld [vmem:[%s362_s1 + $0x18] sm:$0xff]   ;;  %v270_v13 = vld [vmem:[%s362_s1 + $0x10] sm:$0xff]  }
   0x5   :  { %v15_v11 = vld [vmem:[%s363_s0] sm:$0xff]  ;;  %v271_v14 = vld [vmem:[%s362_s1 + $0x48] sm:$0xff]  }
   0x6   :  { %v220_v12 = vcombine.high %v15_v11, %v15_v11  ;;  %v272_v15 = vld [vmem:[%s362_s1 + $0x8] sm:$0xff]   ;;  %v273_v16 = vld [vmem:[%s362_s1 + $0x40] sm:$0xff]   ;;  %v219_v18 = vcombine.low %v15_v11, %v15_v11 }
   0x7   :  { %240 = vmatpush3.bf16.msra.mxu0 %v262_v3  ;;  %v274_v17 = vld [vmem:[%s362_s1] sm:$0xff]  }
   0x8   :  { %241 = vmatprep.subr.bf16.mxu0 %v263_v4  ;;  %183 = vmatprep.mubr.bf16.mxu0 %v220_v12 }
   0xb   :  { %242 = vmatpush3.bf16.msra.mxu0 %v264_v5 }
   0xc   :  { %243 = vmatprep.subr.bf16.mxu0 %v265_v6 }
   0xf   :  { %244 = vmatpush3.bf16.msra.mxu0 %v266_v7 }
  0x10   :  { %245 = vmatprep.subr.bf16.mxu0 %v267_v8 }
  0x13   :  { %246 = vmatpush3.bf16.msra.mxu0 %v268_v9 }
  0x14   :  { %247 = vmatprep.subr.bf16.mxu0 %v269_v10 }
  0x17   :  { %248 = vmatpush3.bf16.msra.mxu0 %v270_v13 }
  0x18   :  { %249 = vmatprep.subr.bf16.mxu0 %v271_v14 }
  0x1b   :  { %250 = vmatpush3.bf16.msra.mxu0 %v272_v15 }
  0x1c   :  { %251 = vmatprep.subr.bf16.mxu0 %v273_v16 }
  0x1f   :  { %252 = vmatpush3.bf16.msra.mxu0 %v274_v17 }
  0x22   :  { %184 = vmatmul.mubr.bf16.vlgmr.msra.gmra.mxu0 %v219_v18 }
  0xe2   :  { %v253_v19 = vpop.f32.mrf.mxu0 }
  0xe4   :  { %v254_v20 = vpop.f32.mrf.mxu0 }
  0xe5   :  { %v255_v21 = vadd.f32 %v254_v20, %v253_v19 }
  0xe6   :  { %v256_v22 = vpop.f32.mrf.mxu0 }
  0xe7   :  { %191 = vst [vmem:[%s364_s2] sm:$0xff] %v255_v21  ;;  %v192_v23 = vrot.slane %v255_v21, 4  ;;  %v199_v24 = vmul.f32 %v255_v21, %v255_v21 }
  0xe8   :  { %v257_v25 = vpop.f32.mrf.mxu0 }
  0xe9   :  { %v193_v26 = vadd.f32 %v255_v21, %v192_v23  ;;  %v200_v27 = vrot.slane %v199_v24, 4 }
  0xeb   :  { %v194_v28 = vrot.slane %v193_v26, 2  ;;  %v201_v29 = vadd.f32 %v200_v27, %v199_v24 }
  0xed   :  { %v195_v30 = vadd.f32 %v194_v28, %v193_v26  ;;  %v202_v31 = vrot.slane %v201_v29, 2 }
  0xef   :  { %v196_v32 = vrot.slane %v195_v30, 1  ;;  %v203_v33 = vadd.f32 %v202_v31, %v201_v29 }
  0xf1   :  { %v197_v34 = vadd.f32 %v196_v32, %v195_v30  ;;  %v204_v35 = vrot.slane %v203_v33, 1 }
  0xf3   :  { %198 = vst [vmem:[%s365_s3] sm:$0x1] %v197_v34  ;;  %v205_v36 = vadd.f32 %v204_v35, %v203_v33 }
  0xf5   :  { %206 = vst [vmem:[%s366_s4] sm:$0x1] %v205_v36 }

// kernel: _lambda_.39
= control target key start
LH: loop header
LB: loop body
LE: loop exit
PB: predicated region body
PF: predicated region fallthrough
CT: control target
= control target key end

     0   :  { %19 = vsyncpa [#allocation3], 0  ;;  %s332_s0 = inlined_call_operand.vmem [shape: f32[8,128], index: 0, kind: input, shape index: {}]   ;;  %s333_s1 = inlined_call_operand.vmem [shape: f32[1,1,128], index: 1, kind: input, shape index: {}]   ;;  %s334_s2 = inlined_call_operand.vmem [shape: f32[1,1,128], index: 2, kind: input, shape index: {}]   ;;  %s335_s3 = inlined_call_operand.vmem [shape: f32[1,128], index: 3, kind: input, shape index: {}]   ;;  %s336_s4 = inlined_call_operand.vmem [shape: f32[1,128], index: 4, kind: input, shape index: {}]   ;;  %s337_s5 = inlined_call_operand.vmem [shape: f32[8,128], index: 5, kind: input, shape index: {}]   ;;  %s338_s6 = inlined_call_operand.vmem [shape: f32[1,1,128], index: 6, kind: input, shape index: {}]   ;;  %s339_s7 = inlined_call_operand.vmem [shape: f32[1,1,128], index: 7, kind: input, shape index: {}]   ;;  %s340_s8 = inlined_call_operand.vmem [shape: f32[1,128], index: 8, kind: input, shape index: {}]   ;;  %s341_s9 = inlined_call_operand.vmem [shape: f32[1,128], index: 9, kind: input, shape index: {}]   ;;  %s342_s10 = inlined_call_operand.vmem [shape: f32[1,128], index: 10, kind: input, shape index: {}]   ;;  %s343_s11 = inlined_call_operand.vmem [shape: f32[8,1], index: 11, kind: output, shape index: {0}]   ;;  %s344_s12 = inlined_call_operand.hbm [shape: f32[1,1,1], index: 12, kind: output, shape index: {1}]   ;;  %s345_s13 = inlined_call_operand.hbm [shape: f32[1,1,1], index: 13, kind: output, shape index: {2}]  }
   0x1   :  { %v43_v0 = vld [vmem:[%s333_s1] sm:$0x1] }
   0x2   :  { %v46_v1 = vld [vmem:[%s334_s2] sm:$0x1]  ;;  %v45_v2 = vmul.f32 0.125, %v43_v0 }
   0x3   :  { %v48_v3 = vmul.f32 0.125, %v46_v1  ;;  %v58_v4 = vld [vmem:[%s338_s6] sm:$0x1] }
   0x4   :  { %v60_v5 = vmul.f32 0.125, %v58_v4  ;;  %v61_v6 = vld [vmem:[%s339_s7] sm:$0x1]  ;;  %v49_v7 = vmul.f32 %v45_v2, %v45_v2 }
   0x5   :  { %v63_v8 = vmul.f32 0.125, %v61_v6 }
   0x6   :  { %v64_v9 = vmul.f32 %v60_v5, %v60_v5 }
   0x7   :  { %20 = vsyncpa [#allocation5], 0  ;;  %v50_v10 = vsub.f32 %v48_v3, %v49_v7  ;;  %v75_v14 = vlaneseq  ;;  %v51_v16 = vld [vmem:[%s335_s3] sm:$0x1]  ;;  %vm115_vm0 = vcmask 7168   ;;  %s216_s22 = smov [#allocation2]  }
   0x8   :  { %v65_v11 = vsub.f32 %v63_v8, %v64_v9  ;;  %v66_v17 = vld [vmem:[%s340_s8] sm:$0x1]  ;;  %s141_s23 = sshll.u32 %s216_s22, 4  ;;  %vm123_vm1 = vcmask 0   ;;  %s142_s23 = int_to_ptr.vmem [resolvable:$true] %s141_s23 }
   0x9   :  { %v52_v12 = vadd.f32 1e-05, %v50_v10  ;;  %v76_v15 = vshrl.u32 %v75_v14, 7  ;;  %v55_v22 = vld [vmem:[%s336_s4] sm:$0x1]  ;;  %s176_s25 = scalar_lea.vmem %s142_s23, 32  ;;  %p177_p1 = scmp.lt.s32.totalorder %s142_s23, %s142_s23 }
   0xa   :  { %v67_v13 = vadd.f32 1e-05, %v65_v11  ;;  %v73_v24 = vld [vmem:[%s332_s0] sm:$0xff] }
   0xb   :  { %168 = vrsqrt.f32 %v52_v12  ;;  %v77_v18 = vsub.s32 0, %v76_v15  ;;  %v70_v26 = vld [vmem:[%s341_s9] sm:$0x1] }
   0xc   :  { %170 = vrsqrt.f32 %v67_v13  ;;  %v88_v29 = vld [vmem:[%s337_s5] sm:$0xff] }
   0xd   :  { %v165_v40 = vld [vmem:[%s342_s10] ss:$0 sm:$0xff]  ;;  %s217_s10 = smov [#allocation4]  }
   0xe   :  { %s151_s24 = sshll.u32 %s217_s10, 4  ;;  %s152_s24 = int_to_ptr.vmem [resolvable:$true] %s151_s24 }
  0x18   :  { %v169_v19 = vpop.eup %168 }
  0x19   :  { %v171_v20 = vpop.eup %170  ;;  %v54_v21 = vmul.f32 %v169_v19, %v51_v16 }
  0x1a   :  { %v69_v23 = vmul.f32 %v171_v20, %v66_v17 }
  0x1b   :  { %v56_v25 = vmul.f32 %v54_v21, %v45_v2  ;;  %v78_v27 = vrot.slane %v54_v21, %v77_v18 }
  0x1c   :  { %v71_v28 = vmul.f32 %v69_v23, %v60_v5  ;;  %v93_v30 = vrot.slane %v69_v23, %v77_v18 }
  0x1d   :  { %v57_v31 = vsub.f32 %v55_v22, %v56_v25  ;;  %v80_v32 = vmul.f32 %v78_v27, %v73_v24 }
  0x1e   :  { %v72_v33 = vsub.f32 %v70_v26, %v71_v28  ;;  %v95_v35 = vmul.f32 %v93_v30, %v88_v29 }
  0x1f   :  { %v85_v34 = vrot.slane %v57_v31, %v77_v18 }
  0x20   :  { %v101_v37 = vrot.slane %v72_v33, %v77_v18 }
  0x21   :  { %v87_v36 = vadd.f32 %v85_v34, %v80_v32 }
  0x23   :  { %v96_v38 = vadd.f32 %v95_v35, %v87_v36 }
  0x25   :  { %v103_v39 = vadd.f32 %v101_v37, %v96_v38 }
  0x27   :  { %v104_v41 = vmax.f32 %v103_v39, 0.0 }
  0x29   :  { %v112_v42 = vmul.f32 %v165_v40, %v104_v41 }
  0x2b   :  { %113 = vadd.xlane.f32.xlu0 %v112_v42 }
  0xb4   :  { %v114_v43 = vpop.xlane.xlu0 %113 }
  0xb5   :  { %116 = vst.msk [vmem:[%s343_s11] sm:$0xff] %vm115_vm0, %v114_v43  ;;  %v117_v44 = vrot.slane %v114_v43, 4  ;;  %v125_v45 = vmul.f32 %v114_v43, %v114_v43  ;;  %s172_s11 = scalar_lea.vmem %s142_s23, 16 }
  0xb6   :  { %p173_p0 = scmp.ne.s32.totalorder %s142_s23, %s172_s11  ;;  %p178_p2 = scmp.lt.s32.totalorder %s176_s25, %s172_s11 }
  0xb7   :  { %v118_v46 = vadd.f32 %v117_v44, %v114_v43  ;;  %v126_v47 = vrot.slane %v125_v45, 4 }
  0xb8   :  { %p179_p3 = por %p178_p2, %p177_p1 }
  0xb9   :  { %v119_v48 = vrot.slane %v118_v46, 2  ;;  %v127_v49 = vadd.f32 %v126_v47, %v125_v45 }
  0xba   :  { %p180_p4 = pnand %p179_p3, %p173_p0 }
  0xbb   :  { %v128_v50 = vrot.slane %v127_v49, 2  ;;  %v120_v51 = vadd.f32 %v119_v48, %v118_v46 }
  0xbd   :  { %v121_v52 = vrot.slane %v120_v51, 1  ;;  %v129_v53 = vadd.f32 %v128_v50, %v127_v49 }
  0xbf   :  { %v122_v54 = vadd.f32 %v121_v52, %v120_v51  ;;  %v130_v55 = vrot.slane %v129_v53, 1 }
  0xc1   :  { %124 = vst.msk [vmem:[#allocation2] sm:$0x1] %vm123_vm1, %v122_v54  ;;  %v131_v56 = vadd.f32 %v130_v55, %v129_v53 }
  0xc2   :  { %183 = shalt.err (!%p180_p4)
}
  0xc3   :  { %144 = dma.vmem_to_hbm [thread:$0]  %s142_s23, 16, %s344_s12, [#allocation3]   ;;  %132 = vst.msk [vmem:[#allocation4] sm:$0x1] %vm123_vm1, %v131_v56 }
  0xc4   :  { %s192_s28 = scalar_lea.vmem %s152_s24, 16  ;;  %s196_s29 = scalar_lea.vmem %s152_s24, 32 }
  0xc5   :  { %p193_p5 = scmp.ne.s32.totalorder %s152_s24, %s192_s28  ;;  %p197_p6 = scmp.lt.s32.totalorder %s152_s24, %s152_s24 }
  0xc6   :  { %p198_p7 = scmp.lt.s32.totalorder %s196_s29, %s192_s28 }
  0xc8   :  { %p199_p8 = por %p198_p7, %p197_p6 }
  0xca   :  { %p200_p9 = pnand %p199_p8, %p193_p5 }
  0xcc   :  { %203 = shalt.err (!%p200_p9)
}
  0xcd   :  { %154 = dma.vmem_to_hbm [thread:$0]  %s152_s24, 16, %s345_s13, [#allocation5]  }
  0xce   :  { %212 = dma.done.wait [#allocation3], 16  }
  0xcf   :  { %213 = vsyncadd [#allocation3], 4294967280 }
  0xd0   :  { %214 = dma.done.wait [#allocation5], 16  }
  0xd1   :  { %215 = vsyncadd [#allocation5], 4294967280 }
  0xd2   :  { %163 = vsyncpa [#allocation3], 1 }
  0xd3   :  { %164 = vsyncpa [#allocation5], 1 }

// kernel: _lambda_.40
= control target key start
LH: loop header
LB: loop body
LE: loop exit
PB: predicated region body
PF: predicated region fallthrough
CT: control target
= control target key end

     0   :  { %s181_s0 = inlined_call_operand.vmem [shape: f32[8,1], index: 0, kind: input, shape index: {}]   ;;  %s182_s1 = inlined_call_operand.<no memory space> [shape: f32[1,1,1], index: 1, kind: input, shape index: {}]   ;;  %s183_s5 = inlined_call_operand.vmem [shape: bf16[8,128], index: 5, kind: input, shape index: {}]   ;;  %s184_s6 = inlined_call_operand.hbm [shape: f32[8,128], index: 6, kind: output, shape index: {}]   ;;  %s185_s2 = inlined_call_operand.<no memory space> [shape: f32[1,1,1], index: 2, kind: input, shape index: {}]   ;;  %s186_s3 = inlined_call_operand.<no memory space> [shape: f32[1,1], index: 3, kind: input, shape index: {}]   ;;  %s187_s4 = inlined_call_operand.<no memory space> [shape: f32[1,1], index: 4, kind: input, shape index: {}]  }
   0x1   :  { %v11_v0 = vstv %s182_s1  ;;  %v13_v1 = vstv %s185_s2  ;;  %v15_v2 = vstv %s186_s3  ;;  %v17_v3 = vstv %s187_s4 }
   0x2   :  { %12 = vst [vmem:[#allocation2] sm:$0x1] %v11_v0  ;;  %14 = vst [vmem:[#allocation3] sm:$0x1] %v13_v1 }
   0x3   :  { %16 = vst [vmem:[#allocation4] sm:$0x1] %v15_v2  ;;  %18 = vst [vmem:[#allocation5] sm:$0x1] %v17_v3 }
   0x4   :  { %v123_v6 = vmov 0  }
   0x5   :  { %94 = vset.pattern.permute.xlu0 %v123_v6 }
   0x9   :  { %v32_v4 = vld [vmem:[#allocation2] sm:$0x1]  ;;  %v35_v5 = vld [vmem:[#allocation3] sm:$0x1] }
   0xa   :  { %v34_v7 = vmul.f32 0.125, %v32_v4  ;;  %v37_v8 = vmul.f32 0.125, %v35_v5 }
   0xb   :  { %19 = vsyncpa [#allocation7], 0  ;;  %v49_v12 = vlaneseq  ;;  %v40_v14 = vld [vmem:[#allocation4] sm:$0x1]  ;;  %v44_v18 = vld [vmem:[#allocation5] sm:$0x1] }
   0xc   :  { %v38_v9 = vmul.f32 %v34_v7, %v34_v7  ;;  %v47_v19 = vld [vmem:[%s181_s0] sm:$0xff]  ;;  %s124_s29 = smov [#allocation6]  }
   0xd   :  { %v50_v13 = vshrl.u32 %v49_v12, 7  ;;  %v68_v30 = vld [vmem:[%s183_s5] sm:$0xf]  ;;  %s83_s0 = sshll.u32 %s124_s29, 4  ;;  %s84_s0 = int_to_ptr.vmem [resolvable:$true] %s83_s0 }
   0xe   :  { %v39_v10 = vsub.f32 %v37_v8, %v38_v9  ;;  %v69_v31 = vunpack.c.l.bf16 %v68_v30  ;;  %s101_s30 = scalar_lea.vmem %s84_s0, 128  ;;  %p106_p1 = scmp.lt.s32.totalorder %s84_s0, %s84_s0 }
   0xf   :  { %v51_v15 = vsub.s32 0, %v50_v13  ;;  %p102_p0 = scmp.ne.s32.totalorder %s84_s0, %s101_s30  ;;  %p107_p2 = scmp.lt.s32.totalorder %s101_s30, %s101_s30 }
  0x10   :  { %v41_v11 = vadd.f32 1e-05, %v39_v10 }
  0x11   :  { %p108_p3 = por %p107_p2, %p106_p1 }
  0x12   :  { %95 = vrsqrt.f32 %v41_v11 }
  0x13   :  { %p109_p4 = pnand %p108_p3, %p102_p0 }
  0x1f   :  { %v96_v16 = vpop.eup %95 }
  0x20   :  { %v43_v17 = vmul.f32 %v96_v16, %v40_v14 }
  0x22   :  { %v45_v20 = vmul.f32 %v43_v17, %v34_v7  ;;  %v52_v21 = vrot.slane %v43_v17, %v51_v15 }
  0x24   :  { %v46_v22 = vsub.f32 %v44_v18, %v45_v20  ;;  %v54_v23 = vmul.f32 %v52_v21, %v47_v19 }
  0x26   :  { %v59_v24 = vrot.slane %v46_v22, %v51_v15 }
  0x28   :  { %v61_v25 = vadd.f32 %v59_v24, %v54_v23 }
  0x2a   :  { %v91_v26 = vmul.f32 -1.442695, %v61_v25 }
  0x2c   :  { %97 = vpow2.f32 %v91_v26 }
  0x39   :  { %v98_v27 = vpop.eup %97 }
  0x3a   :  { %v65_v28 = vadd.f32 1.0, %v98_v27 }
  0x3c   :  { %99 = vrcp.f32 %v65_v28 }
  0x49   :  { %v100_v29 = vpop.eup %99 }
  0x4a   :  { %72 = vperm.xlu0 %94, %v100_v29  }
  0xc5   :  { %v73_v32 = vpop.permute.xlu0 %72 }
  0xc6   :  { %v75_v33 = vmul.f32 %v73_v32, %v69_v31 }
  0xc8   :  { %76 = vst [vmem:[#allocation6] sm:$0xff] %v75_v33 }
  0xc9   :  { %112 = shalt.err (!%p109_p4)
}
  0xca   :  { %86 = dma.vmem_to_hbm [thread:$0]  %s84_s0, 128, %s184_s6, [#allocation7]  }
  0xcb   :  { %121 = dma.done.wait [#allocation7], 128  }
  0xcc   :  { %122 = vsyncadd [#allocation7], 4294967168 }
  0xcd   :  { %90 = vsyncpa [#allocation7], 1 }

// kernel: _lambda_.33
= control target key start
LH: loop header
LB: loop body
LE: loop exit
PB: predicated region body
PF: predicated region fallthrough
CT: control target
= control target key end

     0   :  { %s4284_s15 = smov 0   ;;  %s4286_s16 = smov 0   ;;  %s5230_s0 = inlined_call_operand.vmem [shape: bf16[32,2304], index: 0, kind: input, shape index: {}]   ;;  %s5231_s1 = inlined_call_operand.vmem [shape: bf16[2304,256], index: 1, kind: input, shape index: {}]   ;;  %s5232_s2 = inlined_call_operand.vmem [shape: f32[32,256], index: 2, kind: output, shape index: {0}]   ;;  %s5233_s3 = inlined_call_operand.vmem [shape: f32[1,1,256], index: 3, kind: output, shape index: {1}]   ;;  %s5234_s4 = inlined_call_operand.vmem [shape: f32[1,1,256], index: 4, kind: output, shape index: {2}]  }
   0x1   :  { %s4288_s17 = smov 0   ;;  %s4290_s18 = smov 0  }
   0x2   :  { %s4292_s19 = smov 0  }
   0x3 LB: > { %s27_s20 = sadd.s32 1, %s4253_s18  ;;  %s3519_s21 = sadd.s32 4294967295, %s4257_s19   ;;  %s4257_s19 = sphi %s4292_s19, %s15_s19   ;;  %s4253_s18 = sphi %s4290_s18, %s5249_s18   ;;  %s4249_s17 = sphi %s4288_s17, %s5248_s17   ;;  %s4245_s16 = sphi %s4286_s16, %s5247_s16   ;;  %s4241_s15 = sphi %s4284_s15, %s5246_s15  }
   0x4   : > { %p29_p0 = scmp.ge.s32.totalorder %s27_s20, 2  ;;  %p67_p1 = scmp.ne.s32.totalorder %s4245_s16, %s4241_s15 }
   0x5   : > { %p68_p2 = scmp.eq.s32.totalorder %s4257_s19, 0  ;;  %p99_p4 = scmp.eq.s32.totalorder %s3519_s21, 1 }
   0x6   : > { %s5251_s20 = smov (%p29_p0, %s27_s20), 0  ;;  %s60_s23 = sadd.s32 1, %s4245_s16 }
   0x7   : > { %p69_p3 = por %p68_p2, %p67_p1  ;;  %s57_s22 = ssub.s32 %s4253_s18, %s5251_s20 }
   0x8   : > { %p58_p5 = scmp.eq.s32.totalorder %s57_s22, 0  ;;  %p4319_p6 = por %p99_p4, %p67_p1 }
   0x9   : > { %p3523_p7 = scmp.ge.s32.totalorder %s4257_s19, 2 }
   0xa   : > { %s4324_s25 = scalar_select %p58_p5, %s4245_s16, %s60_s23  }
   0xb   : > { %187 = sbr.rel (%p3523_p7) target bundleno = 212 (0xd4), region = 20 }
  0x10   : > { %190 = sbr.rel (!%p69_p3) target bundleno = 212 (0xd4), region = 24  ;;  %s192_s26 = sand.u32 (%p69_p3), 1, %s4245_s16  }
  0x11   : > { %s3524_s27 = sshll.u32 (%p69_p3), %s4253_s18, 2  ;;  %s3979_s28 = smul.u32 (%p69_p3), 1152, %s192_s26 }
  0x12   : > { %s4332_s5 = scalar_lea.vmem (%p69_p3), %s5231_s1, %s3524_s27 }
  0x13   : > { %v213_v0 = vld [vmem:[%s4332_s5] sm:$0xf] (%p69_p3)  ;;  %v215_v1 = vld [vmem:[%s4332_s5 + $0x8] sm:$0xf] (%p69_p3)  ;;  %v217_v2 = vld [vmem:[%s4332_s5 + $0x10] sm:$0xf] (%p69_p3) }
  0x14   : > { %v219_v3 = vld [vmem:[%s4332_s5 + $0x18] sm:$0xf] (%p69_p3)  ;;  %v221_v4 = vld [vmem:[%s4332_s5 + $0x20] sm:$0xf] (%p69_p3)  ;;  %s4339_s6 = scalar_lea.vmem (%p69_p3), [#allocation2], %s3979_s28 }
  0x15   : > { %214 = vst [vmem:[%s4339_s6] sm:$0xf] %v213_v0  ;;  %216 = vst [vmem:[%s4339_s6 + $0x4] sm:$0xf] %v215_v1  ;;  %v223_v5 = vld [vmem:[%s4332_s5 + $0x28] sm:$0xf] }
  0x16   : > { %218 = vst [vmem:[%s4339_s6 + $0x8] sm:$0xf] %v217_v2  ;;  %220 = vst [vmem:[%s4339_s6 + $0xc] sm:$0xf] %v219_v3  ;;  %v225_v6 = vld [vmem:[%s4332_s5 + $0x30] sm:$0xf] }
  0x17   : > { %222 = vst [vmem:[%s4339_s6 + $0x10] sm:$0xf] %v221_v4  ;;  %v227_v7 = vld [vmem:[%s4332_s5 + $0x38] sm:$0xf]  ;;  %224 = vst [vmem:[%s4339_s6 + $0x14] sm:$0xf] %v223_v5 }
  0x18   : > { %226 = vst [vmem:[%s4339_s6 + $0x18] sm:$0xf] %v225_v6  ;;  %228 = vst [vmem:[%s4339_s6 + $0x1c] sm:$0xf] %v227_v7  ;;  %v229_v8 = vld [vmem:[%s4332_s5 + $0x40] sm:$0xf] }
  0x19   : > { %v231_v9 = vld [vmem:[%s4332_s5 + $0x48] sm:$0xf]  ;;  %v233_v10 = vld [vmem:[%s4332_s5 + $0x50] sm:$0xf]  ;;  %230 = vst [vmem:[%s4339_s6 + $0x20] sm:$0xf] %v229_v8 }
  0x1a   : > { %232 = vst [vmem:[%s4339_s6 + $0x24] sm:$0xf] %v231_v9  ;;  %234 = vst [vmem:[%s4339_s6 + $0x28] sm:$0xf] %v233_v10  ;;  %v235_v11 = vld [vmem:[%s4332_s5 + $0x58] sm:$0xf] }
  0x1b   : > { %v237_v12 = vld [vmem:[%s4332_s5 + $0x60] sm:$0xf]  ;;  %v239_v13 = vld [vmem:[%s4332_s5 + $0x68] sm:$0xf]  ;;  %236 = vst [vmem:[%s4339_s6 + $0x2c] sm:$0xf] %v235_v11 }
  0x1c   : > { %238 = vst [vmem:[%s4339_s6 + $0x30] sm:$0xf] %v237_v12  ;;  %240 = vst [vmem:[%s4339_s6 + $0x34] sm:$0xf] %v239_v13  ;;  %v241_v14 = vld [vmem:[%s4332_s5 + $0x70] sm:$0xf] }
  0x1d   : > { %v243_v15 = vld [vmem:[%s4332_s5 + $0x78] sm:$0xf]  ;;  %v245_v16 = vld [vmem:[%s4332_s5 + $0x80] sm:$0xf]  ;;  %242 = vst [vmem:[%s4339_s6 + $0x38] sm:$0xf] %v241_v14 }
  0x1e   : > { %244 = vst [vmem:[%s4339_s6 + $0x3c] sm:$0xf] %v243_v15  ;;  %246 = vst [vmem:[%s4339_s6 + $0x40] sm:$0xf] %v245_v16  ;;  %v247_v17 = vld [vmem:[%s4332_s5 + $0x88] sm:$0xf] }
  0x1f   : > { %v249_v18 = vld [vmem:[%s4332_s5 + $0x90] sm:$0xf]  ;;  %v251_v19 = vld [vmem:[%s4332_s5 + $0x98] sm:$0xf]  ;;  %248 = vst [vmem:[%s4339_s6 + $0x44] sm:$0xf] %v247_v17 }
  0x20   : > { %250 = vst [vmem:[%s4339_s6 + $0x48] sm:$0xf] %v249_v18  ;;  %252 = vst [vmem:[%s4339_s6 + $0x4c] sm:$0xf] %v251_v19  ;;  %v253_v20 = vld [vmem:[%s4332_s5 + $0xa0] sm:$0xf] }
  0x21   : > { %v255_v21 = vld [vmem:[%s4332_s5 + $0xa8] sm:$0xf]  ;;  %v257_v22 = vld [vmem:[%s4332_s5 + $0xb0] sm:$0xf]  ;;  %254 = vst [vmem:[%s4339_s6 + $0x50] sm:$0xf] %v253_v20 }
  0x22   : > { %256 = vst [vmem:[%s4339_s6 + $0x54] sm:$0xf] %v255_v21  ;;  %258 = vst [vmem:[%s4339_s6 + $0x58] sm:$0xf] %v257_v22  ;;  %v259_v23 = vld [vmem:[%s4332_s5 + $0xb8] sm:$0xf] }
  0x23   : > { %v261_v24 = vld [vmem:[%s4332_s5 + $0xc0] sm:$0xf]  ;;  %v263_v25 = vld [vmem:[%s4332_s5 + $0xc8] sm:$0xf]  ;;  %260 = vst [vmem:[%s4339_s6 + $0x5c] sm:$0xf] %v259_v23 }
  0x24   : > { %262 = vst [vmem:[%s4339_s6 + $0x60] sm:$0xf] %v261_v24  ;;  %264 = vst [vmem:[%s4339_s6 + $0x64] sm:$0xf] %v263_v25  ;;  %v265_v26 = vld [vmem:[%s4332_s5 + $0xd0] sm:$0xf] }
  0x25   : > { %v267_v27 = vld [vmem:[%s4332_s5 + $0xd8] sm:$0xf]  ;;  %v269_v28 = vld [vmem:[%s4332_s5 + $0xe0] sm:$0xf]  ;;  %266 = vst [vmem:[%s4339_s6 + $0x68] sm:$0xf] %v265_v26 }
  0x26   : > { %268 = vst [vmem:[%s4339_s6 + $0x6c] sm:$0xf] %v267_v27  ;;  %270 = vst [vmem:[%s4339_s6 + $0x70] sm:$0xf] %v269_v28  ;;  %v271_v29 = vld [vmem:[%s4332_s5 + $0xe8] sm:$0xf] }
  0x27   : > { %v273_v30 = vld [vmem:[%s4332_s5 + $0xf0] sm:$0xf]  ;;  %v275_v31 = vld [vmem:[%s4332_s5 + $0xf8] sm:$0xf]  ;;  %272 = vst [vmem:[%s4339_s6 + $0x74] sm:$0xf] %v271_v29 }
  0x28   : > { %274 = vst [vmem:[%s4339_s6 + $0x78] sm:$0xf] %v273_v30  ;;  %276 = vst [vmem:[%s4339_s6 + $0x7c] sm:$0xf] %v275_v31  ;;  %v277_v32 = vld [vmem:[%s4332_s5 + $0x100] sm:$0xf] }
  0x29   : > { %v279_v33 = vld [vmem:[%s4332_s5 + $0x108] sm:$0xf]  ;;  %v281_v34 = vld [vmem:[%s4332_s5 + $0x110] sm:$0xf]  ;;  %278 = vst [vmem:[%s4339_s6 + $0x80] sm:$0xf] %v277_v32 }
  0x2a   : > { %280 = vst [vmem:[%s4339_s6 + $0x84] sm:$0xf] %v279_v33  ;;  %282 = vst [vmem:[%s4339_s6 + $0x88] sm:$0xf] %v281_v34  ;;  %v283_v35 = vld [vmem:[%s4332_s5 + $0x118] sm:$0xf] }
  0x2b   : > { %v285_v36 = vld [vmem:[%s4332_s5 + $0x120] sm:$0xf]  ;;  %v287_v37 = vld [vmem:[%s4332_s5 + $0x128] sm:$0xf]  ;;  %284 = vst [vmem:[%s4339_s6 + $0x8c] sm:$0xf] %v283_v35 }
  0x2c   : > { %286 = vst [vmem:[%s4339_s6 + $0x90] sm:$0xf] %v285_v36  ;;  %288 = vst [vmem:[%s4339_s6 + $0x94] sm:$0xf] %v287_v37  ;;  %v289_v38 = vld [vmem:[%s4332_s5 + $0x130] sm:$0xf] }
  0x2d   : > { %v291_v39 = vld [vmem:[%s4332_s5 + $0x138] sm:$0xf]  ;;  %v293_v40 = vld [vmem:[%s4332_s5 + $0x140] sm:$0xf]  ;;  %290 = vst [vmem:[%s4339_s6 + $0x98] sm:$0xf] %v289_v38 }
  0x2e   : > { %292 = vst [vmem:[%s4339_s6 + $0x9c] sm:$0xf] %v291_v39  ;;  %294 = vst [vmem:[%s4339_s6 + $0xa0] sm:$0xf] %v293_v40  ;;  %v295_v41 = vld [vmem:[%s4332_s5 + $0x148] sm:$0xf] }
  0x2f   : > { %v297_v42 = vld [vmem:[%s4332_s5 + $0x150] sm:$0xf]  ;;  %v299_v43 = vld [vmem:[%s4332_s5 + $0x158] sm:$0xf]  ;;  %296 = vst [vmem:[%s4339_s6 + $0xa4] sm:$0xf] %v295_v41 }
  0x30   : > { %298 = vst [vmem:[%s4339_s6 + $0xa8] sm:$0xf] %v297_v42  ;;  %300 = vst [vmem:[%s4339_s6 + $0xac] sm:$0xf] %v299_v43  ;;  %v301_v44 = vld [vmem:[%s4332_s5 + $0x160] sm:$0xf] }
  0x31   : > { %v303_v45 = vld [vmem:[%s4332_s5 + $0x168] sm:$0xf]  ;;  %v305_v46 = vld [vmem:[%s4332_s5 + $0x170] sm:$0xf]  ;;  %302 = vst [vmem:[%s4339_s6 + $0xb0] sm:$0xf] %v301_v44 }
  0x32   : > { %304 = vst [vmem:[%s4339_s6 + $0xb4] sm:$0xf] %v303_v45  ;;  %306 = vst [vmem:[%s4339_s6 + $0xb8] sm:$0xf] %v305_v46  ;;  %v307_v47 = vld [vmem:[%s4332_s5 + $0x178] sm:$0xf] }
  0x33   : > { %v309_v48 = vld [vmem:[%s4332_s5 + $0x180] sm:$0xf]  ;;  %v311_v49 = vld [vmem:[%s4332_s5 + $0x188] sm:$0xf]  ;;  %308 = vst [vmem:[%s4339_s6 + $0xbc] sm:$0xf] %v307_v47 }
  0x34   : > { %310 = vst [vmem:[%s4339_s6 + $0xc0] sm:$0xf] %v309_v48  ;;  %312 = vst [vmem:[%s4339_s6 + $0xc4] sm:$0xf] %v311_v49  ;;  %v313_v50 = vld [vmem:[%s4332_s5 + $0x190] sm:$0xf] }
  0x35   : > { %v315_v51 = vld [vmem:[%s4332_s5 + $0x198] sm:$0xf]  ;;  %v317_v52 = vld [vmem:[%s4332_s5 + $0x1a0] sm:$0xf]  ;;  %314 = vst [vmem:[%s4339_s6 + $0xc8] sm:$0xf] %v313_v50 }
  0x36   : > { %316 = vst [vmem:[%s4339_s6 + $0xcc] sm:$0xf] %v315_v51  ;;  %318 = vst [vmem:[%s4339_s6 + $0xd0] sm:$0xf] %v317_v52  ;;  %v319_v53 = vld [vmem:[%s4332_s5 + $0x1a8] sm:$0xf] }
  0x37   : > { %v321_v54 = vld [vmem:[%s4332_s5 + $0x1b0] sm:$0xf]  ;;  %v323_v55 = vld [vmem:[%s4332_s5 + $0x1b8] sm:$0xf]  ;;  %320 = vst [vmem:[%s4339_s6 + $0xd4] sm:$0xf] %v319_v53 }
  0x38   : > { %322 = vst [vmem:[%s4339_s6 + $0xd8] sm:$0xf] %v321_v54  ;;  %324 = vst [vmem:[%s4339_s6 + $0xdc] sm:$0xf] %v323_v55  ;;  %v325_v56 = vld [vmem:[%s4332_s5 + $0x1c0] sm:$0xf] }
  0x39   : > { %v327_v57 = vld [vmem:[%s4332_s5 + $0x1c8] sm:$0xf]  ;;  %v329_v58 = vld [vmem:[%s4332_s5 + $0x1d0] sm:$0xf]  ;;  %326 = vst [vmem:[%s4339_s6 + $0xe0] sm:$0xf] %v325_v56 }
  0x3a   : > { %328 = vst [vmem:[%s4339_s6 + $0xe4] sm:$0xf] %v327_v57  ;;  %330 = vst [vmem:[%s4339_s6 + $0xe8] sm:$0xf] %v329_v58  ;;  %v331_v59 = vld [vmem:[%s4332_s5 + $0x1d8] sm:$0xf] }
  0x3b   : > { %v333_v60 = vld [vmem:[%s4332_s5 + $0x1e0] sm:$0xf]  ;;  %v335_v61 = vld [vmem:[%s4332_s5 + $0x1e8] sm:$0xf]  ;;  %332 = vst [vmem:[%s4339_s6 + $0xec] sm:$0xf] %v331_v59 }
  0x3c   : > { %334 = vst [vmem:[%s4339_s6 + $0xf0] sm:$0xf] %v333_v60  ;;  %336 = vst [vmem:[%s4339_s6 + $0xf4] sm:$0xf] %v335_v61  ;;  %v337_v62 = vld [vmem:[%s4332_s5 + $0x1f0] sm:$0xf] }
  0x3d   : > { %v339_v63 = vld [vmem:[%s4332_s5 + $0x1f8] sm:$0xf]  ;;  %v341_v0 = vld [vmem:[%s4332_s5 + $0x200] sm:$0xf]  ;;  %338 = vst [vmem:[%s4339_s6 + $0xf8] sm:$0xf] %v337_v62 }
  0x3e   : > { %340 = vst [vmem:[%s4339_s6 + $0xfc] sm:$0xf] %v339_v63  ;;  %342 = vst [vmem:[%s4339_s6 + $0x100] sm:$0xf] %v341_v0  ;;  %v343_v1 = vld [vmem:[%s4332_s5 + $0x208] sm:$0xf] }
  0x3f   : > { %v345_v2 = vld [vmem:[%s4332_s5 + $0x210] sm:$0xf]  ;;  %v347_v3 = vld [vmem:[%s4332_s5 + $0x218] sm:$0xf]  ;;  %344 = vst [vmem:[%s4339_s6 + $0x104] sm:$0xf] %v343_v1 }
  0x40   : > { %346 = vst [vmem:[%s4339_s6 + $0x108] sm:$0xf] %v345_v2  ;;  %348 = vst [vmem:[%s4339_s6 + $0x10c] sm:$0xf] %v347_v3  ;;  %v349_v4 = vld [vmem:[%s4332_s5 + $0x220] sm:$0xf] }
  0x41   : > { %v351_v5 = vld [vmem:[%s4332_s5 + $0x228] sm:$0xf]  ;;  %v353_v6 = vld [vmem:[%s4332_s5 + $0x230] sm:$0xf]  ;;  %350 = vst [vmem:[%s4339_s6 + $0x110] sm:$0xf] %v349_v4 }
  0x42   : > { %352 = vst [vmem:[%s4339_s6 + $0x114] sm:$0xf] %v351_v5  ;;  %354 = vst [vmem:[%s4339_s6 + $0x118] sm:$0xf] %v353_v6  ;;  %v355_v7 = vld [vmem:[%s4332_s5 + $0x238] sm:$0xf] }
  0x43   : > { %v357_v8 = vld [vmem:[%s4332_s5 + $0x240] sm:$0xf]  ;;  %v359_v9 = vld [vmem:[%s4332_s5 + $0x248] sm:$0xf]  ;;  %356 = vst [vmem:[%s4339_s6 + $0x11c] sm:$0xf] %v355_v7 }
  0x44   : > { %358 = vst [vmem:[%s4339_s6 + $0x120] sm:$0xf] %v357_v8  ;;  %360 = vst [vmem:[%s4339_s6 + $0x124] sm:$0xf] %v359_v9  ;;  %v361_v10 = vld [vmem:[%s4332_s5 + $0x250] sm:$0xf] }
  0x45   : > { %v363_v11 = vld [vmem:[%s4332_s5 + $0x258] sm:$0xf]  ;;  %v365_v12 = vld [vmem:[%s4332_s5 + $0x260] sm:$0xf]  ;;  %362 = vst [vmem:[%s4339_s6 + $0x128] sm:$0xf] %v361_v10 }
  0x46   : > { %364 = vst [vmem:[%s4339_s6 + $0x12c] sm:$0xf] %v363_v11  ;;  %366 = vst [vmem:[%s4339_s6 + $0x130] sm:$0xf] %v365_v12  ;;  %v367_v13 = vld [vmem:[%s4332_s5 + $0x268] sm:$0xf] }
  0x47   : > { %v369_v14 = vld [vmem:[%s4332_s5 + $0x270] sm:$0xf]  ;;  %v371_v15 = vld [vmem:[%s4332_s5 + $0x278] sm:$0xf]  ;;  %368 = vst [vmem:[%s4339_s6 + $0x134] sm:$0xf] %v367_v13 }
  0x48   : > { %370 = vst [vmem:[%s4339_s6 + $0x138] sm:$0xf] %v369_v14  ;;  %372 = vst [vmem:[%s4339_s6 + $0x13c] sm:$0xf] %v371_v15  ;;  %v373_v16 = vld [vmem:[%s4332_s5 + $0x280] sm:$0xf] }
  0x49   : > { %v375_v17 = vld [vmem:[%s4332_s5 + $0x288] sm:$0xf]  ;;  %v377_v18 = vld [vmem:[%s4332_s5 + $0x290] sm:$0xf]  ;;  %374 = vst [vmem:[%s4339_s6 + $0x140] sm:$0xf] %v373_v16 }
  0x4a   : > { %376 = vst [vmem:[%s4339_s6 + $0x144] sm:$0xf] %v375_v17  ;;  %378 = vst [vmem:[%s4339_s6 + $0x148] sm:$0xf] %v377_v18  ;;  %v379_v19 = vld [vmem:[%s4332_s5 + $0x298] sm:$0xf] }
  0x4b   : > { %v381_v20 = vld [vmem:[%s4332_s5 + $0x2a0] sm:$0xf]  ;;  %v383_v21 = vld [vmem:[%s4332_s5 + $0x2a8] sm:$0xf]  ;;  %380 = vst [vmem:[%s4339_s6 + $0x14c] sm:$0xf] %v379_v19 }
  0x4c   : > { %382 = vst [vmem:[%s4339_s6 + $0x150] sm:$0xf] %v381_v20  ;;  %384 = vst [vmem:[%s4339_s6 + $0x154] sm:$0xf] %v383_v21  ;;  %v385_v22 = vld [vmem:[%s4332_s5 + $0x2b0] sm:$0xf] }
  0x4d   : > { %v387_v23 = vld [vmem:[%s4332_s5 + $0x2b8] sm:$0xf]  ;;  %v389_v24 = vld [vmem:[%s4332_s5 + $0x2c0] sm:$0xf]  ;;  %386 = vst [vmem:[%s4339_s6 + $0x158] sm:$0xf] %v385_v22 }
  0x4e   : > { %388 = vst [vmem:[%s4339_s6 + $0x15c] sm:$0xf] %v387_v23  ;;  %390 = vst [vmem:[%s4339_s6 + $0x160] sm:$0xf] %v389_v24  ;;  %v391_v25 = vld [vmem:[%s4332_s5 + $0x2c8] sm:$0xf] }
  0x4f   : > { %v393_v26 = vld [vmem:[%s4332_s5 + $0x2d0] sm:$0xf]  ;;  %v395_v27 = vld [vmem:[%s4332_s5 + $0x2d8] sm:$0xf]  ;;  %392 = vst [vmem:[%s4339_s6 + $0x164] sm:$0xf] %v391_v25 }
  0x50   : > { %394 = vst [vmem:[%s4339_s6 + $0x168] sm:$0xf] %v393_v26  ;;  %396 = vst [vmem:[%s4339_s6 + $0x16c] sm:$0xf] %v395_v27  ;;  %v397_v28 = vld [vmem:[%s4332_s5 + $0x2e0] sm:$0xf] }
  0x51   : > { %v399_v29 = vld [vmem:[%s4332_s5 + $0x2e8] sm:$0xf]  ;;  %v401_v30 = vld [vmem:[%s4332_s5 + $0x2f0] sm:$0xf]  ;;  %398 = vst [vmem:[%s4339_s6 + $0x170] sm:$0xf] %v397_v28 }
  0x52   : > { %400 = vst [vmem:[%s4339_s6 + $0x174] sm:$0xf] %v399_v29  ;;  %402 = vst [vmem:[%s4339_s6 + $0x178] sm:$0xf] %v401_v30  ;;  %v403_v31 = vld [vmem:[%s4332_s5 + $0x2f8] sm:$0xf] }
  0x53   : > { %v405_v32 = vld [vmem:[%s4332_s5 + $0x300] sm:$0xf]  ;;  %v407_v33 = vld [vmem:[%s4332_s5 + $0x308] sm:$0xf]  ;;  %404 = vst [vmem:[%s4339_s6 + $0x17c] sm:$0xf] %v403_v31 }
  0x54   : > { %406 = vst [vmem:[%s4339_s6 + $0x180] sm:$0xf] %v405_v32  ;;  %408 = vst [vmem:[%s4339_s6 + $0x184] sm:$0xf] %v407_v33  ;;  %v409_v34 = vld [vmem:[%s4332_s5 + $0x310] sm:$0xf] }
  0x55   : > { %v411_v35 = vld [vmem:[%s4332_s5 + $0x318] sm:$0xf]  ;;  %v413_v36 = vld [vmem:[%s4332_s5 + $0x320] sm:$0xf]  ;;  %410 = vst [vmem:[%s4339_s6 + $0x188] sm:$0xf] %v409_v34 }
  0x56   : > { %412 = vst [vmem:[%s4339_s6 + $0x18c] sm:$0xf] %v411_v35  ;;  %414 = vst [vmem:[%s4339_s6 + $0x190] sm:$0xf] %v413_v36  ;;  %v415_v37 = vld [vmem:[%s4332_s5 + $0x328] sm:$0xf] }
  0x57   : > { %v417_v38 = vld [vmem:[%s4332_s5 + $0x330] sm:$0xf]  ;;  %v419_v39 = vld [vmem:[%s4332_s5 + $0x338] sm:$0xf]  ;;  %416 = vst [vmem:[%s4339_s6 + $0x194] sm:$0xf] %v415_v37 }
  0x58   : > { %418 = vst [vmem:[%s4339_s6 + $0x198] sm:$0xf] %v417_v38  ;;  %420 = vst [vmem:[%s4339_s6 + $0x19c] sm:$0xf] %v419_v39  ;;  %v421_v40 = vld [vmem:[%s4332_s5 + $0x340] sm:$0xf] }
  0x59   : > { %v423_v41 = vld [vmem:[%s4332_s5 + $0x348] sm:$0xf]  ;;  %v425_v42 = vld [vmem:[%s4332_s5 + $0x350] sm:$0xf]  ;;  %422 = vst [vmem:[%s4339_s6 + $0x1a0] sm:$0xf] %v421_v40 }
  0x5a   : > { %424 = vst [vmem:[%s4339_s6 + $0x1a4] sm:$0xf] %v423_v41  ;;  %426 = vst [vmem:[%s4339_s6 + $0x1a8] sm:$0xf] %v425_v42  ;;  %v427_v43 = vld [vmem:[%s4332_s5 + $0x358] sm:$0xf] }
  0x5b   : > { %v429_v44 = vld [vmem:[%s4332_s5 + $0x360] sm:$0xf]  ;;  %v431_v45 = vld [vmem:[%s4332_s5 + $0x368] sm:$0xf]  ;;  %428 = vst [vmem:[%s4339_s6 + $0x1ac] sm:$0xf] %v427_v43 }
  0x5c   : > { %430 = vst [vmem:[%s4339_s6 + $0x1b0] sm:$0xf] %v429_v44  ;;  %432 = vst [vmem:[%s4339_s6 + $0x1b4] sm:$0xf] %v431_v45  ;;  %v433_v46 = vld [vmem:[%s4332_s5 + $0x370] sm:$0xf] }
  0x5d   : > { %v435_v47 = vld [vmem:[%s4332_s5 + $0x378] sm:$0xf]  ;;  %v437_v48 = vld [vmem:[%s4332_s5 + $0x380] sm:$0xf]  ;;  %434 = vst [vmem:[%s4339_s6 + $0x1b8] sm:$0xf] %v433_v46 }
  0x5e   : > { %436 = vst [vmem:[%s4339_s6 + $0x1bc] sm:$0xf] %v435_v47  ;;  %438 = vst [vmem:[%s4339_s6 + $0x1c0] sm:$0xf] %v437_v48  ;;  %v439_v49 = vld [vmem:[%s4332_s5 + $0x388] sm:$0xf] }
  0x5f   : > { %v441_v50 = vld [vmem:[%s4332_s5 + $0x390] sm:$0xf]  ;;  %v443_v51 = vld [vmem:[%s4332_s5 + $0x398] sm:$0xf]  ;;  %440 = vst [vmem:[%s4339_s6 + $0x1c4] sm:$0xf] %v439_v49 }
  0x60   : > { %442 = vst [vmem:[%s4339_s6 + $0x1c8] sm:$0xf] %v441_v50  ;;  %444 = vst [vmem:[%s4339_s6 + $0x1cc] sm:$0xf] %v443_v51  ;;  %v445_v52 = vld [vmem:[%s4332_s5 + $0x3a0] sm:$0xf] }
  0x61   : > { %v447_v53 = vld [vmem:[%s4332_s5 + $0x3a8] sm:$0xf]  ;;  %v449_v54 = vld [vmem:[%s4332_s5 + $0x3b0] sm:$0xf]  ;;  %446 = vst [vmem:[%s4339_s6 + $0x1d0] sm:$0xf] %v445_v52 }
  0x62   : > { %448 = vst [vmem:[%s4339_s6 + $0x1d4] sm:$0xf] %v447_v53  ;;  %450 = vst [vmem:[%s4339_s6 + $0x1d8] sm:$0xf] %v449_v54  ;;  %v451_v55 = vld [vmem:[%s4332_s5 + $0x3b8] sm:$0xf] }
  0x63   : > { %v453_v56 = vld [vmem:[%s4332_s5 + $0x3c0] sm:$0xf]  ;;  %v455_v57 = vld [vmem:[%s4332_s5 + $0x3c8] sm:$0xf]  ;;  %452 = vst [vmem:[%s4339_s6 + $0x1dc] sm:$0xf] %v451_v55 }
  0x64   : > { %454 = vst [vmem:[%s4339_s6 + $0x1e0] sm:$0xf] %v453_v56  ;;  %456 = vst [vmem:[%s4339_s6 + $0x1e4] sm:$0xf] %v455_v57  ;;  %v457_v58 = vld [vmem:[%s4332_s5 + $0x3d0] sm:$0xf] }
  0x65   : > { %v459_v59 = vld [vmem:[%s4332_s5 + $0x3d8] sm:$0xf]  ;;  %v461_v60 = vld [vmem:[%s4332_s5 + $0x3e0] sm:$0xf]  ;;  %458 = vst [vmem:[%s4339_s6 + $0x1e8] sm:$0xf] %v457_v58 }
  0x66   : > { %460 = vst [vmem:[%s4339_s6 + $0x1ec] sm:$0xf] %v459_v59  ;;  %462 = vst [vmem:[%s4339_s6 + $0x1f0] sm:$0xf] %v461_v60  ;;  %v463_v61 = vld [vmem:[%s4332_s5 + $0x3e8] sm:$0xf] }
  0x67   : > { %v465_v62 = vld [vmem:[%s4332_s5 + $0x3f0] sm:$0xf]  ;;  %v467_v63 = vld [vmem:[%s4332_s5 + $0x3f8] sm:$0xf]  ;;  %464 = vst [vmem:[%s4339_s6 + $0x1f4] sm:$0xf] %v463_v61 }
  0x68   : > { %466 = vst [vmem:[%s4339_s6 + $0x1f8] sm:$0xf] %v465_v62  ;;  %468 = vst [vmem:[%s4339_s6 + $0x1fc] sm:$0xf] %v467_v63  ;;  %v469_v0 = vld [vmem:[%s4332_s5 + $0x400] sm:$0xf] }
  0x69   : > { %v471_v1 = vld [vmem:[%s4332_s5 + $0x408] sm:$0xf]  ;;  %v473_v2 = vld [vmem:[%s4332_s5 + $0x410] sm:$0xf]  ;;  %470 = vst [vmem:[%s4339_s6 + $0x200] sm:$0xf] %v469_v0 }
  0x6a   : > { %472 = vst [vmem:[%s4339_s6 + $0x204] sm:$0xf] %v471_v1  ;;  %474 = vst [vmem:[%s4339_s6 + $0x208] sm:$0xf] %v473_v2  ;;  %v475_v3 = vld [vmem:[%s4332_s5 + $0x418] sm:$0xf] }
  0x6b   : > { %v477_v4 = vld [vmem:[%s4332_s5 + $0x420] sm:$0xf]  ;;  %v479_v5 = vld [vmem:[%s4332_s5 + $0x428] sm:$0xf]  ;;  %476 = vst [vmem:[%s4339_s6 + $0x20c] sm:$0xf] %v475_v3 }
  0x6c   : > { %478 = vst [vmem:[%s4339_s6 + $0x210] sm:$0xf] %v477_v4  ;;  %480 = vst [vmem:[%s4339_s6 + $0x214] sm:$0xf] %v479_v5  ;;  %v481_v6 = vld [vmem:[%s4332_s5 + $0x430] sm:$0xf] }
  0x6d   : > { %v483_v7 = vld [vmem:[%s4332_s5 + $0x438] sm:$0xf]  ;;  %v485_v8 = vld [vmem:[%s4332_s5 + $0x440] sm:$0xf]  ;;  %482 = vst [vmem:[%s4339_s6 + $0x218] sm:$0xf] %v481_v6 }
  0x6e   : > { %484 = vst [vmem:[%s4339_s6 + $0x21c] sm:$0xf] %v483_v7  ;;  %486 = vst [vmem:[%s4339_s6 + $0x220] sm:$0xf] %v485_v8  ;;  %v487_v9 = vld [vmem:[%s4332_s5 + $0x448] sm:$0xf] }
  0x6f   : > { %v489_v10 = vld [vmem:[%s4332_s5 + $0x450] sm:$0xf]  ;;  %v491_v11 = vld [vmem:[%s4332_s5 + $0x458] sm:$0xf]  ;;  %488 = vst [vmem:[%s4339_s6 + $0x224] sm:$0xf] %v487_v9 }
  0x70   : > { %490 = vst [vmem:[%s4339_s6 + $0x228] sm:$0xf] %v489_v10  ;;  %492 = vst [vmem:[%s4339_s6 + $0x22c] sm:$0xf] %v491_v11  ;;  %v493_v12 = vld [vmem:[%s4332_s5 + $0x460] sm:$0xf] }
  0x71   : > { %v495_v13 = vld [vmem:[%s4332_s5 + $0x468] sm:$0xf]  ;;  %v497_v14 = vld [vmem:[%s4332_s5 + $0x470] sm:$0xf]  ;;  %494 = vst [vmem:[%s4339_s6 + $0x230] sm:$0xf] %v493_v12 }
  0x72   : > { %496 = vst [vmem:[%s4339_s6 + $0x234] sm:$0xf] %v495_v13  ;;  %498 = vst [vmem:[%s4339_s6 + $0x238] sm:$0xf] %v497_v14  ;;  %v499_v15 = vld [vmem:[%s4332_s5 + $0x478] sm:$0xf] }
  0x73   : > { %v501_v16 = vld [vmem:[%s4332_s5 + $0x480] sm:$0xf]  ;;  %v503_v17 = vld [vmem:[%s4332_s5 + $0x488] sm:$0xf]  ;;  %500 = vst [vmem:[%s4339_s6 + $0x23c] sm:$0xf] %v499_v15 }
  0x74   : > { %502 = vst [vmem:[%s4339_s6 + $0x240] sm:$0xf] %v501_v16  ;;  %504 = vst [vmem:[%s4339_s6 + $0x244] sm:$0xf] %v503_v17  ;;  %v505_v18 = vld [vmem:[%s4332_s5 + $0x490] sm:$0xf] }
  0x75   : > { %v507_v19 = vld [vmem:[%s4332_s5 + $0x498] sm:$0xf]  ;;  %v509_v20 = vld [vmem:[%s4332_s5 + $0x4a0] sm:$0xf]  ;;  %506 = vst [vmem:[%s4339_s6 + $0x248] sm:$0xf] %v505_v18 }
  0x76   : > { %508 = vst [vmem:[%s4339_s6 + $0x24c] sm:$0xf] %v507_v19  ;;  %510 = vst [vmem:[%s4339_s6 + $0x250] sm:$0xf] %v509_v20  ;;  %v511_v21 = vld [vmem:[%s4332_s5 + $0x4a8] sm:$0xf] }
  0x77   : > { %v513_v22 = vld [vmem:[%s4332_s5 + $0x4b0] sm:$0xf]  ;;  %v515_v23 = vld [vmem:[%s4332_s5 + $0x4b8] sm:$0xf]  ;;  %512 = vst [vmem:[%s4339_s6 + $0x254] sm:$0xf] %v511_v21 }
  0x78   : > { %514 = vst [vmem:[%s4339_s6 + $0x258] sm:$0xf] %v513_v22  ;;  %516 = vst [vmem:[%s4339_s6 + $0x25c] sm:$0xf] %v515_v23  ;;  %v517_v24 = vld [vmem:[%s4332_s5 + $0x4c0] sm:$0xf] }
  0x79   : > { %v519_v25 = vld [vmem:[%s4332_s5 + $0x4c8] sm:$0xf]  ;;  %v521_v26 = vld [vmem:[%s4332_s5 + $0x4d0] sm:$0xf]  ;;  %518 = vst [vmem:[%s4339_s6 + $0x260] sm:$0xf] %v517_v24 }
  0x7a   : > { %520 = vst [vmem:[%s4339_s6 + $0x264] sm:$0xf] %v519_v25  ;;  %522 = vst [vmem:[%s4339_s6 + $0x268] sm:$0xf] %v521_v26  ;;  %v523_v27 = vld [vmem:[%s4332_s5 + $0x4d8] sm:$0xf] }
  0x7b   : > { %v525_v28 = vld [vmem:[%s4332_s5 + $0x4e0] sm:$0xf]  ;;  %v527_v29 = vld [vmem:[%s4332_s5 + $0x4e8] sm:$0xf]  ;;  %524 = vst [vmem:[%s4339_s6 + $0x26c] sm:$0xf] %v523_v27 }
  0x7c   : > { %526 = vst [vmem:[%s4339_s6 + $0x270] sm:$0xf] %v525_v28  ;;  %528 = vst [vmem:[%s4339_s6 + $0x274] sm:$0xf] %v527_v29  ;;  %v529_v30 = vld [vmem:[%s4332_s5 + $0x4f0] sm:$0xf] }
  0x7d   : > { %v531_v31 = vld [vmem:[%s4332_s5 + $0x4f8] sm:$0xf]  ;;  %v533_v32 = vld [vmem:[%s4332_s5 + $0x500] sm:$0xf]  ;;  %530 = vst [vmem:[%s4339_s6 + $0x278] sm:$0xf] %v529_v30 }
  0x7e   : > { %532 = vst [vmem:[%s4339_s6 + $0x27c] sm:$0xf] %v531_v31  ;;  %534 = vst [vmem:[%s4339_s6 + $0x280] sm:$0xf] %v533_v32  ;;  %v535_v33 = vld [vmem:[%s4332_s5 + $0x508] sm:$0xf] }
  0x7f   : > { %v537_v34 = vld [vmem:[%s4332_s5 + $0x510] sm:$0xf]  ;;  %v539_v35 = vld [vmem:[%s4332_s5 + $0x518] sm:$0xf]  ;;  %536 = vst [vmem:[%s4339_s6 + $0x284] sm:$0xf] %v535_v33 }
  0x80   : > { %538 = vst [vmem:[%s4339_s6 + $0x288] sm:$0xf] %v537_v34  ;;  %540 = vst [vmem:[%s4339_s6 + $0x28c] sm:$0xf] %v539_v35  ;;  %v541_v36 = vld [vmem:[%s4332_s5 + $0x520] sm:$0xf] }
  0x81   : > { %v543_v37 = vld [vmem:[%s4332_s5 + $0x528] sm:$0xf]  ;;  %v545_v38 = vld [vmem:[%s4332_s5 + $0x530] sm:$0xf]  ;;  %542 = vst [vmem:[%s4339_s6 + $0x290] sm:$0xf] %v541_v36 }
  0x82   : > { %544 = vst [vmem:[%s4339_s6 + $0x294] sm:$0xf] %v543_v37  ;;  %546 = vst [vmem:[%s4339_s6 + $0x298] sm:$0xf] %v545_v38  ;;  %v547_v39 = vld [vmem:[%s4332_s5 + $0x538] sm:$0xf] }
  0x83   : > { %v549_v40 = vld [vmem:[%s4332_s5 + $0x540] sm:$0xf]  ;;  %v551_v41 = vld [vmem:[%s4332_s5 + $0x548] sm:$0xf]  ;;  %548 = vst [vmem:[%s4339_s6 + $0x29c] sm:$0xf] %v547_v39 }
  0x84   : > { %550 = vst [vmem:[%s4339_s6 + $0x2a0] sm:$0xf] %v549_v40  ;;  %552 = vst [vmem:[%s4339_s6 + $0x2a4] sm:$0xf] %v551_v41  ;;  %v553_v42 = vld [vmem:[%s4332_s5 + $0x550] sm:$0xf] }
  0x85   : > { %v555_v43 = vld [vmem:[%s4332_s5 + $0x558] sm:$0xf]  ;;  %v557_v44 = vld [vmem:[%s4332_s5 + $0x560] sm:$0xf]  ;;  %554 = vst [vmem:[%s4339_s6 + $0x2a8] sm:$0xf] %v553_v42 }
  0x86   : > { %556 = vst [vmem:[%s4339_s6 + $0x2ac] sm:$0xf] %v555_v43  ;;  %558 = vst [vmem:[%s4339_s6 + $0x2b0] sm:$0xf] %v557_v44  ;;  %v559_v45 = vld [vmem:[%s4332_s5 + $0x568] sm:$0xf] }
  0x87   : > { %v561_v46 = vld [vmem:[%s4332_s5 + $0x570] sm:$0xf]  ;;  %v563_v47 = vld [vmem:[%s4332_s5 + $0x578] sm:$0xf]  ;;  %560 = vst [vmem:[%s4339_s6 + $0x2b4] sm:$0xf] %v559_v45 }
  0x88   : > { %562 = vst [vmem:[%s4339_s6 + $0x2b8] sm:$0xf] %v561_v46  ;;  %564 = vst [vmem:[%s4339_s6 + $0x2bc] sm:$0xf] %v563_v47  ;;  %v565_v48 = vld [vmem:[%s4332_s5 + $0x580] sm:$0xf] }
  0x89   : > { %v567_v49 = vld [vmem:[%s4332_s5 + $0x588] sm:$0xf]  ;;  %v569_v50 = vld [vmem:[%s4332_s5 + $0x590] sm:$0xf]  ;;  %566 = vst [vmem:[%s4339_s6 + $0x2c0] sm:$0xf] %v565_v48 }
  0x8a   : > { %568 = vst [vmem:[%s4339_s6 + $0x2c4] sm:$0xf] %v567_v49  ;;  %570 = vst [vmem:[%s4339_s6 + $0x2c8] sm:$0xf] %v569_v50  ;;  %v571_v51 = vld [vmem:[%s4332_s5 + $0x598] sm:$0xf] }
  0x8b   : > { %v573_v52 = vld [vmem:[%s4332_s5 + $0x5a0] sm:$0xf]  ;;  %v575_v53 = vld [vmem:[%s4332_s5 + $0x5a8] sm:$0xf]  ;;  %572 = vst [vmem:[%s4339_s6 + $0x2cc] sm:$0xf] %v571_v51 }
  0x8c   : > { %574 = vst [vmem:[%s4339_s6 + $0x2d0] sm:$0xf] %v573_v52  ;;  %576 = vst [vmem:[%s4339_s6 + $0x2d4] sm:$0xf] %v575_v53  ;;  %v577_v54 = vld [vmem:[%s4332_s5 + $0x5b0] sm:$0xf] }
  0x8d   : > { %v579_v55 = vld [vmem:[%s4332_s5 + $0x5b8] sm:$0xf]  ;;  %v581_v56 = vld [vmem:[%s4332_s5 + $0x5c0] sm:$0xf]  ;;  %578 = vst [vmem:[%s4339_s6 + $0x2d8] sm:$0xf] %v577_v54 }
  0x8e   : > { %580 = vst [vmem:[%s4339_s6 + $0x2dc] sm:$0xf] %v579_v55  ;;  %582 = vst [vmem:[%s4339_s6 + $0x2e0] sm:$0xf] %v581_v56  ;;  %v583_v57 = vld [vmem:[%s4332_s5 + $0x5c8] sm:$0xf] }
  0x8f   : > { %v585_v58 = vld [vmem:[%s4332_s5 + $0x5d0] sm:$0xf]  ;;  %v587_v59 = vld [vmem:[%s4332_s5 + $0x5d8] sm:$0xf]  ;;  %584 = vst [vmem:[%s4339_s6 + $0x2e4] sm:$0xf] %v583_v57 }
  0x90   : > { %586 = vst [vmem:[%s4339_s6 + $0x2e8] sm:$0xf] %v585_v58  ;;  %588 = vst [vmem:[%s4339_s6 + $0x2ec] sm:$0xf] %v587_v59  ;;  %v589_v60 = vld [vmem:[%s4332_s5 + $0x5e0] sm:$0xf] }
  0x91   : > { %v591_v61 = vld [vmem:[%s4332_s5 + $0x5e8] sm:$0xf]  ;;  %v593_v62 = vld [vmem:[%s4332_s5 + $0x5f0] sm:$0xf]  ;;  %590 = vst [vmem:[%s4339_s6 + $0x2f0] sm:$0xf] %v589_v60 }
  0x92   : > { %592 = vst [vmem:[%s4339_s6 + $0x2f4] sm:$0xf] %v591_v61  ;;  %594 = vst [vmem:[%s4339_s6 + $0x2f8] sm:$0xf] %v593_v62  ;;  %v595_v63 = vld [vmem:[%s4332_s5 + $0x5f8] sm:$0xf] }
  0x93   : > { %v597_v0 = vld [vmem:[%s4332_s5 + $0x600] sm:$0xf]  ;;  %v599_v1 = vld [vmem:[%s4332_s5 + $0x608] sm:$0xf]  ;;  %596 = vst [vmem:[%s4339_s6 + $0x2fc] sm:$0xf] %v595_v63 }
  0x94   : > { %598 = vst [vmem:[%s4339_s6 + $0x300] sm:$0xf] %v597_v0  ;;  %600 = vst [vmem:[%s4339_s6 + $0x304] sm:$0xf] %v599_v1  ;;  %v601_v2 = vld [vmem:[%s4332_s5 + $0x610] sm:$0xf] }
  0x95   : > { %v603_v3 = vld [vmem:[%s4332_s5 + $0x618] sm:$0xf]  ;;  %v605_v4 = vld [vmem:[%s4332_s5 + $0x620] sm:$0xf]  ;;  %602 = vst [vmem:[%s4339_s6 + $0x308] sm:$0xf] %v601_v2 }
  0x96   : > { %604 = vst [vmem:[%s4339_s6 + $0x30c] sm:$0xf] %v603_v3  ;;  %606 = vst [vmem:[%s4339_s6 + $0x310] sm:$0xf] %v605_v4  ;;  %v607_v5 = vld [vmem:[%s4332_s5 + $0x628] sm:$0xf] }
  0x97   : > { %v609_v6 = vld [vmem:[%s4332_s5 + $0x630] sm:$0xf]  ;;  %v611_v7 = vld [vmem:[%s4332_s5 + $0x638] sm:$0xf]  ;;  %608 = vst [vmem:[%s4339_s6 + $0x314] sm:$0xf] %v607_v5 }
  0x98   : > { %610 = vst [vmem:[%s4339_s6 + $0x318] sm:$0xf] %v609_v6  ;;  %612 = vst [vmem:[%s4339_s6 + $0x31c] sm:$0xf] %v611_v7  ;;  %v613_v8 = vld [vmem:[%s4332_s5 + $0x640] sm:$0xf] }
  0x99   : > { %v615_v9 = vld [vmem:[%s4332_s5 + $0x648] sm:$0xf]  ;;  %v617_v10 = vld [vmem:[%s4332_s5 + $0x650] sm:$0xf]  ;;  %614 = vst [vmem:[%s4339_s6 + $0x320] sm:$0xf] %v613_v8 }
  0x9a   : > { %616 = vst [vmem:[%s4339_s6 + $0x324] sm:$0xf] %v615_v9  ;;  %618 = vst [vmem:[%s4339_s6 + $0x328] sm:$0xf] %v617_v10  ;;  %v619_v11 = vld [vmem:[%s4332_s5 + $0x658] sm:$0xf] }
  0x9b   : > { %v621_v12 = vld [vmem:[%s4332_s5 + $0x660] sm:$0xf]  ;;  %v623_v13 = vld [vmem:[%s4332_s5 + $0x668] sm:$0xf]  ;;  %620 = vst [vmem:[%s4339_s6 + $0x32c] sm:$0xf] %v619_v11 }
  0x9c   : > { %622 = vst [vmem:[%s4339_s6 + $0x330] sm:$0xf] %v621_v12  ;;  %624 = vst [vmem:[%s4339_s6 + $0x334] sm:$0xf] %v623_v13  ;;  %v625_v14 = vld [vmem:[%s4332_s5 + $0x670] sm:$0xf] }
  0x9d   : > { %v627_v15 = vld [vmem:[%s4332_s5 + $0x678] sm:$0xf]  ;;  %v629_v16 = vld [vmem:[%s4332_s5 + $0x680] sm:$0xf]  ;;  %626 = vst [vmem:[%s4339_s6 + $0x338] sm:$0xf] %v625_v14 }
  0x9e   : > { %628 = vst [vmem:[%s4339_s6 + $0x33c] sm:$0xf] %v627_v15  ;;  %630 = vst [vmem:[%s4339_s6 + $0x340] sm:$0xf] %v629_v16  ;;  %v631_v17 = vld [vmem:[%s4332_s5 + $0x688] sm:$0xf] }
  0x9f   : > { %v633_v18 = vld [vmem:[%s4332_s5 + $0x690] sm:$0xf]  ;;  %v635_v19 = vld [vmem:[%s4332_s5 + $0x698] sm:$0xf]  ;;  %632 = vst [vmem:[%s4339_s6 + $0x344] sm:$0xf] %v631_v17 }
  0xa0   : > { %634 = vst [vmem:[%s4339_s6 + $0x348] sm:$0xf] %v633_v18  ;;  %636 = vst [vmem:[%s4339_s6 + $0x34c] sm:$0xf] %v635_v19  ;;  %v637_v20 = vld [vmem:[%s4332_s5 + $0x6a0] sm:$0xf] }
  0xa1   : > { %v639_v21 = vld [vmem:[%s4332_s5 + $0x6a8] sm:$0xf]  ;;  %v641_v22 = vld [vmem:[%s4332_s5 + $0x6b0] sm:$0xf]  ;;  %638 = vst [vmem:[%s4339_s6 + $0x350] sm:$0xf] %v637_v20 }
  0xa2   : > { %640 = vst [vmem:[%s4339_s6 + $0x354] sm:$0xf] %v639_v21  ;;  %642 = vst [vmem:[%s4339_s6 + $0x358] sm:$0xf] %v641_v22  ;;  %v643_v23 = vld [vmem:[%s4332_s5 + $0x6b8] sm:$0xf] }
  0xa3   : > { %v645_v24 = vld [vmem:[%s4332_s5 + $0x6c0] sm:$0xf]  ;;  %v647_v25 = vld [vmem:[%s4332_s5 + $0x6c8] sm:$0xf]  ;;  %644 = vst [vmem:[%s4339_s6 + $0x35c] sm:$0xf] %v643_v23 }
  0xa4   : > { %646 = vst [vmem:[%s4339_s6 + $0x360] sm:$0xf] %v645_v24  ;;  %648 = vst [vmem:[%s4339_s6 + $0x364] sm:$0xf] %v647_v25  ;;  %v649_v26 = vld [vmem:[%s4332_s5 + $0x6d0] sm:$0xf] }
  0xa5   : > { %v651_v27 = vld [vmem:[%s4332_s5 + $0x6d8] sm:$0xf]  ;;  %v653_v28 = vld [vmem:[%s4332_s5 + $0x6e0] sm:$0xf]  ;;  %650 = vst [vmem:[%s4339_s6 + $0x368] sm:$0xf] %v649_v26 }
  0xa6   : > { %652 = vst [vmem:[%s4339_s6 + $0x36c] sm:$0xf] %v651_v27  ;;  %654 = vst [vmem:[%s4339_s6 + $0x370] sm:$0xf] %v653_v28  ;;  %v655_v29 = vld [vmem:[%s4332_s5 + $0x6e8] sm:$0xf] }
  0xa7   : > { %v657_v30 = vld [vmem:[%s4332_s5 + $0x6f0] sm:$0xf]  ;;  %v659_v31 = vld [vmem:[%s4332_s5 + $0x6f8] sm:$0xf]  ;;  %656 = vst [vmem:[%s4339_s6 + $0x374] sm:$0xf] %v655_v29 }
  0xa8   : > { %658 = vst [vmem:[%s4339_s6 + $0x378] sm:$0xf] %v657_v30  ;;  %660 = vst [vmem:[%s4339_s6 + $0x37c] sm:$0xf] %v659_v31  ;;  %v661_v32 = vld [vmem:[%s4332_s5 + $0x700] sm:$0xf] }
  0xa9   : > { %v663_v33 = vld [vmem:[%s4332_s5 + $0x708] sm:$0xf]  ;;  %v665_v34 = vld [vmem:[%s4332_s5 + $0x710] sm:$0xf]  ;;  %662 = vst [vmem:[%s4339_s6 + $0x380] sm:$0xf] %v661_v32 }
  0xaa   : > { %664 = vst [vmem:[%s4339_s6 + $0x384] sm:$0xf] %v663_v33  ;;  %666 = vst [vmem:[%s4339_s6 + $0x388] sm:$0xf] %v665_v34  ;;  %v667_v35 = vld [vmem:[%s4332_s5 + $0x718] sm:$0xf] }
  0xab   : > { %v669_v36 = vld [vmem:[%s4332_s5 + $0x720] sm:$0xf]  ;;  %v671_v37 = vld [vmem:[%s4332_s5 + $0x728] sm:$0xf]  ;;  %668 = vst [vmem:[%s4339_s6 + $0x38c] sm:$0xf] %v667_v35 }
  0xac   : > { %670 = vst [vmem:[%s4339_s6 + $0x390] sm:$0xf] %v669_v36  ;;  %672 = vst [vmem:[%s4339_s6 + $0x394] sm:$0xf] %v671_v37  ;;  %v673_v38 = vld [vmem:[%s4332_s5 + $0x730] sm:$0xf] }
  0xad   : > { %v675_v39 = vld [vmem:[%s4332_s5 + $0x738] sm:$0xf]  ;;  %v677_v40 = vld [vmem:[%s4332_s5 + $0x740] sm:$0xf]  ;;  %674 = vst [vmem:[%s4339_s6 + $0x398] sm:$0xf] %v673_v38 }
  0xae   : > { %676 = vst [vmem:[%s4339_s6 + $0x39c] sm:$0xf] %v675_v39  ;;  %678 = vst [vmem:[%s4339_s6 + $0x3a0] sm:$0xf] %v677_v40  ;;  %v679_v41 = vld [vmem:[%s4332_s5 + $0x748] sm:$0xf] }
  0xaf   : > { %v681_v42 = vld [vmem:[%s4332_s5 + $0x750] sm:$0xf]  ;;  %v683_v43 = vld [vmem:[%s4332_s5 + $0x758] sm:$0xf]  ;;  %680 = vst [vmem:[%s4339_s6 + $0x3a4] sm:$0xf] %v679_v41 }
  0xb0   : > { %682 = vst [vmem:[%s4339_s6 + $0x3a8] sm:$0xf] %v681_v42  ;;  %684 = vst [vmem:[%s4339_s6 + $0x3ac] sm:$0xf] %v683_v43  ;;  %v685_v44 = vld [vmem:[%s4332_s5 + $0x760] sm:$0xf] }
  0xb1   : > { %v687_v45 = vld [vmem:[%s4332_s5 + $0x768] sm:$0xf]  ;;  %v689_v46 = vld [vmem:[%s4332_s5 + $0x770] sm:$0xf]  ;;  %686 = vst [vmem:[%s4339_s6 + $0x3b0] sm:$0xf] %v685_v44 }
  0xb2   : > { %688 = vst [vmem:[%s4339_s6 + $0x3b4] sm:$0xf] %v687_v45  ;;  %690 = vst [vmem:[%s4339_s6 + $0x3b8] sm:$0xf] %v689_v46  ;;  %v691_v47 = vld [vmem:[%s4332_s5 + $0x778] sm:$0xf] }
  0xb3   : > { %v693_v48 = vld [vmem:[%s4332_s5 + $0x780] sm:$0xf]  ;;  %v695_v49 = vld [vmem:[%s4332_s5 + $0x788] sm:$0xf]  ;;  %692 = vst [vmem:[%s4339_s6 + $0x3bc] sm:$0xf] %v691_v47 }
  0xb4   : > { %694 = vst [vmem:[%s4339_s6 + $0x3c0] sm:$0xf] %v693_v48  ;;  %696 = vst [vmem:[%s4339_s6 + $0x3c4] sm:$0xf] %v695_v49  ;;  %v697_v50 = vld [vmem:[%s4332_s5 + $0x790] sm:$0xf] }
  0xb5   : > { %v699_v51 = vld [vmem:[%s4332_s5 + $0x798] sm:$0xf]  ;;  %v701_v52 = vld [vmem:[%s4332_s5 + $0x7a0] sm:$0xf]  ;;  %698 = vst [vmem:[%s4339_s6 + $0x3c8] sm:$0xf] %v697_v50 }
  0xb6   : > { %700 = vst [vmem:[%s4339_s6 + $0x3cc] sm:$0xf] %v699_v51  ;;  %702 = vst [vmem:[%s4339_s6 + $0x3d0] sm:$0xf] %v701_v52  ;;  %v703_v53 = vld [vmem:[%s4332_s5 + $0x7a8] sm:$0xf] }
  0xb7   : > { %v705_v54 = vld [vmem:[%s4332_s5 + $0x7b0] sm:$0xf]  ;;  %v707_v55 = vld [vmem:[%s4332_s5 + $0x7b8] sm:$0xf]  ;;  %704 = vst [vmem:[%s4339_s6 + $0x3d4] sm:$0xf] %v703_v53 }
  0xb8   : > { %706 = vst [vmem:[%s4339_s6 + $0x3d8] sm:$0xf] %v705_v54  ;;  %708 = vst [vmem:[%s4339_s6 + $0x3dc] sm:$0xf] %v707_v55  ;;  %v709_v56 = vld [vmem:[%s4332_s5 + $0x7c0] sm:$0xf] }
  0xb9   : > { %v711_v57 = vld [vmem:[%s4332_s5 + $0x7c8] sm:$0xf]  ;;  %v713_v58 = vld [vmem:[%s4332_s5 + $0x7d0] sm:$0xf]  ;;  %710 = vst [vmem:[%s4339_s6 + $0x3e0] sm:$0xf] %v709_v56 }
  0xba   : > { %712 = vst [vmem:[%s4339_s6 + $0x3e4] sm:$0xf] %v711_v57  ;;  %714 = vst [vmem:[%s4339_s6 + $0x3e8] sm:$0xf] %v713_v58  ;;  %v715_v59 = vld [vmem:[%s4332_s5 + $0x7d8] sm:$0xf] }
  0xbb   : > { %v717_v60 = vld [vmem:[%s4332_s5 + $0x7e0] sm:$0xf]  ;;  %v719_v61 = vld [vmem:[%s4332_s5 + $0x7e8] sm:$0xf]  ;;  %716 = vst [vmem:[%s4339_s6 + $0x3ec] sm:$0xf] %v715_v59 }
  0xbc   : > { %718 = vst [vmem:[%s4339_s6 + $0x3f0] sm:$0xf] %v717_v60  ;;  %720 = vst [vmem:[%s4339_s6 + $0x3f4] sm:$0xf] %v719_v61  ;;  %v721_v62 = vld [vmem:[%s4332_s5 + $0x7f0] sm:$0xf] }
  0xbd   : > { %v723_v63 = vld [vmem:[%s4332_s5 + $0x7f8] sm:$0xf]  ;;  %v725_v0 = vld [vmem:[%s4332_s5 + $0x800] sm:$0xf]  ;;  %722 = vst [vmem:[%s4339_s6 + $0x3f8] sm:$0xf] %v721_v62 }
  0xbe   : > { %724 = vst [vmem:[%s4339_s6 + $0x3fc] sm:$0xf] %v723_v63  ;;  %726 = vst [vmem:[%s4339_s6 + $0x400] sm:$0xf] %v725_v0  ;;  %v727_v1 = vld [vmem:[%s4332_s5 + $0x808] sm:$0xf] }
  0xbf   : > { %v729_v2 = vld [vmem:[%s4332_s5 + $0x810] sm:$0xf]  ;;  %v731_v3 = vld [vmem:[%s4332_s5 + $0x818] sm:$0xf]  ;;  %728 = vst [vmem:[%s4339_s6 + $0x404] sm:$0xf] %v727_v1 }
  0xc0   : > { %730 = vst [vmem:[%s4339_s6 + $0x408] sm:$0xf] %v729_v2  ;;  %732 = vst [vmem:[%s4339_s6 + $0x40c] sm:$0xf] %v731_v3  ;;  %v733_v4 = vld [vmem:[%s4332_s5 + $0x820] sm:$0xf] }
  0xc1   : > { %v735_v5 = vld [vmem:[%s4332_s5 + $0x828] sm:$0xf]  ;;  %v737_v6 = vld [vmem:[%s4332_s5 + $0x830] sm:$0xf]  ;;  %734 = vst [vmem:[%s4339_s6 + $0x410] sm:$0xf] %v733_v4 }
  0xc2   : > { %736 = vst [vmem:[%s4339_s6 + $0x414] sm:$0xf] %v735_v5  ;;  %738 = vst [vmem:[%s4339_s6 + $0x418] sm:$0xf] %v737_v6  ;;  %v739_v7 = vld [vmem:[%s4332_s5 + $0x838] sm:$0xf] }
  0xc3   : > { %v741_v8 = vld [vmem:[%s4332_s5 + $0x840] sm:$0xf]  ;;  %v743_v9 = vld [vmem:[%s4332_s5 + $0x848] sm:$0xf]  ;;  %740 = vst [vmem:[%s4339_s6 + $0x41c] sm:$0xf] %v739_v7 }
  0xc4   : > { %742 = vst [vmem:[%s4339_s6 + $0x420] sm:$0xf] %v741_v8  ;;  %744 = vst [vmem:[%s4339_s6 + $0x424] sm:$0xf] %v743_v9  ;;  %v745_v10 = vld [vmem:[%s4332_s5 + $0x850] sm:$0xf] }
  0xc5   : > { %v747_v11 = vld [vmem:[%s4332_s5 + $0x858] sm:$0xf]  ;;  %v749_v12 = vld [vmem:[%s4332_s5 + $0x860] sm:$0xf]  ;;  %746 = vst [vmem:[%s4339_s6 + $0x428] sm:$0xf] %v745_v10 }
  0xc6   : > { %748 = vst [vmem:[%s4339_s6 + $0x42c] sm:$0xf] %v747_v11  ;;  %750 = vst [vmem:[%s4339_s6 + $0x430] sm:$0xf] %v749_v12  ;;  %v751_v13 = vld [vmem:[%s4332_s5 + $0x868] sm:$0xf] }
  0xc7   : > { %v753_v14 = vld [vmem:[%s4332_s5 + $0x870] sm:$0xf]  ;;  %v755_v15 = vld [vmem:[%s4332_s5 + $0x878] sm:$0xf]  ;;  %752 = vst [vmem:[%s4339_s6 + $0x434] sm:$0xf] %v751_v13 }
  0xc8   : > { %754 = vst [vmem:[%s4339_s6 + $0x438] sm:$0xf] %v753_v14  ;;  %756 = vst [vmem:[%s4339_s6 + $0x43c] sm:$0xf] %v755_v15  ;;  %v757_v16 = vld [vmem:[%s4332_s5 + $0x880] sm:$0xf] }
  0xc9   : > { %v759_v17 = vld [vmem:[%s4332_s5 + $0x888] sm:$0xf]  ;;  %v761_v18 = vld [vmem:[%s4332_s5 + $0x890] sm:$0xf]  ;;  %758 = vst [vmem:[%s4339_s6 + $0x440] sm:$0xf] %v757_v16 }
  0xca   : > { %760 = vst [vmem:[%s4339_s6 + $0x444] sm:$0xf] %v759_v17  ;;  %762 = vst [vmem:[%s4339_s6 + $0x448] sm:$0xf] %v761_v18  ;;  %v763_v19 = vld [vmem:[%s4332_s5 + $0x898] sm:$0xf] }
  0xcb   : > { %v765_v20 = vld [vmem:[%s4332_s5 + $0x8a0] sm:$0xf]  ;;  %v767_v21 = vld [vmem:[%s4332_s5 + $0x8a8] sm:$0xf]  ;;  %764 = vst [vmem:[%s4339_s6 + $0x44c] sm:$0xf] %v763_v19 }
  0xcc   : > { %766 = vst [vmem:[%s4339_s6 + $0x450] sm:$0xf] %v765_v20  ;;  %768 = vst [vmem:[%s4339_s6 + $0x454] sm:$0xf] %v767_v21  ;;  %v769_v22 = vld [vmem:[%s4332_s5 + $0x8b0] sm:$0xf] }
  0xcd   : > { %v771_v23 = vld [vmem:[%s4332_s5 + $0x8b8] sm:$0xf]  ;;  %v773_v24 = vld [vmem:[%s4332_s5 + $0x8c0] sm:$0xf]  ;;  %770 = vst [vmem:[%s4339_s6 + $0x458] sm:$0xf] %v769_v22 }
  0xce   : > { %772 = vst [vmem:[%s4339_s6 + $0x45c] sm:$0xf] %v771_v23  ;;  %774 = vst [vmem:[%s4339_s6 + $0x460] sm:$0xf] %v773_v24  ;;  %v775_v25 = vld [vmem:[%s4332_s5 + $0x8c8] sm:$0xf] }
  0xcf   : > { %v777_v26 = vld [vmem:[%s4332_s5 + $0x8d0] sm:$0xf]  ;;  %v779_v27 = vld [vmem:[%s4332_s5 + $0x8d8] sm:$0xf]  ;;  %776 = vst [vmem:[%s4339_s6 + $0x464] sm:$0xf] %v775_v25 }
  0xd0   : > { %778 = vst [vmem:[%s4339_s6 + $0x468] sm:$0xf] %v777_v26  ;;  %780 = vst [vmem:[%s4339_s6 + $0x46c] sm:$0xf] %v779_v27  ;;  %v781_v28 = vld [vmem:[%s4332_s5 + $0x8e0] sm:$0xf] }
  0xd1   : > { %v783_v29 = vld [vmem:[%s4332_s5 + $0x8e8] sm:$0xf]  ;;  %v785_v30 = vld [vmem:[%s4332_s5 + $0x8f0] sm:$0xf]  ;;  %782 = vst [vmem:[%s4339_s6 + $0x470] sm:$0xf] %v781_v28 }
  0xd2   : > { %784 = vst [vmem:[%s4339_s6 + $0x474] sm:$0xf] %v783_v29  ;;  %786 = vst [vmem:[%s4339_s6 + $0x478] sm:$0xf] %v785_v30  ;;  %v787_v31 = vld [vmem:[%s4332_s5 + $0x8f8] sm:$0xf] }
  0xd3   : > { %788 = vst [vmem:[%s4339_s6 + $0x47c] sm:$0xf] %v787_v31 }
  0xd4 PF: > { %p3525_p8 = scmp.ge.s32.totalorder %s4257_s19, 1  ;;  %p1387_p9 = scmp.lt.s32.totalorder %s4257_s19, 3 }
  0xd6   : > { %p1388_p10 = pnand %p3525_p8, %p1387_p9 }
  0xd8   : > { %1391 = sbr.rel (%p1388_p10) target bundleno = 611 (0x263), region = 65 }
  0xdd   : > { %s1394_s7 = sand.u32 1, %s4241_s15   ;;  %v4055_v32 = vld [vmem:[%s5230_s0 + $0x4] ss:$72 sps:$4 sm:$0xff]   ;;  %v4053_v0 = vld [vmem:[%s5230_s0] ss:$72 sps:$4 sm:$0xff]   ;;  %p1448_p11 = scmp.lt.s32.totalorder %s4249_s17, 1 }
  0xde   : > { %s3980_s8 = smul.u32 1152, %s1394_s7  ;;  %v4058_v33 = vld [vmem:[%s5230_s0 + $0xc] ss:$72 sps:$4 sm:$0xff]   ;;  %2861 = vmatprep.mubr.bf16.mxu0 %v4055_v32  ;;  %v4056_v2 = vld [vmem:[%s5230_s0 + $0x8] ss:$72 sps:$4 sm:$0xff]   ;;  %s3708_s6 = sshll.u32 (%p4319_p6), %s4249_s17, 3 }
  0xdf   : > { %2910 = vmatprep.mubr.bf16.mxu1 %v4058_v33  ;;  %v4079_v4 = vld [vmem:[%s5230_s0 + $0x94] ss:$72 sps:$4 sm:$0xff]   ;;  %v4083_v26 = vld [vmem:[%s5230_s0 + $0x90] ss:$72 sps:$4 sm:$0xff]   ;;  %s3323_s10 = scalar_lea.vmem (%p4319_p6), %s5232_s2, %s3708_s6 }
  0xe0   : > { %s4923_s13 = scalar_lea.vmem [#allocation2], %s3980_s8  ;;  %v4081_v25 = vld [vmem:[%s5230_s0 + $0x9c] ss:$72 sps:$4 sm:$0xff]   ;;  %v4084_v27 = vld [vmem:[%s5230_s0 + $0x98] ss:$72 sps:$4 sm:$0xff]  }
  0xe1   : > { %v4021_v34 = vld [vmem:[%s4923_s13 + $0x78] sm:$0xff]   ;;  %v4025_v38 = vld [vmem:[%s4923_s13 + $0x70] sm:$0xff]   ;;  %v4029_v42 = vld [vmem:[%s4923_s13 + $0x68] sm:$0xff]  }
  0xe2   : > { %v4022_v35 = vld [vmem:[%s4923_s13 + $0xf8] sm:$0xff]   ;;  %3711 = vmatprep.subr.bf16.mxu0 %v4021_v34  ;;  %v4026_v39 = vld [vmem:[%s4923_s13 + $0xf0] sm:$0xff]   ;;  %v4030_v43 = vld [vmem:[%s4923_s13 + $0xe8] sm:$0xff]  }
  0xe3   : > { %v4023_v36 = vld [vmem:[%s4923_s13 + $0x38] sm:$0xff]   ;;  %3739 = vmatprep.subr.bf16.mxu1 %v4022_v35  ;;  %v4027_v40 = vld [vmem:[%s4923_s13 + $0x30] sm:$0xff]   ;;  %v4031_v44 = vld [vmem:[%s4923_s13 + $0x28] sm:$0xff]  }
  0xe4   : > { %v4024_v37 = vld [vmem:[%s4923_s13 + $0xb8] sm:$0xff]   ;;  %3712 = vmatpush3.bf16.msra.mxu0 %v4023_v36  ;;  %v4028_v41 = vld [vmem:[%s4923_s13 + $0xb0] sm:$0xff]   ;;  %v4032_v45 = vld [vmem:[%s4923_s13 + $0xa8] sm:$0xff]  }
  0xe5   : > { %3740 = vmatpush3.bf16.msra.mxu1 %v4024_v37  ;;  %3713 = vmatprep.subr.bf16.mxu0 %v4025_v38  ;;  %v4033_v46 = vld [vmem:[%s4923_s13 + $0x60] sm:$0xff]   ;;  %v4037_v50 = vld [vmem:[%s4923_s13 + $0x58] sm:$0xff]   ;;  %v4041_v54 = vld [vmem:[%s4923_s13 + $0x50] sm:$0xff]  }
  0xe6   : > { %3741 = vmatprep.subr.bf16.mxu1 %v4026_v39  ;;  %v4034_v47 = vld [vmem:[%s4923_s13 + $0xe0] sm:$0xff]   ;;  %v4038_v51 = vld [vmem:[%s4923_s13 + $0xd8] sm:$0xff]   ;;  %v4042_v55 = vld [vmem:[%s4923_s13 + $0xd0] sm:$0xff]  }
  0xe7   : > { %v4035_v48 = vld [vmem:[%s4923_s13 + $0x20] sm:$0xff]   ;;  %v4039_v52 = vld [vmem:[%s4923_s13 + $0x18] sm:$0xff]   ;;  %v4043_v56 = vld [vmem:[%s4923_s13 + $0x10] sm:$0xff]  }
  0xe8   : > { %3714 = vmatpush3.bf16.msra.mxu0 %v4027_v40  ;;  %v4036_v49 = vld [vmem:[%s4923_s13 + $0xa0] sm:$0xff]   ;;  %v4040_v53 = vld [vmem:[%s4923_s13 + $0x98] sm:$0xff]   ;;  %v4044_v57 = vld [vmem:[%s4923_s13 + $0x90] sm:$0xff]  }
  0xe9   : > { %3742 = vmatpush3.bf16.msra.mxu1 %v4028_v41  ;;  %3715 = vmatprep.subr.bf16.mxu0 %v4029_v42  ;;  %v4045_v58 = vld [vmem:[%s4923_s13 + $0x48] sm:$0xff]   ;;  %v4049_v62 = vld [vmem:[%s4923_s13 + $0x40] sm:$0xff]   ;;  %v4059_v5 = vld [vmem:[%s4923_s13 + $0x178] sm:$0xff]  }
  0xea   : > { %3743 = vmatprep.subr.bf16.mxu1 %v4030_v43  ;;  %v4046_v59 = vld [vmem:[%s4923_s13 + $0xc8] sm:$0xff]   ;;  %v4050_v63 = vld [vmem:[%s4923_s13 + $0xc0] sm:$0xff]   ;;  %v4060_v6 = vld [vmem:[%s4923_s13 + $0x1f8] sm:$0xff]  }
  0xeb   : > { %v4047_v60 = vld [vmem:[%s4923_s13 + $0x8] sm:$0xff]   ;;  %v4051_v1 = vld [vmem:[%s4923_s13] sm:$0xff]   ;;  %v4061_v7 = vld [vmem:[%s4923_s13 + $0x138] sm:$0xff]  }
  0xec   : > { %3716 = vmatpush3.bf16.msra.mxu0 %v4031_v44  ;;  %v4048_v61 = vld [vmem:[%s4923_s13 + $0x88] sm:$0xff]   ;;  %v4052_v3 = vld [vmem:[%s4923_s13 + $0x80] sm:$0xff]   ;;  %v4062_v8 = vld [vmem:[%s4923_s13 + $0x1b8] sm:$0xff]  }
  0xed   : > { %3744 = vmatpush3.bf16.msra.mxu1 %v4032_v45  ;;  %3717 = vmatprep.subr.bf16.mxu0 %v4033_v46  ;;  %v4063_v9 = vld [vmem:[%s4923_s13 + $0x170] sm:$0xff]   ;;  %v4067_v13 = vld [vmem:[%s4923_s13 + $0x168] sm:$0xff]   ;;  %v4071_v17 = vld [vmem:[%s4923_s13 + $0x160] sm:$0xff]  }
  0xee   : > { %3745 = vmatprep.subr.bf16.mxu1 %v4034_v47  ;;  %v4064_v10 = vld [vmem:[%s4923_s13 + $0x1f0] sm:$0xff]   ;;  %v4068_v14 = vld [vmem:[%s4923_s13 + $0x1e8] sm:$0xff]   ;;  %v4072_v18 = vld [vmem:[%s4923_s13 + $0x1e0] sm:$0xff]  }
  0xef   : > { %v4065_v11 = vld [vmem:[%s4923_s13 + $0x130] sm:$0xff]   ;;  %v4069_v15 = vld [vmem:[%s4923_s13 + $0x128] sm:$0xff]   ;;  %v4073_v19 = vld [vmem:[%s4923_s13 + $0x120] sm:$0xff]  }
  0xf0   : > { %3718 = vmatpush3.bf16.msra.mxu0 %v4035_v48  ;;  %v4066_v12 = vld [vmem:[%s4923_s13 + $0x1b0] sm:$0xff]   ;;  %v4070_v16 = vld [vmem:[%s4923_s13 + $0x1a8] sm:$0xff]   ;;  %v4074_v20 = vld [vmem:[%s4923_s13 + $0x1a0] sm:$0xff]  }
  0xf1   : > { %3746 = vmatpush3.bf16.msra.mxu1 %v4036_v49  ;;  %3719 = vmatprep.subr.bf16.mxu0 %v4037_v50  ;;  %v4075_v21 = vld [vmem:[%s4923_s13 + $0x158] sm:$0xff]   ;;  %v4085_v28 = vld [vmem:[%s4923_s13 + $0x150] sm:$0xff]   ;;  %v4089_v32 = vld [vmem:[%s4923_s13 + $0x148] sm:$0xff]  }
  0xf2   : > { %3747 = vmatprep.subr.bf16.mxu1 %v4038_v51  ;;  %v4076_v22 = vld [vmem:[%s4923_s13 + $0x1d8] sm:$0xff]   ;;  %v4086_v29 = vld [vmem:[%s4923_s13 + $0x1d0] sm:$0xff]   ;;  %v4090_v33 = vld [vmem:[%s4923_s13 + $0x1c8] sm:$0xff]  }
  0xf3   : > { %v4077_v23 = vld [vmem:[%s4923_s13 + $0x118] sm:$0xff]   ;;  %v4087_v30 = vld [vmem:[%s4923_s13 + $0x110] sm:$0xff]   ;;  %v4091_v34 = vld [vmem:[%s4923_s13 + $0x108] sm:$0xff]  }
  0xf4   : > { %3720 = vmatpush3.bf16.msra.mxu0 %v4039_v52  ;;  %v4078_v24 = vld [vmem:[%s4923_s13 + $0x198] sm:$0xff]   ;;  %v4088_v31 = vld [vmem:[%s4923_s13 + $0x190] sm:$0xff]   ;;  %v4092_v35 = vld [vmem:[%s4923_s13 + $0x188] sm:$0xff]  }
  0xf5   : > { %3748 = vmatpush3.bf16.msra.mxu1 %v4040_v53  ;;  %3721 = vmatprep.subr.bf16.mxu0 %v4041_v54  ;;  %v4093_v36 = vld [vmem:[%s4923_s13 + $0x140] sm:$0xff]   ;;  %v4097_v40 = vld [vmem:[%s5230_s0 + $0x10] ss:$72 sps:$4 sm:$0xff]   ;;  %v4099_v41 = vld [vmem:[%s5230_s0 + $0x14] ss:$72 sps:$4 sm:$0xff]  }
  0xf6   : > { %3749 = vmatprep.subr.bf16.mxu1 %v4042_v55  ;;  %v4094_v37 = vld [vmem:[%s4923_s13 + $0x1c0] sm:$0xff]   ;;  %v4103_v44 = vld [vmem:[%s4923_s13 + $0x278] sm:$0xff]   ;;  %v4107_v48 = vld [vmem:[%s4923_s13 + $0x270] sm:$0xff]  }
  0xf7   : > { %v4095_v38 = vld [vmem:[%s4923_s13 + $0x100] sm:$0xff]   ;;  %v4104_v45 = vld [vmem:[%s4923_s13 + $0x2f8] sm:$0xff]   ;;  %v4108_v49 = vld [vmem:[%s4923_s13 + $0x2f0] sm:$0xff]  }
  0xf8   : > { %3722 = vmatpush3.bf16.msra.mxu0 %v4043_v56  ;;  %v4096_v39 = vld [vmem:[%s4923_s13 + $0x180] sm:$0xff]   ;;  %v4105_v46 = vld [vmem:[%s4923_s13 + $0x238] sm:$0xff]   ;;  %v4109_v50 = vld [vmem:[%s4923_s13 + $0x230] sm:$0xff]  }
  0xf9   : > { %3750 = vmatpush3.bf16.msra.mxu1 %v4044_v57  ;;  %3723 = vmatprep.subr.bf16.mxu0 %v4045_v58  ;;  %v4100_v42 = vld [vmem:[%s5230_s0 + $0x18] ss:$72 sps:$4 sm:$0xff]   ;;  %v4102_v43 = vld [vmem:[%s5230_s0 + $0x1c] ss:$72 sps:$4 sm:$0xff]   ;;  %v4110_v51 = vld [vmem:[%s4923_s13 + $0x2b0] sm:$0xff]  }
  0xfa   : > { %3751 = vmatprep.subr.bf16.mxu1 %v4046_v59  ;;  %v4106_v47 = vld [vmem:[%s4923_s13 + $0x2b8] sm:$0xff]   ;;  %v4111_v52 = vld [vmem:[%s5230_s0 + $0xa4] ss:$72 sps:$4 sm:$0xff]   ;;  %v4113_v53 = vld [vmem:[%s5230_s0 + $0xa0] ss:$72 sps:$4 sm:$0xff]  }
  0xfb   : > { %v4114_v54 = vld [vmem:[%s4923_s13 + $0x268] sm:$0xff]  }
  0xfc   : > { %3724 = vmatpush3.bf16.msra.mxu0 %v4047_v60  ;;  %v4115_v55 = vld [vmem:[%s4923_s13 + $0x2e8] sm:$0xff]   ;;  %v4121_v60 = vld [vmem:[%s4923_s13 + $0x260] sm:$0xff]  }
  0xfd   : > { %3752 = vmatpush3.bf16.msra.mxu1 %v4048_v61  ;;  %3725 = vmatprep.subr.bf16.mxu0 %v4049_v62  ;;  %v4116_v56 = vld [vmem:[%s5230_s0 + $0xac] ss:$72 sps:$4 sm:$0xff]   ;;  %v4120_v59 = vld [vmem:[%s5230_s0 + $0xa8] ss:$72 sps:$4 sm:$0xff]   ;;  %v4122_v61 = vld [vmem:[%s4923_s13 + $0x2e0] sm:$0xff]  }
  0xfe   : > { %3753 = vmatprep.subr.bf16.mxu1 %v4050_v63  ;;  %v4118_v57 = vld [vmem:[%s4923_s13 + $0x228] sm:$0xff]   ;;  %v4123_v62 = vld [vmem:[%s4923_s13 + $0x220] sm:$0xff]  }
  0xff   : > { %v4119_v58 = vld [vmem:[%s4923_s13 + $0x2a8] sm:$0xff]   ;;  %v4124_v63 = vld [vmem:[%s4923_s13 + $0x2a0] sm:$0xff]  }
 0x100   : > { %3726 = vmatpush3.bf16.msra.mxu0 %v4051_v1  ;;  %v4126_v1 = vld [vmem:[%s4923_s13 + $0x2d8] sm:$0xff]  }
 0x101   : > { %3754 = vmatpush3.bf16.msra.mxu1 %v4052_v3  ;;  %3767 = vmatprep.subr.bf16.mxu0 %v4059_v5  ;;  %v4128_v3 = vld [vmem:[%s4923_s13 + $0x298] sm:$0xff]   ;;  %v4130_v5 = vld [vmem:[%s4923_s13 + $0x2d0] sm:$0xff]  }
 0x102   : > { %3795 = vmatprep.subr.bf16.mxu1 %v4060_v6  ;;  %v4131_v6 = vld [vmem:[%s4923_s13 + $0x210] sm:$0xff]  }
 0x103   : > { %2862 = vmatmul.mubr.bf16.vlgmr.msra.gmra.mxu0 %v4053_v0  ;;  %v4125_v0 = vld [vmem:[%s4923_s13 + $0x258] sm:$0xff]  }
 0x104   : > { %2911 = vmatmul.mubr.bf16.vlgmr.msra.gmra.mxu1 %v4056_v2  ;;  %3768 = vmatpush3.bf16.msra.mxu0 %v4061_v7  ;;  %v4127_v2 = vld [vmem:[%s4923_s13 + $0x218] sm:$0xff]   ;;  %v4132_v7 = vld [vmem:[%s4923_s13 + $0x290] sm:$0xff]  }
 0x105   : > { %3796 = vmatpush3.bf16.msra.mxu1 %v4062_v8  ;;  %2869 = vmatprep.mubr.bf16.mxu0 %v4079_v4  ;;  %v4129_v4 = vld [vmem:[%s4923_s13 + $0x250] sm:$0xff]   ;;  %v4133_v8 = vld [vmem:[%s4923_s13 + $0x248] sm:$0xff]  }
 0x106   : > { %3769 = vmatprep.subr.bf16.mxu0 %v4063_v9  ;;  %3797 = vmatprep.subr.bf16.mxu1 %v4064_v10  ;;  %v4134_v9 = vld [vmem:[%s4923_s13 + $0x2c8] sm:$0xff]  }
 0x107   : > { %2918 = vmatprep.mubr.bf16.mxu1 %v4081_v25  ;;  %v4135_v10 = vld [vmem:[%s4923_s13 + $0x208] sm:$0xff]   ;;  %v4152_v25 = vld [vmem:[%s4923_s13 + $0x3f0] sm:$0xff]  }
 0x108   : > { %3770 = vmatpush3.bf16.msra.mxu0 %v4065_v11  ;;  %v4136_v11 = vld [vmem:[%s4923_s13 + $0x288] sm:$0xff]  }
 0x109   : > { %3798 = vmatpush3.bf16.msra.mxu1 %v4066_v12  ;;  %3771 = vmatprep.subr.bf16.mxu0 %v4067_v13  ;;  %v4137_v12 = vld [vmem:[%s4923_s13 + $0x240] sm:$0xff]  }
 0x10a   : > { %3799 = vmatprep.subr.bf16.mxu1 %v4068_v14  ;;  %v4138_v13 = vld [vmem:[%s4923_s13 + $0x2c0] sm:$0xff]  }
 0x10b   : > { %2870 = vmatmul.mubr.bf16.gmra.mxu0 %v4083_v26  ;;  %v4139_v14 = vld [vmem:[%s4923_s13 + $0x200] sm:$0xff]   ;;  %v4153_v26 = vld [vmem:[%s4923_s13 + $0x330] sm:$0xff]  }
 0x10c   : > { %3772 = vmatpush3.bf16.msra.mxu0 %v4069_v15  ;;  %2919 = vmatmul.mubr.bf16.gmra.mxu1 %v4084_v27  ;;  %v4140_v15 = vld [vmem:[%s4923_s13 + $0x280] sm:$0xff]   ;;  %v4154_v27 = vld [vmem:[%s4923_s13 + $0x3b0] sm:$0xff]  }
 0x10d   : > { %3800 = vmatpush3.bf16.msra.mxu1 %v4070_v16  ;;  %3773 = vmatprep.subr.bf16.mxu0 %v4071_v17  ;;  %v4141_v16 = vld [vmem:[%s5230_s0 + $0x20] ss:$72 sps:$4 sm:$0xff]   ;;  %v4143_v17 = vld [vmem:[%s5230_s0 + $0x24] ss:$72 sps:$4 sm:$0xff]  }
 0x10e   : > { %3801 = vmatprep.subr.bf16.mxu1 %v4072_v18  ;;  %2959 = vmatprep.mubr.bf16.mxu0 %v4099_v41  ;;  %v4144_v18 = vld [vmem:[%s5230_s0 + $0x28] ss:$72 sps:$4 sm:$0xff]   ;;  %v4170_v41 = vld [vmem:[%s4923_s13 + $0x3d8] sm:$0xff]  }
 0x10f   : > { %3008 = vmatprep.mubr.bf16.mxu1 %v4102_v43  ;;  %v4172_v43 = vld [vmem:[%s4923_s13 + $0x398] sm:$0xff]  }
 0x110   : > { %3774 = vmatpush3.bf16.msra.mxu0 %v4073_v19  ;;  %v4146_v19 = vld [vmem:[%s5230_s0 + $0x2c] ss:$72 sps:$4 sm:$0xff]  }
 0x111   : > { %3802 = vmatpush3.bf16.msra.mxu1 %v4074_v20  ;;  %3775 = vmatprep.subr.bf16.mxu0 %v4075_v21  ;;  %v4147_v20 = vld [vmem:[%s4923_s13 + $0x378] sm:$0xff]  }
 0x112   : > { %3803 = vmatprep.subr.bf16.mxu1 %v4076_v22  ;;  %v4148_v21 = vld [vmem:[%s4923_s13 + $0x3f8] sm:$0xff]  }
 0x113   : > { %v4149_v22 = vld [vmem:[%s4923_s13 + $0x338] sm:$0xff]  }
 0x114   : > { %3776 = vmatpush3.bf16.msra.mxu0 %v4077_v23  ;;  %v4150_v23 = vld [vmem:[%s4923_s13 + $0x3b8] sm:$0xff]  }
 0x115   : > { %3804 = vmatpush3.bf16.msra.mxu1 %v4078_v24  ;;  %3777 = vmatprep.subr.bf16.mxu0 %v4085_v28  ;;  %v4151_v24 = vld [vmem:[%s4923_s13 + $0x370] sm:$0xff]  }
 0x116   : > { %3805 = vmatprep.subr.bf16.mxu1 %v4086_v29  ;;  %v4155_v28 = vld [vmem:[%s5230_s0 + $0xb4] ss:$72 sps:$4 sm:$0xff]   ;;  %v4157_v29 = vld [vmem:[%s5230_s0 + $0xb0] ss:$72 sps:$4 sm:$0xff]  }
 0x118   : > { %3778 = vmatpush3.bf16.msra.mxu0 %v4087_v30  ;;  %v4158_v30 = vld [vmem:[%s4923_s13 + $0x368] sm:$0xff]  }
 0x119   : > { %3806 = vmatpush3.bf16.msra.mxu1 %v4088_v31  ;;  %3779 = vmatprep.subr.bf16.mxu0 %v4089_v32  ;;  %v4159_v31 = vld [vmem:[%s4923_s13 + $0x3e8] sm:$0xff]   ;;  %v4160_v32 = vld [vmem:[%s5230_s0 + $0xbc] ss:$72 sps:$4 sm:$0xff]  }
 0x11a   : > { %3807 = vmatprep.subr.bf16.mxu1 %v4090_v33  ;;  %v4162_v33 = vld [vmem:[%s4923_s13 + $0x328] sm:$0xff]  }
 0x11c   : > { %3780 = vmatpush3.bf16.msra.mxu0 %v4091_v34  ;;  %v4163_v34 = vld [vmem:[%s4923_s13 + $0x3a8] sm:$0xff]  }
 0x11d   : > { %3808 = vmatpush3.bf16.msra.mxu1 %v4092_v35  ;;  %3781 = vmatprep.subr.bf16.mxu0 %v4093_v36  ;;  %v4164_v35 = vld [vmem:[%s5230_s0 + $0xb8] ss:$72 sps:$4 sm:$0xff]  }
 0x11e   : > { %3809 = vmatprep.subr.bf16.mxu1 %v4094_v37  ;;  %v4165_v36 = vld [vmem:[%s4923_s13 + $0x360] sm:$0xff]  }
 0x11f   : > { %v4166_v37 = vld [vmem:[%s4923_s13 + $0x3e0] sm:$0xff]  }
 0x120   : > { %3782 = vmatpush3.bf16.msra.mxu0 %v4095_v38  ;;  %v4167_v38 = vld [vmem:[%s4923_s13 + $0x320] sm:$0xff]  }
 0x121   : > { %3810 = vmatpush3.bf16.msra.mxu1 %v4096_v39  ;;  %3823 = vmatprep.subr.bf16.mxu0 %v4103_v44  ;;  %v4168_v39 = vld [vmem:[%s4923_s13 + $0x3a0] sm:$0xff]   ;;  %v4173_v44 = vld [vmem:[%s4923_s13 + $0x350] sm:$0xff]  }
 0x122   : > { %3851 = vmatprep.subr.bf16.mxu1 %v4104_v45  ;;  %v4174_v45 = vld [vmem:[%s4923_s13 + $0x3d0] sm:$0xff]  }
 0x123   : > { %2960 = vmatmul.mubr.bf16.vlgmr.msra.gmra.mxu0 %v4097_v40  ;;  %v4169_v40 = vld [vmem:[%s4923_s13 + $0x358] sm:$0xff]  }
 0x124   : > { %3009 = vmatmul.mubr.bf16.vlgmr.msra.gmra.mxu1 %v4100_v42  ;;  %3824 = vmatpush3.bf16.msra.mxu0 %v4105_v46  ;;  %v4171_v42 = vld [vmem:[%s4923_s13 + $0x318] sm:$0xff]   ;;  %v4175_v46 = vld [vmem:[%s4923_s13 + $0x310] sm:$0xff]  }
 0x125   : > { %3852 = vmatpush3.bf16.msra.mxu1 %v4106_v47  ;;  %3825 = vmatprep.subr.bf16.mxu0 %v4107_v48  ;;  %v4176_v47 = vld [vmem:[%s4923_s13 + $0x390] sm:$0xff]   ;;  %v4177_v48 = vld [vmem:[%s4923_s13 + $0x348] sm:$0xff]  }
 0x126   : > { %3853 = vmatprep.subr.bf16.mxu1 %v4108_v49  ;;  %2967 = vmatprep.mubr.bf16.mxu0 %v4111_v52  ;;  %v4178_v49 = vld [vmem:[%s4923_s13 + $0x3c8] sm:$0xff]   ;;  %v4181_v52 = vld [vmem:[%s4923_s13 + $0x340] sm:$0xff]  }
 0x127   : > { %3016 = vmatprep.mubr.bf16.mxu1 %v4116_v56  ;;  %v4185_v56 = vld [vmem:[%s5230_s0 + $0x30] ss:$72 sps:$4 sm:$0xff]  }
 0x128   : > { %3826 = vmatpush3.bf16.msra.mxu0 %v4109_v50  ;;  %v4179_v50 = vld [vmem:[%s4923_s13 + $0x308] sm:$0xff]  }
 0x129   : > { %3854 = vmatpush3.bf16.msra.mxu1 %v4110_v51  ;;  %3827 = vmatprep.subr.bf16.mxu0 %v4114_v54  ;;  %v4180_v51 = vld [vmem:[%s4923_s13 + $0x388] sm:$0xff]   ;;  %v4183_v54 = vld [vmem:[%s4923_s13 + $0x300] sm:$0xff]  }
 0x12a   : > { %3855 = vmatprep.subr.bf16.mxu1 %v4115_v55  ;;  %v4184_v55 = vld [vmem:[%s4923_s13 + $0x380] sm:$0xff]  }
 0x12b   : > { %2968 = vmatmul.mubr.bf16.gmra.mxu0 %v4113_v53  ;;  %v4182_v53 = vld [vmem:[%s4923_s13 + $0x3c0] sm:$0xff]  }
 0x12c   : > { %3828 = vmatpush3.bf16.msra.mxu0 %v4118_v57  ;;  %3017 = vmatmul.mubr.bf16.gmra.mxu1 %v4120_v59  ;;  %v4187_v57 = vld [vmem:[%s5230_s0 + $0x34] ss:$72 sps:$4 sm:$0xff]  }
 0x12d   : > { %3856 = vmatpush3.bf16.msra.mxu1 %v4119_v58  ;;  %3829 = vmatprep.subr.bf16.mxu0 %v4121_v60  ;;  %v4188_v58 = vld [vmem:[%s5230_s0 + $0x38] ss:$72 sps:$4 sm:$0xff]   ;;  %v4190_v59 = vld [vmem:[%s5230_s0 + $0x3c] ss:$72 sps:$4 sm:$0xff]  }
 0x12e   : > { %3857 = vmatprep.subr.bf16.mxu1 %v4122_v61  ;;  %3057 = vmatprep.mubr.bf16.mxu0 %v4143_v17  ;;  %v4191_v60 = vld [vmem:[%s4923_s13 + $0x478] sm:$0xff]   ;;  %v4212_v17 = vld [vmem:[%s4923_s13 + $0x400] sm:$0xff]  }
 0x12f   : > { %3106 = vmatprep.mubr.bf16.mxu1 %v4146_v19  ;;  %v4192_v61 = vld [vmem:[%s4923_s13 + $0x438] sm:$0xff]  }
 0x130   : > { %3830 = vmatpush3.bf16.msra.mxu0 %v4123_v62  ;;  %v4193_v62 = vld [vmem:[%s4923_s13 + $0x470] sm:$0xff]  }
 0x131   : > { %3858 = vmatpush3.bf16.msra.mxu1 %v4124_v63  ;;  %3831 = vmatprep.subr.bf16.mxu0 %v4125_v0  ;;  %v4194_v63 = vld [vmem:[%s4923_s13 + $0x430] sm:$0xff]   ;;  %v4195_v0 = vld [vmem:[%s5230_s0 + $0xc4] ss:$72 sps:$4 sm:$0xff]  }
 0x132   : > { %3859 = vmatprep.subr.bf16.mxu1 %v4126_v1  ;;  %v4197_v1 = vld [vmem:[%s5230_s0 + $0xc0] ss:$72 sps:$4 sm:$0xff]   ;;  %v4216_v19 = vld [vmem:[%s5230_s0 + $0xd0] ss:$72 sps:$4 sm:$0xff]  }
 0x134   : > { %3832 = vmatpush3.bf16.msra.mxu0 %v4127_v2  ;;  %v4198_v2 = vld [vmem:[%s4923_s13 + $0x468] sm:$0xff]  }
 0x135   : > { %3860 = vmatpush3.bf16.msra.mxu1 %v4128_v3  ;;  %3833 = vmatprep.subr.bf16.mxu0 %v4129_v4  ;;  %v4199_v3 = vld [vmem:[%s5230_s0 + $0xcc] ss:$72 sps:$4 sm:$0xff]  }
 0x136   : > { %3861 = vmatprep.subr.bf16.mxu1 %v4130_v5  ;;  %v4201_v4 = vld [vmem:[%s4923_s13 + $0x428] sm:$0xff]  }
 0x137   : > { %v4202_v5 = vld [vmem:[%s5230_s0 + $0xc8] ss:$72 sps:$4 sm:$0xff]  }
 0x138   : > { %3834 = vmatpush3.bf16.msra.mxu0 %v4131_v6  ;;  %v4203_v6 = vld [vmem:[%s4923_s13 + $0x460] sm:$0xff]  }
 0x139   : > { %3862 = vmatpush3.bf16.msra.mxu1 %v4132_v7  ;;  %3835 = vmatprep.subr.bf16.mxu0 %v4133_v8  ;;  %v4204_v7 = vld [vmem:[%s4923_s13 + $0x420] sm:$0xff]   ;;  %v4205_v8 = vld [vmem:[%s4923_s13 + $0x458] sm:$0xff]  }
 0x13a   : > { %3863 = vmatprep.subr.bf16.mxu1 %v4134_v9  ;;  %v4206_v9 = vld [vmem:[%s4923_s13 + $0x418] sm:$0xff]  }
 0x13c   : > { %3836 = vmatpush3.bf16.msra.mxu0 %v4135_v10  ;;  %v4207_v10 = vld [vmem:[%s4923_s13 + $0x450] sm:$0xff]  }
 0x13d   : > { %3864 = vmatpush3.bf16.msra.mxu1 %v4136_v11  ;;  %3837 = vmatprep.subr.bf16.mxu0 %v4137_v12  ;;  %v4208_v11 = vld [vmem:[%s4923_s13 + $0x410] sm:$0xff]   ;;  %v4215_v12 = vld [vmem:[%s5230_s0 + $0x44] ss:$72 sps:$4 sm:$0xff]  }
 0x13e   : > { %3865 = vmatprep.subr.bf16.mxu1 %v4138_v13  ;;  %v4209_v13 = vld [vmem:[%s4923_s13 + $0x448] sm:$0xff]  }
 0x140   : > { %3838 = vmatpush3.bf16.msra.mxu0 %v4139_v14  ;;  %v4218_v14 = vld [vmem:[%s5230_s0 + $0xd4] ss:$72 sps:$4 sm:$0xff]  }
 0x141   : > { %3866 = vmatpush3.bf16.msra.mxu1 %v4140_v15  ;;  %3879 = vmatprep.subr.bf16.mxu0 %v4147_v20  ;;  %v4210_v15 = vld [vmem:[%s4923_s13 + $0x408] sm:$0xff]  }
 0x142   : > { %3907 = vmatprep.subr.bf16.mxu1 %v4148_v21 }
 0x143   : > { %3058 = vmatmul.mubr.bf16.vlgmr.msra.gmra.mxu0 %v4141_v16  ;;  %v4211_v16 = vld [vmem:[%s4923_s13 + $0x440] sm:$0xff]   ;;  %s3526_s13 = sshll.u32 %s1394_s7, 5 }
 0x144   : > { %3107 = vmatmul.mubr.bf16.vlgmr.msra.gmra.mxu1 %v4144_v18  ;;  %3880 = vmatpush3.bf16.msra.mxu0 %v4149_v22  ;;  %v4213_v18 = vld [vmem:[%s5230_s0 + $0x40] ss:$72 sps:$4 sm:$0xff]   ;;  %s5191_s15 = scalar_lea.vmem [#allocation3], %s3526_s13 }
 0x145   : > { %3908 = vmatpush3.bf16.msra.mxu1 %v4150_v23  ;;  %3881 = vmatprep.subr.bf16.mxu0 %v4151_v24  ;;  %s1449_s7 = scalar_select %p1448_p11, %s4249_s17, 1 }
 0x146   : > { %3909 = vmatprep.subr.bf16.mxu1 %v4152_v25  ;;  %3065 = vmatprep.mubr.bf16.mxu0 %v4155_v28 }
 0x147   : > { %3114 = vmatprep.mubr.bf16.mxu1 %v4160_v32  ;;  %s1452_s28 = scalar_lea.vmem %s5233_s3, %s1449_s7  ;;  %s1459_s5 = scalar_lea.vmem %s5234_s4, %s1449_s7 }
 0x148   : > { %3882 = vmatpush3.bf16.msra.mxu0 %v4153_v26 }
 0x149   : > { %3910 = vmatpush3.bf16.msra.mxu1 %v4154_v27  ;;  %3883 = vmatprep.subr.bf16.mxu0 %v4158_v30 }
 0x14a   : > { %3911 = vmatprep.subr.bf16.mxu1 %v4159_v31 }
 0x14b   : > { %3066 = vmatmul.mubr.bf16.gmra.mxu0 %v4157_v29 }
 0x14c   : > { %3884 = vmatpush3.bf16.msra.mxu0 %v4162_v33  ;;  %3115 = vmatmul.mubr.bf16.gmra.mxu1 %v4164_v35 }
 0x14d   : > { %3912 = vmatpush3.bf16.msra.mxu1 %v4163_v34  ;;  %3885 = vmatprep.subr.bf16.mxu0 %v4165_v36 }
 0x14e   : > { %3913 = vmatprep.subr.bf16.mxu1 %v4166_v37  ;;  %3155 = vmatprep.mubr.bf16.mxu0 %v4187_v57 }
 0x14f   : > { %3204 = vmatprep.mubr.bf16.mxu1 %v4190_v59 }
 0x150   : > { %3886 = vmatpush3.bf16.msra.mxu0 %v4167_v38 }
 0x151   : > { %3914 = vmatpush3.bf16.msra.mxu1 %v4168_v39  ;;  %3887 = vmatprep.subr.bf16.mxu0 %v4169_v40 }
 0x152   : > { %3915 = vmatprep.subr.bf16.mxu1 %v4170_v41 }
 0x154   : > { %3888 = vmatpush3.bf16.msra.mxu0 %v4171_v42 }
 0x155   : > { %3916 = vmatpush3.bf16.msra.mxu1 %v4172_v43  ;;  %3889 = vmatprep.subr.bf16.mxu0 %v4173_v44 }
 0x156   : > { %3917 = vmatprep.subr.bf16.mxu1 %v4174_v45 }
 0x158   : > { %3890 = vmatpush3.bf16.msra.mxu0 %v4175_v46 }
 0x159   : > { %3918 = vmatpush3.bf16.msra.mxu1 %v4176_v47  ;;  %3891 = vmatprep.subr.bf16.mxu0 %v4177_v48 }
 0x15a   : > { %3919 = vmatprep.subr.bf16.mxu1 %v4178_v49 }
 0x15c   : > { %3892 = vmatpush3.bf16.msra.mxu0 %v4179_v50 }
 0x15d   : > { %3920 = vmatpush3.bf16.msra.mxu1 %v4180_v51  ;;  %3893 = vmatprep.subr.bf16.mxu0 %v4181_v52 }
 0x15e   : > { %3921 = vmatprep.subr.bf16.mxu1 %v4182_v53 }
 0x160   : > { %3894 = vmatpush3.bf16.msra.mxu0 %v4183_v54 }
 0x161   : > { %3922 = vmatpush3.bf16.msra.mxu1 %v4184_v55  ;;  %3935 = vmatprep.subr.bf16.mxu0 %v4191_v60 }
 0x162   : > { %3963 = vmatprep.subr.bf16.mxu1 %v4191_v60 }
 0x163   : > { %3156 = vmatmul.mubr.bf16.vlgmr.msra.gmra.mxu0 %v4185_v56 }
 0x164   : > { %3205 = vmatmul.mubr.bf16.vlgmr.msra.gmra.mxu1 %v4188_v58  ;;  %3936 = vmatpush3.bf16.msra.mxu0 %v4192_v61 }
 0x165   : > { %3971 = vmatpush3.bf16.msra.mxu1 %v4192_v61  ;;  %3937 = vmatprep.subr.bf16.mxu0 %v4193_v62 }
 0x166   : > { %3964 = vmatprep.subr.bf16.mxu1 %v4193_v62  ;;  %3163 = vmatprep.mubr.bf16.mxu0 %v4195_v0 }
 0x167   : > { %3212 = vmatprep.mubr.bf16.mxu1 %v4199_v3 }
 0x168   : > { %3938 = vmatpush3.bf16.msra.mxu0 %v4194_v63 }
 0x169   : > { %3972 = vmatpush3.bf16.msra.mxu1 %v4194_v63  ;;  %3939 = vmatprep.subr.bf16.mxu0 %v4198_v2 }
 0x16a   : > { %3965 = vmatprep.subr.bf16.mxu1 %v4198_v2 }
 0x16b   : > { %3164 = vmatmul.mubr.bf16.gmra.mxu0 %v4197_v1 }
 0x16c   : > { %3940 = vmatpush3.bf16.msra.mxu0 %v4201_v4  ;;  %3213 = vmatmul.mubr.bf16.gmra.mxu1 %v4202_v5 }
 0x16d   : > { %3973 = vmatpush3.bf16.msra.mxu1 %v4201_v4  ;;  %3941 = vmatprep.subr.bf16.mxu0 %v4203_v6 }
 0x16e   : > { %3966 = vmatprep.subr.bf16.mxu1 %v4203_v6  ;;  %3253 = vmatprep.mubr.bf16.mxu0 %v4215_v12 }
 0x16f   : > { %3261 = vmatprep.mubr.bf16.mxu1 %v4218_v14 }
 0x170   : > { %3942 = vmatpush3.bf16.msra.mxu0 %v4204_v7 }
 0x171   : > { %3974 = vmatpush3.bf16.msra.mxu1 %v4204_v7  ;;  %3943 = vmatprep.subr.bf16.mxu0 %v4205_v8 }
 0x172   : > { %3967 = vmatprep.subr.bf16.mxu1 %v4205_v8 }
 0x174   : > { %3944 = vmatpush3.bf16.msra.mxu0 %v4206_v9 }
 0x175   : > { %3975 = vmatpush3.bf16.msra.mxu1 %v4206_v9  ;;  %3945 = vmatprep.subr.bf16.mxu0 %v4207_v10 }
 0x176   : > { %3968 = vmatprep.subr.bf16.mxu1 %v4207_v10 }
 0x178   : > { %3946 = vmatpush3.bf16.msra.mxu0 %v4208_v11 }
 0x179   : > { %3976 = vmatpush3.bf16.msra.mxu1 %v4208_v11  ;;  %3947 = vmatprep.subr.bf16.mxu0 %v4209_v13 }
 0x17a   : > { %3969 = vmatprep.subr.bf16.mxu1 %v4209_v13 }
 0x17c   : > { %3948 = vmatpush3.bf16.msra.mxu0 %v4210_v15 }
 0x17d   : > { %3977 = vmatpush3.bf16.msra.mxu1 %v4210_v15  ;;  %3949 = vmatprep.subr.bf16.mxu0 %v4211_v16 }
 0x17e   : > { %3970 = vmatprep.subr.bf16.mxu1 %v4211_v16 }
 0x180   : > { %3950 = vmatpush3.bf16.msra.mxu0 %v4212_v17 }
 0x181   : > { %3978 = vmatpush3.bf16.msra.mxu1 %v4212_v17 }
 0x183   : > { %3254 = vmatmul.mubr.bf16.vlgmr.msra.gmra.mxu0 %v4213_v18 }
 0x184   : > { %3262 = vmatmul.mubr.bf16.vlgmr.msra.gmra.mxu1 %v4216_v19 }
 0x1c3   : > { %v3727_v20 = vpop.f32.mrf.mxu0 }
 0x1c4   : > { %v3755_v22 = vpop.f32.mrf.mxu1 }
 0x1c5   : > { %v3728_v21 = vpop.f32.mrf.mxu0 }
 0x1c6   : > { %v3756_v24 = vpop.f32.mrf.mxu1  ;;  %v3729_v9 = vadd.f32 %v3728_v21, %v3727_v20 }
 0x1c7   : > { %v3730_v23 = vpop.f32.mrf.mxu0  ;;  %v3757_v10 = vadd.f32 %v3756_v24, %v3755_v22 }
 0x1c8   : > { %v3758_v27 = vpop.f32.mrf.mxu1 }
 0x1c9   : > { %v3731_v25 = vpop.f32.mrf.mxu0  ;;  %v2913_v17 = vadd.f32 %v3757_v10, %v3729_v9 }
 0x1ca   : > { %v3759_v29 = vpop.f32.mrf.mxu1  ;;  %v3732_v18 = vadd.f32 %v3731_v25, %v3730_v23 }
 0x1cb   : > { %v3733_v26 = vpop.f32.mrf.mxu0  ;;  %v3760_v19 = vadd.f32 %v3759_v29, %v3758_v27 }
 0x1cc   : > { %v3761_v30 = vpop.f32.mrf.mxu1 }
 0x1cd   : > { %v3734_v28 = vpop.f32.mrf.mxu0 }
 0x1ce   : > { %v3762_v32 = vpop.f32.mrf.mxu1  ;;  %v3735_v13 = vadd.f32 %v3734_v28, %v3733_v26 }
 0x1cf   : > { %v3736_v31 = vpop.f32.mrf.mxu0  ;;  %v3763_v14 = vadd.f32 %v3762_v32, %v3761_v30  ;;  %v2916_v32 = vadd.f32 %v3760_v19, %v3732_v18 }
 0x1d0   : > { %v3764_v35 = vpop.f32.mrf.mxu1 }
 0x1d1   : > { %v3737_v33 = vpop.f32.mrf.mxu0 }
 0x1d2   : > { %v3765_v37 = vpop.f32.mrf.mxu1 }
 0x1d3   : > { %v3766_v20 = vadd.f32 %v3765_v37, %v3764_v35 }
 0x1e3   : > { %v3783_v34 = vpop.f32.mrf.mxu0 }
 0x1e4   : > { %v3811_v38 = vpop.f32.mrf.mxu1 }
 0x1e5   : > { %v3784_v36 = vpop.f32.mrf.mxu0 }
 0x1e6   : > { %v3812_v40 = vpop.f32.mrf.mxu1  ;;  %v3785_v15 = vadd.f32 %v3784_v36, %v3783_v34 }
 0x1e7   : > { %v3786_v39 = vpop.f32.mrf.mxu0  ;;  %v3813_v22 = vadd.f32 %v3812_v40, %v3811_v38 }
 0x1e8   : > { %v5171_v42 = vpop.f32.mrf.mxu1  ;;  %v2962_v21 = vadd.f32 %v3785_v15, %v2913_v17 }
 0x1e9   : > { %v3787_v41 = vpop.f32.mrf.mxu0  ;;  %5236 = vst [vmem:[#allocation4_spill] sm:$0xff] %v5171_v42  ;;  %v3738_v42 = vadd.f32 %v3737_v33, %v3736_v31 }
 0x1ea   : > { %v5173_v44 = vpop.f32.mrf.mxu1  ;;  %v3788_v24 = vadd.f32 %v3787_v41, %v3786_v39  ;;  %v3011_v23 = vadd.f32 %v3813_v22, %v2962_v21 }
 0x1eb   : > { %v3789_v43 = vpop.f32.mrf.mxu0  ;;  %5237 = vst [vmem:[#allocation5_spill] sm:$0xff] %v5173_v44  ;;  %v2921_v44 = vadd.f32 %v3763_v14, %v3735_v13 }
 0x1ec   : > { %v3817_v46 = vpop.f32.mrf.mxu1  ;;  %v2965_v25 = vadd.f32 %v3788_v24, %v2916_v32 }
 0x1ed   : > { %v3790_v45 = vpop.f32.mrf.mxu0 }
 0x1ee   : > { %v3818_v48 = vpop.f32.mrf.mxu1  ;;  %v3791_v16 = vadd.f32 %v3790_v45, %v3789_v43  ;;  %v2924_v43 = vadd.f32 %v3766_v20, %v3738_v42 }
 0x1ef   : > { %v3792_v47 = vpop.f32.mrf.mxu0  ;;  %v3819_v28 = vadd.f32 %v3818_v48, %v3817_v46 }
 0x1f0   : > { %v3820_v50 = vpop.f32.mrf.mxu1  ;;  %v2970_v26 = vadd.f32 %v3791_v16, %v2921_v44  ;;  %v5241_v31 = vld [vmem:[#allocation4_spill] sm:$0xff] }
 0x1f1   : > { %v3793_v49 = vpop.f32.mrf.mxu0 }
 0x1f2   : > { %v3821_v52 = vpop.f32.mrf.mxu1  ;;  %v3794_v30 = vadd.f32 %v3793_v49, %v3792_v47  ;;  %v3019_v29 = vadd.f32 %v3819_v28, %v2970_v26  ;;  %v5242_v33 = vld [vmem:[#allocation5_spill] sm:$0xff] }
 0x1f3   : > { %v3822_v10 = vadd.f32 %v3821_v52, %v3820_v50  ;;  %v3816_v35 = vadd.f32 %v5242_v33, %v5241_v31 }
 0x1f4   : > { %v2973_v9 = vadd.f32 %v3794_v30, %v2924_v43 }
 0x1f5   : > { %v3014_v47 = vadd.f32 %v3816_v35, %v2965_v25 }
 0x1f6   : > { %v3022_v49 = vadd.f32 %v3822_v10, %v2973_v9 }
 0x203   : > { %v3839_v51 = vpop.f32.mrf.mxu0 }
 0x204   : > { %v3867_v54 = vpop.f32.mrf.mxu1 }
 0x205   : > { %v3840_v53 = vpop.f32.mrf.mxu0 }
 0x206   : > { %v3868_v56 = vpop.f32.mrf.mxu1  ;;  %v3841_v34 = vadd.f32 %v3840_v53, %v3839_v51 }
 0x207   : > { %v3842_v55 = vpop.f32.mrf.mxu0  ;;  %v3869_v38 = vadd.f32 %v3868_v56, %v3867_v54 }
 0x208   : > { %v5175_v58 = vpop.f32.mrf.mxu1  ;;  %v3060_v37 = vadd.f32 %v3841_v34, %v3011_v23 }
 0x209   : > { %v3843_v57 = vpop.f32.mrf.mxu0  ;;  %5238 = vst [vmem:[#allocation6_spill] sm:$0xff] %v5175_v58 }
 0x20a   : > { %v5177_v60 = vpop.f32.mrf.mxu1  ;;  %v3844_v39 = vadd.f32 %v3843_v57, %v3842_v55  ;;  %v3109_v53 = vadd.f32 %v3869_v38, %v3060_v37 }
 0x20b   : > { %v3845_v59 = vpop.f32.mrf.mxu0  ;;  %5239 = vst [vmem:[#allocation7_spill] sm:$0xff] %v5177_v60 }
 0x20c   : > { %v3873_v62 = vpop.f32.mrf.mxu1 }
 0x20d   : > { %v3846_v61 = vpop.f32.mrf.mxu0 }
 0x20e   : > { %v3874_v0 = vpop.f32.mrf.mxu1  ;;  %v3847_v45 = vadd.f32 %v3846_v61, %v3845_v59  ;;  %v3063_v59 = vadd.f32 %v3844_v39, %v3014_v47 }
 0x20f   : > { %v3848_v63 = vpop.f32.mrf.mxu0  ;;  %v3875_v44 = vadd.f32 %v3874_v0, %v3873_v62 }
 0x210   : > { %v3876_v2 = vpop.f32.mrf.mxu1  ;;  %v3068_v41 = vadd.f32 %v3847_v45, %v3019_v29  ;;  %v5243_v14 = vld [vmem:[#allocation6_spill] sm:$0xff] }
 0x211   : > { %v3849_v1 = vpop.f32.mrf.mxu0 }
 0x212   : > { %v3877_v4 = vpop.f32.mrf.mxu1  ;;  %v3850_v46 = vadd.f32 %v3849_v1, %v3848_v63  ;;  %v3117_v50 = vadd.f32 %v3875_v44, %v3068_v41  ;;  %v5244_v15 = vld [vmem:[#allocation7_spill] sm:$0xff] }
 0x213   : > { %v3878_v13 = vadd.f32 %v3877_v4, %v3876_v2  ;;  %v3872_v54 = vadd.f32 %v5244_v15, %v5243_v14 }
 0x214   : > { %v3071_v52 = vadd.f32 %v3850_v46, %v3022_v49 }
 0x216   : > { %v3120_v16 = vadd.f32 %v3878_v13, %v3071_v52 }
 0x223   : > { %v3895_v3 = vpop.f32.mrf.mxu0 }
 0x224   : > { %v3923_v5 = vpop.f32.mrf.mxu1 }
 0x225   : > { %v3896_v6 = vpop.f32.mrf.mxu0 }
 0x226   : > { %v3924_v7 = vpop.f32.mrf.mxu1  ;;  %v3897_v48 = vadd.f32 %v3896_v6, %v3895_v3  ;;  %v3112_v6 = vadd.f32 %v3872_v54, %v3063_v59 }
 0x227   : > { %v3898_v8 = vpop.f32.mrf.mxu0  ;;  %v3925_v56 = vadd.f32 %v3924_v7, %v3923_v5 }
 0x228   : > { %v5179_v11 = vpop.f32.mrf.mxu1  ;;  %v3158_v55 = vadd.f32 %v3897_v48, %v3109_v53 }
 0x229   : > { %5240 = vst [vmem:[#allocation8_spill] sm:$0xff] %v5179_v11  ;;  %v3899_v12 = vpop.f32.mrf.mxu0 }
 0x22a   : > { %v5181_v60 = vpop.f32.mrf.mxu1  ;;  %v3900_v57 = vadd.f32 %v3899_v12, %v3898_v8  ;;  %v3207_v18 = vadd.f32 %v3925_v56, %v3158_v55 }
 0x22b   : > { %v3901_v58 = vpop.f32.mrf.mxu0 }
 0x22c   : > { %v3929_v11 = vpop.f32.mrf.mxu1  ;;  %v3161_v19 = vadd.f32 %v3900_v57, %v3112_v6 }
 0x22d   : > { %v3902_v36 = vpop.f32.mrf.mxu0 }
 0x22e   : > { %v3930_v27 = vpop.f32.mrf.mxu1  ;;  %v3903_v51 = vadd.f32 %v3902_v36, %v3901_v58 }
 0x22f   : > { %v3904_v40 = vpop.f32.mrf.mxu0  ;;  %v3931_v0 = vadd.f32 %v3930_v27, %v3929_v11 }
 0x230   : > { %v3932_v42 = vpop.f32.mrf.mxu1  ;;  %v3166_v63 = vadd.f32 %v3903_v51, %v3117_v50  ;;  %v5245_v8 = vld [vmem:[#allocation8_spill] sm:$0xff] }
 0x231   : > { %v3905_v61 = vpop.f32.mrf.mxu0  ;;  %v3928_v11 = vadd.f32 %v5181_v60, %v5245_v8 }
 0x232   : > { %v3933_v62 = vpop.f32.mrf.mxu1  ;;  %v3906_v1 = vadd.f32 %v3905_v61, %v3904_v40  ;;  %v3215_v20 = vadd.f32 %v3931_v0, %v3166_v63 }
 0x233   : > { %v3934_v22 = vadd.f32 %v3933_v62, %v3932_v42  ;;  %v3210_v30 = vadd.f32 %v3928_v11, %v3161_v19 }
 0x234   : > { %v3169_v21 = vadd.f32 %v3906_v1, %v3120_v16 }
 0x236   : > { %v3218_v36 = vadd.f32 %v3934_v22, %v3169_v21 }
 0x243   : > { %v3951_v3 = vpop.f32.mrf.mxu0 }
 0x244   : > { %v3957_v58 = vpop.f32.mrf.mxu1 }
 0x245   : > { %v3952_v17 = vpop.f32.mrf.mxu0 }
 0x246   : > { %v3953_v2 = vadd.f32 %v3952_v17, %v3951_v3  ;;  %v3958_v4 = vpop.f32.mrf.mxu1 }
 0x247   : > { %v3959_v5 = vadd.f32 %v3958_v4, %v3957_v58  ;;  %v3954_v7 = vpop.f32.mrf.mxu0 }
 0x248   : > { %v3256_v12 = vadd.f32 %v3953_v2, %v3207_v18  ;;  %v3960_v24 = vpop.f32.mrf.mxu1 }
 0x249   : > { %v3264_v26 = vadd.f32 %v3959_v5, %v3215_v20  ;;  %v3955_v28 = vpop.f32.mrf.mxu0 }
 0x24a   : > { %3270 = vst [vmem:[%s5191_s15] sm:$0xff] %v3256_v12  ;;  %v3956_v32 = vadd.f32 %v3955_v28, %v3954_v7  ;;  %v3961_v34 = vpop.f32.mrf.mxu1  ;;  %v3284_v23 = vmul.f32 %v3256_v12, %v3256_v12 }
 0x24b   : > { %3272 = vst [vmem:[%s5191_s15 + $0x10] sm:$0xff] %v3264_v26  ;;  %v3962_v43 = vadd.f32 %v3961_v34, %v3960_v24  ;;  %v3286_v29 = vmul.f32 %v3264_v26, %v3264_v26 }
 0x24c   : > { %v3259_v45 = vadd.f32 %v3956_v32, %v3210_v30 }
 0x24d   : > { %v3267_v60 = vadd.f32 %v3962_v43, %v3218_v36 }
 0x24e   : > { %3271 = vst [vmem:[%s5191_s15 + $0x8] sm:$0xff] %v3259_v45  ;;  %v3274_v25 = vadd.f32 %v3259_v45, %v3256_v12  ;;  %v3285_v27 = vmul.f32 %v3259_v45, %v3259_v45 }
 0x24f   : > { %3273 = vst [vmem:[%s5191_s15 + $0x18] sm:$0xff] %v3267_v60  ;;  %v3287_v33 = vmul.f32 %v3267_v60, %v3267_v60 }
 0x250   : > { %v3288_v9 = vadd.f32 %v3285_v27, %v3284_v23  ;;  %v3275_v10 = vadd.f32 %v3274_v25, %v3264_v26 }
 0x251   : > { %v3358_v59 = vld [vmem:[%s5191_s15] sm:$0xff] (%p4319_p6) }
 0x252   : > { %v3276_v31 = vadd.f32 %v3275_v10, %v3267_v60  ;;  %v3289_v35 = vadd.f32 %v3288_v9, %v3286_v29  ;;  %v3362_v50 = vld [vmem:[%s5191_s15 + $0x10] sm:$0xff] (%p4319_p6)  ;;  %3359 = vst [vmem:[%s3323_s10] sm:$0xff] (%p4319_p6), %v3358_v59 }
 0x253   : > { %3363 = vst [vmem:[%s3323_s10 + $0x20] sm:$0xff] (%p4319_p6), %v3362_v50 }
 0x254   : > { %v3277_v37 = vrot.slane %v3276_v31, 4  ;;  %v3290_v38 = vadd.f32 %v3289_v35, %v3287_v33 }
 0x255   : > { %v3360_v61 = vld [vmem:[%s5191_s15 + $0x8] sm:$0xff] (%p4319_p6) }
 0x256   : > { %v3278_v39 = vadd.f32 %v3277_v37, %v3276_v31  ;;  %v3291_v40 = vrot.slane %v3290_v38, 4  ;;  %v3364_v52 = vld [vmem:[%s5191_s15 + $0x18] sm:$0xff] (%p4319_p6)  ;;  %3361 = vst [vmem:[%s3323_s10 + $0x10] sm:$0xff] (%p4319_p6), %v3360_v61 }
 0x257   : > { %3365 = vst [vmem:[%s3323_s10 + $0x30] sm:$0xff] (%p4319_p6), %v3364_v52 }
 0x258   : > { %v3279_v41 = vrot.slane %v3278_v39, 2  ;;  %v3292_v44 = vadd.f32 %v3291_v40, %v3290_v38 }
 0x25a   : > { %v3280_v46 = vadd.f32 %v3279_v41, %v3278_v39  ;;  %v3293_v47 = vrot.slane %v3292_v44, 2 }
 0x25c   : > { %v3281_v48 = vrot.slane %v3280_v46, 1  ;;  %v3294_v42 = vadd.f32 %v3293_v47, %v3292_v44 }
 0x25e   : > { %v3282_v49 = vadd.f32 %v3281_v48, %v3280_v46  ;;  %v3295_v51 = vrot.slane %v3294_v42, 1  ;;  %3318 = sbr.rel (!%p4319_p6) target bundleno = 611 (0x263), region = 73 }
 0x260   : > { %3283 = vst [vmem:[%s1452_s28] sm:$0x1] %v3282_v49  ;;  %v3296_v53 = vadd.f32 %v3295_v51, %v3294_v42 }
 0x262   : > { %3297 = vst [vmem:[%s1459_s5] sm:$0x1] %v3296_v53 }
 0x263 PF: > { %s15_s19 = sadd.s32 1, %s4257_s19   ;;  %s5246_s15 = smov %s4245_s16 }
 0x264   : > { %p12_p12 = scmp.ge.s32.totalorder %s15_s19, 4   ;;  %s5247_s16 = smov %s4324_s25 }
 0x265   : > { %s5248_s17 = smov %s4253_s18  ;;  %s5249_s18 = smov %s5251_s20 }
 0x266   :  { %14 = sbr.rel (!%p12_p12) target bundleno = 3 (0x3), region = 169 }

</bundles_post_ra>
